<compile_context>
chip_gen: v7x
topology: tpu7x:2x2x1
jax: 0.10.0
libtpu: 0.0.40
codegen_flags: <defaults>
</compile_context>

<pallas_src>
import numpy as np
import jax
import jax.numpy as jnp
from jax.experimental import pallas as pl
from jax.experimental.pallas import tpu as pltpu

BN_EPS = 1e-5
NEG_SLOPE = 0.2
LATENT_DIM = 32
IN_CH, IN_H, IN_W = 128, 8, 8
# (Cin, Cout, H_in, W_in, stride) for the four conv stages.
LAYERS = ((128, 64, 8, 8, 1),
          (64, 128, 8, 8, 2),
          (128, 256, 4, 4, 2),
          (256, 512, 2, 2, 2))
# Flattened-row shifts of the 9 taps of the stride-1 pad-1 layer (t = kh*3+kw).
L1_SHIFTS = tuple((kh - 1) * IN_W + (kw - 1) for kh in range(3) for kw in range(3))


# ------------------------------ Pallas kernel -------------------------------

def _encoder_kernel(x_ref, m1_ref, w1_ref,
                    s2_ref, w2_ref, g2_ref, b2_ref,
                    s3_ref, w3_hbm_ref, g3_ref, b3_ref,
                    s4_ref, w4_hbm_ref, g4_ref, b4_ref,
                    wh_ref, bh_ref,
                    out_ref,
                    w3_vmem, w4_vmem, dma_sem):
    """Fused 4-stage conv stack + BN(train) + LeakyReLU + fused FC heads."""
    # Kick off the late-layer weight DMAs right away so they overlap the
    # layer-1/2 compute; wait immediately before their first use.
    cp3 = pltpu.make_async_copy(w3_hbm_ref, w3_vmem, dma_sem.at[0])
    cp4 = pltpu.make_async_copy(w4_hbm_ref, w4_vmem, dma_sem.at[1])
    cp3.start()
    cp4.start()

    def lrelu(y):
        return jnp.where(y >= 0, y, NEG_SLOPE * y)

    def bn_lrelu(a, g_ref, b_ref):
        # Train-mode BatchNorm: centered two-pass stats, biased variance.
        m = a.shape[0]
        mean = jnp.sum(a, axis=0, keepdims=True) * (1.0 / m)
        c = a - mean
        var = jnp.sum(c * c, axis=0, keepdims=True) * (1.0 / m)
        return lrelu(c * jax.lax.rsqrt(var + BN_EPS) * g_ref[...] + b_ref[...])

    def gather(h, s_ref, t):
        # One tap's row gather via a 0/1 selection matmul (encodes stride+pad).
        return jnp.dot(s_ref[t], h, preferred_element_type=jnp.float32)

    def conv_taps(h, s_ref, w_ref):
        # Per-tap gather + matmul accumulate (used where Cin % 128 != 0).
        acc = None
        for t in range(s_ref.shape[0]):
            z = jnp.dot(gather(h, s_ref, t), w_ref[t],
                        preferred_element_type=jnp.float32)
            acc = z if acc is None else acc + z
        return acc

    def conv_kstacked(h, s_ref, w_stacked):
        # Lane-concat the tap gathers into an im2col slab and issue a single
        # MXU matmul with K = n_live_taps * Cin.
        cols = [gather(h, s_ref, t) for t in range(s_ref.shape[0])]
        return jnp.dot(jnp.concatenate(cols, axis=1), w_stacked,
                       preferred_element_type=jnp.float32)

    # ---- layer 1: 128 -> 64, stride 1.  Tap gathers are sublane rolls + 0/1
    # masks (XLU/VPU), then one K-stacked (N*64, 1152) x (1152, 64) matmul.
    x = x_ref[...]                                     # (N*64, 128)
    m_rows = x.shape[0]
    cols1 = []
    for t, sh in enumerate(L1_SHIFTS):
        shifted = x if sh == 0 else pltpu.roll(x, shift=(-sh) % m_rows, axis=0)
        cols1.append(shifted * m1_ref[t])              # (N*64,128) * (N*64,1)
    h = lrelu(jnp.dot(jnp.concatenate(cols1, axis=1), w1_ref[...],
                      preferred_element_type=jnp.float32))             # (N*64, 64)

    # ---- layer 2: 64 -> 128, stride 2 (+BN+LeakyReLU), per-tap accumulate.
    h = bn_lrelu(conv_taps(h, s2_ref, w2_ref), g2_ref, b2_ref)          # (N*16,128)

    # ---- layer 3: 128 -> 256, stride 2, K-stacked (K=1152).
    cp3.wait()
    h = bn_lrelu(conv_kstacked(h, s3_ref, w3_vmem[...]), g3_ref, b3_ref)  # (N*4,256)

    # ---- layer 4: 256 -> 512, stride 2 on 2x2 input: only 4/9 taps are live
    # (pruned host-side) -> single K=1024 matmul (flatten + FC).
    cp4.wait()
    h = bn_lrelu(conv_kstacked(h, s4_ref, w4_vmem[...]), g4_ref, b4_ref)  # (N, 512)

    # ---- fused fc_mu | fc_logvar heads.
    out_ref[...] = (jnp.dot(h, wh_ref[...], preferred_element_type=jnp.float32)
                    + bh_ref[...])


# --------------------------- host-side preparation ---------------------------

def _build_selection(n, h, w, stride):
    """0/1 tap-selection matrices (9, N*Ho*Wo, N*H*W) for a pad=1 3x3 conv."""
    ho = (h + 2 - 3) // stride + 1
    wo = (w + 2 - 3) // stride + 1
    s = np.zeros((9, n * ho * wo, n * h * w), np.float32)
    for kh in range(3):
        for kw in range(3):
            t = kh * 3 + kw
            for b in range(n):
                for oh in range(ho):
                    for ow in range(wo):
                        hi = oh * stride + kh - 1
                        wi = ow * stride + kw - 1
                        if 0 <= hi < h and 0 <= wi < w:
                            s[t, b * ho * wo + oh * wo + ow,
                              b * h * w + hi * w + wi] = 1.0
    return s


def _build_layer1_masks(n):
    """(9, N*64, 1) 0/1 validity masks for the roll-based stride-1 gather."""
    m = np.zeros((9, n * IN_H * IN_W, 1), np.float32)
    for kh in range(3):
        for kw in range(3):
            t = kh * 3 + kw
            for b in range(n):
                for oh in range(IN_H):
                    for ow in range(IN_W):
                        if 0 <= oh + kh - 1 < IN_H and 0 <= ow + kw - 1 < IN_W:
                            m[t, b * IN_H * IN_W + oh * IN_W + ow, 0] = 1.0
    return m


def pack_inputs(params, batch):
    """One-time repack of PyTorch-layout params into kernel-ready slabs."""
    pk = {}
    # Layer 1: roll+mask gather; K-stacked weights (9*128, 64).
    w1 = np.asarray(params["conv_w"][0])                       # (64, 128, 3, 3)
    pk["w1"] = jnp.asarray(w1.transpose(2, 3, 1, 0).reshape(9 * IN_CH, 64))
    pk["m1"] = jnp.asarray(_build_layer1_masks(batch))
    # Layers 2-4: selection-matrix gather with dead-tap pruning.
    for idx in (2, 3, 4):
        cin, cout, h, w, stride = LAYERS[idx - 1]
        s_full = _build_selection(batch, h, w, stride)
        live = [t for t in range(9) if s_full[t].any()]         # prune dead taps
        w_taps = np.asarray(params["conv_w"][idx - 1]).transpose(2, 3, 1, 0)
        w_taps = w_taps.reshape(9, cin, cout)[live]             # (n_live,cin,cout)
        pk[f"s{idx}"] = jnp.asarray(s_full[live])
        if idx == 2:
            pk["w2"] = jnp.asarray(w_taps)                      # per-tap path
        else:
            pk[f"w{idx}"] = jnp.asarray(
                w_taps.reshape(len(live) * cin, cout))          # K-stacked path
        g, b = params["bn"][idx - 1]
        pk[f"g{idx}"] = jnp.asarray(g).reshape(1, cout).astype(jnp.float32)
        pk[f"b{idx}"] = jnp.asarray(b).reshape(1, cout).astype(jnp.float32)
    # Fused fc_mu | fc_logvar head.
    w_mu, b_mu = params["fc_mu"]
    w_lv, b_lv = params["fc_logvar"]
    pk["w_head"] = jnp.concatenate([w_mu.T, w_lv.T], axis=1).astype(jnp.float32)
    pk["b_head"] = jnp.concatenate([b_mu, b_lv]).reshape(1, -1).astype(jnp.float32)
    return pk


# ------------------------------ model forward --------------------------------

def encoder_forward(x, pk):
    x = x.reshape(-1, IN_CH, IN_H, IN_W).astype(jnp.float32)   # as in the module
    n = x.shape[0]
    latent = pk["w_head"].shape[1] // 2
    # NCHW -> (N*H*W, C) rows, channels on the lane axis (only host-side glue).
    x_rows = jnp.transpose(x, (0, 2, 3, 1)).reshape(n * IN_H * IN_W, IN_CH)

    vmem = pl.BlockSpec(memory_space=pltpu.MemorySpace.VMEM)
    hbm = pl.BlockSpec(memory_space=pl.ANY)   # manual DMA, overlapped w/ compute

    out = pl.pallas_call(
        _encoder_kernel,
        out_shape=jax.ShapeDtypeStruct((n, 2 * latent), jnp.float32),
        in_specs=[vmem, vmem, vmem,            # x, m1, w1
                  vmem, vmem, vmem, vmem,      # s2, w2, g2, b2
                  vmem, hbm, vmem, vmem,       # s3, w3 (HBM), g3, b3
                  vmem, hbm, vmem, vmem,       # s4, w4 (HBM), g4, b4
                  vmem, vmem],                 # w_head, b_head
        out_specs=vmem,
        scratch_shapes=[pltpu.VMEM(pk["w3"].shape, jnp.float32),
                        pltpu.VMEM(pk["w4"].shape, jnp.float32),
                        pltpu.SemaphoreType.DMA((2,))],
        compiler_params=pltpu.CompilerParams(vmem_limit_bytes=32 * 1024 * 1024),
    )(x_rows, pk["m1"], pk["w1"],
      pk["s2"], pk["w2"], pk["g2"], pk["b2"],
      pk["s3"], pk["w3"], pk["g3"], pk["b3"],
      pk["s4"], pk["w4"], pk["g4"], pk["b4"],
      pk["w_head"], pk["b_head"])
    return out[:, :latent], out[:, latent:]


# ---------------------------- params & reference -----------------------------

def init_params(key, latent_dim=LATENT_DIM):
    params = {"conv_w": [], "bn": []}
    for i, (cin, cout, _, _, _) in enumerate(LAYERS):
        key, kw = jax.random.split(key)
        w = jax.random.normal(kw, (cout, cin, 3, 3), jnp.float32) / jnp.sqrt(9.0 * cin)
        params["conv_w"].append(w)
        if i > 0:
            key, kg, kb = jax.random.split(key, 3)
            gamma = 1.0 + 0.1 * jax.random.normal(kg, (cout,), jnp.float32)
            beta = 0.1 * jax.random.normal(kb, (cout,), jnp.float32)
            params["bn"].append((gamma, beta))
        else:
            params["bn"].append(None)                 # first conv has no BN
    key, k1, k2, k3, k4 = jax.random.split(key, 5)
    params["fc_mu"] = (
        jax.random.normal(k1, (latent_dim, 512), jnp.float32) / jnp.sqrt(512.0),
        0.01 * jax.random.normal(k2, (latent_dim,), jnp.float32))
    params["fc_logvar"] = (
        jax.random.normal(k3, (latent_dim, 512), jnp.float32) / jnp.sqrt(512.0),
        0.01 * jax.random.normal(k4, (latent_dim,), jnp.float32))
    return params


def reference_forward(x, params):
    """Pure-JAX (XLA) f32 reference mirroring the PyTorch forward (train mode)."""
    h = x.reshape(-1, IN_CH, IN_H, IN_W).astype(jnp.float32)
    strides = (1, 2, 2, 2)
    for i, w in enumerate(params["conv_w"]):
        h = jax.lax.conv_general_dilated(
            h, w, (strides[i], strides[i]), ((1, 1), (1, 1)),
            dimension_numbers=("NCHW", "OIHW", "NCHW"))
        if params["bn"][i] is not None:
            g, b = params["bn"][i]
            mean = jnp.mean(h, axis=(0, 2, 3), keepdims=True)
            var = jnp.mean(jnp.square(h - mean), axis=(0, 2, 3), keepdims=True)
            h = ((h - mean) * jax.lax.rsqrt(var + BN_EPS)
                 * g.reshape(1, -1, 1, 1) + b.reshape(1, -1, 1, 1))
        h = jnp.where(h >= 0, h, NEG_SLOPE * h)
    hf = h.reshape(h.shape[0], -1)
    w_mu, b_mu = params["fc_mu"]
    w_lv, b_lv = params["fc_logvar"]
    return hf @ w_mu.T + b_mu, hf @ w_lv.T + b_lv


# ------------------------------------ main ------------------------------------

if __name__ == "__main__":
    key = jax.random.PRNGKey(0)
    kx, kp = jax.random.split(key)
    x = jax.random.normal(kx, (2, IN_CH, IN_H, IN_W), jnp.float32)   # batch = 2
    params = init_params(kp)
    packed = pack_inputs(params, batch=2)

    fwd = jax.jit(encoder_forward)
    mu, logvar = fwd(x, packed)
    jax.block_until_ready((mu, logvar))

    assert mu.shape == (2, LATENT_DIM) and logvar.shape == (2, LATENT_DIM)
    assert bool(jnp.all(jnp.isfinite(mu))) and bool(jnp.all(jnp.isfinite(logvar)))

    mu_ref, lv_ref = reference_forward(x, params)
    err = max(float(jnp.max(jnp.abs(mu - mu_ref))),
              float(jnp.max(jnp.abs(logvar - lv_ref))))
    assert err < 2e-3, f"mismatch vs reference: {err}"

    print("KERNEL_OK")
</pallas_src>

<mosaic_0001>
module attributes {stable_mosaic.version = 11 : i64} {
  func.func @_encoder_kernel(%arg0: memref<128x128xf32, #tpu.memory_space<vmem>>, %arg1: memref<9x128x1xf32, #tpu.memory_space<vmem>>, %arg2: memref<1152x64xf32, #tpu.memory_space<vmem>>, %arg3: memref<9x32x128xf32, #tpu.memory_space<vmem>>, %arg4: memref<9x64x128xf32, #tpu.memory_space<vmem>>, %arg5: memref<1x128xf32, #tpu.memory_space<vmem>>, %arg6: memref<1x128xf32, #tpu.memory_space<vmem>>, %arg7: memref<9x8x32xf32, #tpu.memory_space<vmem>>, %arg8: memref<1152x256xf32, #tpu.memory_space<any>>, %arg9: memref<1x256xf32, #tpu.memory_space<vmem>>, %arg10: memref<1x256xf32, #tpu.memory_space<vmem>>, %arg11: memref<4x2x8xf32, #tpu.memory_space<vmem>>, %arg12: memref<1024x512xf32, #tpu.memory_space<any>>, %arg13: memref<1x512xf32, #tpu.memory_space<vmem>>, %arg14: memref<1x512xf32, #tpu.memory_space<vmem>>, %arg15: memref<512x64xf32, #tpu.memory_space<vmem>>, %arg16: memref<1x64xf32, #tpu.memory_space<vmem>>, %arg17: memref<2x64xf32, #tpu.memory_space<vmem>>, %arg18: memref<1152x256xf32, #tpu.memory_space<vmem>>, %arg19: memref<1024x512xf32, #tpu.memory_space<vmem>>, %arg20: memref<2x!tpu.dma_semaphore, #tpu.memory_space<semaphore_mem>>) attributes {dimension_semantics = [], scalar_prefetch = 0 : i64, scratch_operands = 3 : i64, tpu.core_type = #tpu.core_type<tc>} {
    %c0_i32 = arith.constant 0 : i32
    %0 = tpu.memref_slice %arg20[%c0_i32] : memref<2x!tpu.dma_semaphore, #tpu.memory_space<semaphore_mem>> -> memref<1x!tpu.dma_semaphore, #tpu.memory_space<semaphore_mem>>
    %1 = tpu.memref_squeeze %0 : memref<1x!tpu.dma_semaphore, #tpu.memory_space<semaphore_mem>> -> memref<!tpu.dma_semaphore, #tpu.memory_space<semaphore_mem>>
    tpu.enqueue_dma source(%arg8 : memref<1152x256xf32, #tpu.memory_space<any>>) target(%arg18 : memref<1152x256xf32, #tpu.memory_space<vmem>>) target_semaphore(%1 : memref<!tpu.dma_semaphore, #tpu.memory_space<semaphore_mem>>)
    %c1_i32 = arith.constant 1 : i32
    %2 = tpu.memref_slice %arg20[%c1_i32] : memref<2x!tpu.dma_semaphore, #tpu.memory_space<semaphore_mem>> -> memref<1x!tpu.dma_semaphore, #tpu.memory_space<semaphore_mem>>
    %3 = tpu.memref_squeeze %2 : memref<1x!tpu.dma_semaphore, #tpu.memory_space<semaphore_mem>> -> memref<!tpu.dma_semaphore, #tpu.memory_space<semaphore_mem>>
    tpu.enqueue_dma source(%arg12 : memref<1024x512xf32, #tpu.memory_space<any>>) target(%arg19 : memref<1024x512xf32, #tpu.memory_space<vmem>>) target_semaphore(%3 : memref<!tpu.dma_semaphore, #tpu.memory_space<semaphore_mem>>)
    %c0 = arith.constant 0 : index
    %c0_0 = arith.constant 0 : index
    %4 = vector.load %arg0[%c0, %c0_0] : memref<128x128xf32, #tpu.memory_space<vmem>>, vector<128x128xf32>
    %c9_i32 = arith.constant 9 : i32
    %5 = tpu.dynamic_rotate %4 by %c9_i32 dim 0 : vector<128x128xf32>, i32 -> vector<128x128xf32>
    %c0_1 = arith.constant 0 : index
    %c0_2 = arith.constant 0 : index
    %c0_3 = arith.constant 0 : index
    %6 = vector.load %arg1[%c0_1, %c0_2, %c0_3] : memref<9x128x1xf32, #tpu.memory_space<vmem>>, vector<1x128x1xf32>
    %7 = vector.shape_cast %6 : vector<1x128x1xf32> to vector<128x1xf32>
    %8 = vector.broadcast %7 : vector<128x1xf32> to vector<128x128xf32>
    %9 = arith.mulf %5, %8 : vector<128x128xf32>
    %c8_i32 = arith.constant 8 : i32
    %10 = tpu.dynamic_rotate %4 by %c8_i32 dim 0 : vector<128x128xf32>, i32 -> vector<128x128xf32>
    %c1 = arith.constant 1 : index
    %c0_4 = arith.constant 0 : index
    %c0_5 = arith.constant 0 : index
    %11 = vector.load %arg1[%c1, %c0_4, %c0_5] : memref<9x128x1xf32, #tpu.memory_space<vmem>>, vector<1x128x1xf32>
    %12 = vector.shape_cast %11 : vector<1x128x1xf32> to vector<128x1xf32>
    %13 = vector.broadcast %12 : vector<128x1xf32> to vector<128x128xf32>
    %14 = arith.mulf %10, %13 : vector<128x128xf32>
    %c7_i32 = arith.constant 7 : i32
    %15 = tpu.dynamic_rotate %4 by %c7_i32 dim 0 : vector<128x128xf32>, i32 -> vector<128x128xf32>
    %c2 = arith.constant 2 : index
    %c0_6 = arith.constant 0 : index
    %c0_7 = arith.constant 0 : index
    %16 = vector.load %arg1[%c2, %c0_6, %c0_7] : memref<9x128x1xf32, #tpu.memory_space<vmem>>, vector<1x128x1xf32>
    %17 = vector.shape_cast %16 : vector<1x128x1xf32> to vector<128x1xf32>
    %18 = vector.broadcast %17 : vector<128x1xf32> to vector<128x128xf32>
    %19 = arith.mulf %15, %18 : vector<128x128xf32>
    %c1_i32_8 = arith.constant 1 : i32
    %20 = tpu.dynamic_rotate %4 by %c1_i32_8 dim 0 : vector<128x128xf32>, i32 -> vector<128x128xf32>
    %c3 = arith.constant 3 : index
    %c0_9 = arith.constant 0 : index
    %c0_10 = arith.constant 0 : index
    %21 = vector.load %arg1[%c3, %c0_9, %c0_10] : memref<9x128x1xf32, #tpu.memory_space<vmem>>, vector<1x128x1xf32>
    %22 = vector.shape_cast %21 : vector<1x128x1xf32> to vector<128x1xf32>
    %23 = vector.broadcast %22 : vector<128x1xf32> to vector<128x128xf32>
    %24 = arith.mulf %20, %23 : vector<128x128xf32>
    %c4 = arith.constant 4 : index
    %c0_11 = arith.constant 0 : index
    %c0_12 = arith.constant 0 : index
    %25 = vector.load %arg1[%c4, %c0_11, %c0_12] : memref<9x128x1xf32, #tpu.memory_space<vmem>>, vector<1x128x1xf32>
    %26 = vector.shape_cast %25 : vector<1x128x1xf32> to vector<128x1xf32>
    %27 = vector.broadcast %26 : vector<128x1xf32> to vector<128x128xf32>
    %28 = arith.mulf %4, %27 : vector<128x128xf32>
    %c127_i32 = arith.constant 127 : i32
    %29 = tpu.dynamic_rotate %4 by %c127_i32 dim 0 : vector<128x128xf32>, i32 -> vector<128x128xf32>
    %c5 = arith.constant 5 : index
    %c0_13 = arith.constant 0 : index
    %c0_14 = arith.constant 0 : index
    %30 = vector.load %arg1[%c5, %c0_13, %c0_14] : memref<9x128x1xf32, #tpu.memory_space<vmem>>, vector<1x128x1xf32>
    %31 = vector.shape_cast %30 : vector<1x128x1xf32> to vector<128x1xf32>
    %32 = vector.broadcast %31 : vector<128x1xf32> to vector<128x128xf32>
    %33 = arith.mulf %29, %32 : vector<128x128xf32>
    %c121_i32 = arith.constant 121 : i32
    %34 = tpu.dynamic_rotate %4 by %c121_i32 dim 0 : vector<128x128xf32>, i32 -> vector<128x128xf32>
    %c6 = arith.constant 6 : index
    %c0_15 = arith.constant 0 : index
    %c0_16 = arith.constant 0 : index
    %35 = vector.load %arg1[%c6, %c0_15, %c0_16] : memref<9x128x1xf32, #tpu.memory_space<vmem>>, vector<1x128x1xf32>
    %36 = vector.shape_cast %35 : vector<1x128x1xf32> to vector<128x1xf32>
    %37 = vector.broadcast %36 : vector<128x1xf32> to vector<128x128xf32>
    %38 = arith.mulf %34, %37 : vector<128x128xf32>
    %c120_i32 = arith.constant 120 : i32
    %39 = tpu.dynamic_rotate %4 by %c120_i32 dim 0 : vector<128x128xf32>, i32 -> vector<128x128xf32>
    %c7 = arith.constant 7 : index
    %c0_17 = arith.constant 0 : index
    %c0_18 = arith.constant 0 : index
    %40 = vector.load %arg1[%c7, %c0_17, %c0_18] : memref<9x128x1xf32, #tpu.memory_space<vmem>>, vector<1x128x1xf32>
    %41 = vector.shape_cast %40 : vector<1x128x1xf32> to vector<128x1xf32>
    %42 = vector.broadcast %41 : vector<128x1xf32> to vector<128x128xf32>
    %43 = arith.mulf %39, %42 : vector<128x128xf32>
    %c119_i32 = arith.constant 119 : i32
    %44 = tpu.dynamic_rotate %4 by %c119_i32 dim 0 : vector<128x128xf32>, i32 -> vector<128x128xf32>
    %c8 = arith.constant 8 : index
    %c0_19 = arith.constant 0 : index
    %c0_20 = arith.constant 0 : index
    %45 = vector.load %arg1[%c8, %c0_19, %c0_20] : memref<9x128x1xf32, #tpu.memory_space<vmem>>, vector<1x128x1xf32>
    %46 = vector.shape_cast %45 : vector<1x128x1xf32> to vector<128x1xf32>
    %47 = vector.broadcast %46 : vector<128x1xf32> to vector<128x128xf32>
    %48 = arith.mulf %44, %47 : vector<128x128xf32>
    %49 = tpu.concatenate %9, %14, %19, %24, %28, %33, %38, %43, %48 in 1 : vector<128x128xf32>, vector<128x128xf32>, vector<128x128xf32>, vector<128x128xf32>, vector<128x128xf32>, vector<128x128xf32>, vector<128x128xf32>, vector<128x128xf32>, vector<128x128xf32> -> vector<128x1152xf32>
    %c0_21 = arith.constant 0 : index
    %c0_22 = arith.constant 0 : index
    %50 = vector.load %arg2[%c0_21, %c0_22] : memref<1152x64xf32, #tpu.memory_space<vmem>>, vector<1152x64xf32>
    %cst = arith.constant dense<0.000000e+00> : vector<128x64xf32>
    %51 = tpu.matmul %49, %50, %cst {dimension_numbers = #tpu.dot_dimension_numbers<[1], [0], [0], [1], [0, 0, 1, 1], [], []>} : vector<128x1152xf32>, vector<1152x64xf32>, vector<128x64xf32> -> vector<128x64xf32>
    %cst_23 = arith.constant 0.000000e+00 : f32
    %52 = vector.broadcast %cst_23 : f32 to vector<128x64xf32>
    %53 = arith.cmpf oge, %51, %52 : vector<128x64xf32>
    %cst_24 = arith.constant 2.000000e-01 : f32
    %54 = vector.broadcast %cst_24 : f32 to vector<128x64xf32>
    %55 = arith.mulf %54, %51 : vector<128x64xf32>
    %56 = arith.select %53, %51, %55 : vector<128x64xi1>, vector<128x64xf32>
    %c0_25 = arith.constant 0 : index
    %c0_26 = arith.constant 0 : index
    %c0_27 = arith.constant 0 : index
    %57 = vector.load %arg3[%c0_25, %c0_26, %c0_27] : memref<9x32x128xf32, #tpu.memory_space<vmem>>, vector<1x32x128xf32>
    %58 = vector.shape_cast %57 : vector<1x32x128xf32> to vector<32x128xf32>
    %cst_28 = arith.constant dense<0.000000e+00> : vector<32x64xf32>
    %59 = tpu.matmul %58, %56, %cst_28 {dimension_numbers = #tpu.dot_dimension_numbers<[1], [0], [0], [1], [0, 0, 1, 1], [], []>} : vector<32x128xf32>, vector<128x64xf32>, vector<32x64xf32> -> vector<32x64xf32>
    %c0_29 = arith.constant 0 : index
    %c0_30 = arith.constant 0 : index
    %c0_31 = arith.constant 0 : index
    %60 = vector.load %arg4[%c0_29, %c0_30, %c0_31] : memref<9x64x128xf32, #tpu.memory_space<vmem>>, vector<1x64x128xf32>
    %61 = vector.shape_cast %60 : vector<1x64x128xf32> to vector<64x128xf32>
    %cst_32 = arith.constant dense<0.000000e+00> : vector<32x128xf32>
    %62 = tpu.matmul %59, %61, %cst_32 {dimension_numbers = #tpu.dot_dimension_numbers<[1], [0], [0], [1], [0, 0, 1, 1], [], []>} : vector<32x64xf32>, vector<64x128xf32>, vector<32x128xf32> -> vector<32x128xf32>
    %c1_33 = arith.constant 1 : index
    %c0_34 = arith.constant 0 : index
    %c0_35 = arith.constant 0 : index
    %63 = vector.load %arg3[%c1_33, %c0_34, %c0_35] : memref<9x32x128xf32, #tpu.memory_space<vmem>>, vector<1x32x128xf32>
    %64 = vector.shape_cast %63 : vector<1x32x128xf32> to vector<32x128xf32>
    %cst_36 = arith.constant dense<0.000000e+00> : vector<32x64xf32>
    %65 = tpu.matmul %64, %56, %cst_36 {dimension_numbers = #tpu.dot_dimension_numbers<[1], [0], [0], [1], [0, 0, 1, 1], [], []>} : vector<32x128xf32>, vector<128x64xf32>, vector<32x64xf32> -> vector<32x64xf32>
    %c1_37 = arith.constant 1 : index
    %c0_38 = arith.constant 0 : index
    %c0_39 = arith.constant 0 : index
    %66 = vector.load %arg4[%c1_37, %c0_38, %c0_39] : memref<9x64x128xf32, #tpu.memory_space<vmem>>, vector<1x64x128xf32>
    %67 = vector.shape_cast %66 : vector<1x64x128xf32> to vector<64x128xf32>
    %cst_40 = arith.constant dense<0.000000e+00> : vector<32x128xf32>
    %68 = tpu.matmul %65, %67, %cst_40 {dimension_numbers = #tpu.dot_dimension_numbers<[1], [0], [0], [1], [0, 0, 1, 1], [], []>} : vector<32x64xf32>, vector<64x128xf32>, vector<32x128xf32> -> vector<32x128xf32>
    %69 = arith.addf %62, %68 : vector<32x128xf32>
    %c2_41 = arith.constant 2 : index
    %c0_42 = arith.constant 0 : index
    %c0_43 = arith.constant 0 : index
    %70 = vector.load %arg3[%c2_41, %c0_42, %c0_43] : memref<9x32x128xf32, #tpu.memory_space<vmem>>, vector<1x32x128xf32>
    %71 = vector.shape_cast %70 : vector<1x32x128xf32> to vector<32x128xf32>
    %cst_44 = arith.constant dense<0.000000e+00> : vector<32x64xf32>
    %72 = tpu.matmul %71, %56, %cst_44 {dimension_numbers = #tpu.dot_dimension_numbers<[1], [0], [0], [1], [0, 0, 1, 1], [], []>} : vector<32x128xf32>, vector<128x64xf32>, vector<32x64xf32> -> vector<32x64xf32>
    %c2_45 = arith.constant 2 : index
    %c0_46 = arith.constant 0 : index
    %c0_47 = arith.constant 0 : index
    %73 = vector.load %arg4[%c2_45, %c0_46, %c0_47] : memref<9x64x128xf32, #tpu.memory_space<vmem>>, vector<1x64x128xf32>
    %74 = vector.shape_cast %73 : vector<1x64x128xf32> to vector<64x128xf32>
    %cst_48 = arith.constant dense<0.000000e+00> : vector<32x128xf32>
    %75 = tpu.matmul %72, %74, %cst_48 {dimension_numbers = #tpu.dot_dimension_numbers<[1], [0], [0], [1], [0, 0, 1, 1], [], []>} : vector<32x64xf32>, vector<64x128xf32>, vector<32x128xf32> -> vector<32x128xf32>
    %76 = arith.addf %69, %75 : vector<32x128xf32>
    %c3_49 = arith.constant 3 : index
    %c0_50 = arith.constant 0 : index
    %c0_51 = arith.constant 0 : index
    %77 = vector.load %arg3[%c3_49, %c0_50, %c0_51] : memref<9x32x128xf32, #tpu.memory_space<vmem>>, vector<1x32x128xf32>
    %78 = vector.shape_cast %77 : vector<1x32x128xf32> to vector<32x128xf32>
    %cst_52 = arith.constant dense<0.000000e+00> : vector<32x64xf32>
    %79 = tpu.matmul %78, %56, %cst_52 {dimension_numbers = #tpu.dot_dimension_numbers<[1], [0], [0], [1], [0, 0, 1, 1], [], []>} : vector<32x128xf32>, vector<128x64xf32>, vector<32x64xf32> -> vector<32x64xf32>
    %c3_53 = arith.constant 3 : index
    %c0_54 = arith.constant 0 : index
    %c0_55 = arith.constant 0 : index
    %80 = vector.load %arg4[%c3_53, %c0_54, %c0_55] : memref<9x64x128xf32, #tpu.memory_space<vmem>>, vector<1x64x128xf32>
    %81 = vector.shape_cast %80 : vector<1x64x128xf32> to vector<64x128xf32>
    %cst_56 = arith.constant dense<0.000000e+00> : vector<32x128xf32>
    %82 = tpu.matmul %79, %81, %cst_56 {dimension_numbers = #tpu.dot_dimension_numbers<[1], [0], [0], [1], [0, 0, 1, 1], [], []>} : vector<32x64xf32>, vector<64x128xf32>, vector<32x128xf32> -> vector<32x128xf32>
    %83 = arith.addf %76, %82 : vector<32x128xf32>
    %c4_57 = arith.constant 4 : index
    %c0_58 = arith.constant 0 : index
    %c0_59 = arith.constant 0 : index
    %84 = vector.load %arg3[%c4_57, %c0_58, %c0_59] : memref<9x32x128xf32, #tpu.memory_space<vmem>>, vector<1x32x128xf32>
    %85 = vector.shape_cast %84 : vector<1x32x128xf32> to vector<32x128xf32>
    %cst_60 = arith.constant dense<0.000000e+00> : vector<32x64xf32>
    %86 = tpu.matmul %85, %56, %cst_60 {dimension_numbers = #tpu.dot_dimension_numbers<[1], [0], [0], [1], [0, 0, 1, 1], [], []>} : vector<32x128xf32>, vector<128x64xf32>, vector<32x64xf32> -> vector<32x64xf32>
    %c4_61 = arith.constant 4 : index
    %c0_62 = arith.constant 0 : index
    %c0_63 = arith.constant 0 : index
    %87 = vector.load %arg4[%c4_61, %c0_62, %c0_63] : memref<9x64x128xf32, #tpu.memory_space<vmem>>, vector<1x64x128xf32>
    %88 = vector.shape_cast %87 : vector<1x64x128xf32> to vector<64x128xf32>
    %cst_64 = arith.constant dense<0.000000e+00> : vector<32x128xf32>
    %89 = tpu.matmul %86, %88, %cst_64 {dimension_numbers = #tpu.dot_dimension_numbers<[1], [0], [0], [1], [0, 0, 1, 1], [], []>} : vector<32x64xf32>, vector<64x128xf32>, vector<32x128xf32> -> vector<32x128xf32>
    %90 = arith.addf %83, %89 : vector<32x128xf32>
    %c5_65 = arith.constant 5 : index
    %c0_66 = arith.constant 0 : index
    %c0_67 = arith.constant 0 : index
    %91 = vector.load %arg3[%c5_65, %c0_66, %c0_67] : memref<9x32x128xf32, #tpu.memory_space<vmem>>, vector<1x32x128xf32>
    %92 = vector.shape_cast %91 : vector<1x32x128xf32> to vector<32x128xf32>
    %cst_68 = arith.constant dense<0.000000e+00> : vector<32x64xf32>
    %93 = tpu.matmul %92, %56, %cst_68 {dimension_numbers = #tpu.dot_dimension_numbers<[1], [0], [0], [1], [0, 0, 1, 1], [], []>} : vector<32x128xf32>, vector<128x64xf32>, vector<32x64xf32> -> vector<32x64xf32>
    %c5_69 = arith.constant 5 : index
    %c0_70 = arith.constant 0 : index
    %c0_71 = arith.constant 0 : index
    %94 = vector.load %arg4[%c5_69, %c0_70, %c0_71] : memref<9x64x128xf32, #tpu.memory_space<vmem>>, vector<1x64x128xf32>
    %95 = vector.shape_cast %94 : vector<1x64x128xf32> to vector<64x128xf32>
    %cst_72 = arith.constant dense<0.000000e+00> : vector<32x128xf32>
    %96 = tpu.matmul %93, %95, %cst_72 {dimension_numbers = #tpu.dot_dimension_numbers<[1], [0], [0], [1], [0, 0, 1, 1], [], []>} : vector<32x64xf32>, vector<64x128xf32>, vector<32x128xf32> -> vector<32x128xf32>
    %97 = arith.addf %90, %96 : vector<32x128xf32>
    %c6_73 = arith.constant 6 : index
    %c0_74 = arith.constant 0 : index
    %c0_75 = arith.constant 0 : index
    %98 = vector.load %arg3[%c6_73, %c0_74, %c0_75] : memref<9x32x128xf32, #tpu.memory_space<vmem>>, vector<1x32x128xf32>
    %99 = vector.shape_cast %98 : vector<1x32x128xf32> to vector<32x128xf32>
    %cst_76 = arith.constant dense<0.000000e+00> : vector<32x64xf32>
    %100 = tpu.matmul %99, %56, %cst_76 {dimension_numbers = #tpu.dot_dimension_numbers<[1], [0], [0], [1], [0, 0, 1, 1], [], []>} : vector<32x128xf32>, vector<128x64xf32>, vector<32x64xf32> -> vector<32x64xf32>
    %c6_77 = arith.constant 6 : index
    %c0_78 = arith.constant 0 : index
    %c0_79 = arith.constant 0 : index
    %101 = vector.load %arg4[%c6_77, %c0_78, %c0_79] : memref<9x64x128xf32, #tpu.memory_space<vmem>>, vector<1x64x128xf32>
    %102 = vector.shape_cast %101 : vector<1x64x128xf32> to vector<64x128xf32>
    %cst_80 = arith.constant dense<0.000000e+00> : vector<32x128xf32>
    %103 = tpu.matmul %100, %102, %cst_80 {dimension_numbers = #tpu.dot_dimension_numbers<[1], [0], [0], [1], [0, 0, 1, 1], [], []>} : vector<32x64xf32>, vector<64x128xf32>, vector<32x128xf32> -> vector<32x128xf32>
    %104 = arith.addf %97, %103 : vector<32x128xf32>
    %c7_81 = arith.constant 7 : index
    %c0_82 = arith.constant 0 : index
    %c0_83 = arith.constant 0 : index
    %105 = vector.load %arg3[%c7_81, %c0_82, %c0_83] : memref<9x32x128xf32, #tpu.memory_space<vmem>>, vector<1x32x128xf32>
    %106 = vector.shape_cast %105 : vector<1x32x128xf32> to vector<32x128xf32>
    %cst_84 = arith.constant dense<0.000000e+00> : vector<32x64xf32>
    %107 = tpu.matmul %106, %56, %cst_84 {dimension_numbers = #tpu.dot_dimension_numbers<[1], [0], [0], [1], [0, 0, 1, 1], [], []>} : vector<32x128xf32>, vector<128x64xf32>, vector<32x64xf32> -> vector<32x64xf32>
    %c7_85 = arith.constant 7 : index
    %c0_86 = arith.constant 0 : index
    %c0_87 = arith.constant 0 : index
    %108 = vector.load %arg4[%c7_85, %c0_86, %c0_87] : memref<9x64x128xf32, #tpu.memory_space<vmem>>, vector<1x64x128xf32>
    %109 = vector.shape_cast %108 : vector<1x64x128xf32> to vector<64x128xf32>
    %cst_88 = arith.constant dense<0.000000e+00> : vector<32x128xf32>
    %110 = tpu.matmul %107, %109, %cst_88 {dimension_numbers = #tpu.dot_dimension_numbers<[1], [0], [0], [1], [0, 0, 1, 1], [], []>} : vector<32x64xf32>, vector<64x128xf32>, vector<32x128xf32> -> vector<32x128xf32>
    %111 = arith.addf %104, %110 : vector<32x128xf32>
    %c8_89 = arith.constant 8 : index
    %c0_90 = arith.constant 0 : index
    %c0_91 = arith.constant 0 : index
    %112 = vector.load %arg3[%c8_89, %c0_90, %c0_91] : memref<9x32x128xf32, #tpu.memory_space<vmem>>, vector<1x32x128xf32>
    %113 = vector.shape_cast %112 : vector<1x32x128xf32> to vector<32x128xf32>
    %cst_92 = arith.constant dense<0.000000e+00> : vector<32x64xf32>
    %114 = tpu.matmul %113, %56, %cst_92 {dimension_numbers = #tpu.dot_dimension_numbers<[1], [0], [0], [1], [0, 0, 1, 1], [], []>} : vector<32x128xf32>, vector<128x64xf32>, vector<32x64xf32> -> vector<32x64xf32>
    %c8_93 = arith.constant 8 : index
    %c0_94 = arith.constant 0 : index
    %c0_95 = arith.constant 0 : index
    %115 = vector.load %arg4[%c8_93, %c0_94, %c0_95] : memref<9x64x128xf32, #tpu.memory_space<vmem>>, vector<1x64x128xf32>
    %116 = vector.shape_cast %115 : vector<1x64x128xf32> to vector<64x128xf32>
    %cst_96 = arith.constant dense<0.000000e+00> : vector<32x128xf32>
    %117 = tpu.matmul %114, %116, %cst_96 {dimension_numbers = #tpu.dot_dimension_numbers<[1], [0], [0], [1], [0, 0, 1, 1], [], []>} : vector<32x64xf32>, vector<64x128xf32>, vector<32x128xf32> -> vector<32x128xf32>
    %118 = arith.addf %111, %117 : vector<32x128xf32>
    %cst_97 = arith.constant dense<0.000000e+00> : vector<128xf32>
    %119 = vector.multi_reduction <add>, %118, %cst_97 [0] : vector<32x128xf32> to vector<128xf32>
    %120 = vector.shape_cast %119 : vector<128xf32> to vector<1x128xf32>
    %cst_98 = arith.constant 3.125000e-02 : f32
    %121 = vector.broadcast %cst_98 : f32 to vector<1x128xf32>
    %122 = arith.mulf %120, %121 : vector<1x128xf32>
    %123 = vector.broadcast %122 : vector<1x128xf32> to vector<32x128xf32>
    %124 = arith.subf %118, %123 : vector<32x128xf32>
    %125 = arith.mulf %124, %124 : vector<32x128xf32>
    %cst_99 = arith.constant dense<0.000000e+00> : vector<128xf32>
    %126 = vector.multi_reduction <add>, %125, %cst_99 [0] : vector<32x128xf32> to vector<128xf32>
    %127 = vector.shape_cast %126 : vector<128xf32> to vector<1x128xf32>
    %cst_100 = arith.constant 3.125000e-02 : f32
    %128 = vector.broadcast %cst_100 : f32 to vector<1x128xf32>
    %129 = arith.mulf %127, %128 : vector<1x128xf32>
    %cst_101 = arith.constant 9.99999974E-6 : f32
    %130 = vector.broadcast %cst_101 : f32 to vector<1x128xf32>
    %131 = arith.addf %129, %130 : vector<1x128xf32>
    %132 = math.rsqrt %131 : vector<1x128xf32>
    %133 = vector.broadcast %132 : vector<1x128xf32> to vector<32x128xf32>
    %134 = arith.mulf %124, %133 : vector<32x128xf32>
    %c0_102 = arith.constant 0 : index
    %c0_103 = arith.constant 0 : index
    %135 = vector.load %arg5[%c0_102, %c0_103] : memref<1x128xf32, #tpu.memory_space<vmem>>, vector<1x128xf32>
    %136 = vector.broadcast %135 : vector<1x128xf32> to vector<32x128xf32>
    %137 = arith.mulf %134, %136 : vector<32x128xf32>
    %c0_104 = arith.constant 0 : index
    %c0_105 = arith.constant 0 : index
    %138 = vector.load %arg6[%c0_104, %c0_105] : memref<1x128xf32, #tpu.memory_space<vmem>>, vector<1x128xf32>
    %139 = vector.broadcast %138 : vector<1x128xf32> to vector<32x128xf32>
    %140 = arith.addf %137, %139 : vector<32x128xf32>
    %cst_106 = arith.constant 0.000000e+00 : f32
    %141 = vector.broadcast %cst_106 : f32 to vector<32x128xf32>
    %142 = arith.cmpf oge, %140, %141 : vector<32x128xf32>
    %cst_107 = arith.constant 2.000000e-01 : f32
    %143 = vector.broadcast %cst_107 : f32 to vector<32x128xf32>
    %144 = arith.mulf %143, %140 : vector<32x128xf32>
    %145 = arith.select %142, %140, %144 : vector<32x128xi1>, vector<32x128xf32>
    %c0_i32_108 = arith.constant 0 : i32
    %146 = tpu.memref_slice %arg20[%c0_i32_108] : memref<2x!tpu.dma_semaphore, #tpu.memory_space<semaphore_mem>> -> memref<1x!tpu.dma_semaphore, #tpu.memory_space<semaphore_mem>>
    %147 = tpu.memref_squeeze %146 : memref<1x!tpu.dma_semaphore, #tpu.memory_space<semaphore_mem>> -> memref<!tpu.dma_semaphore, #tpu.memory_space<semaphore_mem>>
    tpu.wait_dma2 semaphore(%147 : memref<!tpu.dma_semaphore, #tpu.memory_space<semaphore_mem>>) src(%arg8 : memref<1152x256xf32, #tpu.memory_space<any>>) dst(%arg18 : memref<1152x256xf32, #tpu.memory_space<vmem>>)
    %c0_109 = arith.constant 0 : index
    %c0_110 = arith.constant 0 : index
    %148 = vector.load %arg18[%c0_109, %c0_110] : memref<1152x256xf32, #tpu.memory_space<vmem>>, vector<1152x256xf32>
    %c0_111 = arith.constant 0 : index
    %c0_112 = arith.constant 0 : index
    %c0_113 = arith.constant 0 : index
    %149 = vector.load %arg7[%c0_111, %c0_112, %c0_113] : memref<9x8x32xf32, #tpu.memory_space<vmem>>, vector<1x8x32xf32>
    %150 = vector.shape_cast %149 : vector<1x8x32xf32> to vector<8x32xf32>
    %cst_114 = arith.constant dense<0.000000e+00> : vector<8x128xf32>
    %151 = tpu.matmul %150, %145, %cst_114 {dimension_numbers = #tpu.dot_dimension_numbers<[1], [0], [0], [1], [0, 0, 1, 1], [], []>} : vector<8x32xf32>, vector<32x128xf32>, vector<8x128xf32> -> vector<8x128xf32>
    %c1_115 = arith.constant 1 : index
    %c0_116 = arith.constant 0 : index
    %c0_117 = arith.constant 0 : index
    %152 = vector.load %arg7[%c1_115, %c0_116, %c0_117] : memref<9x8x32xf32, #tpu.memory_space<vmem>>, vector<1x8x32xf32>
    %153 = vector.shape_cast %152 : vector<1x8x32xf32> to vector<8x32xf32>
    %cst_118 = arith.constant dense<0.000000e+00> : vector<8x128xf32>
    %154 = tpu.matmul %153, %145, %cst_118 {dimension_numbers = #tpu.dot_dimension_numbers<[1], [0], [0], [1], [0, 0, 1, 1], [], []>} : vector<8x32xf32>, vector<32x128xf32>, vector<8x128xf32> -> vector<8x128xf32>
    %c2_119 = arith.constant 2 : index
    %c0_120 = arith.constant 0 : index
    %c0_121 = arith.constant 0 : index
    %155 = vector.load %arg7[%c2_119, %c0_120, %c0_121] : memref<9x8x32xf32, #tpu.memory_space<vmem>>, vector<1x8x32xf32>
    %156 = vector.shape_cast %155 : vector<1x8x32xf32> to vector<8x32xf32>
    %cst_122 = arith.constant dense<0.000000e+00> : vector<8x128xf32>
    %157 = tpu.matmul %156, %145, %cst_122 {dimension_numbers = #tpu.dot_dimension_numbers<[1], [0], [0], [1], [0, 0, 1, 1], [], []>} : vector<8x32xf32>, vector<32x128xf32>, vector<8x128xf32> -> vector<8x128xf32>
    %c3_123 = arith.constant 3 : index
    %c0_124 = arith.constant 0 : index
    %c0_125 = arith.constant 0 : index
    %158 = vector.load %arg7[%c3_123, %c0_124, %c0_125] : memref<9x8x32xf32, #tpu.memory_space<vmem>>, vector<1x8x32xf32>
    %159 = vector.shape_cast %158 : vector<1x8x32xf32> to vector<8x32xf32>
    %cst_126 = arith.constant dense<0.000000e+00> : vector<8x128xf32>
    %160 = tpu.matmul %159, %145, %cst_126 {dimension_numbers = #tpu.dot_dimension_numbers<[1], [0], [0], [1], [0, 0, 1, 1], [], []>} : vector<8x32xf32>, vector<32x128xf32>, vector<8x128xf32> -> vector<8x128xf32>
    %c4_127 = arith.constant 4 : index
    %c0_128 = arith.constant 0 : index
    %c0_129 = arith.constant 0 : index
    %161 = vector.load %arg7[%c4_127, %c0_128, %c0_129] : memref<9x8x32xf32, #tpu.memory_space<vmem>>, vector<1x8x32xf32>
    %162 = vector.shape_cast %161 : vector<1x8x32xf32> to vector<8x32xf32>
    %cst_130 = arith.constant dense<0.000000e+00> : vector<8x128xf32>
    %163 = tpu.matmul %162, %145, %cst_130 {dimension_numbers = #tpu.dot_dimension_numbers<[1], [0], [0], [1], [0, 0, 1, 1], [], []>} : vector<8x32xf32>, vector<32x128xf32>, vector<8x128xf32> -> vector<8x128xf32>
    %c5_131 = arith.constant 5 : index
    %c0_132 = arith.constant 0 : index
    %c0_133 = arith.constant 0 : index
    %164 = vector.load %arg7[%c5_131, %c0_132, %c0_133] : memref<9x8x32xf32, #tpu.memory_space<vmem>>, vector<1x8x32xf32>
    %165 = vector.shape_cast %164 : vector<1x8x32xf32> to vector<8x32xf32>
    %cst_134 = arith.constant dense<0.000000e+00> : vector<8x128xf32>
    %166 = tpu.matmul %165, %145, %cst_134 {dimension_numbers = #tpu.dot_dimension_numbers<[1], [0], [0], [1], [0, 0, 1, 1], [], []>} : vector<8x32xf32>, vector<32x128xf32>, vector<8x128xf32> -> vector<8x128xf32>
    %c6_135 = arith.constant 6 : index
    %c0_136 = arith.constant 0 : index
    %c0_137 = arith.constant 0 : index
    %167 = vector.load %arg7[%c6_135, %c0_136, %c0_137] : memref<9x8x32xf32, #tpu.memory_space<vmem>>, vector<1x8x32xf32>
    %168 = vector.shape_cast %167 : vector<1x8x32xf32> to vector<8x32xf32>
    %cst_138 = arith.constant dense<0.000000e+00> : vector<8x128xf32>
    %169 = tpu.matmul %168, %145, %cst_138 {dimension_numbers = #tpu.dot_dimension_numbers<[1], [0], [0], [1], [0, 0, 1, 1], [], []>} : vector<8x32xf32>, vector<32x128xf32>, vector<8x128xf32> -> vector<8x128xf32>
    %c7_139 = arith.constant 7 : index
    %c0_140 = arith.constant 0 : index
    %c0_141 = arith.constant 0 : index
    %170 = vector.load %arg7[%c7_139, %c0_140, %c0_141] : memref<9x8x32xf32, #tpu.memory_space<vmem>>, vector<1x8x32xf32>
    %171 = vector.shape_cast %170 : vector<1x8x32xf32> to vector<8x32xf32>
    %cst_142 = arith.constant dense<0.000000e+00> : vector<8x128xf32>
    %172 = tpu.matmul %171, %145, %cst_142 {dimension_numbers = #tpu.dot_dimension_numbers<[1], [0], [0], [1], [0, 0, 1, 1], [], []>} : vector<8x32xf32>, vector<32x128xf32>, vector<8x128xf32> -> vector<8x128xf32>
    %c8_143 = arith.constant 8 : index
    %c0_144 = arith.constant 0 : index
    %c0_145 = arith.constant 0 : index
    %173 = vector.load %arg7[%c8_143, %c0_144, %c0_145] : memref<9x8x32xf32, #tpu.memory_space<vmem>>, vector<1x8x32xf32>
    %174 = vector.shape_cast %173 : vector<1x8x32xf32> to vector<8x32xf32>
    %cst_146 = arith.constant dense<0.000000e+00> : vector<8x128xf32>
    %175 = tpu.matmul %174, %145, %cst_146 {dimension_numbers = #tpu.dot_dimension_numbers<[1], [0], [0], [1], [0, 0, 1, 1], [], []>} : vector<8x32xf32>, vector<32x128xf32>, vector<8x128xf32> -> vector<8x128xf32>
    %176 = tpu.concatenate %151, %154, %157, %160, %163, %166, %169, %172, %175 in 1 : vector<8x128xf32>, vector<8x128xf32>, vector<8x128xf32>, vector<8x128xf32>, vector<8x128xf32>, vector<8x128xf32>, vector<8x128xf32>, vector<8x128xf32>, vector<8x128xf32> -> vector<8x1152xf32>
    %cst_147 = arith.constant dense<0.000000e+00> : vector<8x256xf32>
    %177 = tpu.matmul %176, %148, %cst_147 {dimension_numbers = #tpu.dot_dimension_numbers<[1], [0], [0], [1], [0, 0, 1, 1], [], []>} : vector<8x1152xf32>, vector<1152x256xf32>, vector<8x256xf32> -> vector<8x256xf32>
    %cst_148 = arith.constant dense<0.000000e+00> : vector<256xf32>
    %178 = vector.multi_reduction <add>, %177, %cst_148 [0] : vector<8x256xf32> to vector<256xf32>
    %179 = vector.shape_cast %178 : vector<256xf32> to vector<1x256xf32>
    %cst_149 = arith.constant 1.250000e-01 : f32
    %180 = vector.broadcast %cst_149 : f32 to vector<1x256xf32>
    %181 = arith.mulf %179, %180 : vector<1x256xf32>
    %182 = vector.broadcast %181 : vector<1x256xf32> to vector<8x256xf32>
    %183 = arith.subf %177, %182 : vector<8x256xf32>
    %184 = arith.mulf %183, %183 : vector<8x256xf32>
    %cst_150 = arith.constant dense<0.000000e+00> : vector<256xf32>
    %185 = vector.multi_reduction <add>, %184, %cst_150 [0] : vector<8x256xf32> to vector<256xf32>
    %186 = vector.shape_cast %185 : vector<256xf32> to vector<1x256xf32>
    %cst_151 = arith.constant 1.250000e-01 : f32
    %187 = vector.broadcast %cst_151 : f32 to vector<1x256xf32>
    %188 = arith.mulf %186, %187 : vector<1x256xf32>
    %cst_152 = arith.constant 9.99999974E-6 : f32
    %189 = vector.broadcast %cst_152 : f32 to vector<1x256xf32>
    %190 = arith.addf %188, %189 : vector<1x256xf32>
    %191 = math.rsqrt %190 : vector<1x256xf32>
    %192 = vector.broadcast %191 : vector<1x256xf32> to vector<8x256xf32>
    %193 = arith.mulf %183, %192 : vector<8x256xf32>
    %c0_153 = arith.constant 0 : index
    %c0_154 = arith.constant 0 : index
    %194 = vector.load %arg9[%c0_153, %c0_154] : memref<1x256xf32, #tpu.memory_space<vmem>>, vector<1x256xf32>
    %195 = vector.broadcast %194 : vector<1x256xf32> to vector<8x256xf32>
    %196 = arith.mulf %193, %195 : vector<8x256xf32>
    %c0_155 = arith.constant 0 : index
    %c0_156 = arith.constant 0 : index
    %197 = vector.load %arg10[%c0_155, %c0_156] : memref<1x256xf32, #tpu.memory_space<vmem>>, vector<1x256xf32>
    %198 = vector.broadcast %197 : vector<1x256xf32> to vector<8x256xf32>
    %199 = arith.addf %196, %198 : vector<8x256xf32>
    %cst_157 = arith.constant 0.000000e+00 : f32
    %200 = vector.broadcast %cst_157 : f32 to vector<8x256xf32>
    %201 = arith.cmpf oge, %199, %200 : vector<8x256xf32>
    %cst_158 = arith.constant 2.000000e-01 : f32
    %202 = vector.broadcast %cst_158 : f32 to vector<8x256xf32>
    %203 = arith.mulf %202, %199 : vector<8x256xf32>
    %204 = arith.select %201, %199, %203 : vector<8x256xi1>, vector<8x256xf32>
    %c1_i32_159 = arith.constant 1 : i32
    %205 = tpu.memref_slice %arg20[%c1_i32_159] : memref<2x!tpu.dma_semaphore, #tpu.memory_space<semaphore_mem>> -> memref<1x!tpu.dma_semaphore, #tpu.memory_space<semaphore_mem>>
    %206 = tpu.memref_squeeze %205 : memref<1x!tpu.dma_semaphore, #tpu.memory_space<semaphore_mem>> -> memref<!tpu.dma_semaphore, #tpu.memory_space<semaphore_mem>>
    tpu.wait_dma2 semaphore(%206 : memref<!tpu.dma_semaphore, #tpu.memory_space<semaphore_mem>>) src(%arg12 : memref<1024x512xf32, #tpu.memory_space<any>>) dst(%arg19 : memref<1024x512xf32, #tpu.memory_space<vmem>>)
    %c0_160 = arith.constant 0 : index
    %c0_161 = arith.constant 0 : index
    %207 = vector.load %arg19[%c0_160, %c0_161] : memref<1024x512xf32, #tpu.memory_space<vmem>>, vector<1024x512xf32>
    %c0_162 = arith.constant 0 : index
    %c0_163 = arith.constant 0 : index
    %c0_164 = arith.constant 0 : index
    %208 = vector.load %arg11[%c0_162, %c0_163, %c0_164] : memref<4x2x8xf32, #tpu.memory_space<vmem>>, vector<1x2x8xf32>
    %209 = vector.shape_cast %208 : vector<1x2x8xf32> to vector<2x8xf32>
    %cst_165 = arith.constant dense<0.000000e+00> : vector<2x256xf32>
    %210 = tpu.matmul %209, %204, %cst_165 {dimension_numbers = #tpu.dot_dimension_numbers<[1], [0], [0], [1], [0, 0, 1, 1], [], []>} : vector<2x8xf32>, vector<8x256xf32>, vector<2x256xf32> -> vector<2x256xf32>
    %c1_166 = arith.constant 1 : index
    %c0_167 = arith.constant 0 : index
    %c0_168 = arith.constant 0 : index
    %211 = vector.load %arg11[%c1_166, %c0_167, %c0_168] : memref<4x2x8xf32, #tpu.memory_space<vmem>>, vector<1x2x8xf32>
    %212 = vector.shape_cast %211 : vector<1x2x8xf32> to vector<2x8xf32>
    %cst_169 = arith.constant dense<0.000000e+00> : vector<2x256xf32>
    %213 = tpu.matmul %212, %204, %cst_169 {dimension_numbers = #tpu.dot_dimension_numbers<[1], [0], [0], [1], [0, 0, 1, 1], [], []>} : vector<2x8xf32>, vector<8x256xf32>, vector<2x256xf32> -> vector<2x256xf32>
    %c2_170 = arith.constant 2 : index
    %c0_171 = arith.constant 0 : index
    %c0_172 = arith.constant 0 : index
    %214 = vector.load %arg11[%c2_170, %c0_171, %c0_172] : memref<4x2x8xf32, #tpu.memory_space<vmem>>, vector<1x2x8xf32>
    %215 = vector.shape_cast %214 : vector<1x2x8xf32> to vector<2x8xf32>
    %cst_173 = arith.constant dense<0.000000e+00> : vector<2x256xf32>
    %216 = tpu.matmul %215, %204, %cst_173 {dimension_numbers = #tpu.dot_dimension_numbers<[1], [0], [0], [1], [0, 0, 1, 1], [], []>} : vector<2x8xf32>, vector<8x256xf32>, vector<2x256xf32> -> vector<2x256xf32>
    %c3_174 = arith.constant 3 : index
    %c0_175 = arith.constant 0 : index
    %c0_176 = arith.constant 0 : index
    %217 = vector.load %arg11[%c3_174, %c0_175, %c0_176] : memref<4x2x8xf32, #tpu.memory_space<vmem>>, vector<1x2x8xf32>
    %218 = vector.shape_cast %217 : vector<1x2x8xf32> to vector<2x8xf32>
    %cst_177 = arith.constant dense<0.000000e+00> : vector<2x256xf32>
    %219 = tpu.matmul %218, %204, %cst_177 {dimension_numbers = #tpu.dot_dimension_numbers<[1], [0], [0], [1], [0, 0, 1, 1], [], []>} : vector<2x8xf32>, vector<8x256xf32>, vector<2x256xf32> -> vector<2x256xf32>
    %220 = tpu.concatenate %210, %213, %216, %219 in 1 : vector<2x256xf32>, vector<2x256xf32>, vector<2x256xf32>, vector<2x256xf32> -> vector<2x1024xf32>
    %cst_178 = arith.constant dense<0.000000e+00> : vector<2x512xf32>
    %221 = tpu.matmul %220, %207, %cst_178 {dimension_numbers = #tpu.dot_dimension_numbers<[1], [0], [0], [1], [0, 0, 1, 1], [], []>} : vector<2x1024xf32>, vector<1024x512xf32>, vector<2x512xf32> -> vector<2x512xf32>
    %cst_179 = arith.constant dense<0.000000e+00> : vector<512xf32>
    %222 = vector.multi_reduction <add>, %221, %cst_179 [0] : vector<2x512xf32> to vector<512xf32>
    %223 = vector.shape_cast %222 : vector<512xf32> to vector<1x512xf32>
    %cst_180 = arith.constant 5.000000e-01 : f32
    %224 = vector.broadcast %cst_180 : f32 to vector<1x512xf32>
    %225 = arith.mulf %223, %224 : vector<1x512xf32>
    %226 = vector.broadcast %225 : vector<1x512xf32> to vector<2x512xf32>
    %227 = arith.subf %221, %226 : vector<2x512xf32>
    %228 = arith.mulf %227, %227 : vector<2x512xf32>
    %cst_181 = arith.constant dense<0.000000e+00> : vector<512xf32>
    %229 = vector.multi_reduction <add>, %228, %cst_181 [0] : vector<2x512xf32> to vector<512xf32>
    %230 = vector.shape_cast %229 : vector<512xf32> to vector<1x512xf32>
    %cst_182 = arith.constant 5.000000e-01 : f32
    %231 = vector.broadcast %cst_182 : f32 to vector<1x512xf32>
    %232 = arith.mulf %230, %231 : vector<1x512xf32>
    %cst_183 = arith.constant 9.99999974E-6 : f32
    %233 = vector.broadcast %cst_183 : f32 to vector<1x512xf32>
    %234 = arith.addf %232, %233 : vector<1x512xf32>
    %235 = math.rsqrt %234 : vector<1x512xf32>
    %236 = vector.broadcast %235 : vector<1x512xf32> to vector<2x512xf32>
    %237 = arith.mulf %227, %236 : vector<2x512xf32>
    %c0_184 = arith.constant 0 : index
    %c0_185 = arith.constant 0 : index
    %238 = vector.load %arg13[%c0_184, %c0_185] : memref<1x512xf32, #tpu.memory_space<vmem>>, vector<1x512xf32>
    %239 = vector.broadcast %238 : vector<1x512xf32> to vector<2x512xf32>
    %240 = arith.mulf %237, %239 : vector<2x512xf32>
    %c0_186 = arith.constant 0 : index
    %c0_187 = arith.constant 0 : index
    %241 = vector.load %arg14[%c0_186, %c0_187] : memref<1x512xf32, #tpu.memory_space<vmem>>, vector<1x512xf32>
    %242 = vector.broadcast %241 : vector<1x512xf32> to vector<2x512xf32>
    %243 = arith.addf %240, %242 : vector<2x512xf32>
    %cst_188 = arith.constant 0.000000e+00 : f32
    %244 = vector.broadcast %cst_188 : f32 to vector<2x512xf32>
    %245 = arith.cmpf oge, %243, %244 : vector<2x512xf32>
    %cst_189 = arith.constant 2.000000e-01 : f32
    %246 = vector.broadcast %cst_189 : f32 to vector<2x512xf32>
    %247 = arith.mulf %246, %243 : vector<2x512xf32>
    %248 = arith.select %245, %243, %247 : vector<2x512xi1>, vector<2x512xf32>
    %c0_190 = arith.constant 0 : index
    %c0_191 = arith.constant 0 : index
    %249 = vector.load %arg15[%c0_190, %c0_191] : memref<512x64xf32, #tpu.memory_space<vmem>>, vector<512x64xf32>
    %cst_192 = arith.constant dense<0.000000e+00> : vector<2x64xf32>
    %250 = tpu.matmul %248, %249, %cst_192 {dimension_numbers = #tpu.dot_dimension_numbers<[1], [0], [0], [1], [0, 0, 1, 1], [], []>} : vector<2x512xf32>, vector<512x64xf32>, vector<2x64xf32> -> vector<2x64xf32>
    %c0_193 = arith.constant 0 : index
    %c0_194 = arith.constant 0 : index
    %251 = vector.load %arg16[%c0_193, %c0_194] : memref<1x64xf32, #tpu.memory_space<vmem>>, vector<1x64xf32>
    %252 = vector.broadcast %251 : vector<1x64xf32> to vector<2x64xf32>
    %253 = arith.addf %250, %252 : vector<2x64xf32>
    %c0_195 = arith.constant 0 : index
    %c0_196 = arith.constant 0 : index
    %254 = vector.load %arg17[%c0_195, %c0_196] : memref<2x64xf32, #tpu.memory_space<vmem>>, vector<2x64xf32>
    tpu.vector_store %arg17[%c0_195, %c0_196], %253 {strides = array<i32>} : memref<2x64xf32, #tpu.memory_space<vmem>>, vector<2x64xf32>,
    return
  }
}

</mosaic_0001>

<bundles_post_ra>
// kernel: encoder_forward.1
= control target key start
LH: loop header
LB: loop body
LE: loop exit
PB: predicated region body
PF: predicated region fallthrough
CT: control target
= control target key end

     0   :  { %s15682_s0 = inlined_call_operand.hbm [shape: f32[128,128], index: 0, kind: input, shape index: {}]   ;;  %s15683_s1 = inlined_call_operand.vmem [shape: f32[9,128,1], index: 1, kind: input, shape index: {}]   ;;  %s15684_s2 = inlined_call_operand.vmem [shape: f32[1152,64], index: 2, kind: input, shape index: {}]   ;;  %s15685_s3 = inlined_call_operand.hbm [shape: f32[9,32,128], index: 3, kind: input, shape index: {}]   ;;  %s15686_s4 = inlined_call_operand.vmem [shape: f32[9,64,128], index: 4, kind: input, shape index: {}]   ;;  %s15687_s5 = inlined_call_operand.hbm [shape: f32[1,128], index: 5, kind: input, shape index: {}]   ;;  %s15688_s6 = inlined_call_operand.hbm [shape: f32[1,128], index: 6, kind: input, shape index: {}]   ;;  %s15689_s7 = inlined_call_operand.hbm [shape: f32[9,8,32], index: 7, kind: input, shape index: {}]   ;;  %s15690_s8 = inlined_call_operand.vmem [shape: f32[1152,256], index: 8, kind: input, shape index: {}]   ;;  %s15691_s9 = inlined_call_operand.hbm [shape: f32[1,256], index: 9, kind: input, shape index: {}]   ;;  %s15692_s10 = inlined_call_operand.hbm [shape: f32[1,256], index: 10, kind: input, shape index: {}]   ;;  %s15693_s11 = inlined_call_operand.hbm [shape: f32[4,2,8], index: 11, kind: input, shape index: {}]   ;;  %s15694_s12 = inlined_call_operand.hbm [shape: f32[1024,512], index: 12, kind: input, shape index: {}]   ;;  %s15695_s13 = inlined_call_operand.hbm [shape: f32[1,512], index: 13, kind: input, shape index: {}]   ;;  %s15696_s14 = inlined_call_operand.hbm [shape: f32[1,512], index: 14, kind: input, shape index: {}]   ;;  %s15697_s15 = inlined_call_operand.vmem [shape: f32[512,64], index: 15, kind: input, shape index: {}]   ;;  %s15698_s16 = inlined_call_operand.hbm [shape: f32[1,64], index: 16, kind: input, shape index: {}]   ;;  %s15699_s17 = inlined_call_operand.vmem [shape: f32[2,64], index: 17, kind: output, shape index: {}]  }
   0x1   :  { %15703 = sst [smem:[#allocation320_spill]] %s15682_s0 }
   0x2   :  { %15704 = sst [smem:[#allocation321_spill]] %s15683_s1 }
   0x3   :  { %22 = vsyncpa [#allocation6], 0 }
   0x4   :  { %23 = vsyncpa [#allocation8], 0 }
   0x5   :  { %24 = vsyncpa [#allocation11], 0 }
   0x6   :  { %25 = vsyncpa [#allocation14], 0 }
   0x7   :  { %26 = vsyncpa [#allocation17], 0 }
   0x8   :  { %27 = vsyncpa [#allocation20], 0  ;;  %s11472_s24 = smov [#allocation7]   ;;  %s11473_s26 = smov [#allocation10]  }
   0x9   :  { %s49_s25 = sshll.u32 %s11472_s24, 4  ;;  %s74_s27 = sshll.u32 %s11473_s26, 4  ;;  %s50_s25 = int_to_ptr.vmem [resolvable:$true] %s49_s25  ;;  %s11582_s27 = int_to_ptr.vmem [resolvable:$true] %s74_s27 }
   0xa   :  { %s11192_s0 = scalar_lea.hbm %s15685_s3, 4608 }
   0xb   :  { %p11193_p0 = scmp.ne.s32.totalorder %s15685_s3, %s11192_s0  ;;  %p11196_p1 = scmp.lt.u32.totalorder %s11192_s0, %s15685_s3 }
   0xd   :  { %p11198_p2 = pnand %p11196_p1, %p11193_p0 }
   0xf   :  { %11201 = shalt.err (!%p11198_p2)
}
  0x10   :  { %s11202_s20 = scalar_lea.vmem %s50_s25, 4608  ;;  %p11207_p4 = scmp.lt.s32.totalorder %s50_s25, %s50_s25 }
  0x11   :  { %p11203_p3 = scmp.ne.s32.totalorder %s50_s25, %s11202_s20  ;;  %p11208_p5 = scmp.lt.s32.totalorder %s11202_s20, %s11202_s20 }
  0x13   :  { %p11209_p6 = por %p11208_p5, %p11207_p4 }
  0x15   :  { %p11210_p7 = pnand %p11209_p6, %p11203_p3 }
  0x17   :  { %11213 = shalt.err (!%p11210_p7)
}
  0x18   :  { %s11474_s21 = smov 128   ;;  %s11475_s22 = smov 8  }
  0x19   :  { %55 = dma.hbm_to_vmem [thread:$0]  %s15685_s3, 4608, %s50_s25, [#allocation8], %s11474_s21, %s11474_s21, %s11475_s22  }
  0x1a   :  { %s11214_s29 = scalar_lea.hbm %s15688_s6, 16 }
  0x1b   :  { %p11215_p8 = scmp.ne.s32.totalorder %s15688_s6, %s11214_s29  ;;  %p11218_p9 = scmp.lt.u32.totalorder %s11214_s29, %s15688_s6 }
  0x1d   :  { %p11220_p10 = pnand %p11218_p9, %p11215_p8 }
  0x1f   :  { %11223 = shalt.err (!%p11220_p10)
}
  0x20   :  { %s11224_s1 = scalar_lea.vmem %s11582_s27, 16  ;;  %s11228_s3 = scalar_lea.vmem %s11582_s27, 32 }
  0x21   :  { %p11225_p11 = scmp.ne.s32.totalorder %s11582_s27, %s11224_s1  ;;  %p11229_p12 = scmp.lt.s32.totalorder %s11582_s27, %s11582_s27 }
  0x22   :  { %p11230_p13 = scmp.lt.s32.totalorder %s11228_s3, %s11224_s1 }
  0x24   :  { %p11231_p0 = por %p11230_p13, %p11229_p12 }
  0x26   :  { %p11232_p1 = pnand %p11231_p0, %p11225_p11 }
  0x28   :  { %11235 = shalt.err (!%p11232_p1)
}
  0x29   :  { %77 = dma.hbm_to_vmem [thread:$0]  %s15688_s6, 16, %s11582_s27, [#allocation11]  }
  0x2a   :  { %s11476_s23 = smov [#allocation13]   ;;  %s11477_s26 = smov [#allocation16]  }
  0x2b   :  { %s96_s24 = sshll.u32 %s11476_s23, 4  ;;  %s115_s28 = sshll.u32 %s11477_s26, 4  ;;  %s97_s24 = int_to_ptr.vmem [resolvable:$true] %s96_s24  ;;  %s11617_s28 = int_to_ptr.vmem [resolvable:$true] %s115_s28 }
  0x2c   :  { %s11236_s30 = scalar_lea.hbm %s15691_s9, 32 }
  0x2d   :  { %p11237_p2 = scmp.ne.s32.totalorder %s15691_s9, %s11236_s30  ;;  %p11240_p3 = scmp.lt.u32.totalorder %s11236_s30, %s15691_s9 }
  0x2f   :  { %p11242_p4 = pnand %p11240_p3, %p11237_p2 }
  0x31   :  { %11245 = shalt.err (!%p11242_p4)
}
  0x32   :  { %s11246_s6 = scalar_lea.vmem %s97_s24, 32  ;;  %p11251_p6 = scmp.lt.s32.totalorder %s97_s24, %s97_s24 }
  0x33   :  { %p11247_p5 = scmp.ne.s32.totalorder %s97_s24, %s11246_s6  ;;  %p11252_p7 = scmp.lt.s32.totalorder %s11246_s6, %s11246_s6 }
  0x35   :  { %p11253_p8 = por %p11252_p7, %p11251_p6 }
  0x37   :  { %p11254_p9 = pnand %p11253_p8, %p11247_p5 }
  0x39   :  { %11257 = shalt.err (!%p11254_p9)
}
  0x3a   :  { %99 = dma.hbm_to_vmem [thread:$0]  %s15691_s9, 32, %s97_s24, [#allocation14]  }
  0x3b   :  { %s11258_s26 = scalar_lea.hbm %s15693_s11, 128 }
  0x3c   :  { %p11259_p10 = scmp.ne.s32.totalorder %s15693_s11, %s11258_s26  ;;  %p11262_p11 = scmp.lt.u32.totalorder %s11258_s26, %s15693_s11 }
  0x3e   :  { %p11264_p12 = pnand %p11262_p11, %p11259_p10 }
  0x40   :  { %11267 = shalt.err (!%p11264_p12)
}
  0x41   :  { %s11268_s19 = scalar_lea.vmem %s11617_s28, 128  ;;  %p11273_p0 = scmp.lt.s32.totalorder %s11617_s28, %s11617_s28 }
  0x42   :  { %p11269_p13 = scmp.ne.s32.totalorder %s11617_s28, %s11268_s19  ;;  %p11274_p1 = scmp.lt.s32.totalorder %s11268_s19, %s11268_s19 }
  0x44   :  { %p11275_p2 = por %p11274_p1, %p11273_p0 }
  0x46   :  { %p11276_p3 = pnand %p11275_p2, %p11269_p13 }
  0x48   :  { %11279 = shalt.err (!%p11276_p3)
}
  0x49   :  { %s11478_s9 = smov 32   ;;  %s11479_s24 = smov 2  }
  0x4a   :  { %121 = dma.hbm_to_vmem [thread:$0]  %s15693_s11, 128, %s11617_s28, [#allocation17], %s11478_s9, %s11478_s9, %s11479_s24  }
  0x4b   :  { %s11480_s6 = smov [#allocation19]   ;;  %s11481_s25 = smov [#allocation5]  }
  0x4c   :  { %s138_s27 = sshll.u32 %s11480_s6, 4  ;;  %s33_s20 = sshll.u32 %s11481_s25, 4  ;;  %s139_s27 = int_to_ptr.vmem [resolvable:$true] %s138_s27  ;;  %s11648_s20 = int_to_ptr.vmem [resolvable:$true] %s33_s20 }
  0x4d   :  { %s11280_s29 = scalar_lea.hbm %s15696_s14, 64 }
  0x4e   :  { %p11281_p4 = scmp.ne.s32.totalorder %s15696_s14, %s11280_s29  ;;  %p11284_p5 = scmp.lt.u32.totalorder %s11280_s29, %s15696_s14 }
  0x50   :  { %p11286_p6 = pnand %p11284_p5, %p11281_p4 }
  0x52   :  { %11289 = shalt.err (!%p11286_p6)
}
  0x53   :  { %s11290_s11 = scalar_lea.vmem %s139_s27, 64  ;;  %p11295_p8 = scmp.lt.s32.totalorder %s139_s27, %s139_s27 }
  0x54   :  { %p11291_p7 = scmp.ne.s32.totalorder %s139_s27, %s11290_s11  ;;  %p11296_p9 = scmp.lt.s32.totalorder %s11290_s11, %s11290_s11 }
  0x56   :  { %p11297_p10 = por %p11296_p9, %p11295_p8 }
  0x58   :  { %p11298_p11 = pnand %p11297_p10, %p11291_p7 }
  0x5a   :  { %11301 = shalt.err (!%p11298_p11)
}
  0x5b   :  { %141 = dma.hbm_to_vmem [thread:$0]  %s15696_s14, 64, %s139_s27, [#allocation20]  }
  0x5c   :  { %s15705_s3 = sld [smem:[#allocation320_spill]] }
  0x62   :  { %s11302_s6 = scalar_lea.hbm %s15705_s3, 2048 }
  0x63   :  { %p11303_p12 = scmp.ne.s32.totalorder %s15705_s3, %s11302_s6  ;;  %p11306_p13 = scmp.lt.u32.totalorder %s11302_s6, %s15705_s3 }
  0x65   :  { %p11308_p0 = pnand %p11306_p13, %p11303_p12 }
  0x67   :  { %11311 = shalt.err (!%p11308_p0)
}
  0x68   :  { %s11312_s0 = scalar_lea.vmem %s11648_s20, 2048  ;;  %p11317_p2 = scmp.lt.s32.totalorder %s11648_s20, %s11648_s20 }
  0x69   :  { %p11313_p1 = scmp.ne.s32.totalorder %s11648_s20, %s11312_s0  ;;  %p11318_p3 = scmp.lt.s32.totalorder %s11312_s0, %s11312_s0 }
  0x6b   :  { %p11319_p4 = por %p11318_p3, %p11317_p2 }
  0x6d   :  { %p11320_p5 = pnand %p11319_p4, %p11313_p1 }
  0x6f   :  { %11323 = shalt.err (!%p11320_p5)
}
  0x70   :  { %39 = dma.hbm_to_vmem [thread:$0]  %s15705_s3, 2048, %s11648_s20, [#allocation6], %s11474_s21, %s11474_s21, %s11475_s22  }
  0x71   :  { %s11482_s30 = smov [#allocation9]   ;;  %s11483_s19 = smov [#allocation12]  }
  0x72   :  { %s64_s18 = sshll.u32 %s11482_s30, 4  ;;  %s83_s11 = sshll.u32 %s11483_s19, 4  ;;  %s65_s18 = int_to_ptr.vmem [resolvable:$true] %s64_s18  ;;  %s11682_s11 = int_to_ptr.vmem [resolvable:$true] %s83_s11 }
  0x73   :  { %s11324_s24 = scalar_lea.hbm %s15687_s5, 16 }
  0x74   :  { %p11325_p6 = scmp.ne.s32.totalorder %s15687_s5, %s11324_s24  ;;  %p11328_p7 = scmp.lt.u32.totalorder %s11324_s24, %s15687_s5 }
  0x76   :  { %p11330_p8 = pnand %p11328_p7, %p11325_p6 }
  0x78   :  { %11333 = shalt.err (!%p11330_p8)
}
  0x79   :  { %s11334_s20 = scalar_lea.vmem %s65_s18, 16  ;;  %s11338_s3 = scalar_lea.vmem %s65_s18, 32 }
  0x7a   :  { %p11335_p9 = scmp.ne.s32.totalorder %s65_s18, %s11334_s20  ;;  %p11339_p10 = scmp.lt.s32.totalorder %s65_s18, %s65_s18 }
  0x7b   :  { %p11340_p11 = scmp.lt.s32.totalorder %s11338_s3, %s11334_s20 }
  0x7d   :  { %p11341_p12 = por %p11340_p11, %p11339_p10 }
  0x7f   :  { %p11342_p13 = pnand %p11341_p12, %p11335_p9 }
  0x81   :  { %11345 = shalt.err (!%p11342_p13)
}
  0x82   :  { %67 = dma.hbm_to_vmem [thread:$0]  %s15687_s5, 16, %s65_s18, [#allocation8]  }
  0x83   :  { %s11346_s27 = scalar_lea.hbm %s15689_s7, 1152 }
  0x84   :  { %p11347_p0 = scmp.ne.s32.totalorder %s15689_s7, %s11346_s27  ;;  %p11350_p1 = scmp.lt.u32.totalorder %s11346_s27, %s15689_s7 }
  0x86   :  { %p11352_p2 = pnand %p11350_p1, %p11347_p0 }
  0x88   :  { %11355 = shalt.err (!%p11352_p2)
}
  0x89   :  { %s11356_s24 = scalar_lea.vmem %s11682_s11, 1152  ;;  %p11361_p4 = scmp.lt.s32.totalorder %s11682_s11, %s11682_s11 }
  0x8a   :  { %p11357_p3 = scmp.ne.s32.totalorder %s11682_s11, %s11356_s24  ;;  %p11362_p5 = scmp.lt.s32.totalorder %s11356_s24, %s11356_s24 }
  0x8c   :  { %p11363_p6 = por %p11362_p5, %p11361_p4 }
  0x8e   :  { %p11364_p7 = pnand %p11363_p6, %p11357_p3 }
  0x90   :  { %11367 = shalt.err (!%p11364_p7)
}
  0x91   :  { %89 = dma.hbm_to_vmem [thread:$0]  %s15689_s7, 1152, %s11682_s11, [#allocation11], %s11474_s21, %s11474_s21, %s11475_s22  }
  0x92   :  { %s11484_s1 = smov [#allocation15]   ;;  %s11485_s25 = smov [#allocation18]  }
  0x93   :  { %s106_s6 = sshll.u32 %s11484_s1, 4  ;;  %s128_s23 = sshll.u32 %s11485_s25, 4  ;;  %s107_s6 = int_to_ptr.vmem [resolvable:$true] %s106_s6  ;;  %s129_s23 = int_to_ptr.vmem [resolvable:$true] %s128_s23 }
  0x94   :  { %s11368_s26 = scalar_lea.hbm %s15692_s10, 32 }
  0x95   :  { %p11369_p8 = scmp.ne.s32.totalorder %s15692_s10, %s11368_s26  ;;  %p11372_p9 = scmp.lt.u32.totalorder %s11368_s26, %s15692_s10 }
  0x97   :  { %p11374_p10 = pnand %p11372_p9, %p11369_p8 }
  0x99   :  { %11377 = shalt.err (!%p11374_p10)
}
  0x9a   :  { %s11378_s7 = scalar_lea.vmem %s107_s6, 32  ;;  %p11383_p12 = scmp.lt.s32.totalorder %s107_s6, %s107_s6 }
  0x9b   :  { %p11379_p11 = scmp.ne.s32.totalorder %s107_s6, %s11378_s7  ;;  %p11384_p13 = scmp.lt.s32.totalorder %s11378_s7, %s11378_s7 }
  0x9d   :  { %p11385_p0 = por %p11384_p13, %p11383_p12 }
  0x9f   :  { %p11386_p1 = pnand %p11385_p0, %p11379_p11 }
  0xa1   :  { %11389 = shalt.err (!%p11386_p1)
}
  0xa2   :  { %109 = dma.hbm_to_vmem [thread:$0]  %s15692_s10, 32, %s107_s6, [#allocation14]  }
  0xa3   :  { %s11390_s19 = scalar_lea.hbm %s15695_s13, 64 }
  0xa4   :  { %p11391_p2 = scmp.ne.s32.totalorder %s15695_s13, %s11390_s19  ;;  %p11394_p3 = scmp.lt.u32.totalorder %s11390_s19, %s15695_s13 }
  0xa6   :  { %p11396_p4 = pnand %p11394_p3, %p11391_p2 }
  0xa8   :  { %11399 = shalt.err (!%p11396_p4)
}
  0xa9   :  { %s11400_s18 = scalar_lea.vmem %s129_s23, 64  ;;  %p11405_p6 = scmp.lt.s32.totalorder %s129_s23, %s129_s23 }
  0xaa   :  { %p11401_p5 = scmp.ne.s32.totalorder %s129_s23, %s11400_s18  ;;  %p11406_p7 = scmp.lt.s32.totalorder %s11400_s18, %s11400_s18 }
  0xac   :  { %p11407_p8 = por %p11406_p7, %p11405_p6 }
  0xae   :  { %p11408_p9 = pnand %p11407_p8, %p11401_p5 }
  0xb0   :  { %11411 = shalt.err (!%p11408_p9)
}
  0xb1   :  { %131 = dma.hbm_to_vmem [thread:$0]  %s15695_s13, 64, %s129_s23, [#allocation17]  }
  0xb2   :  { %s11486_s6 = smov [#allocation21]   ;;  %s11412_s26 = scalar_lea.hbm %s15698_s16, 16 }
  0xb3   :  { %s150_s25 = sshll.u32 %s11486_s6, 4  ;;  %p11413_p10 = scmp.ne.s32.totalorder %s15698_s16, %s11412_s26  ;;  %s151_s25 = int_to_ptr.vmem [resolvable:$true] %s150_s25 }
  0xb4   :  { %p11416_p11 = scmp.lt.u32.totalorder %s11412_s26, %s15698_s16 }
  0xb6   :  { %p11418_p12 = pnand %p11416_p11, %p11413_p10 }
  0xb8   :  { %11421 = shalt.err (!%p11418_p12)
}
  0xb9   :  { %s11422_s7 = scalar_lea.vmem %s151_s25, 16  ;;  %s11426_s13 = scalar_lea.vmem %s151_s25, 32 }
  0xba   :  { %p11423_p13 = scmp.ne.s32.totalorder %s151_s25, %s11422_s7  ;;  %p11427_p0 = scmp.lt.s32.totalorder %s151_s25, %s151_s25 }
  0xbb   :  { %p11428_p1 = scmp.lt.s32.totalorder %s11426_s13, %s11422_s7 }
  0xbd   :  { %p11429_p2 = por %p11428_p1, %p11427_p0 }
  0xbf   :  { %p11430_p3 = pnand %p11429_p2, %p11423_p13 }
  0xc1   :  { %11433 = shalt.err (!%p11430_p3)
}
  0xc2   :  { %153 = dma.hbm_to_vmem [thread:$0]  %s15698_s16, 16, %s151_s25, [#allocation20]  }
  0xc3   :  { %11456 = dma.done.wait [#allocation6], 2048  }
  0xc4   :  { %11457 = vsyncadd [#allocation6], 4294965248 }
  0xc5   :  { %11458 = dma.done.wait [#allocation8], 4624  }
  0xc6   :  { %11459 = vsyncadd [#allocation8], 4294962672 }
  0xc7   :  { %11460 = dma.done.wait [#allocation11], 1168  }
  0xc8   :  { %11461 = vsyncadd [#allocation11], 4294966128 }
  0xc9   :  { %11462 = dma.done.wait [#allocation14], 64  }
  0xca   :  { %11463 = vsyncadd [#allocation14], 4294967232 }
  0xcb   :  { %11464 = dma.done.wait [#allocation17], 192  }
  0xcc   :  { %11465 = vsyncadd [#allocation17], 4294967104 }
  0xcd   :  { %11466 = dma.done.wait [#allocation20], 80  }
  0xce   :  { %11467 = vsyncadd [#allocation20], 4294967216  ;;  %v11755_v0 = vld [vmem:[%s15690_s8] sm:$0xff]  ;;  %v11760_v1 = vld [vmem:[%s15690_s8 + $0x8] sm:$0xff]  ;;  %s15991_s19 = sld [smem:[#allocation321_spill]] }
  0xcf   :  { %v11765_v2 = vld [vmem:[%s15690_s8 + $0x10] sm:$0xff]  ;;  %v11770_v3 = vld [vmem:[%s15690_s8 + $0x18] sm:$0xff]  ;;  %v11775_v4 = vld [vmem:[%s15690_s8 + $0x20] sm:$0xff] }
  0xd0   :  { %15706 = vst [vmem:[#allocation35_spill] sm:$0xff] %v11765_v2  ;;  %15707 = vst [vmem:[#allocation36_spill] sm:$0xff] %v11775_v4  ;;  %v11780_v5 = vld [vmem:[%s15690_s8 + $0x28] sm:$0xff]  ;;  %v11785_v6 = vld [vmem:[%s15690_s8 + $0x30] sm:$0xff] }
  0xd1   :  { %15708 = vst [vmem:[#allocation37_spill] sm:$0xff] %v11780_v5  ;;  %15709 = vst [vmem:[#allocation38_spill] sm:$0xff] %v11785_v6  ;;  %v11790_v7 = vld [vmem:[%s15690_s8 + $0x38] sm:$0xff]  ;;  %v11795_v8 = vld [vmem:[%s15690_s8 + $0x40] sm:$0xff] }
  0xd2   :  { %15710 = vst [vmem:[#allocation39_spill] sm:$0xff] %v11790_v7  ;;  %15711 = vst [vmem:[#allocation40_spill] sm:$0xff] %v11795_v8  ;;  %v11800_v9 = vld [vmem:[%s15690_s8 + $0x48] sm:$0xff]  ;;  %v11805_v10 = vld [vmem:[%s15690_s8 + $0x50] sm:$0xff] }
  0xd3   :  { %15712 = vst [vmem:[#allocation41_spill] sm:$0xff] %v11800_v9  ;;  %15713 = vst [vmem:[#allocation42_spill] sm:$0xff] %v11805_v10  ;;  %v11810_v11 = vld [vmem:[%s15690_s8 + $0x58] sm:$0xff]  ;;  %v11815_v12 = vld [vmem:[%s15690_s8 + $0x60] sm:$0xff] }
  0xd4   :  { %15714 = vst [vmem:[#allocation43_spill] sm:$0xff] %v11810_v11  ;;  %15715 = vst [vmem:[#allocation44_spill] sm:$0xff] %v11815_v12  ;;  %v11820_v13 = vld [vmem:[%s15690_s8 + $0x68] sm:$0xff]  ;;  %v11825_v14 = vld [vmem:[%s15690_s8 + $0x70] sm:$0xff] }
  0xd5   :  { %15716 = vst [vmem:[#allocation45_spill] sm:$0xff] %v11820_v13  ;;  %15717 = vst [vmem:[#allocation46_spill] sm:$0xff] %v11825_v14  ;;  %v11830_v15 = vld [vmem:[%s15690_s8 + $0x78] sm:$0xff]  ;;  %v11835_v16 = vld [vmem:[%s15690_s8 + $0x80] sm:$0xff] }
  0xd6   :  { %15718 = vst [vmem:[#allocation47_spill] sm:$0xff] %v11830_v15  ;;  %15719 = vst [vmem:[#allocation48_spill] sm:$0xff] %v11835_v16  ;;  %v11840_v17 = vld [vmem:[%s15690_s8 + $0x88] sm:$0xff]  ;;  %v11845_v18 = vld [vmem:[%s15690_s8 + $0x90] sm:$0xff] }
  0xd7   :  { %15720 = vst [vmem:[#allocation49_spill] sm:$0xff] %v11840_v17  ;;  %15721 = vst [vmem:[#allocation50_spill] sm:$0xff] %v11845_v18  ;;  %v11850_v19 = vld [vmem:[%s15690_s8 + $0x98] sm:$0xff]  ;;  %v11855_v20 = vld [vmem:[%s15690_s8 + $0xa0] sm:$0xff] }
  0xd8   :  { %15722 = vst [vmem:[#allocation51_spill] sm:$0xff] %v11850_v19  ;;  %15723 = vst [vmem:[#allocation52_spill] sm:$0xff] %v11855_v20  ;;  %v11860_v21 = vld [vmem:[%s15690_s8 + $0xa8] sm:$0xff]  ;;  %v11865_v22 = vld [vmem:[%s15690_s8 + $0xb0] sm:$0xff] }
  0xd9   :  { %15724 = vst [vmem:[#allocation53_spill] sm:$0xff] %v11860_v21  ;;  %15725 = vst [vmem:[#allocation54_spill] sm:$0xff] %v11865_v22  ;;  %v11870_v23 = vld [vmem:[%s15690_s8 + $0xb8] sm:$0xff]  ;;  %v11875_v24 = vld [vmem:[%s15690_s8 + $0xc0] sm:$0xff] }
  0xda   :  { %15726 = vst [vmem:[#allocation55_spill] sm:$0xff] %v11870_v23  ;;  %15727 = vst [vmem:[#allocation56_spill] sm:$0xff] %v11875_v24  ;;  %v11880_v25 = vld [vmem:[%s15690_s8 + $0xc8] sm:$0xff]  ;;  %v11885_v26 = vld [vmem:[%s15690_s8 + $0xd0] sm:$0xff] }
  0xdb   :  { %15728 = vst [vmem:[#allocation57_spill] sm:$0xff] %v11880_v25  ;;  %15729 = vst [vmem:[#allocation58_spill] sm:$0xff] %v11885_v26  ;;  %v11890_v27 = vld [vmem:[%s15690_s8 + $0xd8] sm:$0xff]  ;;  %v11895_v28 = vld [vmem:[%s15690_s8 + $0xe0] sm:$0xff] }
  0xdc   :  { %15730 = vst [vmem:[#allocation59_spill] sm:$0xff] %v11890_v27  ;;  %15731 = vst [vmem:[#allocation60_spill] sm:$0xff] %v11895_v28  ;;  %v11900_v29 = vld [vmem:[%s15690_s8 + $0xe8] sm:$0xff]  ;;  %v11905_v30 = vld [vmem:[%s15690_s8 + $0xf0] sm:$0xff] }
  0xdd   :  { %15732 = vst [vmem:[#allocation61_spill] sm:$0xff] %v11900_v29  ;;  %15733 = vst [vmem:[#allocation62_spill] sm:$0xff] %v11905_v30  ;;  %v11910_v31 = vld [vmem:[%s15690_s8 + $0xf8] sm:$0xff]  ;;  %v11915_v32 = vld [vmem:[%s15690_s8 + $0x100] sm:$0xff] }
  0xde   :  { %15734 = vst [vmem:[#allocation63_spill] sm:$0xff] %v11910_v31  ;;  %15735 = vst [vmem:[#allocation64_spill] sm:$0xff] %v11915_v32  ;;  %v11920_v33 = vld [vmem:[%s15690_s8 + $0x108] sm:$0xff]  ;;  %v11925_v34 = vld [vmem:[%s15690_s8 + $0x110] sm:$0xff] }
  0xdf   :  { %15736 = vst [vmem:[#allocation65_spill] sm:$0xff] %v11920_v33  ;;  %15737 = vst [vmem:[#allocation66_spill] sm:$0xff] %v11925_v34  ;;  %v11930_v35 = vld [vmem:[%s15690_s8 + $0x118] sm:$0xff]  ;;  %v11935_v36 = vld [vmem:[%s15690_s8 + $0x120] sm:$0xff] }
  0xe0   :  { %15738 = vst [vmem:[#allocation67_spill] sm:$0xff] %v11930_v35  ;;  %15739 = vst [vmem:[#allocation68_spill] sm:$0xff] %v11935_v36  ;;  %v11940_v37 = vld [vmem:[%s15690_s8 + $0x128] sm:$0xff]  ;;  %v11945_v38 = vld [vmem:[%s15690_s8 + $0x130] sm:$0xff] }
  0xe1   :  { %15740 = vst [vmem:[#allocation69_spill] sm:$0xff] %v11940_v37  ;;  %15741 = vst [vmem:[#allocation70_spill] sm:$0xff] %v11945_v38  ;;  %v11950_v39 = vld [vmem:[%s15690_s8 + $0x138] sm:$0xff]  ;;  %v11955_v40 = vld [vmem:[%s15690_s8 + $0x140] sm:$0xff] }
  0xe2   :  { %15742 = vst [vmem:[#allocation71_spill] sm:$0xff] %v11950_v39  ;;  %15743 = vst [vmem:[#allocation72_spill] sm:$0xff] %v11955_v40  ;;  %v11960_v41 = vld [vmem:[%s15690_s8 + $0x148] sm:$0xff]  ;;  %v11965_v42 = vld [vmem:[%s15690_s8 + $0x150] sm:$0xff] }
  0xe3   :  { %15744 = vst [vmem:[#allocation73_spill] sm:$0xff] %v11960_v41  ;;  %15745 = vst [vmem:[#allocation74_spill] sm:$0xff] %v11965_v42  ;;  %v11970_v43 = vld [vmem:[%s15690_s8 + $0x158] sm:$0xff]  ;;  %v11975_v44 = vld [vmem:[%s15690_s8 + $0x160] sm:$0xff] }
  0xe4   :  { %15746 = vst [vmem:[#allocation75_spill] sm:$0xff] %v11970_v43  ;;  %15747 = vst [vmem:[#allocation76_spill] sm:$0xff] %v11975_v44  ;;  %v11980_v45 = vld [vmem:[%s15690_s8 + $0x168] sm:$0xff]  ;;  %v11985_v46 = vld [vmem:[%s15690_s8 + $0x170] sm:$0xff] }
  0xe5   :  { %15748 = vst [vmem:[#allocation77_spill] sm:$0xff] %v11980_v45  ;;  %15749 = vst [vmem:[#allocation78_spill] sm:$0xff] %v11985_v46  ;;  %v11990_v47 = vld [vmem:[%s15690_s8 + $0x178] sm:$0xff]  ;;  %v11995_v48 = vld [vmem:[%s15690_s8 + $0x180] sm:$0xff] }
  0xe6   :  { %15750 = vst [vmem:[#allocation79_spill] sm:$0xff] %v11990_v47  ;;  %15751 = vst [vmem:[#allocation80_spill] sm:$0xff] %v11995_v48  ;;  %v12000_v49 = vld [vmem:[%s15690_s8 + $0x188] sm:$0xff]  ;;  %v12005_v50 = vld [vmem:[%s15690_s8 + $0x190] sm:$0xff] }
  0xe7   :  { %15752 = vst [vmem:[#allocation81_spill] sm:$0xff] %v12000_v49  ;;  %15753 = vst [vmem:[#allocation82_spill] sm:$0xff] %v12005_v50  ;;  %v12010_v51 = vld [vmem:[%s15690_s8 + $0x198] sm:$0xff]  ;;  %v12015_v52 = vld [vmem:[%s15690_s8 + $0x1a0] sm:$0xff] }
  0xe8   :  { %15754 = vst [vmem:[#allocation83_spill] sm:$0xff] %v12010_v51  ;;  %15755 = vst [vmem:[#allocation84_spill] sm:$0xff] %v12015_v52  ;;  %v12020_v53 = vld [vmem:[%s15690_s8 + $0x1a8] sm:$0xff]  ;;  %v12025_v54 = vld [vmem:[%s15690_s8 + $0x1b0] sm:$0xff] }
  0xe9   :  { %15756 = vst [vmem:[#allocation85_spill] sm:$0xff] %v12020_v53  ;;  %15757 = vst [vmem:[#allocation86_spill] sm:$0xff] %v12025_v54  ;;  %v12030_v55 = vld [vmem:[%s15690_s8 + $0x1b8] sm:$0xff]  ;;  %v12035_v56 = vld [vmem:[%s15690_s8 + $0x1c0] sm:$0xff] }
  0xea   :  { %15758 = vst [vmem:[#allocation87_spill] sm:$0xff] %v12030_v55  ;;  %15759 = vst [vmem:[#allocation88_spill] sm:$0xff] %v12035_v56  ;;  %v12040_v57 = vld [vmem:[%s15690_s8 + $0x1c8] sm:$0xff]  ;;  %v12045_v58 = vld [vmem:[%s15690_s8 + $0x1d0] sm:$0xff]  ;;  %v11487_v56 = vmov 0  }
  0xeb   :  { %15760 = vst [vmem:[#allocation89_spill] sm:$0xff] %v12040_v57  ;;  %15761 = vst [vmem:[#allocation90_spill] sm:$0xff] %v12045_v58  ;;  %v12050_v59 = vld [vmem:[%s15690_s8 + $0x1d8] sm:$0xff]  ;;  %v12055_v60 = vld [vmem:[%s15690_s8 + $0x1e0] sm:$0xff]  ;;  %11161 = vset.pattern.permute.xlu1 %v11487_v56  ;;  %11160 = vset.pattern.permute.xlu0 %v11487_v56 }
  0xec   :  { %15762 = vst [vmem:[#allocation91_spill] sm:$0xff] %v12050_v59  ;;  %15763 = vst [vmem:[#allocation92_spill] sm:$0xff] %v12055_v60  ;;  %v12060_v61 = vld [vmem:[%s15690_s8 + $0x1e8] sm:$0xff]  ;;  %v12065_v62 = vld [vmem:[%s15690_s8 + $0x1f0] sm:$0xff] }
  0xed   :  { %15764 = vst [vmem:[#allocation93_spill] sm:$0xff] %v12060_v61  ;;  %15765 = vst [vmem:[#allocation94_spill] sm:$0xff] %v12065_v62  ;;  %v12070_v63 = vld [vmem:[%s15690_s8 + $0x1f8] sm:$0xff]  ;;  %v12075_v58 = vld [vmem:[%s15690_s8 + $0x200] sm:$0xff] }
  0xee   :  { %15766 = vst [vmem:[#allocation95_spill] sm:$0xff] %v12070_v63  ;;  %15767 = vst [vmem:[#allocation96_spill] sm:$0xff] %v12075_v58  ;;  %v12080_v60 = vld [vmem:[%s15690_s8 + $0x208] sm:$0xff]  ;;  %v12085_v61 = vld [vmem:[%s15690_s8 + $0x210] sm:$0xff] }
  0xef   :  { %15768 = vst [vmem:[#allocation97_spill] sm:$0xff] %v12080_v60  ;;  %15769 = vst [vmem:[#allocation98_spill] sm:$0xff] %v12085_v61  ;;  %v12090_v62 = vld [vmem:[%s15690_s8 + $0x218] sm:$0xff]  ;;  %v12095_v63 = vld [vmem:[%s15690_s8 + $0x220] sm:$0xff] }
  0xf0   :  { %15770 = vst [vmem:[#allocation99_spill] sm:$0xff] %v12090_v62  ;;  %15771 = vst [vmem:[#allocation100_spill] sm:$0xff] %v12095_v63  ;;  %v12100_v58 = vld [vmem:[%s15690_s8 + $0x228] sm:$0xff]  ;;  %v12105_v60 = vld [vmem:[%s15690_s8 + $0x230] sm:$0xff] }
  0xf1   :  { %15772 = vst [vmem:[#allocation101_spill] sm:$0xff] %v12100_v58  ;;  %15773 = vst [vmem:[#allocation102_spill] sm:$0xff] %v12105_v60  ;;  %v12110_v61 = vld [vmem:[%s15690_s8 + $0x238] sm:$0xff]  ;;  %v12115_v62 = vld [vmem:[%s15690_s8 + $0x240] sm:$0xff] }
  0xf2   :  { %15774 = vst [vmem:[#allocation103_spill] sm:$0xff] %v12110_v61  ;;  %15775 = vst [vmem:[#allocation104_spill] sm:$0xff] %v12115_v62  ;;  %v12120_v63 = vld [vmem:[%s15690_s8 + $0x248] sm:$0xff]  ;;  %v12125_v58 = vld [vmem:[%s15690_s8 + $0x250] sm:$0xff] }
  0xf3   :  { %15776 = vst [vmem:[#allocation105_spill] sm:$0xff] %v12120_v63  ;;  %15777 = vst [vmem:[#allocation106_spill] sm:$0xff] %v12125_v58  ;;  %v12130_v60 = vld [vmem:[%s15690_s8 + $0x258] sm:$0xff]  ;;  %v12135_v61 = vld [vmem:[%s15690_s8 + $0x260] sm:$0xff] }
  0xf4   :  { %15778 = vst [vmem:[#allocation107_spill] sm:$0xff] %v12130_v60  ;;  %15779 = vst [vmem:[#allocation108_spill] sm:$0xff] %v12135_v61  ;;  %v12140_v62 = vld [vmem:[%s15690_s8 + $0x268] sm:$0xff]  ;;  %v12145_v63 = vld [vmem:[%s15690_s8 + $0x270] sm:$0xff] }
  0xf5   :  { %15780 = vst [vmem:[#allocation109_spill] sm:$0xff] %v12140_v62  ;;  %15781 = vst [vmem:[#allocation110_spill] sm:$0xff] %v12145_v63  ;;  %v12150_v58 = vld [vmem:[%s15690_s8 + $0x278] sm:$0xff]  ;;  %v12155_v60 = vld [vmem:[%s15690_s8 + $0x280] sm:$0xff] }
  0xf6   :  { %15782 = vst [vmem:[#allocation111_spill] sm:$0xff] %v12150_v58  ;;  %15783 = vst [vmem:[#allocation112_spill] sm:$0xff] %v12155_v60  ;;  %v12160_v61 = vld [vmem:[%s15690_s8 + $0x288] sm:$0xff]  ;;  %v12165_v62 = vld [vmem:[%s15690_s8 + $0x290] sm:$0xff] }
  0xf7   :  { %15784 = vst [vmem:[#allocation113_spill] sm:$0xff] %v12160_v61  ;;  %15785 = vst [vmem:[#allocation114_spill] sm:$0xff] %v12165_v62  ;;  %v12170_v63 = vld [vmem:[%s15690_s8 + $0x298] sm:$0xff]  ;;  %v12175_v58 = vld [vmem:[%s15690_s8 + $0x2a0] sm:$0xff] }
  0xf8   :  { %15786 = vst [vmem:[#allocation115_spill] sm:$0xff] %v12170_v63  ;;  %15787 = vst [vmem:[#allocation116_spill] sm:$0xff] %v12175_v58  ;;  %v12180_v60 = vld [vmem:[%s15690_s8 + $0x2a8] sm:$0xff]  ;;  %v12185_v61 = vld [vmem:[%s15690_s8 + $0x2b0] sm:$0xff] }
  0xf9   :  { %15788 = vst [vmem:[#allocation117_spill] sm:$0xff] %v12180_v60  ;;  %15789 = vst [vmem:[#allocation118_spill] sm:$0xff] %v12185_v61  ;;  %v12190_v62 = vld [vmem:[%s15690_s8 + $0x2b8] sm:$0xff]  ;;  %v12195_v63 = vld [vmem:[%s15690_s8 + $0x2c0] sm:$0xff] }
  0xfa   :  { %15790 = vst [vmem:[#allocation119_spill] sm:$0xff] %v12190_v62  ;;  %15791 = vst [vmem:[#allocation120_spill] sm:$0xff] %v12195_v63  ;;  %v12200_v58 = vld [vmem:[%s15690_s8 + $0x2c8] sm:$0xff]  ;;  %v12205_v60 = vld [vmem:[%s15690_s8 + $0x2d0] sm:$0xff] }
  0xfb   :  { %15792 = vst [vmem:[#allocation121_spill] sm:$0xff] %v12200_v58  ;;  %15793 = vst [vmem:[#allocation122_spill] sm:$0xff] %v12205_v60  ;;  %v12210_v61 = vld [vmem:[%s15690_s8 + $0x2d8] sm:$0xff]  ;;  %v12215_v62 = vld [vmem:[%s15690_s8 + $0x2e0] sm:$0xff] }
  0xfc   :  { %15794 = vst [vmem:[#allocation123_spill] sm:$0xff] %v12210_v61  ;;  %15795 = vst [vmem:[#allocation124_spill] sm:$0xff] %v12215_v62  ;;  %v12220_v63 = vld [vmem:[%s15690_s8 + $0x2e8] sm:$0xff]  ;;  %v12225_v58 = vld [vmem:[%s15690_s8 + $0x2f0] sm:$0xff] }
  0xfd   :  { %15796 = vst [vmem:[#allocation125_spill] sm:$0xff] %v12220_v63  ;;  %15797 = vst [vmem:[#allocation126_spill] sm:$0xff] %v12225_v58  ;;  %v12230_v60 = vld [vmem:[%s15690_s8 + $0x2f8] sm:$0xff]  ;;  %v12235_v61 = vld [vmem:[%s15690_s8 + $0x300] sm:$0xff] }
  0xfe   :  { %15798 = vst [vmem:[#allocation127_spill] sm:$0xff] %v12230_v60  ;;  %15799 = vst [vmem:[#allocation128_spill] sm:$0xff] %v12235_v61  ;;  %v12240_v62 = vld [vmem:[%s15690_s8 + $0x308] sm:$0xff]  ;;  %v12245_v63 = vld [vmem:[%s15690_s8 + $0x310] sm:$0xff] }
  0xff   :  { %15800 = vst [vmem:[#allocation129_spill] sm:$0xff] %v12240_v62  ;;  %15801 = vst [vmem:[#allocation130_spill] sm:$0xff] %v12245_v63  ;;  %v12250_v58 = vld [vmem:[%s15690_s8 + $0x318] sm:$0xff]  ;;  %v12255_v60 = vld [vmem:[%s15690_s8 + $0x320] sm:$0xff] }
 0x100   :  { %15802 = vst [vmem:[#allocation131_spill] sm:$0xff] %v12250_v58  ;;  %15803 = vst [vmem:[#allocation132_spill] sm:$0xff] %v12255_v60  ;;  %v12260_v61 = vld [vmem:[%s15690_s8 + $0x328] sm:$0xff]  ;;  %v12265_v62 = vld [vmem:[%s15690_s8 + $0x330] sm:$0xff] }
 0x101   :  { %15804 = vst [vmem:[#allocation133_spill] sm:$0xff] %v12260_v61  ;;  %15805 = vst [vmem:[#allocation134_spill] sm:$0xff] %v12265_v62  ;;  %v12270_v63 = vld [vmem:[%s15690_s8 + $0x338] sm:$0xff]  ;;  %v12275_v58 = vld [vmem:[%s15690_s8 + $0x340] sm:$0xff] }
 0x102   :  { %15806 = vst [vmem:[#allocation135_spill] sm:$0xff] %v12270_v63  ;;  %15807 = vst [vmem:[#allocation136_spill] sm:$0xff] %v12275_v58  ;;  %v12280_v60 = vld [vmem:[%s15690_s8 + $0x348] sm:$0xff]  ;;  %v12285_v61 = vld [vmem:[%s15690_s8 + $0x350] sm:$0xff] }
 0x103   :  { %15808 = vst [vmem:[#allocation137_spill] sm:$0xff] %v12280_v60  ;;  %15809 = vst [vmem:[#allocation138_spill] sm:$0xff] %v12285_v61  ;;  %v12290_v62 = vld [vmem:[%s15690_s8 + $0x358] sm:$0xff]  ;;  %v12295_v63 = vld [vmem:[%s15690_s8 + $0x360] sm:$0xff] }
 0x104   :  { %15810 = vst [vmem:[#allocation139_spill] sm:$0xff] %v12290_v62  ;;  %15811 = vst [vmem:[#allocation140_spill] sm:$0xff] %v12295_v63  ;;  %v12300_v58 = vld [vmem:[%s15690_s8 + $0x368] sm:$0xff]  ;;  %v12305_v60 = vld [vmem:[%s15690_s8 + $0x370] sm:$0xff] }
 0x105   :  { %15812 = vst [vmem:[#allocation141_spill] sm:$0xff] %v12300_v58  ;;  %15813 = vst [vmem:[#allocation142_spill] sm:$0xff] %v12305_v60  ;;  %v12310_v61 = vld [vmem:[%s15690_s8 + $0x378] sm:$0xff]  ;;  %v12315_v62 = vld [vmem:[%s15690_s8 + $0x380] sm:$0xff] }
 0x106   :  { %15814 = vst [vmem:[#allocation143_spill] sm:$0xff] %v12310_v61  ;;  %15815 = vst [vmem:[#allocation144_spill] sm:$0xff] %v12315_v62  ;;  %v12320_v63 = vld [vmem:[%s15690_s8 + $0x388] sm:$0xff]  ;;  %v12325_v58 = vld [vmem:[%s15690_s8 + $0x390] sm:$0xff] }
 0x107   :  { %15816 = vst [vmem:[#allocation145_spill] sm:$0xff] %v12320_v63  ;;  %15817 = vst [vmem:[#allocation146_spill] sm:$0xff] %v12325_v58  ;;  %v12330_v60 = vld [vmem:[%s15690_s8 + $0x398] sm:$0xff]  ;;  %v12335_v61 = vld [vmem:[%s15690_s8 + $0x3a0] sm:$0xff] }
 0x108   :  { %15818 = vst [vmem:[#allocation147_spill] sm:$0xff] %v12330_v60  ;;  %15819 = vst [vmem:[#allocation148_spill] sm:$0xff] %v12335_v61  ;;  %v12340_v62 = vld [vmem:[%s15690_s8 + $0x3a8] sm:$0xff]  ;;  %v12345_v63 = vld [vmem:[%s15690_s8 + $0x3b0] sm:$0xff] }
 0x109   :  { %15820 = vst [vmem:[#allocation149_spill] sm:$0xff] %v12340_v62  ;;  %15821 = vst [vmem:[#allocation150_spill] sm:$0xff] %v12345_v63  ;;  %v12350_v58 = vld [vmem:[%s15690_s8 + $0x3b8] sm:$0xff]  ;;  %v12355_v60 = vld [vmem:[%s15690_s8 + $0x3c0] sm:$0xff] }
 0x10a   :  { %15822 = vst [vmem:[#allocation151_spill] sm:$0xff] %v12350_v58  ;;  %15823 = vst [vmem:[#allocation152_spill] sm:$0xff] %v12355_v60  ;;  %v12360_v61 = vld [vmem:[%s15690_s8 + $0x3c8] sm:$0xff]  ;;  %v12365_v62 = vld [vmem:[%s15690_s8 + $0x3d0] sm:$0xff] }
 0x10b   :  { %15824 = vst [vmem:[#allocation153_spill] sm:$0xff] %v12360_v61  ;;  %15825 = vst [vmem:[#allocation154_spill] sm:$0xff] %v12365_v62  ;;  %v12370_v63 = vld [vmem:[%s15690_s8 + $0x3d8] sm:$0xff]  ;;  %v12375_v58 = vld [vmem:[%s15690_s8 + $0x3e0] sm:$0xff] }
 0x10c   :  { %15826 = vst [vmem:[#allocation155_spill] sm:$0xff] %v12370_v63  ;;  %15827 = vst [vmem:[#allocation156_spill] sm:$0xff] %v12375_v58  ;;  %v12380_v60 = vld [vmem:[%s15690_s8 + $0x3e8] sm:$0xff]  ;;  %v12385_v61 = vld [vmem:[%s15690_s8 + $0x3f0] sm:$0xff] }
 0x10d   :  { %15828 = vst [vmem:[#allocation157_spill] sm:$0xff] %v12380_v60  ;;  %15829 = vst [vmem:[#allocation158_spill] sm:$0xff] %v12385_v61  ;;  %v12390_v62 = vld [vmem:[%s15690_s8 + $0x3f8] sm:$0xff]  ;;  %v12395_v63 = vld [vmem:[%s15690_s8 + $0x400] sm:$0xff] }
 0x10e   :  { %15830 = vst [vmem:[#allocation159_spill] sm:$0xff] %v12390_v62  ;;  %15831 = vst [vmem:[#allocation160_spill] sm:$0xff] %v12395_v63  ;;  %v12400_v58 = vld [vmem:[%s15690_s8 + $0x408] sm:$0xff]  ;;  %v12405_v60 = vld [vmem:[%s15690_s8 + $0x410] sm:$0xff] }
 0x10f   :  { %15832 = vst [vmem:[#allocation161_spill] sm:$0xff] %v12400_v58  ;;  %15833 = vst [vmem:[#allocation162_spill] sm:$0xff] %v12405_v60  ;;  %v12410_v61 = vld [vmem:[%s15690_s8 + $0x418] sm:$0xff]  ;;  %v12415_v62 = vld [vmem:[%s15690_s8 + $0x420] sm:$0xff] }
 0x110   :  { %15834 = vst [vmem:[#allocation163_spill] sm:$0xff] %v12410_v61  ;;  %15835 = vst [vmem:[#allocation164_spill] sm:$0xff] %v12415_v62  ;;  %v12420_v63 = vld [vmem:[%s15690_s8 + $0x428] sm:$0xff]  ;;  %v12425_v58 = vld [vmem:[%s15690_s8 + $0x430] sm:$0xff] }
 0x111   :  { %15836 = vst [vmem:[#allocation165_spill] sm:$0xff] %v12420_v63  ;;  %15837 = vst [vmem:[#allocation166_spill] sm:$0xff] %v12425_v58  ;;  %v12430_v60 = vld [vmem:[%s15690_s8 + $0x438] sm:$0xff]  ;;  %v12435_v61 = vld [vmem:[%s15690_s8 + $0x440] sm:$0xff] }
 0x112   :  { %15838 = vst [vmem:[#allocation167_spill] sm:$0xff] %v12430_v60  ;;  %15839 = vst [vmem:[#allocation168_spill] sm:$0xff] %v12435_v61  ;;  %v12440_v62 = vld [vmem:[%s15690_s8 + $0x448] sm:$0xff]  ;;  %v12445_v63 = vld [vmem:[%s15690_s8 + $0x450] sm:$0xff] }
 0x113   :  { %15840 = vst [vmem:[#allocation169_spill] sm:$0xff] %v12440_v62  ;;  %15841 = vst [vmem:[#allocation170_spill] sm:$0xff] %v12445_v63  ;;  %v12450_v58 = vld [vmem:[%s15690_s8 + $0x458] sm:$0xff]  ;;  %v12455_v60 = vld [vmem:[%s15690_s8 + $0x460] sm:$0xff] }
 0x114   :  { %15842 = vst [vmem:[#allocation171_spill] sm:$0xff] %v12450_v58  ;;  %15843 = vst [vmem:[#allocation172_spill] sm:$0xff] %v12455_v60  ;;  %v12460_v61 = vld [vmem:[%s15690_s8 + $0x468] sm:$0xff]  ;;  %v12465_v62 = vld [vmem:[%s15690_s8 + $0x470] sm:$0xff] }
 0x115   :  { %15844 = vst [vmem:[#allocation173_spill] sm:$0xff] %v12460_v61  ;;  %15845 = vst [vmem:[#allocation174_spill] sm:$0xff] %v12465_v62  ;;  %v12470_v63 = vld [vmem:[%s15690_s8 + $0x478] sm:$0xff]  ;;  %v12475_v58 = vld [vmem:[%s15690_s8 + $0x480] sm:$0xff] }
 0x116   :  { %15846 = vst [vmem:[#allocation175_spill] sm:$0xff] %v12470_v63  ;;  %15847 = vst [vmem:[#allocation176_spill] sm:$0xff] %v12475_v58  ;;  %v12480_v60 = vld [vmem:[%s15690_s8 + $0x488] sm:$0xff]  ;;  %v12485_v61 = vld [vmem:[%s15690_s8 + $0x490] sm:$0xff] }
 0x117   :  { %15848 = vst [vmem:[#allocation177_spill] sm:$0xff] %v12480_v60  ;;  %15849 = vst [vmem:[#allocation178_spill] sm:$0xff] %v12485_v61  ;;  %v12490_v62 = vld [vmem:[%s15690_s8 + $0x498] sm:$0xff]  ;;  %v12495_v63 = vld [vmem:[%s15690_s8 + $0x4a0] sm:$0xff] }
 0x118   :  { %15850 = vst [vmem:[#allocation179_spill] sm:$0xff] %v12490_v62  ;;  %15851 = vst [vmem:[#allocation180_spill] sm:$0xff] %v12495_v63  ;;  %v12500_v58 = vld [vmem:[%s15690_s8 + $0x4a8] sm:$0xff]  ;;  %v12505_v60 = vld [vmem:[%s15690_s8 + $0x4b0] sm:$0xff] }
 0x119   :  { %15852 = vst [vmem:[#allocation181_spill] sm:$0xff] %v12500_v58  ;;  %15853 = vst [vmem:[#allocation182_spill] sm:$0xff] %v12505_v60  ;;  %v12510_v61 = vld [vmem:[%s15690_s8 + $0x4b8] sm:$0xff]  ;;  %v12515_v62 = vld [vmem:[%s15690_s8 + $0x4c0] sm:$0xff] }
 0x11a   :  { %15854 = vst [vmem:[#allocation183_spill] sm:$0xff] %v12510_v61  ;;  %15855 = vst [vmem:[#allocation184_spill] sm:$0xff] %v12515_v62  ;;  %v12520_v63 = vld [vmem:[%s15690_s8 + $0x4c8] sm:$0xff]  ;;  %v12525_v58 = vld [vmem:[%s15690_s8 + $0x4d0] sm:$0xff] }
 0x11b   :  { %15856 = vst [vmem:[#allocation185_spill] sm:$0xff] %v12520_v63  ;;  %15857 = vst [vmem:[#allocation186_spill] sm:$0xff] %v12525_v58  ;;  %v12530_v60 = vld [vmem:[%s15690_s8 + $0x4d8] sm:$0xff]  ;;  %v12535_v61 = vld [vmem:[%s15690_s8 + $0x4e0] sm:$0xff] }
 0x11c   :  { %15858 = vst [vmem:[#allocation187_spill] sm:$0xff] %v12530_v60  ;;  %15859 = vst [vmem:[#allocation188_spill] sm:$0xff] %v12535_v61  ;;  %v12540_v62 = vld [vmem:[%s15690_s8 + $0x4e8] sm:$0xff]  ;;  %v12545_v63 = vld [vmem:[%s15690_s8 + $0x4f0] sm:$0xff] }
 0x11d   :  { %15860 = vst [vmem:[#allocation189_spill] sm:$0xff] %v12540_v62  ;;  %15861 = vst [vmem:[#allocation190_spill] sm:$0xff] %v12545_v63  ;;  %v12550_v58 = vld [vmem:[%s15690_s8 + $0x4f8] sm:$0xff]  ;;  %v12555_v60 = vld [vmem:[%s15690_s8 + $0x500] sm:$0xff] }
 0x11e   :  { %15862 = vst [vmem:[#allocation191_spill] sm:$0xff] %v12550_v58  ;;  %15863 = vst [vmem:[#allocation192_spill] sm:$0xff] %v12555_v60  ;;  %v12560_v61 = vld [vmem:[%s15690_s8 + $0x508] sm:$0xff]  ;;  %v12565_v62 = vld [vmem:[%s15690_s8 + $0x510] sm:$0xff] }
 0x11f   :  { %15864 = vst [vmem:[#allocation193_spill] sm:$0xff] %v12560_v61  ;;  %15865 = vst [vmem:[#allocation194_spill] sm:$0xff] %v12565_v62  ;;  %v12570_v63 = vld [vmem:[%s15690_s8 + $0x518] sm:$0xff]  ;;  %v12575_v58 = vld [vmem:[%s15690_s8 + $0x520] sm:$0xff] }
 0x120   :  { %15866 = vst [vmem:[#allocation195_spill] sm:$0xff] %v12570_v63  ;;  %15867 = vst [vmem:[#allocation196_spill] sm:$0xff] %v12575_v58  ;;  %v12580_v60 = vld [vmem:[%s15690_s8 + $0x528] sm:$0xff]  ;;  %v12585_v61 = vld [vmem:[%s15690_s8 + $0x530] sm:$0xff] }
 0x121   :  { %15868 = vst [vmem:[#allocation197_spill] sm:$0xff] %v12580_v60  ;;  %15869 = vst [vmem:[#allocation198_spill] sm:$0xff] %v12585_v61  ;;  %v12590_v62 = vld [vmem:[%s15690_s8 + $0x538] sm:$0xff]  ;;  %v12595_v63 = vld [vmem:[%s15690_s8 + $0x540] sm:$0xff] }
 0x122   :  { %15870 = vst [vmem:[#allocation199_spill] sm:$0xff] %v12590_v62  ;;  %15871 = vst [vmem:[#allocation200_spill] sm:$0xff] %v12595_v63  ;;  %v12600_v58 = vld [vmem:[%s15690_s8 + $0x548] sm:$0xff]  ;;  %v12605_v60 = vld [vmem:[%s15690_s8 + $0x550] sm:$0xff] }
 0x123   :  { %15872 = vst [vmem:[#allocation201_spill] sm:$0xff] %v12600_v58  ;;  %15873 = vst [vmem:[#allocation202_spill] sm:$0xff] %v12605_v60  ;;  %v12610_v61 = vld [vmem:[%s15690_s8 + $0x558] sm:$0xff]  ;;  %v12615_v62 = vld [vmem:[%s15690_s8 + $0x560] sm:$0xff] }
 0x124   :  { %15874 = vst [vmem:[#allocation203_spill] sm:$0xff] %v12610_v61  ;;  %15875 = vst [vmem:[#allocation204_spill] sm:$0xff] %v12615_v62  ;;  %v12620_v63 = vld [vmem:[%s15690_s8 + $0x568] sm:$0xff]  ;;  %v12625_v58 = vld [vmem:[%s15690_s8 + $0x570] sm:$0xff] }
 0x125   :  { %15876 = vst [vmem:[#allocation205_spill] sm:$0xff] %v12620_v63  ;;  %15877 = vst [vmem:[#allocation206_spill] sm:$0xff] %v12625_v58  ;;  %v12630_v60 = vld [vmem:[%s15690_s8 + $0x578] sm:$0xff]  ;;  %v12635_v61 = vld [vmem:[%s15690_s8 + $0x580] sm:$0xff] }
 0x126   :  { %15878 = vst [vmem:[#allocation207_spill] sm:$0xff] %v12630_v60  ;;  %15879 = vst [vmem:[#allocation208_spill] sm:$0xff] %v12635_v61  ;;  %v12640_v62 = vld [vmem:[%s15690_s8 + $0x588] sm:$0xff]  ;;  %v12645_v63 = vld [vmem:[%s15690_s8 + $0x590] sm:$0xff] }
 0x127   :  { %15880 = vst [vmem:[#allocation209_spill] sm:$0xff] %v12640_v62  ;;  %15881 = vst [vmem:[#allocation210_spill] sm:$0xff] %v12645_v63  ;;  %v12650_v58 = vld [vmem:[%s15690_s8 + $0x598] sm:$0xff]  ;;  %v12655_v60 = vld [vmem:[%s15690_s8 + $0x5a0] sm:$0xff] }
 0x128   :  { %15882 = vst [vmem:[#allocation211_spill] sm:$0xff] %v12650_v58  ;;  %15883 = vst [vmem:[#allocation212_spill] sm:$0xff] %v12655_v60  ;;  %v12660_v61 = vld [vmem:[%s15690_s8 + $0x5a8] sm:$0xff]  ;;  %v12665_v62 = vld [vmem:[%s15690_s8 + $0x5b0] sm:$0xff] }
 0x129   :  { %15884 = vst [vmem:[#allocation213_spill] sm:$0xff] %v12660_v61  ;;  %15885 = vst [vmem:[#allocation214_spill] sm:$0xff] %v12665_v62  ;;  %v12670_v63 = vld [vmem:[%s15690_s8 + $0x5b8] sm:$0xff]  ;;  %v12675_v58 = vld [vmem:[%s15690_s8 + $0x5c0] sm:$0xff] }
 0x12a   :  { %15886 = vst [vmem:[#allocation215_spill] sm:$0xff] %v12670_v63  ;;  %15887 = vst [vmem:[#allocation216_spill] sm:$0xff] %v12675_v58  ;;  %v12680_v60 = vld [vmem:[%s15690_s8 + $0x5c8] sm:$0xff]  ;;  %v12685_v61 = vld [vmem:[%s15690_s8 + $0x5d0] sm:$0xff] }
 0x12b   :  { %15888 = vst [vmem:[#allocation217_spill] sm:$0xff] %v12680_v60  ;;  %15889 = vst [vmem:[#allocation218_spill] sm:$0xff] %v12685_v61  ;;  %v12690_v62 = vld [vmem:[%s15690_s8 + $0x5d8] sm:$0xff]  ;;  %v12695_v63 = vld [vmem:[%s15690_s8 + $0x5e0] sm:$0xff] }
 0x12c   :  { %15890 = vst [vmem:[#allocation219_spill] sm:$0xff] %v12690_v62  ;;  %15891 = vst [vmem:[#allocation220_spill] sm:$0xff] %v12695_v63  ;;  %v12700_v58 = vld [vmem:[%s15690_s8 + $0x5e8] sm:$0xff]  ;;  %v12705_v60 = vld [vmem:[%s15690_s8 + $0x5f0] sm:$0xff] }
 0x12d   :  { %15892 = vst [vmem:[#allocation221_spill] sm:$0xff] %v12700_v58  ;;  %15893 = vst [vmem:[#allocation222_spill] sm:$0xff] %v12705_v60  ;;  %v12710_v61 = vld [vmem:[%s15690_s8 + $0x5f8] sm:$0xff]  ;;  %v12715_v62 = vld [vmem:[%s15690_s8 + $0x600] sm:$0xff] }
 0x12e   :  { %15894 = vst [vmem:[#allocation223_spill] sm:$0xff] %v12710_v61  ;;  %15895 = vst [vmem:[#allocation224_spill] sm:$0xff] %v12715_v62  ;;  %v12720_v63 = vld [vmem:[%s15690_s8 + $0x608] sm:$0xff]  ;;  %v12725_v58 = vld [vmem:[%s15690_s8 + $0x610] sm:$0xff] }
 0x12f   :  { %15896 = vst [vmem:[#allocation225_spill] sm:$0xff] %v12720_v63  ;;  %15897 = vst [vmem:[#allocation226_spill] sm:$0xff] %v12725_v58  ;;  %v12730_v60 = vld [vmem:[%s15690_s8 + $0x618] sm:$0xff]  ;;  %v12735_v61 = vld [vmem:[%s15690_s8 + $0x620] sm:$0xff] }
 0x130   :  { %15898 = vst [vmem:[#allocation227_spill] sm:$0xff] %v12730_v60  ;;  %15899 = vst [vmem:[#allocation228_spill] sm:$0xff] %v12735_v61  ;;  %v12740_v62 = vld [vmem:[%s15690_s8 + $0x628] sm:$0xff]  ;;  %v12745_v63 = vld [vmem:[%s15690_s8 + $0x630] sm:$0xff] }
 0x131   :  { %15900 = vst [vmem:[#allocation229_spill] sm:$0xff] %v12740_v62  ;;  %15901 = vst [vmem:[#allocation230_spill] sm:$0xff] %v12745_v63  ;;  %v12750_v58 = vld [vmem:[%s15690_s8 + $0x638] sm:$0xff]  ;;  %v12755_v60 = vld [vmem:[%s15690_s8 + $0x640] sm:$0xff] }
 0x132   :  { %15902 = vst [vmem:[#allocation231_spill] sm:$0xff] %v12750_v58  ;;  %15903 = vst [vmem:[#allocation232_spill] sm:$0xff] %v12755_v60  ;;  %v12760_v61 = vld [vmem:[%s15690_s8 + $0x648] sm:$0xff]  ;;  %v12765_v62 = vld [vmem:[%s15690_s8 + $0x650] sm:$0xff] }
 0x133   :  { %15904 = vst [vmem:[#allocation233_spill] sm:$0xff] %v12760_v61  ;;  %15905 = vst [vmem:[#allocation234_spill] sm:$0xff] %v12765_v62  ;;  %v12770_v63 = vld [vmem:[%s15690_s8 + $0x658] sm:$0xff]  ;;  %v12775_v58 = vld [vmem:[%s15690_s8 + $0x660] sm:$0xff] }
 0x134   :  { %15906 = vst [vmem:[#allocation235_spill] sm:$0xff] %v12770_v63  ;;  %15907 = vst [vmem:[#allocation236_spill] sm:$0xff] %v12775_v58  ;;  %v12780_v60 = vld [vmem:[%s15690_s8 + $0x668] sm:$0xff]  ;;  %v12785_v61 = vld [vmem:[%s15690_s8 + $0x670] sm:$0xff] }
 0x135   :  { %15908 = vst [vmem:[#allocation237_spill] sm:$0xff] %v12780_v60  ;;  %15909 = vst [vmem:[#allocation238_spill] sm:$0xff] %v12785_v61  ;;  %v12790_v62 = vld [vmem:[%s15690_s8 + $0x678] sm:$0xff]  ;;  %v12795_v63 = vld [vmem:[%s15690_s8 + $0x680] sm:$0xff] }
 0x136   :  { %15910 = vst [vmem:[#allocation239_spill] sm:$0xff] %v12790_v62  ;;  %15911 = vst [vmem:[#allocation240_spill] sm:$0xff] %v12795_v63  ;;  %v12800_v58 = vld [vmem:[%s15690_s8 + $0x688] sm:$0xff]  ;;  %v12805_v60 = vld [vmem:[%s15690_s8 + $0x690] sm:$0xff] }
 0x137   :  { %15912 = vst [vmem:[#allocation241_spill] sm:$0xff] %v12800_v58  ;;  %15913 = vst [vmem:[#allocation242_spill] sm:$0xff] %v12805_v60  ;;  %v12810_v61 = vld [vmem:[%s15690_s8 + $0x698] sm:$0xff]  ;;  %v12815_v62 = vld [vmem:[%s15690_s8 + $0x6a0] sm:$0xff] }
 0x138   :  { %15914 = vst [vmem:[#allocation243_spill] sm:$0xff] %v12810_v61  ;;  %15915 = vst [vmem:[#allocation244_spill] sm:$0xff] %v12815_v62  ;;  %v12820_v63 = vld [vmem:[%s15690_s8 + $0x6a8] sm:$0xff]  ;;  %v12825_v58 = vld [vmem:[%s15690_s8 + $0x6b0] sm:$0xff] }
 0x139   :  { %15916 = vst [vmem:[#allocation245_spill] sm:$0xff] %v12820_v63  ;;  %15917 = vst [vmem:[#allocation246_spill] sm:$0xff] %v12825_v58  ;;  %v12830_v60 = vld [vmem:[%s15690_s8 + $0x6b8] sm:$0xff]  ;;  %v12835_v61 = vld [vmem:[%s15690_s8 + $0x6c0] sm:$0xff] }
 0x13a   :  { %15918 = vst [vmem:[#allocation247_spill] sm:$0xff] %v12830_v60  ;;  %15919 = vst [vmem:[#allocation248_spill] sm:$0xff] %v12835_v61  ;;  %v12840_v62 = vld [vmem:[%s15690_s8 + $0x6c8] sm:$0xff]  ;;  %v12845_v63 = vld [vmem:[%s15690_s8 + $0x6d0] sm:$0xff] }
 0x13b   :  { %15920 = vst [vmem:[#allocation249_spill] sm:$0xff] %v12840_v62  ;;  %15921 = vst [vmem:[#allocation250_spill] sm:$0xff] %v12845_v63  ;;  %v12850_v58 = vld [vmem:[%s15690_s8 + $0x6d8] sm:$0xff]  ;;  %v12855_v60 = vld [vmem:[%s15690_s8 + $0x6e0] sm:$0xff] }
 0x13c   :  { %15922 = vst [vmem:[#allocation251_spill] sm:$0xff] %v12850_v58  ;;  %15923 = vst [vmem:[#allocation252_spill] sm:$0xff] %v12855_v60  ;;  %v12860_v61 = vld [vmem:[%s15690_s8 + $0x6e8] sm:$0xff]  ;;  %v12865_v62 = vld [vmem:[%s15690_s8 + $0x6f0] sm:$0xff] }
 0x13d   :  { %15924 = vst [vmem:[#allocation253_spill] sm:$0xff] %v12860_v61  ;;  %15925 = vst [vmem:[#allocation254_spill] sm:$0xff] %v12865_v62  ;;  %v12870_v63 = vld [vmem:[%s15690_s8 + $0x6f8] sm:$0xff]  ;;  %v12875_v58 = vld [vmem:[%s15690_s8 + $0x700] sm:$0xff] }
 0x13e   :  { %15926 = vst [vmem:[#allocation255_spill] sm:$0xff] %v12870_v63  ;;  %15927 = vst [vmem:[#allocation256_spill] sm:$0xff] %v12875_v58  ;;  %v12880_v60 = vld [vmem:[%s15690_s8 + $0x708] sm:$0xff]  ;;  %v12885_v61 = vld [vmem:[%s15690_s8 + $0x710] sm:$0xff] }
 0x13f   :  { %15928 = vst [vmem:[#allocation257_spill] sm:$0xff] %v12880_v60  ;;  %15929 = vst [vmem:[#allocation258_spill] sm:$0xff] %v12885_v61  ;;  %v12890_v62 = vld [vmem:[%s15690_s8 + $0x718] sm:$0xff]  ;;  %v12895_v63 = vld [vmem:[%s15690_s8 + $0x720] sm:$0xff] }
 0x140   :  { %15930 = vst [vmem:[#allocation259_spill] sm:$0xff] %v12890_v62  ;;  %15931 = vst [vmem:[#allocation260_spill] sm:$0xff] %v12895_v63  ;;  %v12900_v58 = vld [vmem:[%s15690_s8 + $0x728] sm:$0xff]  ;;  %v12905_v60 = vld [vmem:[%s15690_s8 + $0x730] sm:$0xff] }
 0x141   :  { %15932 = vst [vmem:[#allocation261_spill] sm:$0xff] %v12900_v58  ;;  %15933 = vst [vmem:[#allocation262_spill] sm:$0xff] %v12905_v60  ;;  %v12910_v61 = vld [vmem:[%s15690_s8 + $0x738] sm:$0xff]  ;;  %v12915_v62 = vld [vmem:[%s15690_s8 + $0x740] sm:$0xff] }
 0x142   :  { %15934 = vst [vmem:[#allocation263_spill] sm:$0xff] %v12910_v61  ;;  %15935 = vst [vmem:[#allocation264_spill] sm:$0xff] %v12915_v62  ;;  %v12920_v63 = vld [vmem:[%s15690_s8 + $0x748] sm:$0xff]  ;;  %v12925_v58 = vld [vmem:[%s15690_s8 + $0x750] sm:$0xff] }
 0x143   :  { %15936 = vst [vmem:[#allocation265_spill] sm:$0xff] %v12920_v63  ;;  %15937 = vst [vmem:[#allocation266_spill] sm:$0xff] %v12925_v58  ;;  %v12930_v60 = vld [vmem:[%s15690_s8 + $0x758] sm:$0xff]  ;;  %v12935_v61 = vld [vmem:[%s15690_s8 + $0x760] sm:$0xff] }
 0x144   :  { %15938 = vst [vmem:[#allocation267_spill] sm:$0xff] %v12930_v60  ;;  %15939 = vst [vmem:[#allocation268_spill] sm:$0xff] %v12935_v61  ;;  %v12940_v62 = vld [vmem:[%s15690_s8 + $0x768] sm:$0xff]  ;;  %v12945_v63 = vld [vmem:[%s15690_s8 + $0x770] sm:$0xff] }
 0x145   :  { %15940 = vst [vmem:[#allocation269_spill] sm:$0xff] %v12940_v62  ;;  %15941 = vst [vmem:[#allocation270_spill] sm:$0xff] %v12945_v63  ;;  %v12950_v58 = vld [vmem:[%s15690_s8 + $0x778] sm:$0xff]  ;;  %v12955_v60 = vld [vmem:[%s15690_s8 + $0x780] sm:$0xff] }
 0x146   :  { %15942 = vst [vmem:[#allocation271_spill] sm:$0xff] %v12950_v58  ;;  %15943 = vst [vmem:[#allocation272_spill] sm:$0xff] %v12955_v60  ;;  %v12960_v61 = vld [vmem:[%s15690_s8 + $0x788] sm:$0xff]  ;;  %v12965_v62 = vld [vmem:[%s15690_s8 + $0x790] sm:$0xff] }
 0x147   :  { %15944 = vst [vmem:[#allocation273_spill] sm:$0xff] %v12960_v61  ;;  %15945 = vst [vmem:[#allocation274_spill] sm:$0xff] %v12965_v62  ;;  %v12970_v63 = vld [vmem:[%s15690_s8 + $0x798] sm:$0xff]  ;;  %v12975_v58 = vld [vmem:[%s15690_s8 + $0x7a0] sm:$0xff] }
 0x148   :  { %15946 = vst [vmem:[#allocation275_spill] sm:$0xff] %v12970_v63  ;;  %15947 = vst [vmem:[#allocation276_spill] sm:$0xff] %v12975_v58  ;;  %v12980_v60 = vld [vmem:[%s15690_s8 + $0x7a8] sm:$0xff]  ;;  %v12985_v61 = vld [vmem:[%s15690_s8 + $0x7b0] sm:$0xff] }
 0x149   :  { %15948 = vst [vmem:[#allocation277_spill] sm:$0xff] %v12980_v60  ;;  %15949 = vst [vmem:[#allocation278_spill] sm:$0xff] %v12985_v61  ;;  %v12990_v62 = vld [vmem:[%s15690_s8 + $0x7b8] sm:$0xff]  ;;  %v12995_v63 = vld [vmem:[%s15690_s8 + $0x7c0] sm:$0xff] }
 0x14a   :  { %15950 = vst [vmem:[#allocation279_spill] sm:$0xff] %v12990_v62  ;;  %15951 = vst [vmem:[#allocation280_spill] sm:$0xff] %v12995_v63  ;;  %v13000_v58 = vld [vmem:[%s15690_s8 + $0x7c8] sm:$0xff]  ;;  %v13005_v60 = vld [vmem:[%s15690_s8 + $0x7d0] sm:$0xff] }
 0x14b   :  { %15952 = vst [vmem:[#allocation281_spill] sm:$0xff] %v13000_v58  ;;  %15953 = vst [vmem:[#allocation282_spill] sm:$0xff] %v13005_v60  ;;  %v13010_v61 = vld [vmem:[%s15690_s8 + $0x7d8] sm:$0xff]  ;;  %v13015_v62 = vld [vmem:[%s15690_s8 + $0x7e0] sm:$0xff] }
 0x14c   :  { %15954 = vst [vmem:[#allocation283_spill] sm:$0xff] %v13010_v61  ;;  %15955 = vst [vmem:[#allocation284_spill] sm:$0xff] %v13015_v62  ;;  %v13020_v63 = vld [vmem:[%s15690_s8 + $0x7e8] sm:$0xff]  ;;  %v13025_v58 = vld [vmem:[%s15690_s8 + $0x7f0] sm:$0xff] }
 0x14d   :  { %15956 = vst [vmem:[#allocation285_spill] sm:$0xff] %v13020_v63  ;;  %15957 = vst [vmem:[#allocation286_spill] sm:$0xff] %v13025_v58  ;;  %v13030_v60 = vld [vmem:[%s15690_s8 + $0x7f8] sm:$0xff]  ;;  %v13035_v61 = vld [vmem:[%s15690_s8 + $0x800] sm:$0xff] }
 0x14e   :  { %15958 = vst [vmem:[#allocation287_spill] sm:$0xff] %v13030_v60  ;;  %15959 = vst [vmem:[#allocation288_spill] sm:$0xff] %v13035_v61  ;;  %v13040_v62 = vld [vmem:[%s15690_s8 + $0x808] sm:$0xff]  ;;  %v13045_v63 = vld [vmem:[%s15690_s8 + $0x810] sm:$0xff] }
 0x14f   :  { %15960 = vst [vmem:[#allocation289_spill] sm:$0xff] %v13040_v62  ;;  %15961 = vst [vmem:[#allocation290_spill] sm:$0xff] %v13045_v63  ;;  %v13050_v58 = vld [vmem:[%s15690_s8 + $0x818] sm:$0xff]  ;;  %v13055_v60 = vld [vmem:[%s15690_s8 + $0x820] sm:$0xff] }
 0x150   :  { %15962 = vst [vmem:[#allocation291_spill] sm:$0xff] %v13050_v58  ;;  %15963 = vst [vmem:[#allocation292_spill] sm:$0xff] %v13055_v60  ;;  %v13060_v61 = vld [vmem:[%s15690_s8 + $0x828] sm:$0xff]  ;;  %v13065_v62 = vld [vmem:[%s15690_s8 + $0x830] sm:$0xff] }
 0x151   :  { %15964 = vst [vmem:[#allocation293_spill] sm:$0xff] %v13060_v61  ;;  %15965 = vst [vmem:[#allocation294_spill] sm:$0xff] %v13065_v62  ;;  %v13070_v63 = vld [vmem:[%s15690_s8 + $0x838] sm:$0xff]  ;;  %v13075_v58 = vld [vmem:[%s15690_s8 + $0x840] sm:$0xff] }
 0x152   :  { %15966 = vst [vmem:[#allocation295_spill] sm:$0xff] %v13070_v63  ;;  %15967 = vst [vmem:[#allocation296_spill] sm:$0xff] %v13075_v58  ;;  %v13080_v60 = vld [vmem:[%s15690_s8 + $0x848] sm:$0xff]  ;;  %v13085_v61 = vld [vmem:[%s15690_s8 + $0x850] sm:$0xff] }
 0x153   :  { %15968 = vst [vmem:[#allocation297_spill] sm:$0xff] %v13080_v60  ;;  %15969 = vst [vmem:[#allocation298_spill] sm:$0xff] %v13085_v61  ;;  %v13090_v62 = vld [vmem:[%s15690_s8 + $0x858] sm:$0xff]  ;;  %v13095_v63 = vld [vmem:[%s15690_s8 + $0x860] sm:$0xff] }
 0x154   :  { %15970 = vst [vmem:[#allocation299_spill] sm:$0xff] %v13090_v62  ;;  %15971 = vst [vmem:[#allocation300_spill] sm:$0xff] %v13095_v63  ;;  %v13100_v58 = vld [vmem:[%s15690_s8 + $0x868] sm:$0xff]  ;;  %v13105_v60 = vld [vmem:[%s15690_s8 + $0x870] sm:$0xff] }
 0x155   :  { %15972 = vst [vmem:[#allocation301_spill] sm:$0xff] %v13100_v58  ;;  %15973 = vst [vmem:[#allocation302_spill] sm:$0xff] %v13105_v60  ;;  %v13110_v61 = vld [vmem:[%s15690_s8 + $0x878] sm:$0xff]  ;;  %v13115_v62 = vld [vmem:[%s15690_s8 + $0x880] sm:$0xff] }
 0x156   :  { %15974 = vst [vmem:[#allocation303_spill] sm:$0xff] %v13110_v61  ;;  %15975 = vst [vmem:[#allocation304_spill] sm:$0xff] %v13115_v62  ;;  %v13120_v63 = vld [vmem:[%s15690_s8 + $0x888] sm:$0xff]  ;;  %v13125_v58 = vld [vmem:[%s15690_s8 + $0x890] sm:$0xff] }
 0x157   :  { %15976 = vst [vmem:[#allocation305_spill] sm:$0xff] %v13120_v63  ;;  %15977 = vst [vmem:[#allocation306_spill] sm:$0xff] %v13125_v58  ;;  %v13130_v60 = vld [vmem:[%s15690_s8 + $0x898] sm:$0xff]  ;;  %v13135_v61 = vld [vmem:[%s15690_s8 + $0x8a0] sm:$0xff] }
 0x158   :  { %15978 = vst [vmem:[#allocation307_spill] sm:$0xff] %v13130_v60  ;;  %15979 = vst [vmem:[#allocation308_spill] sm:$0xff] %v13135_v61  ;;  %v13140_v62 = vld [vmem:[%s15690_s8 + $0x8a8] sm:$0xff]  ;;  %v13145_v63 = vld [vmem:[%s15690_s8 + $0x8b0] sm:$0xff] }
 0x159   :  { %15980 = vst [vmem:[#allocation309_spill] sm:$0xff] %v13140_v62  ;;  %15981 = vst [vmem:[#allocation310_spill] sm:$0xff] %v13145_v63  ;;  %v13150_v58 = vld [vmem:[%s15690_s8 + $0x8b8] sm:$0xff]  ;;  %v13155_v60 = vld [vmem:[%s15690_s8 + $0x8c0] sm:$0xff] }
 0x15a   :  { %15982 = vst [vmem:[#allocation311_spill] sm:$0xff] %v13150_v58  ;;  %15983 = vst [vmem:[#allocation312_spill] sm:$0xff] %v13155_v60  ;;  %v13160_v61 = vld [vmem:[%s15690_s8 + $0x8c8] sm:$0xff]  ;;  %v13165_v62 = vld [vmem:[%s15690_s8 + $0x8d0] sm:$0xff] }
 0x15b   :  { %15984 = vst [vmem:[#allocation313_spill] sm:$0xff] %v13160_v61  ;;  %15985 = vst [vmem:[#allocation314_spill] sm:$0xff] %v13165_v62  ;;  %v13170_v63 = vld [vmem:[%s15690_s8 + $0x8d8] sm:$0xff]  ;;  %v13175_v58 = vld [vmem:[%s15690_s8 + $0x8e0] sm:$0xff] }
 0x15c   :  { %15986 = vst [vmem:[#allocation315_spill] sm:$0xff] %v13170_v63  ;;  %15987 = vst [vmem:[#allocation316_spill] sm:$0xff] %v13175_v58  ;;  %v13180_v60 = vld [vmem:[%s15690_s8 + $0x8e8] sm:$0xff]  ;;  %v13185_v61 = vld [vmem:[%s15690_s8 + $0x8f0] sm:$0xff] }
 0x15d   :  { %15988 = vst [vmem:[#allocation317_spill] sm:$0xff] %v13180_v60  ;;  %15989 = vst [vmem:[#allocation318_spill] sm:$0xff] %v13185_v61  ;;  %v13190_v62 = vld [vmem:[%s15690_s8 + $0x8f8] sm:$0xff]  ;;  %v7867_v63 = vld [vmem:[%s15991_s19 + $0x88] sm:$0xff] }
 0x15e   :  { %15990 = vst [vmem:[#allocation319_spill] sm:$0xff] %v13190_v62  ;;  %v7866_v58 = vld [vmem:[%s15991_s19 + $0x80] sm:$0xff]  ;;  %1002 = vperm.xlu1 %11161, %v7867_v63   ;;  %v867_v61 = vld [vmem:[%s15991_s19 + $0x8] sm:$0xff]  ;;  %v868_v60 = vld [vmem:[%s15991_s19 + $0x10] sm:$0xff] }
 0x15f   :  { %997 = vperm.xlu0 %11160, %v7866_v58   ;;  %v866_v62 = vld [vmem:[%s15991_s19] sm:$0xff]  ;;  %v7868_v56 = vld [vmem:[%s15991_s19 + $0x90] sm:$0xff]  ;;  %v869_v58 = vld [vmem:[%s15991_s19 + $0x18] sm:$0xff] }
 0x160   :  { %v7869_v63 = vld [vmem:[%s15991_s19 + $0x98] sm:$0xff]  ;;  %v1915_v59 = vld [vmem:[%s15684_s2] sm:$0xff]  ;;  %v1916_v57 = vld [vmem:[%s15684_s2 + $0x8] sm:$0xff] }
 0x161   :  { %v7871_v54 = vld [vmem:[%s15991_s19 + $0xa8] sm:$0xff]  ;;  %v9564_v52 = vpack.c.bf16 %v1916_v57, %v1915_v59  ;;  %v1918_v55 = vld [vmem:[%s15684_s2 + $0x18] sm:$0xff]  ;;  %v1935_v59 = vld [vmem:[%s15684_s2 + $0xa0] sm:$0xff] }
 0x162   :  { %889 = vperm.xlu1 %11161, %v867_v61   ;;  %v870_v61 = vld [vmem:[%s15991_s19 + $0x20] sm:$0xff]  ;;  %v1936_v53 = vld [vmem:[%s15684_s2 + $0xa8] sm:$0xff]  ;;  %v1921_v50 = vld [vmem:[%s15684_s2 + $0x30] sm:$0xff] }
 0x163   :  { %884 = vperm.xlu0 %11160, %v866_v62   ;;  %v7870_v62 = vld [vmem:[%s15991_s19 + $0xa0] sm:$0xff] }
 0x166   :  { %894 = vperm.xlu1 %11161, %v868_v60   ;;  %v1931_v60 = vld [vmem:[%s15684_s2 + $0x80] sm:$0xff] }
 0x167   :  { %1007 = vperm.xlu0 %11160, %v7868_v56   ;;  %v1932_v56 = vld [vmem:[%s15684_s2 + $0x88] sm:$0xff] }
 0x16a   :  { %899 = vperm.xlu1 %11161, %v869_v58   ;;  %v871_v58 = vld [vmem:[%s15991_s19 + $0x28] sm:$0xff] }
 0x16b   :  { %1012 = vperm.xlu0 %11160, %v7869_v63   ;;  %v9562_v63 = vpack.c.bf16 %v1932_v56, %v1931_v60  ;;  %v1917_v56 = vld [vmem:[%s15684_s2 + $0x10] sm:$0xff] }
 0x16c   :  { %v9568_v57 = vpack.c.bf16 %v1918_v55, %v1917_v56  ;;  %v7872_v55 = vld [vmem:[%s15991_s19 + $0xb0] sm:$0xff] }
 0x16d   :  { %9563 = vmatprep.subr.bf16.mxu1 %v9562_v63  ;;  %v1919_v63 = vld [vmem:[%s15684_s2 + $0x20] sm:$0xff] }
 0x16e   :  { %904 = vperm.xlu1 %11161, %v870_v61   ;;  %v1933_v61 = vld [vmem:[%s15684_s2 + $0x90] sm:$0xff]  ;;  %9565 = vmatpush3.bf16.msra.mxu1 %v9564_v52 }
 0x16f   :  { %1017 = vperm.xlu0 %11160, %v7870_v62   ;;  %v1934_v62 = vld [vmem:[%s15684_s2 + $0x98] sm:$0xff]  ;;  %v872_v52 = vld [vmem:[%s15991_s19 + $0x30] sm:$0xff] }
 0x170   :  { %v9566_v60 = vpack.c.bf16 %v1934_v62, %v1933_v61  ;;  %v1920_v61 = vld [vmem:[%s15684_s2 + $0x28] sm:$0xff]  ;;  %v9570_v62 = vpack.c.bf16 %v1936_v53, %v1935_v59  ;;  %v1922_v53 = vld [vmem:[%s15684_s2 + $0x38] sm:$0xff] }
 0x171   :  { %v9572_v56 = vpack.c.bf16 %v1920_v61, %v1919_v63  ;;  %v7873_v59 = vld [vmem:[%s15991_s19 + $0xb8] sm:$0xff]  ;;  %v1939_v63 = vld [vmem:[%s15684_s2 + $0xc0] sm:$0xff]  ;;  %v1940_v61 = vld [vmem:[%s15684_s2 + $0xc8] sm:$0xff] }
 0x172   :  { %909 = vperm.xlu1 %11161, %v871_v58   ;;  %9567 = vmatprep.subr.bf16.mxu1 %v9566_v60  ;;  %v1938_v58 = vld [vmem:[%s15684_s2 + $0xb8] sm:$0xff] }
 0x173   :  { %1022 = vperm.xlu0 %11160, %v7871_v54   ;;  %v1937_v54 = vld [vmem:[%s15684_s2 + $0xb0] sm:$0xff]  ;;  %9569 = vmatpush3.bf16.msra.mxu1 %v9568_v57  ;;  %v873_v60 = vld [vmem:[%s15991_s19 + $0x38] sm:$0xff] }
 0x174   :  { %9571 = vmatprep.subr.bf16.mxu1 %v9570_v62  ;;  %v9574_v57 = vpack.c.bf16 %v1938_v58, %v1937_v54  ;;  %v1924_v62 = vld [vmem:[%s15684_s2 + $0x48] sm:$0xff]  ;;  %v874_v54 = vld [vmem:[%s15991_s19 + $0x40] sm:$0xff] }
 0x175   :  { %v7874_v58 = vld [vmem:[%s15991_s19 + $0xc0] sm:$0xff] }
 0x176   :  { %914 = vperm.xlu1 %11161, %v872_v52   ;;  %v9576_v52 = vpack.c.bf16 %v1922_v53, %v1921_v50  ;;  %v9578_v50 = vpack.c.bf16 %v1940_v61, %v1939_v63  ;;  %v1942_v53 = vld [vmem:[%s15684_s2 + $0xd8] sm:$0xff]  ;;  %v875_v63 = vld [vmem:[%s15991_s19 + $0x48] sm:$0xff] }
 0x177   :  { %1027 = vperm.xlu0 %11160, %v7872_v55   ;;  %9573 = vmatpush3.bf16.msra.mxu1 %v9572_v56  ;;  %v1923_v55 = vld [vmem:[%s15684_s2 + $0x40] sm:$0xff]  ;;  %v1941_v56 = vld [vmem:[%s15684_s2 + $0xd0] sm:$0xff]  ;;  %v7875_v61 = vld [vmem:[%s15991_s19 + $0xc8] sm:$0xff] }
 0x178   :  { %9575 = vmatprep.subr.bf16.mxu1 %v9574_v57  ;;  %v1926_v57 = vld [vmem:[%s15684_s2 + $0x58] sm:$0xff] }
 0x17a   :  { %919 = vperm.xlu1 %11161, %v873_v60   ;;  %v9580_v60 = vpack.c.bf16 %v1924_v62, %v1923_v55  ;;  %v1943_v55 = vld [vmem:[%s15684_s2 + $0xe0] sm:$0xff]  ;;  %v1944_v62 = vld [vmem:[%s15684_s2 + $0xe8] sm:$0xff] }
 0x17b   :  { %1032 = vperm.xlu0 %11160, %v7873_v59   ;;  %9577 = vmatpush3.bf16.msra.mxu1 %v9576_v52  ;;  %v1925_v59 = vld [vmem:[%s15684_s2 + $0x50] sm:$0xff]  ;;  %v9582_v52 = vpack.c.bf16 %v1942_v53, %v1941_v56 }
 0x17c   :  { %9579 = vmatprep.subr.bf16.mxu1 %v9578_v50  ;;  %v1928_v50 = vld [vmem:[%s15684_s2 + $0x68] sm:$0xff]  ;;  %v876_v56 = vld [vmem:[%s15991_s19 + $0x50] sm:$0xff] }
 0x17d   :  { %v7876_v53 = vld [vmem:[%s15991_s19 + $0xd0] sm:$0xff] }
 0x17e   :  { %924 = vperm.xlu1 %11161, %v874_v54   ;;  %v9584_v54 = vpack.c.bf16 %v1926_v57, %v1925_v59  ;;  %v1945_v59 = vld [vmem:[%s15684_s2 + $0xf0] sm:$0xff]  ;;  %v1946_v57 = vld [vmem:[%s15684_s2 + $0xf8] sm:$0xff] }
 0x17f   :  { %1037 = vperm.xlu0 %11160, %v7874_v58   ;;  %9581 = vmatpush3.bf16.msra.mxu1 %v9580_v60  ;;  %v1927_v58 = vld [vmem:[%s15684_s2 + $0x60] sm:$0xff]  ;;  %v9586_v60 = vpack.c.bf16 %v1944_v62, %v1943_v55  ;;  %v877_v55 = vld [vmem:[%s15991_s19 + $0x58] sm:$0xff] }
 0x180   :  { %9583 = vmatprep.subr.bf16.mxu1 %v9582_v52  ;;  %v1930_v52 = vld [vmem:[%s15684_s2 + $0x78] sm:$0xff] }
 0x181   :  { %v7877_v62 = vld [vmem:[%s15991_s19 + $0xd8] sm:$0xff] }
 0x182   :  { %929 = vperm.xlu1 %11161, %v875_v63   ;;  %v9588_v63 = vpack.c.bf16 %v1928_v50, %v1927_v58  ;;  %v1963_v58 = vld [vmem:[%s15684_s2 + $0x180] sm:$0xff]  ;;  %v1964_v50 = vld [vmem:[%s15684_s2 + $0x188] sm:$0xff] }
 0x183   :  { %1042 = vperm.xlu0 %11160, %v7875_v61   ;;  %9585 = vmatpush3.bf16.msra.mxu1 %v9584_v54  ;;  %v1929_v61 = vld [vmem:[%s15684_s2 + $0x70] sm:$0xff]  ;;  %v9590_v54 = vpack.c.bf16 %v1946_v57, %v1945_v59  ;;  %v9594_v59 = vpack.c.bf16 %v1964_v50, %v1963_v58 }
 0x184   :  { %9587 = vmatprep.subr.bf16.mxu1 %v9586_v60  ;;  %v7878_v60 = vld [vmem:[%s15991_s19 + $0xe0] sm:$0xff] }
 0x186   :  { %934 = vperm.xlu1 %11161, %v876_v56   ;;  %v9592_v56 = vpack.c.bf16 %v1930_v52, %v1929_v61 }
 0x187   :  { %1047 = vperm.xlu0 %11160, %v7876_v53   ;;  %9589 = vmatpush3.bf16.msra.mxu1 %v9588_v63  ;;  %v878_v53 = vld [vmem:[%s15991_s19 + $0x60] sm:$0xff] }
 0x188   :  { %9591 = vmatprep.subr.bf16.mxu1 %v9590_v54 }
 0x18a   :  { %939 = vperm.xlu1 %11161, %v877_v55  }
 0x18b   :  { %1052 = vperm.xlu0 %11160, %v7877_v62  }
 0x18c   :  { %802 = vsyncadd [#allocation4], 36864  ;;  %9593 = vmatpush3.bf16.msra.mxu1 %v9592_v56  ;;  %v879_v57 = vld [vmem:[%s15991_s19 + $0x68] sm:$0xff]  ;;  %v880_v61 = vld [vmem:[%s15991_s19 + $0x70] sm:$0xff]  ;;  %s11488_s8 = smov [#allocation3]   ;;  %s11434_s1 = scalar_lea.hbm %s15694_s12, 65536 }
 0x18d   :  { %v7879_v63 = vld [vmem:[%s15991_s19 + $0xe8] sm:$0xff]  ;;  %9595 = vmatprep.subr.bf16.mxu1 %v9594_v59  ;;  %v7880_v52 = vld [vmem:[%s15991_s19 + $0xf0] sm:$0xff]  ;;  %v881_v55 = vld [vmem:[%s15991_s19 + $0x78] sm:$0xff]  ;;  %s811_s18 = sshll.u32 %s11488_s8, 4  ;;  %p11435_p4 = scmp.ne.s32.totalorder %s15694_s12, %s11434_s1  ;;  %s812_s18 = int_to_ptr.vmem [resolvable:$true] %s811_s18 }
 0x18e   :  { %944 = vperm.xlu1 %11161, %v878_v53   ;;  %v7881_v62 = vld [vmem:[%s15991_s19 + $0xf8] sm:$0xff]  ;;  %v7882_v54 = vld [vmem:[%s15991_s19 + $0x100] sm:$0xff]  ;;  %v7883_v50 = vld [vmem:[%s15991_s19 + $0x108] sm:$0xff]  ;;  %p11438_p5 = scmp.lt.u32.totalorder %s11434_s1, %s15694_s12 }
 0x18f   :  { %1057 = vperm.xlu0 %11160, %v7878_v60   ;;  %v7898_v58 = vld [vmem:[%s15991_s19 + $0x180] sm:$0xff]  ;;  %v7899_v56 = vld [vmem:[%s15991_s19 + $0x188] sm:$0xff]  ;;  %v7884_v53 = vld [vmem:[%s15991_s19 + $0x110] sm:$0xff] }
 0x190   :  { %v7900_v60 = vld [vmem:[%s15991_s19 + $0x190] sm:$0xff]  ;;  %v7885_v59 = vld [vmem:[%s15991_s19 + $0x118] sm:$0xff]  ;;  %v2003_v51 = vld [vmem:[%s15684_s2 + $0x2c0] sm:$0xff]  ;;  %p11440_p6 = pnand %p11438_p5, %p11435_p4 }
 0x191   :  { %v2002_v48 = vld [vmem:[%s15684_s2 + $0x2b8] sm:$0xff]  ;;  %v2004_v49 = vld [vmem:[%s15684_s2 + $0x2c8] sm:$0xff]  ;;  %v2005_v44 = vld [vmem:[%s15684_s2 + $0x2d0] sm:$0xff] }
 0x192   :  { %949 = vperm.xlu1 %11161, %v879_v57   ;;  %v7901_v57 = vld [vmem:[%s15991_s19 + $0x198] sm:$0xff]  ;;  %v13594_v42 = vld [vmem:[#allocation5 + $0x70] sm:$0xff]  ;;  %v2007_v43 = vld [vmem:[%s15684_s2 + $0x2e0] sm:$0xff] }
 0x193   :  { %1062 = vperm.xlu0 %11160, %v7879_v63   ;;  %v7886_v63 = vld [vmem:[%s15991_s19 + $0x120] sm:$0xff]  ;;  %v2006_v47 = vld [vmem:[%s15684_s2 + $0x2d8] sm:$0xff]  ;;  %v1948_v34 = vld [vmem:[%s15684_s2 + $0x108] sm:$0xff]  ;;  %v15992_v33 = vrot.slane %v13594_v42, 7 }
 0x194   :  { %v13622_v38 = vld [vmem:[#allocation5] sm:$0xff]  ;;  %v1993_v35 = vld [vmem:[%s15684_s2 + $0x270] sm:$0xff]  ;;  %v13663_v28 = vld [vmem:[#allocation5 + $0x8] sm:$0xff] }
 0x195   :  { %v1947_v37 = vld [vmem:[%s15684_s2 + $0x100] sm:$0xff]  ;;  %v1966_v31 = vld [vmem:[%s15684_s2 + $0x198] sm:$0xff]  ;;  %v1952_v23 = vld [vmem:[%s15684_s2 + $0x128] sm:$0xff] }
 0x196   :  { %954 = vperm.xlu1 %11161, %v880_v61   ;;  %v7902_v61 = vld [vmem:[%s15991_s19 + $0x1a0] sm:$0xff]  ;;  %v9596_v24 = vpack.c.bf16 %v1948_v34, %v1947_v37  ;;  %v7940_v37 = vld [vmem:[%s15991_s19 + $0x2d0] sm:$0xff] }
 0x197   :  { %1067 = vperm.xlu0 %11160, %v7880_v52   ;;  %v7887_v52 = vld [vmem:[%s15991_s19 + $0x128] sm:$0xff] }
 0x19a   :  { %959 = vperm.xlu1 %11161, %v881_v55   ;;  %v7903_v55 = vld [vmem:[%s15991_s19 + $0x1a8] sm:$0xff] }
 0x19b   :  { %1072 = vperm.xlu0 %11160, %v7881_v62   ;;  %v7888_v62 = vld [vmem:[%s15991_s19 + $0x130] sm:$0xff] }
 0x19e   :  { %1143 = vperm.xlu1 %11161, %v7882_v54   ;;  %v7904_v54 = vld [vmem:[%s15991_s19 + $0x1b0] sm:$0xff] }
 0x19f   :  { %1256 = vperm.xlu0 %11160, %v7898_v58   ;;  %v7889_v58 = vld [vmem:[%s15991_s19 + $0x138] sm:$0xff] }
 0x1a2   :  { %1148 = vperm.xlu1 %11161, %v7883_v50   ;;  %v7905_v50 = vld [vmem:[%s15991_s19 + $0x1b8] sm:$0xff] }
 0x1a3   :  { %1261 = vperm.xlu0 %11160, %v7899_v56   ;;  %v7890_v56 = vld [vmem:[%s15991_s19 + $0x140] sm:$0xff] }
 0x1a6   :  { %1153 = vperm.xlu1 %11161, %v7884_v53   ;;  %v7906_v53 = vld [vmem:[%s15991_s19 + $0x1c0] sm:$0xff] }
 0x1a7   :  { %1266 = vperm.xlu0 %11160, %v7900_v60   ;;  %v7891_v60 = vld [vmem:[%s15991_s19 + $0x148] sm:$0xff] }
 0x1aa   :  { %1158 = vperm.xlu1 %11161, %v7885_v59   ;;  %v7907_v59 = vld [vmem:[%s15991_s19 + $0x1c8] sm:$0xff] }
 0x1ab   :  { %1271 = vperm.xlu0 %11160, %v7901_v57   ;;  %v1995_v57 = vld [vmem:[%s15684_s2 + $0x280] sm:$0xff] }
 0x1ae   :  { %1163 = vperm.xlu1 %11161, %v7886_v63   ;;  %v1996_v63 = vld [vmem:[%s15684_s2 + $0x288] sm:$0xff] }
 0x1af   :  { %1276 = vperm.xlu0 %11160, %v7902_v61   ;;  %v1979_v61 = vld [vmem:[%s15684_s2 + $0x200] sm:$0xff] }
 0x1b2   :  { %1168 = vperm.xlu1 %11161, %v7887_v52   ;;  %v1980_v52 = vld [vmem:[%s15684_s2 + $0x208] sm:$0xff] }
 0x1b3   :  { %1281 = vperm.xlu0 %11160, %v7903_v55   ;;  %v7892_v55 = vld [vmem:[%s15991_s19 + $0x150] sm:$0xff] }
 0x1b6   :  { %1173 = vperm.xlu1 %11161, %v7888_v62   ;;  %v7908_v62 = vld [vmem:[%s15991_s19 + $0x1d0] sm:$0xff] }
 0x1b7   :  { %1286 = vperm.xlu0 %11160, %v7904_v54   ;;  %v13468_v54 = vpack.c.bf16 %v1996_v63, %v1995_v57  ;;  %v7909_v57 = vld [vmem:[%s15991_s19 + $0x1d8] sm:$0xff] }
 0x1b9   :  { %9627 = vmatprep.subr.bf16.mxu0 %v13468_v54 }
 0x1ba   :  { %1178 = vperm.xlu1 %11161, %v7889_v58   ;;  %v13470_v58 = vpack.c.bf16 %v1980_v52, %v1979_v61  ;;  %v1999_v52 = vld [vmem:[%s15684_s2 + $0x2a0] sm:$0xff] }
 0x1bb   :  { %1291 = vperm.xlu0 %11160, %v7905_v50   ;;  %v1997_v50 = vld [vmem:[%s15684_s2 + $0x290] sm:$0xff] }
 0x1bc   :  { %9629 = vmatpush3.bf16.msra.mxu0 %v13470_v58 }
 0x1be   :  { %1183 = vperm.xlu1 %11161, %v7890_v56   ;;  %v1998_v56 = vld [vmem:[%s15684_s2 + $0x298] sm:$0xff] }
 0x1bf   :  { %1296 = vperm.xlu0 %11160, %v7906_v53   ;;  %v1981_v53 = vld [vmem:[%s15684_s2 + $0x210] sm:$0xff]  ;;  %v13491_v63 = vpack.c.bf16 %v1998_v56, %v1997_v50  ;;  %v1984_v50 = vld [vmem:[%s15684_s2 + $0x228] sm:$0xff]  ;;  %v7894_v56 = vld [vmem:[%s15991_s19 + $0x160] sm:$0xff] }
 0x1c1   :  { %9631 = vmatprep.subr.bf16.mxu0 %v13491_v63 }
 0x1c2   :  { %1188 = vperm.xlu1 %11161, %v7891_v60   ;;  %v1982_v60 = vld [vmem:[%s15684_s2 + $0x218] sm:$0xff] }
 0x1c3   :  { %1301 = vperm.xlu0 %11160, %v7907_v59   ;;  %v7893_v59 = vld [vmem:[%s15991_s19 + $0x158] sm:$0xff]  ;;  %v13494_v61 = vpack.c.bf16 %v1982_v60, %v1981_v53  ;;  %v7910_v53 = vld [vmem:[%s15991_s19 + $0x1e0] sm:$0xff] }
 0x1c5   :  { %9633 = vmatpush3.bf16.msra.mxu0 %v13494_v61 }
 0x1c6   :  { %1193 = vperm.xlu1 %11161, %v7892_v55   ;;  %v2000_v55 = vld [vmem:[%s15684_s2 + $0x2a8] sm:$0xff] }
 0x1c7   :  { %1306 = vperm.xlu0 %11160, %v7908_v62   ;;  %v1983_v62 = vld [vmem:[%s15684_s2 + $0x220] sm:$0xff]  ;;  %v13515_v60 = vpack.c.bf16 %v2000_v55, %v1999_v52  ;;  %v1985_v52 = vld [vmem:[%s15684_s2 + $0x230] sm:$0xff]  ;;  %v1986_v55 = vld [vmem:[%s15684_s2 + $0x238] sm:$0xff] }
 0x1c9   :  { %9635 = vmatprep.subr.bf16.mxu0 %v13515_v60 }
 0x1ca   :  { %1198 = vperm.xlu1 %11161, %v7893_v59   ;;  %v13518_v59 = vpack.c.bf16 %v1984_v50, %v1983_v62  ;;  %v7895_v62 = vld [vmem:[%s15991_s19 + $0x168] sm:$0xff] }
 0x1cb   :  { %1311 = vperm.xlu0 %11160, %v7909_v57   ;;  %v2001_v57 = vld [vmem:[%s15684_s2 + $0x2b0] sm:$0xff]  ;;  %v7911_v50 = vld [vmem:[%s15991_s19 + $0x1e8] sm:$0xff] }
 0x1cc   :  { %9637 = vmatpush3.bf16.msra.mxu0 %v13518_v59 }
 0x1ce   :  { %1203 = vperm.xlu1 %11161, %v7894_v56   ;;  %v13539_v56 = vpack.c.bf16 %v2002_v48, %v2001_v57  ;;  %v1987_v48 = vld [vmem:[%s15684_s2 + $0x240] sm:$0xff]  ;;  %v1988_v57 = vld [vmem:[%s15684_s2 + $0x248] sm:$0xff] }
 0x1cf   :  { %1316 = vperm.xlu0 %11160, %v7910_v53   ;;  %v13542_v53 = vpack.c.bf16 %v1986_v55, %v1985_v52  ;;  %v7896_v52 = vld [vmem:[%s15991_s19 + $0x170] sm:$0xff]  ;;  %v13566_v46 = vpack.c.bf16 %v1988_v57, %v1987_v48  ;;  %v7897_v48 = vld [vmem:[%s15991_s19 + $0x178] sm:$0xff] }
 0x1d0   :  { %9639 = vmatprep.subr.bf16.mxu0 %v13539_v56  ;;  %v7912_v55 = vld [vmem:[%s15991_s19 + $0x1f0] sm:$0xff]  ;;  %v7913_v57 = vld [vmem:[%s15991_s19 + $0x1f8] sm:$0xff] }
 0x1d1   :  { %9641 = vmatpush3.bf16.msra.mxu0 %v13542_v53 }
 0x1d2   :  { %1208 = vperm.xlu1 %11161, %v7895_v62   ;;  %v13563_v62 = vpack.c.bf16 %v2004_v49, %v2003_v51  ;;  %v1989_v49 = vld [vmem:[%s15684_s2 + $0x250] sm:$0xff]  ;;  %v1990_v51 = vld [vmem:[%s15684_s2 + $0x258] sm:$0xff] }
 0x1d3   :  { %1321 = vperm.xlu0 %11160, %v7911_v50   ;;  %v847_v50 = vlaneseq  ;;  %v13596_v40 = vpack.c.bf16 %v1990_v51, %v1989_v49  ;;  %v7922_v49 = vld [vmem:[%s15991_s19 + $0x240] sm:$0xff] }
 0x1d4   :  { %9643 = vmatprep.subr.bf16.mxu0 %v13563_v62  ;;  %v7938_v51 = vld [vmem:[%s15991_s19 + $0x2c0] sm:$0xff] }
 0x1d5   :  { %9645 = vmatpush3.bf16.msra.mxu0 %v13566_v46  ;;  %v13592_v45 = vshrl.u32 %v847_v50, 7  ;;  %v1992_v50 = vld [vmem:[%s15684_s2 + $0x268] sm:$0xff] }
 0x1d6   :  { %1213 = vperm.xlu1 %11161, %v7896_v52   ;;  %v13587_v52 = vpack.c.bf16 %v2006_v47, %v2005_v44  ;;  %v2008_v44 = vld [vmem:[%s15684_s2 + $0x2e8] sm:$0xff]  ;;  %v1991_v47 = vld [vmem:[%s15684_s2 + $0x260] sm:$0xff] }
 0x1d7   :  { %1326 = vperm.xlu0 %11160, %v7912_v55   ;;  %v13590_v55 = vld [vmem:[#allocation5 + $0x78] sm:$0xff]  ;;  %v13619_v41 = vpack.c.bf16 %v2008_v44, %v2007_v43  ;;  %vm849_vm0 = vcmp.lt.s32.totalorder %v13592_v45, 1  ;;  %v13631_v32 = vpack.c.bf16 %v1992_v50, %v1991_v47  ;;  %v2009_v43 = vld [vmem:[%s15684_s2 + $0x2f0] sm:$0xff]  ;;  %v831_v50 = vrot.slane %v13622_v38, 7 }
 0x1d8   :  { %9647 = vmatprep.subr.bf16.mxu0 %v13587_v52  ;;  %v1994_v47 = vld [vmem:[%s15684_s2 + $0x278] sm:$0xff]  ;;  %v15702_v2 = vrot.slane %v13590_v55, 1  ;;  %vm1107_vm1 = vcmp.lt.s32.totalorder %v13592_v45, 7 }
 0x1d9   :  { %9649 = vmatpush3.bf16.msra.mxu0 %v13596_v40  ;;  %v13671_v27 = vpack.c.bf16 %v1994_v47, %v1993_v35  ;;  %v832_v35 = vrot.slane %v13663_v28, 7 }
 0x1da   :  { %1218 = vperm.xlu1 %11161, %v7897_v48   ;;  %v846_v48 = vrot.slane %v13590_v55, 7  ;;  %9651 = vmatprep.subr.bf16.mxu0 %v13619_v41 }
 0x1db   :  { %1331 = vperm.xlu0 %11160, %v7913_v57   ;;  %v2010_v57 = vld [vmem:[%s15684_s2 + $0x2f8] sm:$0xff]  ;;  %v13712_v21 = vsel %vm849_vm0, %v831_v50, %v832_v35 }
 0x1dc   :  { %v13660_v30 = vpack.c.bf16 %v2010_v57, %v2009_v43  ;;  %v1949_v43 = vld [vmem:[%s15684_s2 + $0x110] sm:$0xff]  ;;  %v13684_v34 = vsel %vm849_vm0, %v846_v48, %v831_v50 }
 0x1dd   :  { %v1003_v36 = vpop.permute.xlu1 %1002  ;;  %9653 = vmatpush3.bf16.msra.mxu0 %v13631_v32  ;;  %v1969_v50 = vld [vmem:[%s15684_s2 + $0x1b0] sm:$0xff] }
 0x1de   :  { %v998_v39 = vpop.permute.xlu0 %997  ;;  %1409 = vperm.xlu1 %11161, %v7922_v49   ;;  %v13652_v49 = vsel %vm849_vm0, %v15992_v33, %v846_v48  ;;  %v1965_v33 = vld [vmem:[%s15684_s2 + $0x190] sm:$0xff]  ;;  %9655 = vmatprep.subr.bf16.mxu0 %v13660_v30  ;;  %v1076_v25 = vmul.f32 %v1003_v36, %v13622_v38  ;;  %v1967_v36 = vld [vmem:[%s15684_s2 + $0x1a0] sm:$0xff]  ;;  %v1968_v48 = vld [vmem:[%s15684_s2 + $0x1a8] sm:$0xff] }
 0x1df   :  { %1522 = vperm.xlu0 %11160, %v7938_v51   ;;  %v1075_v44 = vmul.f32 %v998_v39, %v13590_v55  ;;  %v7923_v39 = vld [vmem:[%s15991_s19 + $0x248] sm:$0xff]  ;;  %v9598_v47 = vpack.c.bf16 %v1966_v31, %v1965_v33 }
 0x1e0   :  { %v7939_v51 = vld [vmem:[%s15991_s19 + $0x2c8] sm:$0xff] }
 0x1e1   :  { %2123 = vmatprep.mubr.f32.mxu1 %v1075_v44  ;;  %v890_v29 = vpop.permute.xlu1 %889  ;;  %v1950_v44 = vld [vmem:[%s15684_s2 + $0x118] sm:$0xff]  ;;  %9657 = vmatpush3.bf16.msra.mxu0 %v13671_v27 }
 0x1e2   :  { %v885_v26 = vpop.permute.xlu0 %884  ;;  %1414 = vperm.xlu1 %11161, %v7923_v39   ;;  %v13694_v39 = vld [vmem:[#allocation5 + $0x10] sm:$0xff]  ;;  %v9600_v20 = vpack.c.bf16 %v1950_v44, %v1949_v43  ;;  %v963_v31 = vmul.f32 %v890_v29, %v13684_v34  ;;  %v9602_v29 = vpack.c.bf16 %v1968_v48, %v1967_v36  ;;  %v13721_v43 = vld [vmem:[#allocation5 + $0x18] sm:$0xff] }
 0x1e3   :  { %v962_v57 = vmul.f32 %v885_v26, %v13652_v49  ;;  %1527 = vperm.xlu0 %11160, %v7939_v51   ;;  %v7924_v26 = vld [vmem:[%s15991_s19 + $0x250] sm:$0xff]  ;;  %v1970_v44 = vld [vmem:[%s15684_s2 + $0x1b8] sm:$0xff] }
 0x1e4   :  { %v1953_v36 = vld [vmem:[%s15684_s2 + $0x130] sm:$0xff]  ;;  %v1954_v48 = vld [vmem:[%s15684_s2 + $0x138] sm:$0xff] }
 0x1e5   :  { %2124 = vmatmul.mubr.f32.vlgmr.msra.gmra.mrb[0].mxu1 %v962_v57  ;;  %v895_v51 = vpop.permute.xlu1 %894  ;;  %v1951_v57 = vld [vmem:[%s15684_s2 + $0x120] sm:$0xff]  ;;  %v9608_v19 = vpack.c.bf16 %v1954_v48, %v1953_v36  ;;  %v13775_v48 = vld [vmem:[#allocation5 + $0x28] sm:$0xff] }
 0x1e6   :  { %v1008_v22 = vpop.permute.xlu0 %1007  ;;  %2128 = vmatprep.mubr.f32.mxu1 %v1076_v25  ;;  %9597 = vmatpush3.bf16.msra.mxu1 %v9596_v24  ;;  %v833_v24 = vrot.slane %v13694_v39, 7  ;;  %v7941_v25 = vld [vmem:[%s15991_s19 + $0x2d8] sm:$0xff]  ;;  %v9604_v18 = vpack.c.bf16 %v1952_v23, %v1951_v57  ;;  %v964_v16 = vmul.f32 %v895_v51, %v13712_v21  ;;  %v7926_v23 = vld [vmem:[%s15991_s19 + $0x260] sm:$0xff] }
 0x1e7   :  { %v1077_v33 = vmul.f32 %v1008_v22, %v13663_v28  ;;  %1419 = vperm.xlu1 %11161, %v7924_v26   ;;  %1532 = vperm.xlu0 %11160, %v7940_v37   ;;  %v7925_v22 = vld [vmem:[%s15991_s19 + $0x258] sm:$0xff]  ;;  %v7942_v51 = vld [vmem:[%s15991_s19 + $0x2e0] sm:$0xff] }
 0x1e8   :  { %9599 = vmatprep.subr.bf16.mxu1 %v9598_v47  ;;  %v13748_v57 = vld [vmem:[#allocation5 + $0x20] sm:$0xff] }
 0x1e9   :  { %2129 = vmatmul.mubr.f32.gmra.mrb[2].mxu1 %v963_v31  ;;  %v900_v26 = vpop.permute.xlu1 %899  ;;  %v13739_v31 = vsel %vm849_vm0, %v832_v35, %v833_v24  ;;  %v1971_v35 = vld [vmem:[%s15684_s2 + $0x1c0] sm:$0xff] }
 0x1ea   :  { %v1013_v37 = vpop.permute.xlu0 %1012  ;;  %2133 = vmatprep.mubr.f32.mxu1 %v1077_v33  ;;  %9601 = vmatpush3.bf16.msra.mxu1 %v9600_v20  ;;  %v834_v20 = vrot.slane %v13721_v43, 7  ;;  %v9606_v33 = vpack.c.bf16 %v1970_v44, %v1969_v50  ;;  %v965_v17 = vmul.f32 %v900_v26, %v13739_v31  ;;  %v1956_v50 = vld [vmem:[%s15684_s2 + $0x148] sm:$0xff] }
 0x1eb   :  { %v1078_v47 = vmul.f32 %v1013_v37, %v13694_v39  ;;  %1424 = vperm.xlu1 %11161, %v7925_v22   ;;  %1537 = vperm.xlu0 %11160, %v7941_v25   ;;  %v1972_v22 = vld [vmem:[%s15684_s2 + $0x1c8] sm:$0xff] }
 0x1ec   :  { %9603 = vmatprep.subr.bf16.mxu1 %v9602_v29  ;;  %v13766_v44 = vsel %vm849_vm0, %v833_v24, %v834_v20  ;;  %v7927_v26 = vld [vmem:[%s15991_s19 + $0x268] sm:$0xff]  ;;  %v9610_v36 = vpack.c.bf16 %v1972_v22, %v1971_v35  ;;  %v1973_v24 = vld [vmem:[%s15684_s2 + $0x1d0] sm:$0xff]  ;;  %v1958_v35 = vld [vmem:[%s15684_s2 + $0x158] sm:$0xff] }
 0x1ed   :  { %2134 = vmatmul.mubr.f32.gmra.mrb[4].mxu1 %v964_v16  ;;  %v905_v25 = vpop.permute.xlu1 %904  ;;  %v1955_v16 = vld [vmem:[%s15684_s2 + $0x140] sm:$0xff] }
 0x1ee   :  { %v1018_v37 = vpop.permute.xlu0 %1017  ;;  %2138 = vmatprep.mubr.f32.mxu1 %v1078_v47  ;;  %9605 = vmatpush3.bf16.msra.mxu1 %v9604_v18  ;;  %v835_v18 = vrot.slane %v13748_v57, 7  ;;  %v7943_v47 = vld [vmem:[%s15991_s19 + $0x2e8] sm:$0xff]  ;;  %v9612_v14 = vpack.c.bf16 %v1956_v50, %v1955_v16  ;;  %v966_v12 = vmul.f32 %v905_v25, %v13766_v44  ;;  %v7928_v25 = vld [vmem:[%s15991_s19 + $0x270] sm:$0xff] }
 0x1ef   :  { %v1079_v29 = vmul.f32 %v1018_v37, %v13721_v43  ;;  %1429 = vperm.xlu1 %11161, %v7926_v23   ;;  %1542 = vperm.xlu0 %11160, %v7942_v51   ;;  %v1974_v23 = vld [vmem:[%s15684_s2 + $0x1d8] sm:$0xff]  ;;  %v13802_v50 = vld [vmem:[#allocation5 + $0x30] sm:$0xff] }
 0x1f0   :  { %9607 = vmatprep.subr.bf16.mxu1 %v9606_v33  ;;  %v13793_v22 = vsel %vm849_vm0, %v834_v20, %v835_v18  ;;  %v9614_v16 = vpack.c.bf16 %v1974_v23, %v1973_v24  ;;  %v1975_v20 = vld [vmem:[%s15684_s2 + $0x1e0] sm:$0xff]  ;;  %v1960_v24 = vld [vmem:[%s15684_s2 + $0x168] sm:$0xff] }
 0x1f1   :  { %2139 = vmatmul.mubr.f32.gmra.mrb[6].mxu1 %v965_v17  ;;  %v910_v51 = vpop.permute.xlu1 %909  ;;  %v1957_v17 = vld [vmem:[%s15684_s2 + $0x150] sm:$0xff] }
 0x1f2   :  { %v1023_v37 = vpop.permute.xlu0 %1022  ;;  %2143 = vmatprep.mubr.f32.mxu1 %v1079_v29  ;;  %9609 = vmatpush3.bf16.msra.mxu1 %v9608_v19  ;;  %v836_v19 = vrot.slane %v13775_v48, 7  ;;  %v7944_v29 = vld [vmem:[%s15991_s19 + $0x2f0] sm:$0xff]  ;;  %v9616_v15 = vpack.c.bf16 %v1958_v35, %v1957_v17  ;;  %v967_v13 = vmul.f32 %v910_v51, %v13793_v22  ;;  %v7929_v51 = vld [vmem:[%s15991_s19 + $0x278] sm:$0xff] }
 0x1f3   :  { %v1080_v33 = vmul.f32 %v1023_v37, %v13748_v57  ;;  %1434 = vperm.xlu1 %11161, %v7927_v26   ;;  %1547 = vperm.xlu0 %11160, %v7943_v47   ;;  %v1976_v26 = vld [vmem:[%s15684_s2 + $0x1e8] sm:$0xff]  ;;  %v13829_v35 = vld [vmem:[#allocation5 + $0x38] sm:$0xff] }
 0x1f4   :  { %9611 = vmatprep.subr.bf16.mxu1 %v9610_v36  ;;  %v13820_v23 = vsel %vm849_vm0, %v835_v18, %v836_v19  ;;  %v9618_v17 = vpack.c.bf16 %v1976_v26, %v1975_v20  ;;  %v1977_v18 = vld [vmem:[%s15684_s2 + $0x1f0] sm:$0xff]  ;;  %v1962_v20 = vld [vmem:[%s15684_s2 + $0x178] sm:$0xff] }
 0x1f5   :  { %2144 = vmatmul.mubr.f32.gmra.mrb[8].mxu1 %v966_v12  ;;  %v915_v47 = vpop.permute.xlu1 %914  ;;  %v1959_v12 = vld [vmem:[%s15684_s2 + $0x160] sm:$0xff] }
 0x1f6   :  { %v1028_v37 = vpop.permute.xlu0 %1027  ;;  %2148 = vmatprep.mubr.f32.mxu1 %v1080_v33  ;;  %9613 = vmatpush3.bf16.msra.mxu1 %v9612_v14  ;;  %v837_v14 = vrot.slane %v13802_v50, 7  ;;  %v7945_v33 = vld [vmem:[%s15991_s19 + $0x2f8] sm:$0xff]  ;;  %v9620_v10 = vpack.c.bf16 %v1960_v24, %v1959_v12  ;;  %v968_v8 = vmul.f32 %v915_v47, %v13820_v23  ;;  %v7946_v47 = vld [vmem:[%s15991_s19 + $0x300] sm:$0xff] }
 0x1f7   :  { %v1081_v36 = vmul.f32 %v1028_v37, %v13775_v48  ;;  %1439 = vperm.xlu1 %11161, %v7928_v25   ;;  %1552 = vperm.xlu0 %11160, %v7944_v29   ;;  %v1978_v25 = vld [vmem:[%s15684_s2 + $0x1f8] sm:$0xff]  ;;  %v13856_v24 = vld [vmem:[#allocation5 + $0x40] sm:$0xff] }
 0x1f8   :  { %9615 = vmatprep.subr.bf16.mxu1 %v9614_v16  ;;  %v13847_v26 = vsel %vm849_vm0, %v836_v19, %v837_v14  ;;  %v9622_v12 = vpack.c.bf16 %v1978_v25, %v1977_v18  ;;  %v13871_v18 = vld [vmem:[#allocation5 + $0x48] sm:$0xff] }
 0x1f9   :  { %2149 = vmatmul.mubr.f32.gmra.mrb[10].mxu1 %v967_v13  ;;  %v920_v29 = vpop.permute.xlu1 %919  ;;  %v1961_v13 = vld [vmem:[%s15684_s2 + $0x170] sm:$0xff] }
 0x1fa   :  { %v1033_v37 = vpop.permute.xlu0 %1032  ;;  %2153 = vmatprep.mubr.f32.mxu1 %v1081_v36  ;;  %9617 = vmatpush3.bf16.msra.mxu1 %v9616_v15  ;;  %v838_v15 = vrot.slane %v13829_v35, 7  ;;  %v7962_v36 = vld [vmem:[%s15991_s19 + $0x380] sm:$0xff]  ;;  %v9624_v19 = vpack.c.bf16 %v1962_v20, %v1961_v13  ;;  %v840_v20 = vrot.slane %v13871_v18, 7 }
 0x1fb   :  { %v1082_v16 = vmul.f32 %v1033_v37, %v13802_v50  ;;  %1444 = vperm.xlu1 %11161, %v7929_v51   ;;  %1557 = vperm.xlu0 %11160, %v7945_v33   ;;  %v969_v37 = vmul.f32 %v920_v29, %v13847_v26 }
 0x1fc   :  { %9619 = vmatprep.subr.bf16.mxu1 %v9618_v17  ;;  %v13862_v9 = vsel %vm849_vm0, %v837_v14, %v838_v15  ;;  %v839_v17 = vrot.slane %v13856_v24, 7 }
 0x1fd   :  { %2154 = vmatmul.mubr.f32.gmra.mrb[12].mxu1 %v968_v8  ;;  %v925_v51 = vpop.permute.xlu1 %924  ;;  %v7963_v8 = vld [vmem:[%s15991_s19 + $0x388] sm:$0xff] }
 0x1fe   :  { %v1038_v33 = vpop.permute.xlu0 %1037  ;;  %2158 = vmatprep.mubr.f32.mxu1 %v1082_v16  ;;  %9621 = vmatpush3.bf16.msra.mxu1 %v9620_v10  ;;  %v7930_v10 = vld [vmem:[%s15991_s19 + $0x280] sm:$0xff]  ;;  %v970_v14 = vmul.f32 %v925_v51, %v13862_v9  ;;  %v13877_v13 = vsel %vm849_vm0, %v838_v15, %v839_v17 }
 0x1ff   :  { %v1083_v11 = vmul.f32 %v1038_v33, %v13829_v35  ;;  %1595 = vperm.xlu1 %11161, %v7946_v47   ;;  %1708 = vperm.xlu0 %11160, %v7962_v36   ;;  %v7947_v47 = vld [vmem:[%s15991_s19 + $0x308] sm:$0xff]  ;;  %v13887_v36 = vld [vmem:[#allocation5 + $0x50] sm:$0xff] }
 0x200   :  { %9623 = vmatprep.subr.bf16.mxu1 %v9622_v12 }
 0x201   :  { %2159 = vmatmul.mubr.f32.gmra.mrb[14].mxu1 %v969_v37  ;;  %v930_v25 = vpop.permute.xlu1 %929  ;;  %v841_v37 = vrot.slane %v13887_v36, 7 }
 0x202   :  { %v1043_v29 = vpop.permute.xlu0 %1042  ;;  %2163 = vmatprep.mubr.f32.mxu1 %v1083_v11  ;;  %9625 = vmatpush3.bf16.msra.mxu1 %v9624_v19  ;;  %v7914_v11 = vld [vmem:[%s15991_s19 + $0x200] sm:$0xff]  ;;  %v971_v15 = vmul.f32 %v930_v25, %v13877_v13  ;;  %v13893_v19 = vsel %vm849_vm0, %v839_v17, %v840_v20 }
 0x203   :  { %v1084_v16 = vmul.f32 %v1043_v29, %v13856_v24  ;;  %1713 = vperm.xlu1 %11161, %v7963_v8   ;;  %1482 = vperm.xlu0 %11160, %v7930_v10   ;;  %v7931_v8 = vld [vmem:[%s15991_s19 + $0x288] sm:$0xff]  ;;  %v13902_v10 = vld [vmem:[#allocation5 + $0x58] sm:$0xff] }
 0x204   :  { %11072 = vmatprep.subr.bf16.mxu1 %v13468_v54  ;;  %v7964_v54 = vld [vmem:[%s15991_s19 + $0x390] sm:$0xff] }
 0x205   :  { %2164 = vmatmul.mubr.f32.gmra.mrb[16].mxu1 %v970_v14  ;;  %v935_v12 = vpop.permute.xlu1 %934 }
 0x206   :  { %v1048_v51 = vpop.permute.xlu0 %1047  ;;  %2168 = vmatprep.mubr.f32.mxu1 %v1084_v16  ;;  %v972_v14 = vmul.f32 %v935_v12, %v13893_v19  ;;  %v13908_v16 = vsel %vm849_vm0, %v840_v20, %v841_v37  ;;  %v13917_v12 = vld [vmem:[#allocation5 + $0x60] sm:$0xff] }
 0x207   :  { %v1085_v33 = vmul.f32 %v1048_v51, %v13871_v18  ;;  %1600 = vperm.xlu1 %11161, %v7947_v47   ;;  %1369 = vperm.xlu0 %11160, %v7914_v11   ;;  %v842_v47 = vrot.slane %v13902_v10, 7  ;;  %v7948_v11 = vld [vmem:[%s15991_s19 + $0x310] sm:$0xff]  ;;  %v7915_v51 = vld [vmem:[%s15991_s19 + $0x208] sm:$0xff] }
 0x209   :  { %2169 = vmatmul.mubr.f32.gmra.mrb[18].mxu1 %v971_v15  ;;  %v940_v25 = vpop.permute.xlu1 %939 }
 0x20a   :  { %v1053_v29 = vpop.permute.xlu0 %1052  ;;  %2173 = vmatprep.mubr.f32.mxu1 %v1085_v33 }
 0x20b   :  { %v1086_v17 = vmul.f32 %v1053_v29, %v13887_v36  ;;  %1718 = vperm.xlu1 %11161, %v7964_v54   ;;  %1487 = vperm.xlu0 %11160, %v7931_v8   ;;  %v973_v54 = vmul.f32 %v940_v25, %v13908_v16  ;;  %v13923_v8 = vsel %vm849_vm0, %v841_v37, %v842_v47  ;;  %v843_v29 = vrot.slane %v13917_v12, 7  ;;  %v13932_v25 = vld [vmem:[#allocation5 + $0x68] sm:$0xff] }
 0x20c   :  { %v844_v4 = vrot.slane %v13932_v25, 7 }
 0x20d   :  { %2174 = vmatmul.mubr.f32.gmra.mrb[20].mxu1 %v972_v14  ;;  %v945_v15 = vpop.permute.xlu1 %944  ;;  %v7965_v14 = vld [vmem:[%s15991_s19 + $0x398] sm:$0xff]  ;;  %v13938_v6 = vsel %vm849_vm0, %v842_v47, %v843_v29 }
 0x20e   :  { %v1058_v33 = vpop.permute.xlu0 %1057  ;;  %2178 = vmatprep.mubr.f32.mxu1 %v1086_v17  ;;  %v7932_v17 = vld [vmem:[%s15991_s19 + $0x290] sm:$0xff]  ;;  %v13951_v47 = vsel %vm849_vm0, %v843_v29, %v844_v4  ;;  %v15993_v29 = vrot.slane %v13594_v42, 7 }
 0x20f   :  { %v1087_v20 = vmul.f32 %v1058_v33, %v13902_v10  ;;  %1605 = vperm.xlu1 %11161, %v7948_v11   ;;  %1374 = vperm.xlu0 %11160, %v7915_v51   ;;  %v974_v51 = vmul.f32 %v945_v15, %v13923_v8 }
 0x211   :  { %2179 = vmatmul.mubr.f32.gmra.mrb[22].mxu1 %v973_v54  ;;  %v950_v33 = vpop.permute.xlu1 %949  ;;  %v7949_v54 = vld [vmem:[%s15991_s19 + $0x318] sm:$0xff] }
 0x212   :  { %v1063_v11 = vpop.permute.xlu0 %1062  ;;  %2183 = vmatprep.mubr.f32.mxu1 %v1087_v20  ;;  %v7916_v20 = vld [vmem:[%s15991_s19 + $0x210] sm:$0xff] }
 0x213   :  { %v1088_v37 = vmul.f32 %v1063_v11, %v13917_v12  ;;  %1723 = vperm.xlu1 %11161, %v7965_v14   ;;  %1492 = vperm.xlu0 %11160, %v7932_v17   ;;  %v975_v14 = vmul.f32 %v950_v33, %v13938_v6  ;;  %v7966_v11 = vld [vmem:[%s15991_s19 + $0x3a0] sm:$0xff] }
 0x215   :  { %2184 = vmatmul.mubr.f32.gmra.mrb[24].mxu1 %v974_v51  ;;  %v955_v15 = vpop.permute.xlu1 %954  ;;  %v7933_v51 = vld [vmem:[%s15991_s19 + $0x298] sm:$0xff] }
 0x216   :  { %v1068_v7 = vpop.permute.xlu0 %1067  ;;  %2188 = vmatprep.mubr.f32.mxu1 %v1088_v37 }
 0x217   :  { %v1089_v17 = vmul.f32 %v1068_v7, %v13932_v25  ;;  %1610 = vperm.xlu1 %11161, %v7949_v54   ;;  %1379 = vperm.xlu0 %11160, %v7916_v20   ;;  %v976_v7 = vmul.f32 %v955_v15, %v13951_v47  ;;  %v13965_v54 = vsel %vm849_vm0, %v844_v4, %v15993_v29  ;;  %v1091_v20 = vrot.slane %v13622_v38, 1 }
 0x219   :  { %2189 = vmatmul.mubr.f32.gmra.mrb[26].mxu1 %v975_v14  ;;  %v960_v37 = vpop.permute.xlu1 %959  ;;  %v7950_v14 = vld [vmem:[%s15991_s19 + $0x320] sm:$0xff] }
 0x21a   :  { %v1073_v5 = vpop.permute.xlu0 %1072  ;;  %2193 = vmatprep.mubr.f32.mxu1 %v1089_v17  ;;  %v977_v4 = vmul.f32 %v960_v37, %v13965_v54  ;;  %v7934_v37 = vld [vmem:[%s15991_s19 + $0x2a0] sm:$0xff] }
 0x21b   :  { %v1090_v33 = vmul.f32 %v1073_v5, %v13594_v42  ;;  %1728 = vperm.xlu1 %11161, %v7966_v11   ;;  %1497 = vperm.xlu0 %11160, %v7933_v51   ;;  %v7917_v5 = vld [vmem:[%s15991_s19 + $0x218] sm:$0xff]  ;;  %v13982_v11 = vsel %vm1107_vm1, %v15702_v2, %v1091_v20  ;;  %v1092_v51 = vrot.slane %v13663_v28, 1  ;;  %v7951_v2 = vld [vmem:[%s15991_s19 + $0x328] sm:$0xff] }
 0x21d   :  { %2194 = vmatmul.mubr.f32.gmra.mrb[28].mxu1 %v976_v7  ;;  %v1144_v15 = vpop.permute.xlu1 %1143  ;;  %v7967_v7 = vld [vmem:[%s15991_s19 + $0x3a8] sm:$0xff]  ;;  %v13995_v28 = vsel %vm1107_vm1, %v1091_v20, %v1092_v51  ;;  %v2043_v20 = vld [vmem:[%s15684_s2 + $0x400] sm:$0xff] }
 0x21e   :  { %v1257_v17 = vpop.permute.xlu0 %1256  ;;  %2198 = vmatprep.mubr.f32.mxu1 %v1090_v33 }
 0x21f   :  { %v1334_v38 = vmul.f32 %v1257_v17, %v13684_v34  ;;  %1615 = vperm.xlu1 %11161, %v7950_v14   ;;  %1384 = vperm.xlu0 %11160, %v7917_v5   ;;  %v1221_v14 = vmul.f32 %v1144_v15, %v13982_v11  ;;  %v1093_v17 = vrot.slane %v13694_v39, 1  ;;  %v2044_v39 = vld [vmem:[%s15684_s2 + $0x408] sm:$0xff] }
 0x221   :  { %2199 = vmatmul.mubr.f32.gmra.mrb[30].mxu1 %v977_v4  ;;  %v1149_v33 = vpop.permute.xlu1 %1148  ;;  %v7918_v4 = vld [vmem:[%s15991_s19 + $0x220] sm:$0xff] }
 0x222   :  { %v1262_v29 = vpop.permute.xlu0 %1261  ;;  %2268 = vmatprep.mubr.f32.mxu1 %v1334_v38 }
 0x223   :  { %v1335_v5 = vmul.f32 %v1262_v29, %v13712_v21  ;;  %1733 = vperm.xlu1 %11161, %v7967_v7   ;;  %1502 = vperm.xlu0 %11160, %v7934_v37   ;;  %v1222_v7 = vmul.f32 %v1149_v33, %v13995_v28  ;;  %v14013_v29 = vpack.c.bf16 %v2044_v39, %v2043_v20  ;;  %v7935_v33 = vld [vmem:[%s15991_s19 + $0x2a8] sm:$0xff]  ;;  %v7952_v20 = vld [vmem:[%s15991_s19 + $0x330] sm:$0xff] }
 0x225   :  { %2269 = vmatmul.mubr.f32.vlgmr.msra.gmra.mrb[32].mxu1 %v1221_v14  ;;  %v1154_v15 = vpop.permute.xlu1 %1153  ;;  %v14017_v14 = vsel %vm1107_vm1, %v1092_v51, %v1093_v17  ;;  %9691 = vmatprep.subr.bf16.mxu0 %v14013_v29 }
 0x226   :  { %v1267_v38 = vpop.permute.xlu0 %1266  ;;  %2273 = vmatprep.mubr.f32.mxu1 %v1335_v5  ;;  %11080 = vmatpush3.bf16.msra.mxu1 %v13470_v58  ;;  %v1094_v58 = vrot.slane %v13721_v43, 1  ;;  %v7968_v5 = vld [vmem:[%s15991_s19 + $0x3b0] sm:$0xff]  ;;  %v1223_v43 = vmul.f32 %v1154_v15, %v14017_v14 }
 0x227   :  { %v1336_v37 = vmul.f32 %v1267_v38, %v13739_v31  ;;  %1620 = vperm.xlu1 %11161, %v7951_v2   ;;  %1389 = vperm.xlu0 %11160, %v7918_v4  }
 0x228   :  { %11073 = vmatprep.subr.bf16.mxu1 %v13491_v63  ;;  %v14033_v38 = vsel %vm1107_vm1, %v1093_v17, %v1094_v58  ;;  %v1095_v63 = vrot.slane %v13748_v57, 1 }
 0x229   :  { %2274 = vmatmul.mubr.f32.gmra.mrb[34].mxu1 %v1222_v7  ;;  %v1159_v2 = vpop.permute.xlu1 %1158 }
 0x22a   :  { %v1272_v4 = vpop.permute.xlu0 %1271  ;;  %2278 = vmatprep.mubr.f32.mxu1 %v1336_v37  ;;  %11081 = vmatpush3.bf16.msra.mxu1 %v13494_v61  ;;  %v7919_v61 = vld [vmem:[%s15991_s19 + $0x228] sm:$0xff]  ;;  %v1224_v17 = vmul.f32 %v1159_v2, %v14033_v38  ;;  %v14048_v7 = vsel %vm1107_vm1, %v1094_v58, %v1095_v63  ;;  %v1096_v37 = vrot.slane %v13775_v48, 1 }
 0x22b   :  { %v1337_v51 = vmul.f32 %v1272_v4, %v13766_v44  ;;  %1738 = vperm.xlu1 %11161, %v7968_v5   ;;  %1507 = vperm.xlu0 %11160, %v7935_v33   ;;  %v1097_v4 = vrot.slane %v13802_v50, 1 }
 0x22c   :  { %11074 = vmatprep.subr.bf16.mxu1 %v13515_v60  ;;  %v7969_v60 = vld [vmem:[%s15991_s19 + $0x3b8] sm:$0xff]  ;;  %v14063_v2 = vsel %vm1107_vm1, %v1095_v63, %v1096_v37 }
 0x22d   :  { %2279 = vmatmul.mubr.f32.gmra.mrb[36].mxu1 %v1223_v43  ;;  %v1164_v15 = vpop.permute.xlu1 %1163 }
 0x22e   :  { %v1277_v39 = vpop.permute.xlu0 %1276  ;;  %2283 = vmatprep.mubr.f32.mxu1 %v1337_v51  ;;  %11082 = vmatpush3.bf16.msra.mxu1 %v13518_v59  ;;  %v7936_v59 = vld [vmem:[%s15991_s19 + $0x2b0] sm:$0xff]  ;;  %v1225_v58 = vmul.f32 %v1164_v15, %v14048_v7 }
 0x22f   :  { %v1338_v57 = vmul.f32 %v1277_v39, %v13793_v22  ;;  %1625 = vperm.xlu1 %11161, %v7952_v20   ;;  %1394 = vperm.xlu0 %11160, %v7919_v61   ;;  %v14078_v20 = vsel %vm1107_vm1, %v1096_v37, %v1097_v4  ;;  %v1098_v61 = vrot.slane %v13829_v35, 1  ;;  %v1099_v37 = vrot.slane %v13856_v24, 1 }
 0x230   :  { %11075 = vmatprep.subr.bf16.mxu1 %v13539_v56  ;;  %v7953_v56 = vld [vmem:[%s15991_s19 + $0x338] sm:$0xff] }
 0x231   :  { %2284 = vmatmul.mubr.f32.gmra.mrb[38].mxu1 %v1224_v17  ;;  %v1169_v5 = vpop.permute.xlu1 %1168 }
 0x232   :  { %v1282_v33 = vpop.permute.xlu0 %1281  ;;  %2288 = vmatprep.mubr.f32.mxu1 %v1338_v57  ;;  %11083 = vmatpush3.bf16.msra.mxu1 %v13542_v53  ;;  %v7920_v53 = vld [vmem:[%s15991_s19 + $0x230] sm:$0xff]  ;;  %v1226_v63 = vmul.f32 %v1169_v5, %v14063_v2  ;;  %v14093_v57 = vsel %vm1107_vm1, %v1097_v4, %v1098_v61  ;;  %v1100_v4 = vrot.slane %v13871_v18, 1 }
 0x233   :  { %v1339_v48 = vmul.f32 %v1282_v33, %v13820_v23  ;;  %1743 = vperm.xlu1 %11161, %v7969_v60   ;;  %1512 = vperm.xlu0 %11160, %v7936_v59   ;;  %v2027_v60 = vld [vmem:[%s15684_s2 + $0x380] sm:$0xff]  ;;  %v2028_v59 = vld [vmem:[%s15684_s2 + $0x388] sm:$0xff] }
 0x234   :  { %11076 = vmatprep.subr.bf16.mxu1 %v13563_v62  ;;  %v7970_v62 = vld [vmem:[%s15991_s19 + $0x3c0] sm:$0xff] }
 0x235   :  { %2289 = vmatmul.mubr.f32.gmra.mrb[40].mxu1 %v1225_v58  ;;  %v1174_v43 = vpop.permute.xlu1 %1173 }
 0x236   :  { %v1287_v51 = vpop.permute.xlu0 %1286  ;;  %2293 = vmatprep.mubr.f32.mxu1 %v1339_v48  ;;  %11084 = vmatpush3.bf16.msra.mxu1 %v13566_v46  ;;  %v7937_v46 = vld [vmem:[%s15991_s19 + $0x2b8] sm:$0xff]  ;;  %v1227_v17 = vmul.f32 %v1174_v43, %v14078_v20 }
 0x237   :  { %v1340_v50 = vmul.f32 %v1287_v51, %v13847_v26  ;;  %1630 = vperm.xlu1 %11161, %v7953_v56   ;;  %1399 = vperm.xlu0 %11160, %v7920_v53   ;;  %v7978_v56 = vld [vmem:[%s15991_s19 + $0x400] sm:$0xff]  ;;  %v9658_v53 = vpack.c.bf16 %v2028_v59, %v2027_v60 }
 0x238   :  { %11077 = vmatprep.subr.bf16.mxu1 %v13587_v52  ;;  %v7954_v52 = vld [vmem:[%s15991_s19 + $0x340] sm:$0xff] }
 0x239   :  { %2294 = vmatmul.mubr.f32.gmra.mrb[42].mxu1 %v1226_v63  ;;  %v1179_v15 = vpop.permute.xlu1 %1178 }
 0x23a   :  { %v1292_v39 = vpop.permute.xlu0 %1291  ;;  %2298 = vmatprep.mubr.f32.mxu1 %v1340_v50  ;;  %11085 = vmatpush3.bf16.msra.mxu1 %v13596_v40  ;;  %v7921_v40 = vld [vmem:[%s15991_s19 + $0x238] sm:$0xff]  ;;  %v1228_v58 = vmul.f32 %v1179_v15, %v14093_v57 }
 0x23b   :  { %v1341_v35 = vmul.f32 %v1292_v39, %v13862_v9  ;;  %1748 = vperm.xlu1 %11161, %v7970_v62   ;;  %1517 = vperm.xlu0 %11160, %v7937_v46   ;;  %v1101_v62 = vrot.slane %v13887_v36, 1 }
 0x23c   :  { %11078 = vmatprep.subr.bf16.mxu1 %v13619_v41  ;;  %v14114_v41 = vsel %vm1107_vm1, %v1098_v61, %v1099_v37  ;;  %v14129_v61 = vsel %vm1107_vm1, %v1099_v37, %v1100_v4  ;;  %v1102_v37 = vrot.slane %v13902_v10, 1 }
 0x23d   :  { %2299 = vmatmul.mubr.f32.gmra.mrb[44].mxu1 %v1227_v17  ;;  %v1184_v5 = vpop.permute.xlu1 %1183 }
 0x23e   :  { %v1297_v33 = vpop.permute.xlu0 %1296  ;;  %2303 = vmatprep.mubr.f32.mxu1 %v1341_v35  ;;  %11086 = vmatpush3.bf16.msra.mxu1 %v13631_v32  ;;  %v7971_v32 = vld [vmem:[%s15991_s19 + $0x3c8] sm:$0xff]  ;;  %v1229_v63 = vmul.f32 %v1184_v5, %v14114_v41  ;;  %v14142_v35 = vsel %vm1107_vm1, %v1100_v4, %v1101_v62  ;;  %v7981_v4 = vld [vmem:[%s15991_s19 + $0x418] sm:$0xff] }
 0x23f   :  { %v1342_v48 = vmul.f32 %v1297_v33, %v13877_v13  ;;  %1635 = vperm.xlu1 %11161, %v7954_v52   ;;  %1404 = vperm.xlu0 %11160, %v7921_v40   ;;  %v7980_v52 = vld [vmem:[%s15991_s19 + $0x410] sm:$0xff] }
 0x240   :  { %11079 = vmatprep.subr.bf16.mxu1 %v13660_v30  ;;  %v7979_v30 = vld [vmem:[%s15991_s19 + $0x408] sm:$0xff]  ;;  %v7972_v40 = vld [vmem:[%s15991_s19 + $0x3d0] sm:$0xff] }
 0x241   :  { %2304 = vmatmul.mubr.f32.gmra.mrb[46].mxu1 %v1228_v58  ;;  %v1189_v43 = vpop.permute.xlu1 %1188  ;;  %v14155_v58 = vsel %vm1107_vm1, %v1101_v62, %v1102_v37  ;;  %v7982_v62 = vld [vmem:[%s15991_s19 + $0x420] sm:$0xff] }
 0x242   :  { %v1302_v51 = vpop.permute.xlu0 %1301  ;;  %2308 = vmatprep.mubr.f32.mxu1 %v1342_v48  ;;  %11087 = vmatpush3.bf16.msra.mxu1 %v13671_v27  ;;  %v7955_v27 = vld [vmem:[%s15991_s19 + $0x348] sm:$0xff]  ;;  %v1230_v39 = vmul.f32 %v1189_v43, %v14129_v61  ;;  %v1103_v48 = vrot.slane %v13917_v12, 1 }
 0x243   :  { %v1343_v50 = vmul.f32 %v1302_v51, %v13893_v19  ;;  %1821 = vperm.xlu1 %11161, %v7978_v56   ;;  %1753 = vperm.xlu0 %11160, %v7971_v32   ;;  %v7956_v56 = vld [vmem:[%s15991_s19 + $0x350] sm:$0xff] }
 0x244   :  { %9659 = vmatprep.subr.bf16.mxu1 %v9658_v53 }
 0x245   :  { %2309 = vmatmul.mubr.f32.gmra.mrb[48].mxu1 %v1229_v63  ;;  %v1194_v46 = vpop.permute.xlu1 %1193  ;;  %v14168_v63 = vsel %vm1107_vm1, %v1102_v37, %v1103_v48  ;;  %v1105_v37 = vrot.slane %v13594_v42, 1 }
 0x246   :  { %v1307_v15 = vpop.permute.xlu0 %1306  ;;  %2313 = vmatprep.mubr.f32.mxu1 %v1343_v50  ;;  %v1231_v5 = vmul.f32 %v1194_v46, %v14142_v35  ;;  %v1104_v50 = vrot.slane %v13932_v25, 1 }
 0x247   :  { %v1344_v17 = vmul.f32 %v1307_v15, %v13908_v16  ;;  %1826 = vperm.xlu1 %11161, %v7979_v30   ;;  %1640 = vperm.xlu0 %11160, %v7955_v27   ;;  %v7973_v30 = vld [vmem:[%s15991_s19 + $0x3d8] sm:$0xff] }
 0x248   :  { %v14194_v42 = vsel %vm1107_vm1, %v1104_v50, %v1105_v37 }
 0x249   :  { %2314 = vmatmul.mubr.f32.gmra.mrb[50].mxu1 %v1230_v39  ;;  %v1199_v60 = vpop.permute.xlu1 %1198 }
 0x24a   :  { %v1312_v59 = vpop.permute.xlu0 %1311  ;;  %2318 = vmatprep.mubr.f32.mxu1 %v1344_v17  ;;  %v1232_v43 = vmul.f32 %v1199_v60, %v14155_v58  ;;  %v14181_v17 = vsel %vm1107_vm1, %v1103_v48, %v1104_v50  ;;  %v7984_v48 = vld [vmem:[%s15991_s19 + $0x430] sm:$0xff] }
 0x24b   :  { %v1345_v33 = vmul.f32 %v1312_v59, %v13923_v8  ;;  %1831 = vperm.xlu1 %11161, %v7980_v52   ;;  %1758 = vperm.xlu0 %11160, %v7972_v40   ;;  %v7983_v52 = vld [vmem:[%s15991_s19 + $0x428] sm:$0xff]  ;;  %v7957_v40 = vld [vmem:[%s15991_s19 + $0x358] sm:$0xff] }
 0x24d   :  { %2319 = vmatmul.mubr.f32.gmra.mrb[52].mxu1 %v1231_v5  ;;  %v1204_v32 = vpop.permute.xlu1 %1203 }
 0x24e   :  { %v1317_v53 = vpop.permute.xlu0 %1316  ;;  %2323 = vmatprep.mubr.f32.mxu1 %v1345_v33  ;;  %v1233_v15 = vmul.f32 %v1204_v32, %v14168_v63 }
 0x24f   :  { %v1346_v51 = vmul.f32 %v1317_v53, %v13938_v6  ;;  %1836 = vperm.xlu1 %11161, %v7981_v4   ;;  %1645 = vperm.xlu0 %11160, %v7956_v56   ;;  %v7974_v4 = vld [vmem:[%s15991_s19 + $0x3e0] sm:$0xff] }
 0x251   :  { %2324 = vmatmul.mubr.f32.gmra.mrb[54].mxu1 %v1232_v43  ;;  %v1209_v27 = vpop.permute.xlu1 %1208 }
 0x252   :  { %v1322_v46 = vpop.permute.xlu0 %1321  ;;  %2328 = vmatprep.mubr.f32.mxu1 %v1346_v51  ;;  %v1234_v5 = vmul.f32 %v1209_v27, %v14181_v17  ;;  %v15994_v51 = vrot.slane %v13590_v55, 1 }
 0x253   :  { %v1347_v39 = vmul.f32 %v1322_v46, %v13951_v47  ;;  %1841 = vperm.xlu1 %11161, %v7982_v62   ;;  %1763 = vperm.xlu0 %11160, %v7973_v30   ;;  %v7985_v62 = vld [vmem:[%s15991_s19 + $0x438] sm:$0xff]  ;;  %v7958_v30 = vld [vmem:[%s15991_s19 + $0x360] sm:$0xff] }
 0x254   :  { %v14208_v50 = vsel %vm1107_vm1, %v1105_v37, %v15994_v51  ;;  %v2012_v37 = vld [vmem:[%s15684_s2 + $0x308] sm:$0xff] }
 0x255   :  { %2329 = vmatmul.mubr.f32.gmra.mrb[56].mxu1 %v1233_v15  ;;  %v1214_v60 = vpop.permute.xlu1 %1213 }
 0x256   :  { %v1327_v59 = vpop.permute.xlu0 %1326  ;;  %2333 = vmatprep.mubr.f32.mxu1 %v1347_v39  ;;  %v1235_v53 = vmul.f32 %v1214_v60, %v14194_v42  ;;  %v2011_v39 = vld [vmem:[%s15684_s2 + $0x300] sm:$0xff]  ;;  %v2029_v60 = vld [vmem:[%s15684_s2 + $0x390] sm:$0xff] }
 0x257   :  { %v1348_v33 = vmul.f32 %v1327_v59, %v13965_v54  ;;  %1846 = vperm.xlu1 %11161, %v7983_v52   ;;  %1650 = vperm.xlu0 %11160, %v7957_v40   ;;  %v7986_v52 = vld [vmem:[%s15991_s19 + $0x440] sm:$0xff]  ;;  %v7975_v40 = vld [vmem:[%s15991_s19 + $0x3e8] sm:$0xff]  ;;  %v2030_v59 = vld [vmem:[%s15684_s2 + $0x398] sm:$0xff] }
 0x258   :  { %v9662_v51 = vpack.c.bf16 %v2030_v59, %v2029_v60  ;;  %v2033_v59 = vld [vmem:[%s15684_s2 + $0x3b0] sm:$0xff] }
 0x259   :  { %2334 = vmatmul.mubr.f32.gmra.mrb[58].mxu1 %v1234_v5  ;;  %v1219_v56 = vpop.permute.xlu1 %1218 }
 0x25a   :  { %v1332_v32 = vpop.permute.xlu0 %1331  ;;  %2338 = vmatprep.mubr.f32.mxu1 %v1348_v33  ;;  %v1236_v15 = vmul.f32 %v1219_v56, %v14208_v50 }
 0x25b   :  { %v1349_v43 = vmul.f32 %v1332_v32, %v13652_v49  ;;  %1851 = vperm.xlu1 %11161, %v7984_v48   ;;  %1768 = vperm.xlu0 %11160, %v7974_v4   ;;  %v9660_v48 = vpack.c.bf16 %v2012_v37, %v2011_v39  ;;  %v2013_v32 = vld [vmem:[%s15684_s2 + $0x310] sm:$0xff]  ;;  %v2015_v37 = vld [vmem:[%s15684_s2 + $0x320] sm:$0xff] }
 0x25d   :  { %2339 = vmatmul.mubr.f32.gmra.mrb[60].mxu1 %v1235_v53  ;;  %v1410_v27 = vpop.permute.xlu1 %1409  ;;  %v2014_v53 = vld [vmem:[%s15684_s2 + $0x318] sm:$0xff] }
 0x25e   :  { %v1523_v46 = vpop.permute.xlu0 %1522  ;;  %2343 = vmatprep.mubr.f32.mxu1 %v1349_v43  ;;  %v1455_v4 = vmul.f32 %v1410_v27, %v13856_v24  ;;  %v7987_v43 = vld [vmem:[%s15991_s19 + $0x448] sm:$0xff] }
 0x25f   :  { %v1568_v55 = vmul.f32 %v1523_v46, %v14129_v61  ;;  %1856 = vperm.xlu1 %11161, %v7985_v62   ;;  %1655 = vperm.xlu0 %11160, %v7958_v30   ;;  %v7959_v24 = vld [vmem:[%s15991_s19 + $0x368] sm:$0xff]  ;;  %v2031_v62 = vld [vmem:[%s15684_s2 + $0x3a0] sm:$0xff] }
 0x260   :  { %v2032_v30 = vld [vmem:[%s15684_s2 + $0x3a8] sm:$0xff] }
 0x261   :  { %2344 = vmatmul.mubr.f32.gmra.mrb[62].mxu1 %v1236_v15  ;;  %v1415_v5 = vpop.permute.xlu1 %1414  ;;  %v9664_v15 = vpack.c.bf16 %v2014_v53, %v2013_v32  ;;  %v9666_v60 = vpack.c.bf16 %v2032_v30, %v2031_v62  ;;  %v2017_v53 = vld [vmem:[%s15684_s2 + $0x330] sm:$0xff]  ;;  %v2035_v62 = vld [vmem:[%s15684_s2 + $0x3c0] sm:$0xff]  ;;  %v2036_v30 = vld [vmem:[%s15684_s2 + $0x3c8] sm:$0xff] }
 0x262   :  { %v1528_v33 = vpop.permute.xlu0 %1527  ;;  %2453 = vmatprep.mubr.f32.mxu1 %v1568_v55  ;;  %v1456_v55 = vmul.f32 %v1415_v5, %v13871_v18  ;;  %v7976_v18 = vld [vmem:[%s15991_s19 + $0x3f0] sm:$0xff]  ;;  %v2034_v5 = vld [vmem:[%s15684_s2 + $0x3b8] sm:$0xff] }
 0x263   :  { %v1569_v56 = vmul.f32 %v1528_v33, %v14142_v35  ;;  %1861 = vperm.xlu1 %11161, %v7986_v52   ;;  %1773 = vperm.xlu0 %11160, %v7975_v40   ;;  %v2016_v52 = vld [vmem:[%s15684_s2 + $0x328] sm:$0xff]  ;;  %v7988_v40 = vld [vmem:[%s15991_s19 + $0x450] sm:$0xff] }
 0x265   :  { %2454 = vmatmul.mubr.f32.vlgmr.msra.gmra.mrb[64].mxu1 %v1455_v4  ;;  %v9668_v4 = vpack.c.bf16 %v2016_v52, %v2015_v37  ;;  %v2019_v37 = vld [vmem:[%s15684_s2 + $0x340] sm:$0xff]  ;;  %v2020_v52 = vld [vmem:[%s15684_s2 + $0x348] sm:$0xff] }
 0x266   :  { %v1420_v27 = vpop.permute.xlu1 %1419  ;;  %v1533_v46 = vpop.permute.xlu0 %1532  ;;  %2458 = vmatprep.mubr.f32.mxu1 %v1569_v56  ;;  %9661 = vmatpush3.bf16.msra.mxu1 %v9660_v48 }
 0x267   :  { %v1570_v39 = vmul.f32 %v1533_v46, %v14155_v58  ;;  %1866 = vperm.xlu1 %11161, %v7987_v43   ;;  %1660 = vperm.xlu0 %11160, %v7959_v24   ;;  %v1457_v56 = vmul.f32 %v1420_v27, %v13887_v36  ;;  %v2018_v43 = vld [vmem:[%s15684_s2 + $0x338] sm:$0xff]  ;;  %v7960_v36 = vld [vmem:[%s15991_s19 + $0x370] sm:$0xff] }
 0x268   :  { %9663 = vmatprep.subr.bf16.mxu1 %v9662_v51  ;;  %v7989_v24 = vld [vmem:[%s15991_s19 + $0x458] sm:$0xff]  ;;  %v9670_v51 = vpack.c.bf16 %v2034_v5, %v2033_v59 }
 0x269   :  { %2459 = vmatmul.mubr.f32.gmra.mrb[66].mxu1 %v1456_v55  ;;  %v2038_v59 = vld [vmem:[%s15684_s2 + $0x3d8] sm:$0xff] }
 0x26a   :  { %v1425_v33 = vpop.permute.xlu1 %1424  ;;  %v1538_v48 = vpop.permute.xlu0 %1537  ;;  %2463 = vmatprep.mubr.f32.mxu1 %v1570_v39  ;;  %9665 = vmatpush3.bf16.msra.mxu1 %v9664_v15  ;;  %v9672_v15 = vpack.c.bf16 %v2018_v43, %v2017_v53  ;;  %v2022_v53 = vld [vmem:[%s15684_s2 + $0x358] sm:$0xff]  ;;  %v7991_v43 = vld [vmem:[%s15991_s19 + $0x468] sm:$0xff] }
 0x26b   :  { %v1571_v32 = vmul.f32 %v1538_v48, %v14168_v63  ;;  %1871 = vperm.xlu1 %11161, %v7988_v40   ;;  %1778 = vperm.xlu0 %11160, %v7976_v18   ;;  %v1458_v55 = vmul.f32 %v1425_v33, %v13902_v10  ;;  %v7990_v40 = vld [vmem:[%s15991_s19 + $0x460] sm:$0xff]  ;;  %v7977_v10 = vld [vmem:[%s15991_s19 + $0x3f8] sm:$0xff]  ;;  %v9674_v18 = vpack.c.bf16 %v2036_v30, %v2035_v62 }
 0x26c   :  { %9667 = vmatprep.subr.bf16.mxu1 %v9666_v60  ;;  %v2037_v60 = vld [vmem:[%s15684_s2 + $0x3d0] sm:$0xff]  ;;  %v9676_v48 = vpack.c.bf16 %v2020_v52, %v2019_v37  ;;  %v2024_v37 = vld [vmem:[%s15684_s2 + $0x368] sm:$0xff] }
 0x26d   :  { %2464 = vmatmul.mubr.f32.gmra.mrb[68].mxu1 %v1457_v56 }
 0x26e   :  { %v1430_v27 = vpop.permute.xlu1 %1429  ;;  %v1543_v46 = vpop.permute.xlu0 %1542  ;;  %2468 = vmatprep.mubr.f32.mxu1 %v1571_v32  ;;  %9669 = vmatpush3.bf16.msra.mxu1 %v9668_v4  ;;  %v2021_v32 = vld [vmem:[%s15684_s2 + $0x350] sm:$0xff] }
 0x26f   :  { %v1572_v39 = vmul.f32 %v1543_v46, %v14181_v17  ;;  %1876 = vperm.xlu1 %11161, %v7989_v24   ;;  %1665 = vperm.xlu0 %11160, %v7960_v36   ;;  %v1459_v4 = vmul.f32 %v1430_v27, %v13917_v12  ;;  %v7961_v12 = vld [vmem:[%s15991_s19 + $0x378] sm:$0xff]  ;;  %v9678_v24 = vpack.c.bf16 %v2038_v59, %v2037_v60  ;;  %v2039_v36 = vld [vmem:[%s15684_s2 + $0x3e0] sm:$0xff] }
 0x270   :  { %9671 = vmatprep.subr.bf16.mxu1 %v9670_v51  ;;  %v2040_v51 = vld [vmem:[%s15684_s2 + $0x3e8] sm:$0xff]  ;;  %v9680_v27 = vpack.c.bf16 %v2022_v53, %v2021_v32  ;;  %v2026_v32 = vld [vmem:[%s15684_s2 + $0x378] sm:$0xff] }
 0x271   :  { %2469 = vmatmul.mubr.f32.gmra.mrb[70].mxu1 %v1458_v55  ;;  %v7993_v55 = vld [vmem:[%s15991_s19 + $0x478] sm:$0xff]  ;;  %v9682_v52 = vpack.c.bf16 %v2040_v51, %v2039_v36  ;;  %v11166_v51 = vld [vmem:[#allocation5 + $0x8] sm:$0xff] }
 0x272   :  { %v1435_v5 = vpop.permute.xlu1 %1434  ;;  %v1548_v33 = vpop.permute.xlu0 %1547  ;;  %2473 = vmatprep.mubr.f32.mxu1 %v1572_v39  ;;  %9673 = vmatpush3.bf16.msra.mxu1 %v9672_v15  ;;  %v2023_v39 = vld [vmem:[%s15684_s2 + $0x360] sm:$0xff] }
 0x273   :  { %v1573_v56 = vmul.f32 %v1548_v33, %v14194_v42  ;;  %1881 = vperm.xlu1 %11161, %v7990_v40   ;;  %1783 = vperm.xlu0 %11160, %v7977_v10   ;;  %v1460_v46 = vmul.f32 %v1435_v5, %v13932_v25  ;;  %v7992_v25 = vld [vmem:[%s15991_s19 + $0x470] sm:$0xff]  ;;  %v2042_v10 = vld [vmem:[%s15684_s2 + $0x3f8] sm:$0xff]  ;;  %v9684_v59 = vpack.c.bf16 %v2024_v37, %v2023_v39 }
 0x274   :  { %9675 = vmatprep.subr.bf16.mxu1 %v9674_v18  ;;  %v2041_v40 = vld [vmem:[%s15684_s2 + $0x3f0] sm:$0xff] }
 0x275   :  { %2474 = vmatmul.mubr.f32.gmra.mrb[72].mxu1 %v1459_v4  ;;  %v14356_v5 = vld [vmem:[#allocation5 + $0x70] sm:$0xff]  ;;  %v9686_v4 = vpack.c.bf16 %v2042_v10, %v2041_v40 }
 0x276   :  { %v1440_v62 = vpop.permute.xlu1 %1439  ;;  %v1553_v30 = vpop.permute.xlu0 %1552  ;;  %2478 = vmatprep.mubr.f32.mxu1 %v1573_v56  ;;  %9677 = vmatpush3.bf16.msra.mxu1 %v9676_v48  ;;  %v2025_v56 = vld [vmem:[%s15684_s2 + $0x370] sm:$0xff] }
 0x277   :  { %v1574_v15 = vmul.f32 %v1553_v30, %v14208_v50  ;;  %1886 = vperm.xlu1 %11161, %v7991_v43   ;;  %1670 = vperm.xlu0 %11160, %v7961_v12   ;;  %v1461_v33 = vmul.f32 %v14356_v5, %v1440_v62  ;;  %v9688_v12 = vpack.c.bf16 %v2026_v32, %v2025_v56  ;;  %v2045_v37 = vld [vmem:[%s15684_s2 + $0x410] sm:$0xff] }
 0x278   :  { %9679 = vmatprep.subr.bf16.mxu1 %v9678_v24  ;;  %v14366_v24 = vld [vmem:[#allocation5 + $0x78] sm:$0xff] }
 0x279   :  { %2479 = vmatmul.mubr.f32.gmra.mrb[74].mxu1 %v1460_v46 }
 0x27a   :  { %v1445_v18 = vpop.permute.xlu1 %1444  ;;  %v1558_v60 = vpop.permute.xlu0 %1557  ;;  %2483 = vmatprep.mubr.f32.mxu1 %v1574_v15  ;;  %9681 = vmatpush3.bf16.msra.mxu1 %v9680_v27  ;;  %v11167_v15 = vld [vmem:[#allocation5 + $0x10] sm:$0xff] }
 0x27b   :  { %v1575_v48 = vmul.f32 %v1558_v60, %v13982_v11  ;;  %1896 = vperm.xlu1 %11161, %v7993_v55   ;;  %1891 = vperm.xlu0 %11160, %v7992_v25   ;;  %v1462_v36 = vmul.f32 %v14366_v24, %v1445_v18  ;;  %v2046_v25 = vld [vmem:[%s15684_s2 + $0x418] sm:$0xff] }
 0x27c   :  { %9683 = vmatprep.subr.bf16.mxu1 %v9682_v52  ;;  %v9694_v60 = vpack.c.bf16 %v2046_v25, %v2045_v37  ;;  %v11170_v25 = vld [vmem:[#allocation5 + $0x20] sm:$0xff] }
 0x27d   :  { %2484 = vmatmul.mubr.f32.gmra.mrb[76].mxu1 %v1461_v33  ;;  %v2048_v33 = vld [vmem:[%s15684_s2 + $0x428] sm:$0xff] }
 0x27e   :  { %v1596_v53 = vpop.permute.xlu1 %1595  ;;  %v1709_v43 = vpop.permute.xlu0 %1708  ;;  %2488 = vmatprep.mubr.f32.mxu1 %v1575_v48  ;;  %9685 = vmatpush3.bf16.msra.mxu1 %v9684_v59  ;;  %v2047_v59 = vld [vmem:[%s15684_s2 + $0x420] sm:$0xff] }
 0x27f   :  { %v1786_v62 = vmul.f32 %v11166_v51, %v1709_v43  ;;  %9687 = vmatprep.subr.bf16.mxu1 %v9686_v4  ;;  %v1673_v46 = vmul.f32 %v1596_v53, %v13712_v21  ;;  %v14378_v21 = vld [vmem:[#allocation5] sm:$0xff]  ;;  %v9698_v53 = vpack.c.bf16 %v2048_v33, %v2047_v59  ;;  %v2049_v43 = vld [vmem:[%s15684_s2 + $0x430] sm:$0xff] }
 0x281   :  { %2489 = vmatmul.mubr.f32.gmra.mrb[78].mxu1 %v1462_v36 }
 0x282   :  { %v1714_v30 = vpop.permute.xlu1 %1713  ;;  %v1483_v27 = vpop.permute.xlu0 %1482  ;;  %9689 = vmatpush3.bf16.msra.mxu1 %v9688_v12  ;;  %2558 = vmatprep.mubr.f32.mxu1 %v1786_v62  ;;  %v2050_v12 = vld [vmem:[%s15684_s2 + $0x438] sm:$0xff] }
 0x283   :  { %v1787_v55 = vmul.f32 %v11167_v15, %v1714_v30  ;;  %v1560_v39 = vmul.f32 %v1483_v27, %v13995_v28  ;;  %v9702_v27 = vpack.c.bf16 %v2050_v12, %v2049_v43  ;;  %v11171_v43 = vld [vmem:[#allocation5 + $0x28] sm:$0xff] }
 0x285   :  { %2413 = vmatprep.mubr.f32.mxu0 %v1560_v39  ;;  %2559 = vmatmul.mubr.f32.vlgmr.msra.gmra.mrb[80].mxu1 %v1673_v46  ;;  %v2051_v46 = vld [vmem:[%s15684_s2 + $0x440] sm:$0xff] }
 0x286   :  { %v1601_v52 = vpop.permute.xlu1 %1600  ;;  %v1370_v40 = vpop.permute.xlu0 %1369  ;;  %2563 = vmatprep.mubr.f32.mxu1 %v1787_v55  ;;  %v2052_v55 = vld [vmem:[%s15684_s2 + $0x448] sm:$0xff] }
 0x287   :  { %v1674_v10 = vmul.f32 %v1601_v52, %v13739_v31  ;;  %v1447_v18 = vmul.f32 %v14378_v21, %v1370_v40  ;;  %v11169_v31 = vld [vmem:[#allocation5 + $0x18] sm:$0xff]  ;;  %v2053_v40 = vld [vmem:[%s15684_s2 + $0x450] sm:$0xff] }
 0x289   :  { %2414 = vmatmul.mubr.f32.vlgmr.msra.gmra.mrb[0].mxu0 %v1447_v18  ;;  %2564 = vmatmul.mubr.f32.gmra.mrb[82].mxu1 %v1674_v10  ;;  %v2054_v10 = vld [vmem:[%s15684_s2 + $0x458] sm:$0xff] }
 0x28a   :  { %v1719_v48 = vpop.permute.xlu1 %1718  ;;  %v1488_v4 = vpop.permute.xlu0 %1487  ;;  %9693 = vmatpush3.bf16.msra.mxu0 %v14013_v29 }
 0x28b   :  { %v1788_v56 = vmul.f32 %v11169_v31, %v1719_v48  ;;  %v1561_v32 = vmul.f32 %v1488_v4, %v14017_v14  ;;  %9695 = vmatprep.subr.bf16.mxu0 %v9694_v60  ;;  %v9710_v48 = vpack.c.bf16 %v2054_v10, %v2053_v40  ;;  %v2055_v4 = vld [vmem:[%s15684_s2 + $0x460] sm:$0xff] }
 0x28d   :  { %2418 = vmatprep.mubr.f32.mxu0 %v1561_v32  ;;  %2568 = vmatprep.mubr.f32.mxu1 %v1788_v56  ;;  %v2056_v56 = vld [vmem:[%s15684_s2 + $0x468] sm:$0xff] }
 0x28e   :  { %v1606_v36 = vpop.permute.xlu1 %1605  ;;  %v1375_v62 = vpop.permute.xlu0 %1374  ;;  %9697 = vmatpush3.bf16.msra.mxu0 %v9694_v60 }
 0x28f   :  { %v1675_v29 = vmul.f32 %v1606_v36, %v13766_v44  ;;  %v1448_v30 = vmul.f32 %v11166_v51, %v1375_v62  ;;  %9699 = vmatprep.subr.bf16.mxu0 %v9698_v53  ;;  %v9706_v51 = vpack.c.bf16 %v2052_v55, %v2051_v46  ;;  %v2057_v36 = vld [vmem:[%s15684_s2 + $0x470] sm:$0xff]  ;;  %v2058_v62 = vld [vmem:[%s15684_s2 + $0x478] sm:$0xff] }
 0x290   :  { %v9718_v55 = vpack.c.bf16 %v2058_v62, %v2057_v36 }
 0x291   :  { %2419 = vmatmul.mubr.f32.gmra.mrb[2].mxu0 %v1448_v30  ;;  %2569 = vmatmul.mubr.f32.gmra.mrb[84].mxu1 %v1675_v29 }
 0x292   :  { %v1724_v39 = vpop.permute.xlu1 %1723  ;;  %v1493_v37 = vpop.permute.xlu0 %1492  ;;  %9701 = vmatpush3.bf16.msra.mxu0 %v9698_v53 }
 0x293   :  { %v1789_v52 = vmul.f32 %v11170_v25, %v1724_v39  ;;  %v1562_v44 = vmul.f32 %v1493_v37, %v14033_v38  ;;  %9703 = vmatprep.subr.bf16.mxu0 %v9702_v27 }
 0x295   :  { %2423 = vmatprep.mubr.f32.mxu0 %v1562_v44  ;;  %2573 = vmatprep.mubr.f32.mxu1 %v1789_v52  ;;  %v11172_v52 = vld [vmem:[#allocation5 + $0x30] sm:$0xff] }
 0x296   :  { %v1611_v18 = vpop.permute.xlu1 %1610  ;;  %v1380_v60 = vpop.permute.xlu0 %1379  ;;  %9705 = vmatpush3.bf16.msra.mxu0 %v9702_v27 }
 0x297   :  { %v1676_v59 = vmul.f32 %v1611_v18, %v13793_v22  ;;  %v1449_v33 = vmul.f32 %v11167_v15, %v1380_v60  ;;  %9707 = vmatprep.subr.bf16.mxu0 %v9706_v51  ;;  %v9714_v15 = vpack.c.bf16 %v2056_v56, %v2055_v4 }
 0x299   :  { %2424 = vmatmul.mubr.f32.gmra.mrb[4].mxu0 %v1449_v33  ;;  %2574 = vmatmul.mubr.f32.gmra.mrb[86].mxu1 %v1676_v59  ;;  %v11173_v59 = vld [vmem:[#allocation5 + $0x38] sm:$0xff] }
 0x29a   :  { %v1729_v32 = vpop.permute.xlu1 %1728  ;;  %v1498_v53 = vpop.permute.xlu0 %1497  ;;  %9709 = vmatpush3.bf16.msra.mxu0 %v9706_v51 }
 0x29b   :  { %v1790_v12 = vmul.f32 %v11171_v43, %v1729_v32  ;;  %v1563_v22 = vmul.f32 %v1498_v53, %v14048_v7  ;;  %9711 = vmatprep.subr.bf16.mxu0 %v9710_v48 }
 0x29d   :  { %2428 = vmatprep.mubr.f32.mxu0 %v1563_v22  ;;  %2578 = vmatprep.mubr.f32.mxu1 %v1790_v12 }
 0x29e   :  { %v1616_v29 = vpop.permute.xlu1 %1615  ;;  %v1385_v30 = vpop.permute.xlu0 %1384  ;;  %9713 = vmatpush3.bf16.msra.mxu0 %v9710_v48 }
 0x29f   :  { %v1677_v27 = vmul.f32 %v1616_v29, %v13820_v23  ;;  %v1450_v46 = vmul.f32 %v11169_v31, %v1385_v30  ;;  %9715 = vmatprep.subr.bf16.mxu0 %v9714_v15 }
 0x2a1   :  { %2429 = vmatmul.mubr.f32.gmra.mrb[6].mxu0 %v1450_v46  ;;  %2579 = vmatmul.mubr.f32.gmra.mrb[88].mxu1 %v1677_v27 }
 0x2a2   :  { %v1734_v39 = vpop.permute.xlu1 %1733  ;;  %v1503_v37 = vpop.permute.xlu0 %1502  ;;  %9717 = vmatpush3.bf16.msra.mxu0 %v9714_v15 }
 0x2a3   :  { %v1791_v44 = vmul.f32 %v11172_v52, %v1734_v39  ;;  %v1564_v51 = vmul.f32 %v1503_v37, %v14063_v2  ;;  %9719 = vmatprep.subr.bf16.mxu0 %v9718_v55  ;;  %v11175_v39 = vld [vmem:[#allocation5 + $0x48] sm:$0xff] }
 0x2a5   :  { %2433 = vmatprep.mubr.f32.mxu0 %v1564_v51  ;;  %2583 = vmatprep.mubr.f32.mxu1 %v1791_v44 }
 0x2a6   :  { %v1621_v40 = vpop.permute.xlu1 %1620  ;;  %v1390_v10 = vpop.permute.xlu0 %1389  ;;  %9721 = vmatpush3.bf16.msra.mxu0 %v9718_v55 }
 0x2a7   :  { %v1678_v23 = vmul.f32 %v1621_v40, %v13847_v26  ;;  %v1451_v31 = vmul.f32 %v11170_v25, %v1390_v10  ;;  %v11174_v25 = vld [vmem:[#allocation5 + $0x40] sm:$0xff] }
 0x2a9   :  { %2434 = vmatmul.mubr.f32.gmra.mrb[8].mxu0 %v1451_v31  ;;  %2584 = vmatmul.mubr.f32.gmra.mrb[90].mxu1 %v1678_v23 }
 0x2aa   :  { %v1739_v18 = vpop.permute.xlu1 %1738  ;;  %v1508_v60 = vpop.permute.xlu0 %1507 }
 0x2ab   :  { %v1792_v33 = vmul.f32 %v11173_v59, %v1739_v18  ;;  %v1565_v48 = vmul.f32 %v1508_v60, %v14078_v20 }
 0x2ad   :  { %2438 = vmatprep.mubr.f32.mxu0 %v1565_v48  ;;  %2588 = vmatprep.mubr.f32.mxu1 %v1792_v33 }
 0x2ae   :  { %v1626_v4 = vpop.permute.xlu1 %1625  ;;  %v1395_v56 = vpop.permute.xlu0 %1394 }
 0x2af   :  { %v1679_v32 = vmul.f32 %v1626_v4, %v13862_v9  ;;  %v1452_v53 = vmul.f32 %v11171_v43, %v1395_v56 }
 0x2b1   :  { %2439 = vmatmul.mubr.f32.gmra.mrb[10].mxu0 %v1452_v53  ;;  %2589 = vmatmul.mubr.f32.gmra.mrb[92].mxu1 %v1679_v32  ;;  %v11176_v32 = vld [vmem:[#allocation5 + $0x50] sm:$0xff] }
 0x2b2   :  { %v1744_v12 = vpop.permute.xlu1 %1743  ;;  %v1513_v26 = vpop.permute.xlu0 %1512 }
 0x2b3   :  { %v1793_v22 = vmul.f32 %v11174_v25, %v1744_v12  ;;  %v1566_v15 = vmul.f32 %v1513_v26, %v14093_v57 }
 0x2b5   :  { %2443 = vmatprep.mubr.f32.mxu0 %v1566_v15  ;;  %2593 = vmatprep.mubr.f32.mxu1 %v1793_v22 }
 0x2b6   :  { %v1631_v36 = vpop.permute.xlu1 %1630  ;;  %v1400_v62 = vpop.permute.xlu0 %1399 }
 0x2b7   :  { %v1680_v29 = vmul.f32 %v1631_v36, %v13877_v13  ;;  %v1453_v30 = vmul.f32 %v11172_v52, %v1400_v62 }
 0x2b8   :  { %v8144_v27 = vpop.f32.mrb[0].mxu1 }
 0x2b9   :  { %v8145_v46 = vpop.f32.mrb[1].mxu1  ;;  %2444 = vmatmul.mubr.f32.gmra.mrb[12].mxu0 %v1453_v30  ;;  %2594 = vmatmul.mubr.f32.gmra.mrb[94].mxu1 %v1680_v29 }
 0x2ba   :  { %v14430_v9 = vadd.f32 %v8145_v46, %v8144_v27  ;;  %v1749_v43 = vpop.permute.xlu1 %1748  ;;  %v1518_v55 = vpop.permute.xlu0 %1517  ;;  %v11177_v46 = vld [vmem:[#allocation5 + $0x58] sm:$0xff] }
 0x2bb   :  { %v1794_v37 = vmul.f32 %v11175_v39, %v1749_v43  ;;  %v1567_v44 = vmul.f32 %v1518_v55, %v14114_v41 }
 0x2bc   :  { %v8147_v51 = vpop.f32.mrb[2].mxu1 }
 0x2bd   :  { %v8148_v40 = vpop.f32.mrb[3].mxu1  ;;  %2448 = vmatprep.mubr.f32.mxu0 %v1567_v44  ;;  %2598 = vmatprep.mubr.f32.mxu1 %v1794_v37 }
 0x2be   :  { %v14433_v10 = vadd.f32 %v8148_v40, %v8147_v51  ;;  %v1636_v13 = vpop.permute.xlu1 %1635  ;;  %v1405_v52 = vpop.permute.xlu0 %1404 }
 0x2bf   :  { %v1681_v23 = vmul.f32 %v1636_v13, %v13893_v19  ;;  %v1454_v31 = vmul.f32 %v11173_v59, %v1405_v52 }
 0x2c0   :  { %v8150_v18 = vpop.f32.mrb[4].mxu1 }
 0x2c1   :  { %v8151_v60 = vpop.f32.mrb[5].mxu1  ;;  %2449 = vmatmul.mubr.f32.gmra.mrb[14].mxu0 %v1454_v31  ;;  %2599 = vmatmul.mubr.f32.gmra.mrb[96].mxu1 %v1681_v23 }
 0x2c2   :  { %v14436_v33 = vadd.f32 %v8151_v60, %v8150_v18  ;;  %v1822_v48 = vpop.permute.xlu1 %1821  ;;  %v1754_v4 = vpop.permute.xlu0 %1753  ;;  %v11178_v18 = vld [vmem:[#allocation5 + $0x60] sm:$0xff] }
 0x2c3   :  { %v1899_v56 = vmul.f32 %v1822_v48, %v14017_v14  ;;  %v1795_v53 = vmul.f32 %v11176_v32, %v1754_v4 }
 0x2c4   :  { %v8153_v12 = vpop.f32.mrb[6].mxu1 }
 0x2c5   :  { %v8154_v26 = vpop.f32.mrb[7].mxu1  ;;  %2603 = vmatprep.mubr.f32.mxu1 %v1795_v53  ;;  %8899 = vmatprep.mubr.f32.mxu0 %v1899_v56 }
 0x2c6   :  { %v14439_v25 = vadd.f32 %v8154_v26, %v8153_v12  ;;  %v1827_v19 = vpop.permute.xlu1 %1826  ;;  %v1641_v59 = vpop.permute.xlu0 %1640 }
 0x2c7   :  { %v1900_v22 = vmul.f32 %v1827_v19, %v14033_v38  ;;  %v1682_v15 = vmul.f32 %v1641_v59, %v13908_v16 }
 0x2c8   :  { %v8156_v36 = vpop.f32.mrb[8].mxu1 }
 0x2c9   :  { %v8157_v62 = vpop.f32.mrb[9].mxu1  ;;  %2604 = vmatmul.mubr.f32.gmra.mrb[98].mxu1 %v1682_v15  ;;  %8900 = vmatmul.mubr.f32.vlgmr.msra.gmra.mrb[16].mxu0 %v1900_v22  ;;  %v11179_v15 = vld [vmem:[#allocation5 + $0x68] sm:$0xff] }
 0x2ca   :  { %v14443_v29 = vadd.f32 %v8157_v62, %v8156_v36  ;;  %v1832_v14 = vpop.permute.xlu1 %1831  ;;  %v1759_v30 = vpop.permute.xlu0 %1758 }
 0x2cb   :  { %v1901_v27 = vmul.f32 %v1832_v14, %v14048_v7  ;;  %v1796_v43 = vmul.f32 %v11177_v46, %v1759_v30 }
 0x2cc   :  { %v8159_v55 = vpop.f32.mrb[10].mxu1 }
 0x2cd   :  { %v8160_v39 = vpop.f32.mrb[11].mxu1  ;;  %2608 = vmatprep.mubr.f32.mxu1 %v1796_v43  ;;  %8902 = vmatprep.mubr.f32.mxu0 %v1901_v27 }
 0x2ce   :  { %v14446_v37 = vadd.f32 %v8160_v39, %v8159_v55  ;;  %v1837_v38 = vpop.permute.xlu1 %1836  ;;  %v1646_v16 = vpop.permute.xlu0 %1645 }
 0x2cf   :  { %v1902_v44 = vmul.f32 %v1837_v38, %v14063_v2  ;;  %v1683_v51 = vmul.f32 %v1646_v16, %v13923_v8 }
 0x2d0   :  { %v8162_v40 = vpop.f32.mrb[12].mxu1 }
 0x2d1   :  { %v8163_v13 = vpop.f32.mrb[13].mxu1  ;;  %2609 = vmatmul.mubr.f32.gmra.mrb[100].mxu1 %v1683_v51  ;;  %8903 = vmatmul.mubr.f32.gmra.mrb[18].mxu0 %v1902_v44 }
 0x2d2   :  { %v14450_v52 = vadd.f32 %v8163_v13, %v8162_v40  ;;  %v1842_v7 = vpop.permute.xlu1 %1841  ;;  %v1764_v23 = vpop.permute.xlu0 %1763 }
 0x2d3   :  { %v1903_v31 = vmul.f32 %v1842_v7, %v14078_v20  ;;  %v1797_v60 = vmul.f32 %v11178_v18, %v1764_v23 }
 0x2d4   :  { %v8165_v48 = vpop.f32.mrb[14].mxu1 }
 0x2d5   :  { %v8166_v4 = vpop.f32.mrb[15].mxu1  ;;  %2613 = vmatprep.mubr.f32.mxu1 %v1797_v60  ;;  %8905 = vmatprep.mubr.f32.mxu0 %v1903_v31 }
 0x2d6   :  { %v14453_v56 = vadd.f32 %v8166_v4, %v8165_v48  ;;  %v1847_v2 = vpop.permute.xlu1 %1846  ;;  %v1651_v8 = vpop.permute.xlu0 %1650 }
 0x2d7   :  { %v1904_v32 = vmul.f32 %v1847_v2, %v14093_v57  ;;  %v1684_v53 = vmul.f32 %v1651_v8, %v13938_v6 }
 0x2d8   :  { %v8168_v12 = vpop.f32.mrb[16].mxu1 }
 0x2d9   :  { %v8169_v26 = vpop.f32.mrb[17].mxu1  ;;  %2614 = vmatmul.mubr.f32.gmra.mrb[102].mxu1 %v1684_v53  ;;  %8906 = vmatmul.mubr.f32.gmra.mrb[20].mxu0 %v1904_v32 }
 0x2da   :  { %v14457_v19 = vadd.f32 %v8169_v26, %v8168_v12  ;;  %v1852_v20 = vpop.permute.xlu1 %1851  ;;  %v1769_v59 = vpop.permute.xlu0 %1768 }
 0x2db   :  { %v1905_v22 = vmul.f32 %v1852_v20, %v14114_v41  ;;  %v1798_v36 = vmul.f32 %v11179_v15, %v1769_v59 }
 0x2dc   :  { %v8171_v62 = vpop.f32.mrb[18].mxu1 }
 0x2dd   :  { %v8172_v14 = vpop.f32.mrb[19].mxu1  ;;  %2618 = vmatprep.mubr.f32.mxu1 %v1798_v36  ;;  %8908 = vmatprep.mubr.f32.mxu0 %v1905_v22 }
 0x2de   :  { %v14460_v30 = vadd.f32 %v8172_v14, %v8171_v62  ;;  %v1857_v57 = vpop.permute.xlu1 %1856  ;;  %v1656_v6 = vpop.permute.xlu0 %1655 }
 0x2df   :  { %v1906_v27 = vmul.f32 %v1857_v57, %v14129_v61  ;;  %v1685_v46 = vmul.f32 %v1656_v6, %v13951_v47 }
 0x2e0   :  { %v8174_v43 = vpop.f32.mrb[20].mxu1 }
 0x2e1   :  { %v8175_v55 = vpop.f32.mrb[21].mxu1  ;;  %2619 = vmatmul.mubr.f32.gmra.mrb[104].mxu1 %v1685_v46  ;;  %8909 = vmatmul.mubr.f32.gmra.mrb[22].mxu0 %v1906_v27 }
 0x2e2   :  { %v14464_v39 = vadd.f32 %v8175_v55, %v8174_v43  ;;  %v1862_v41 = vpop.permute.xlu1 %1861  ;;  %v1774_v38 = vpop.permute.xlu0 %1773 }
 0x2e3   :  { %v1907_v16 = vmul.f32 %v1862_v41, %v14142_v35  ;;  %v1799_v44 = vmul.f32 %v14356_v5, %v1774_v38 }
 0x2e4   :  { %v8177_v51 = vpop.f32.mrb[22].mxu1 }
 0x2e5   :  { %v8178_v40 = vpop.f32.mrb[23].mxu1  ;;  %2623 = vmatprep.mubr.f32.mxu1 %v1799_v44  ;;  %8911 = vmatprep.mubr.f32.mxu0 %v1907_v16 }
 0x2e6   :  { %v14468_v13 = vadd.f32 %v8178_v40, %v8177_v51  ;;  %v1867_v61 = vpop.permute.xlu1 %1866  ;;  %v1661_v47 = vpop.permute.xlu0 %1660 }
 0x2e7   :  { %v1908_v7 = vmul.f32 %v1867_v61, %v14155_v58  ;;  %v1686_v23 = vmul.f32 %v1661_v47, %v13965_v54 }
 0x2e8   :  { %v8180_v31 = vpop.f32.mrb[24].mxu1 }
 0x2e9   :  { %v8181_v18 = vpop.f32.mrb[25].mxu1  ;;  %2624 = vmatmul.mubr.f32.gmra.mrb[106].mxu1 %v1686_v23  ;;  %8912 = vmatmul.mubr.f32.gmra.mrb[24].mxu0 %v1908_v7 }
 0x2ea   :  { %v14472_v60 = vadd.f32 %v8181_v18, %v8180_v31  ;;  %v1872_v35 = vpop.permute.xlu1 %1871  ;;  %v1779_v5 = vpop.permute.xlu0 %1778 }
 0x2eb   :  { %v1909_v48 = vmul.f32 %v1872_v35, %v14168_v63  ;;  %v1800_v4 = vmul.f32 %v14366_v24, %v1779_v5 }
 0x2ec   :  { %v8183_v2 = vpop.f32.mrb[26].mxu1 }
 0x2ed   :  { %v8184_v8 = vpop.f32.mrb[27].mxu1  ;;  %2628 = vmatprep.mubr.f32.mxu1 %v1800_v4  ;;  %8914 = vmatprep.mubr.f32.mxu0 %v1909_v48 }
 0x2ee   :  { %v14476_v32 = vadd.f32 %v8184_v8, %v8183_v2  ;;  %v1877_v58 = vpop.permute.xlu1 %1876  ;;  %v1666_v54 = vpop.permute.xlu0 %1665 }
 0x2ef   :  { %v1910_v53 = vmul.f32 %v1877_v58, %v14181_v17  ;;  %v1687_v12 = vmul.f32 %v1666_v54, %v13652_v49 }
 0x2f0   :  { %v8186_v26 = vpop.f32.mrb[28].mxu1 }
 0x2f1   :  { %v8187_v20 = vpop.f32.mrb[29].mxu1  ;;  %2629 = vmatmul.mubr.f32.gmra.mrb[108].mxu1 %v1687_v12  ;;  %8915 = vmatmul.mubr.f32.gmra.mrb[26].mxu0 %v1910_v53 }
 0x2f2   :  { %v14480_v59 = vadd.f32 %v8187_v20, %v8186_v26  ;;  %v1882_v63 = vpop.permute.xlu1 %1881  ;;  %v1784_v24 = vpop.permute.xlu0 %1783 }
 0x2f3   :  { %v1911_v22 = vmul.f32 %v1882_v63, %v14194_v42  ;;  %v1801_v15 = vmul.f32 %v14378_v21, %v1784_v24 }
 0x2f4   :  { %v8189_v36 = vpop.f32.mrb[30].mxu1 }
 0x2f5   :  { %v8190_v62 = vpop.f32.mrb[31].mxu1  ;;  %2633 = vmatprep.mubr.f32.mxu1 %v1801_v15  ;;  %8917 = vmatprep.mubr.f32.mxu0 %v1911_v22 }
 0x2f6   :  { %v14484_v14 = vadd.f32 %v8190_v62, %v8189_v36  ;;  %v1887_v17 = vpop.permute.xlu1 %1886  ;;  %v1671_v49 = vpop.permute.xlu0 %1670 }
 0x2f7   :  { %v1912_v57 = vmul.f32 %v1887_v17, %v14208_v50  ;;  %v1688_v6 = vmul.f32 %v1671_v49, %v13684_v34 }
 0x2f8   :  { %v8224_v27 = vpop.f32.mrb[32].mxu1 }
 0x2f9   :  { %v8225_v46 = vpop.f32.mrb[33].mxu1  ;;  %2634 = vmatmul.mubr.f32.gmra.mrb[110].mxu1 %v1688_v6  ;;  %8918 = vmatmul.mubr.f32.gmra.mrb[28].mxu0 %v1912_v57 }
 0x2fa   :  { %v8226_v43 = vadd.f32 %v8225_v46, %v8224_v27  ;;  %v1897_v42 = vpop.permute.xlu1 %1896  ;;  %v1892_v55 = vpop.permute.xlu0 %1891 }
 0x2fb   :  { %v1914_v21 = vmul.f32 %v1897_v42, %v13995_v28  ;;  %v1913_v41 = vmul.f32 %v1892_v55, %v13982_v11 }
 0x2fc   :  { %v14491_v38 = vadd.f32 %v8226_v43, %v14430_v9  ;;  %v8227_v16 = vpop.f32.mrb[34].mxu1 }
 0x2fd   :  { %v8228_v44 = vpop.f32.mrb[35].mxu1  ;;  %8920 = vmatprep.mubr.f32.mxu0 %v1913_v41 }
 0x2fe   :  { %v8229_v50 = vadd.f32 %v8228_v44, %v8227_v16  ;;  %8921 = vmatmul.mubr.f32.gmra.mrb[30].mxu0 %v1914_v21 }
 0x300   :  { %v14494_v34 = vadd.f32 %v8229_v50, %v14433_v10  ;;  %v8230_v51 = vpop.f32.mrb[36].mxu1 }
 0x301   :  { %v8231_v40 = vpop.f32.mrb[37].mxu1 }
 0x302   :  { %v8232_v61 = vadd.f32 %v8231_v40, %v8230_v51 }
 0x304   :  { %v14497_v47 = vadd.f32 %v8232_v61, %v14436_v33  ;;  %v8233_v28 = vpop.f32.mrb[38].mxu1 }
 0x305   :  { %v8234_v7 = vpop.f32.mrb[39].mxu1 }
 0x306   :  { %v8235_v11 = vadd.f32 %v8234_v7, %v8233_v28 }
 0x308   :  { %v14500_v9 = vadd.f32 %v8235_v11, %v14439_v25  ;;  %v8236_v23 = vpop.f32.mrb[40].mxu1 }
 0x309   :  { %v8237_v31 = vpop.f32.mrb[41].mxu1 }
 0x30a   :  { %v8238_v18 = vadd.f32 %v8237_v31, %v8236_v23 }
 0x30c   :  { %v14503_v35 = vadd.f32 %v8238_v18, %v14443_v29  ;;  %v8239_v10 = vpop.f32.mrb[42].mxu1 }
 0x30d   :  { %v8240_v5 = vpop.f32.mrb[43].mxu1 }
 0x30e   :  { %v8241_v48 = vadd.f32 %v8240_v5, %v8239_v10 }
 0x310   :  { %v14506_v4 = vadd.f32 %v8241_v48, %v14446_v37  ;;  %v8242_v33 = vpop.f32.mrb[44].mxu1 }
 0x311   :  { %v8243_v2 = vpop.f32.mrb[45].mxu1 }
 0x312   :  { %v8244_v8 = vadd.f32 %v8243_v2, %v8242_v33 }
 0x314   :  { %v14509_v58 = vadd.f32 %v8244_v8, %v14450_v52  ;;  %v8245_v25 = vpop.f32.mrb[46].mxu1 }
 0x315   :  { %v8246_v54 = vpop.f32.mrb[47].mxu1 }
 0x316   :  { %v8247_v53 = vadd.f32 %v8246_v54, %v8245_v25 }
 0x318   :  { %v14512_v12 = vadd.f32 %v8247_v53, %v14453_v56  ;;  %v8248_v29 = vpop.f32.mrb[48].mxu1 }
 0x319   :  { %v8249_v26 = vpop.f32.mrb[49].mxu1 }
 0x31a   :  { %v8250_v20 = vadd.f32 %v8249_v26, %v8248_v29 }
 0x31c   :  { %v2311_v63 = vadd.f32 %v8250_v20, %v14457_v19  ;;  %v8251_v24 = vpop.f32.mrb[50].mxu1 }
 0x31d   :  { %v8252_v37 = vpop.f32.mrb[51].mxu1 }
 0x31e   :  { %v8253_v22 = vadd.f32 %v8252_v37, %v8251_v24 }
 0x320   :  { %v2316_v15 = vadd.f32 %v8253_v22, %v14460_v30  ;;  %v8254_v36 = vpop.f32.mrb[52].mxu1 }
 0x321   :  { %v8255_v62 = vpop.f32.mrb[53].mxu1 }
 0x322   :  { %v8256_v52 = vadd.f32 %v8255_v62, %v8254_v36 }
 0x324   :  { %v2321_v17 = vadd.f32 %v8256_v52, %v14464_v39  ;;  %v8257_v49 = vpop.f32.mrb[54].mxu1 }
 0x325   :  { %v8258_v57 = vpop.f32.mrb[55].mxu1 }
 0x326   :  { %v8259_v6 = vadd.f32 %v8258_v57, %v8257_v49 }
 0x328   :  { %v2326_v56 = vadd.f32 %v8259_v6, %v14468_v13  ;;  %v8260_v27 = vpop.f32.mrb[56].mxu1 }
 0x329   :  { %v8261_v46 = vpop.f32.mrb[57].mxu1 }
 0x32a   :  { %v8262_v43 = vadd.f32 %v8261_v46, %v8260_v27  ;;  %v2930_v46 = vld [vmem:[#allocation7 + $0x20] sm:$0xff] }
 0x32b   :  { %8993 = vmatprep.mubr.f32.mxu0 %v2930_v46 }
 0x32c   :  { %v2331_v19 = vadd.f32 %v8262_v43, %v14472_v60  ;;  %v8263_v42 = vpop.f32.mrb[58].mxu1 }
 0x32d   :  { %v8264_v55 = vpop.f32.mrb[59].mxu1 }
 0x32e   :  { %v8265_v21 = vadd.f32 %v8264_v55, %v8263_v42 }
 0x330   :  { %v2336_v30 = vadd.f32 %v8265_v21, %v14476_v32  ;;  %v8266_v41 = vpop.f32.mrb[60].mxu1 }
 0x331   :  { %v8267_v16 = vpop.f32.mrb[61].mxu1 }
 0x332   :  { %v8268_v44 = vadd.f32 %v8267_v16, %v8266_v41 }
 0x334   :  { %v2341_v39 = vadd.f32 %v8268_v44, %v14480_v59  ;;  %v8269_v50 = vpop.f32.mrb[62].mxu1 }
 0x335   :  { %v8270_v51 = vpop.f32.mrb[63].mxu1 }
 0x336   :  { %v8271_v40 = vadd.f32 %v8270_v51, %v8269_v50 }
 0x338   :  { %v2346_v13 = vadd.f32 %v8271_v40, %v14484_v14  ;;  %v8328_v61 = vpop.f32.mrb[64].mxu1 }
 0x339   :  { %v8329_v28 = vpop.f32.mrb[65].mxu1 }
 0x33a   :  { %v8330_v7 = vadd.f32 %v8329_v28, %v8328_v61  ;;  %v2832_v61 = vld [vmem:[#allocation7] sm:$0xff] }
 0x33b   :  { %8955 = vmatprep.mubr.f32.mxu1 %v2832_v61 }
 0x33c   :  { %v14522_v11 = vadd.f32 %v8330_v7, %v2311_v63  ;;  %v8331_v60 = vpop.f32.mrb[66].mxu1 }
 0x33d   :  { %v8332_v23 = vpop.f32.mrb[67].mxu1 }
 0x33e   :  { %v8333_v31 = vadd.f32 %v8332_v23, %v8331_v60 }
 0x340   :  { %v14524_v18 = vadd.f32 %v8333_v31, %v2316_v15  ;;  %v8334_v32 = vpop.f32.mrb[68].mxu1 }
 0x341   :  { %v8335_v10 = vpop.f32.mrb[69].mxu1 }
 0x342   :  { %v8336_v5 = vadd.f32 %v8335_v10, %v8334_v32 }
 0x344   :  { %v14526_v48 = vadd.f32 %v8336_v5, %v2321_v17  ;;  %v8337_v59 = vpop.f32.mrb[70].mxu1 }
 0x345   :  { %v8338_v33 = vpop.f32.mrb[71].mxu1 }
 0x346   :  { %v8339_v2 = vadd.f32 %v8338_v33, %v8337_v59 }
 0x348   :  { %v14528_v8 = vadd.f32 %v8339_v2, %v2326_v56  ;;  %v8340_v14 = vpop.f32.mrb[72].mxu1 }
 0x349   :  { %v8341_v25 = vpop.f32.mrb[73].mxu1 }
 0x34a   :  { %v8342_v54 = vadd.f32 %v8341_v25, %v8340_v14 }
 0x34c   :  { %v14530_v53 = vadd.f32 %v8342_v54, %v2331_v19  ;;  %v8343_v29 = vpop.f32.mrb[74].mxu1 }
 0x34d   :  { %v8344_v26 = vpop.f32.mrb[75].mxu1 }
 0x34e   :  { %v8345_v20 = vadd.f32 %v8344_v26, %v8343_v29 }
 0x350   :  { %v14532_v63 = vadd.f32 %v8345_v20, %v2336_v30  ;;  %v8346_v24 = vpop.f32.mrb[76].mxu1 }
 0x351   :  { %v8347_v37 = vpop.f32.mrb[77].mxu1 }
 0x352   :  { %v8348_v22 = vadd.f32 %v8347_v37, %v8346_v24 }
 0x354   :  { %v14534_v15 = vadd.f32 %v8348_v22, %v2341_v39  ;;  %v8349_v36 = vpop.f32.mrb[78].mxu1 }
 0x355   :  { %v8350_v62 = vpop.f32.mrb[79].mxu1 }
 0x356   :  { %v8351_v52 = vadd.f32 %v8350_v62, %v8349_v36 }
 0x358   :  { %v14536_v17 = vadd.f32 %v8351_v52, %v2346_v13  ;;  %v8384_v49 = vpop.f32.mrb[80].mxu1 }
 0x359   :  { %v8385_v57 = vpop.f32.mrb[81].mxu1 }
 0x35a   :  { %v8386_v6 = vadd.f32 %v8385_v57, %v8384_v49 }
 0x35c   :  { %v8304_v56 = vpop.f32.mrb[0].mxu0  ;;  %v8387_v27 = vpop.f32.mrb[82].mxu1 }
 0x35d   :  { %v8305_v43 = vpop.f32.mrb[1].mxu0  ;;  %v8388_v19 = vpop.f32.mrb[83].mxu1 }
 0x35e   :  { %v8306_v42 = vadd.f32 %v8305_v43, %v8304_v56  ;;  %v8389_v55 = vadd.f32 %v8388_v19, %v8387_v27 }
 0x360   :  { %v2416_v21 = vadd.f32 %v8306_v42, %v14491_v38 }
 0x362   :  { %v14539_v30 = vadd.f32 %v8386_v6, %v2416_v21 }
 0x364   :  { %v8307_v41 = vpop.f32.mrb[2].mxu0  ;;  %v8390_v16 = vpop.f32.mrb[84].mxu1 }
 0x365   :  { %v8308_v44 = vpop.f32.mrb[3].mxu0  ;;  %v8391_v39 = vpop.f32.mrb[85].mxu1 }
 0x366   :  { %v8309_v50 = vadd.f32 %v8308_v44, %v8307_v41  ;;  %v8392_v51 = vadd.f32 %v8391_v39, %v8390_v16 }
 0x368   :  { %v2421_v40 = vadd.f32 %v8309_v50, %v14494_v34 }
 0x36a   :  { %v2566_v13 = vadd.f32 %v8389_v55, %v2421_v40 }
 0x36c   :  { %v8310_v28 = vpop.f32.mrb[4].mxu0  ;;  %v8393_v7 = vpop.f32.mrb[86].mxu1 }
 0x36d   :  { %v8311_v60 = vpop.f32.mrb[5].mxu0  ;;  %v8394_v23 = vpop.f32.mrb[87].mxu1 }
 0x36e   :  { %v8312_v31 = vadd.f32 %v8311_v60, %v8310_v28  ;;  %v8395_v32 = vadd.f32 %v8394_v23, %v8393_v7 }
 0x370   :  { %v2426_v38 = vadd.f32 %v8312_v31, %v14497_v47 }
 0x372   :  { %v14543_v10 = vadd.f32 %v8392_v51, %v2426_v38 }
 0x374   :  { %v8313_v5 = vpop.f32.mrb[6].mxu0  ;;  %v8396_v59 = vpop.f32.mrb[88].mxu1 }
 0x375   :  { %v8314_v33 = vpop.f32.mrb[7].mxu0  ;;  %v8397_v2 = vpop.f32.mrb[89].mxu1 }
 0x376   :  { %v8315_v14 = vadd.f32 %v8314_v33, %v8313_v5  ;;  %v8398_v25 = vadd.f32 %v8397_v2, %v8396_v59 }
 0x378   :  { %v2431_v34 = vadd.f32 %v8315_v14, %v14500_v9 }
 0x37a   :  { %v2576_v54 = vadd.f32 %v8395_v32, %v2431_v34 }
 0x37c   :  { %v8316_v29 = vpop.f32.mrb[8].mxu0  ;;  %v8399_v26 = vpop.f32.mrb[90].mxu1 }
 0x37d   :  { %v8317_v20 = vpop.f32.mrb[9].mxu0  ;;  %v8400_v24 = vpop.f32.mrb[91].mxu1 }
 0x37e   :  { %v8318_v37 = vadd.f32 %v8317_v20, %v8316_v29  ;;  %v8401_v22 = vadd.f32 %v8400_v24, %v8399_v26 }
 0x380   :  { %v2436_v36 = vadd.f32 %v8318_v37, %v14503_v35 }
 0x382   :  { %v14547_v47 = vadd.f32 %v8398_v25, %v2436_v36 }
 0x384   :  { %v8319_v62 = vpop.f32.mrb[10].mxu0  ;;  %v8402_v52 = vpop.f32.mrb[92].mxu1 }
 0x385   :  { %v8320_v49 = vpop.f32.mrb[11].mxu0  ;;  %v8403_v57 = vpop.f32.mrb[93].mxu1 }
 0x386   :  { %v8321_v6 = vadd.f32 %v8320_v49, %v8319_v62  ;;  %v8404_v56 = vadd.f32 %v8403_v57, %v8402_v52 }
 0x388   :  { %v2441_v27 = vadd.f32 %v8321_v6, %v14506_v4 }
 0x38a   :  { %v2586_v9 = vadd.f32 %v8401_v22, %v2441_v27 }
 0x38c   :  { %v8322_v46 = vpop.f32.mrb[12].mxu0  ;;  %v8405_v43 = vpop.f32.mrb[94].mxu1 }
 0x38d   :  { %v8323_v19 = vpop.f32.mrb[13].mxu0  ;;  %v8406_v42 = vpop.f32.mrb[95].mxu1 }
 0x38e   :  { %v8324_v55 = vadd.f32 %v8323_v19, %v8322_v46  ;;  %v8407_v21 = vadd.f32 %v8406_v42, %v8405_v43 }
 0x390   :  { %v2446_v41 = vadd.f32 %v8324_v55, %v14509_v58 }
 0x392   :  { %v14551_v35 = vadd.f32 %v8404_v56, %v2446_v41 }
 0x394   :  { %v8325_v16 = vpop.f32.mrb[14].mxu0  ;;  %v8408_v44 = vpop.f32.mrb[96].mxu1 }
 0x395   :  { %v8326_v39 = vpop.f32.mrb[15].mxu0  ;;  %v8409_v50 = vpop.f32.mrb[97].mxu1 }
 0x396   :  { %v8327_v51 = vadd.f32 %v8326_v39, %v8325_v16  ;;  %v8410_v40 = vadd.f32 %v8409_v50, %v8408_v44 }
 0x398   :  { %v2451_v61 = vadd.f32 %v8327_v51, %v14512_v12  ;;  %v14555_v4 = vadd.f32 %v8410_v40, %v14522_v11 }
 0x39a   :  { %v2596_v28 = vadd.f32 %v8407_v21, %v2451_v61 }
 0x39c   :  { %v8411_v7 = vpop.f32.mrb[98].mxu1  ;;  %v8901_v60 = vpop.f32.mrb[16].mxu0 }
 0x39d   :  { %v2711_v23 = vadd.f32 %v8901_v60, %v2566_v13  ;;  %v8412_v31 = vpop.f32.mrb[99].mxu1  ;;  %v2705_v32 = vpop.f32.mrb[17].mxu0 }
 0x39e   :  { %v8413_v58 = vadd.f32 %v8412_v31, %v8411_v7  ;;  %v2706_v38 = vadd.f32 %v2705_v32, %v14539_v30 }
 0x39f   :  { %vm2785_vm2 = vcmp.ge.f32.partialorder %v2711_v23, 0.0  ;;  %v2801_v5 = vmul.f32 0.2, %v2711_v23 }
 0x3a0   :  { %vm2784_vm3 = vcmp.ge.f32.partialorder %v2706_v38, 0.0  ;;  %v2800_v59 = vmul.f32 0.2, %v2706_v38  ;;  %v14559_v33 = vadd.f32 %v8413_v58, %v14524_v18 }
 0x3a1   :  { %v2817_v12 = vsel %vm2785_vm2, %v2711_v23, %v2801_v5  ;;  %vm3028_vm2 = vcmask 523264  }
 0x3a2   :  { %v2816_v2 = vsel %vm2784_vm3, %v2706_v38, %v2800_v59 }
 0x3a3   :  { %v14561_v11 = vpack.c.bf16 %v2817_v12, %v2816_v2 }
 0x3a4   :  { %v8414_v14 = vpop.f32.mrb[100].mxu1  ;;  %v8904_v25 = vpop.f32.mrb[18].mxu0 }
 0x3a5   :  { %v2721_v34 = vadd.f32 %v8904_v25, %v2576_v54  ;;  %v8415_v13 = vpop.f32.mrb[101].mxu1  ;;  %v2715_v29 = vpop.f32.mrb[19].mxu0  ;;  %9723 = vmatprep.subr.bf16.mxu1 %v14561_v11  ;;  %9755 = vmatprep.subr.bf16.mxu0 %v14561_v11 }
 0x3a6   :  { %v8416_v30 = vadd.f32 %v8415_v13, %v8414_v14  ;;  %v2716_v26 = vadd.f32 %v2715_v29, %v14543_v10  ;;  %9725 = vmatpush3.bf16.msra.mxu1 %v14561_v11  ;;  %9757 = vmatpush3.bf16.msra.mxu0 %v14561_v11 }
 0x3a7   :  { %vm2787_vm4 = vcmp.ge.f32.partialorder %v2721_v34, 0.0  ;;  %v2803_v18 = vmul.f32 0.2, %v2721_v34 }
 0x3a8   :  { %vm2786_vm5 = vcmp.ge.f32.partialorder %v2716_v26, 0.0  ;;  %v2802_v20 = vmul.f32 0.2, %v2716_v26  ;;  %v14569_v24 = vadd.f32 %v8416_v30, %v14526_v48 }
 0x3a9   :  { %v2819_v54 = vsel %vm2787_vm4, %v2721_v34, %v2803_v18 }
 0x3aa   :  { %v2818_v37 = vsel %vm2786_vm5, %v2716_v26, %v2802_v20 }
 0x3ab   :  { %v14571_v22 = vpack.c.bf16 %v2819_v54, %v2818_v37 }
 0x3ac   :  { %v8417_v36 = vpop.f32.mrb[102].mxu1  ;;  %v8907_v62 = vpop.f32.mrb[20].mxu0 }
 0x3ad   :  { %v2731_v52 = vadd.f32 %v8907_v62, %v2586_v9  ;;  %v8418_v49 = vpop.f32.mrb[103].mxu1  ;;  %v2725_v10 = vpop.f32.mrb[21].mxu0  ;;  %9727 = vmatprep.subr.bf16.mxu1 %v14571_v22  ;;  %9759 = vmatprep.subr.bf16.mxu0 %v14571_v22 }
 0x3ae   :  { %v8419_v57 = vadd.f32 %v8418_v49, %v8417_v36  ;;  %v2726_v6 = vadd.f32 %v2725_v10, %v14547_v47  ;;  %9729 = vmatpush3.bf16.msra.mxu1 %v14571_v22  ;;  %9761 = vmatpush3.bf16.msra.mxu0 %v14571_v22 }
 0x3af   :  { %vm2789_vm6 = vcmp.ge.f32.partialorder %v2731_v52, 0.0  ;;  %v2805_v48 = vmul.f32 0.2, %v2731_v52 }
 0x3b0   :  { %vm2788_vm7 = vcmp.ge.f32.partialorder %v2726_v6, 0.0  ;;  %v2804_v56 = vmul.f32 0.2, %v2726_v6  ;;  %v2616_v27 = vadd.f32 %v8419_v57, %v14528_v8 }
 0x3b1   :  { %v2821_v9 = vsel %vm2789_vm6, %v2731_v52, %v2805_v48 }
 0x3b2   :  { %v2820_v46 = vsel %vm2788_vm7, %v2726_v6, %v2804_v56 }
 0x3b3   :  { %v14579_v43 = vpack.c.bf16 %v2821_v9, %v2820_v46 }
 0x3b4   :  { %v8420_v19 = vpop.f32.mrb[104].mxu1  ;;  %v8910_v42 = vpop.f32.mrb[22].mxu0 }
 0x3b5   :  { %v2741_v55 = vadd.f32 %v8910_v42, %v2596_v28  ;;  %v8421_v21 = vpop.f32.mrb[105].mxu1  ;;  %v2735_v41 = vpop.f32.mrb[23].mxu0  ;;  %9731 = vmatprep.subr.bf16.mxu1 %v14579_v43  ;;  %9763 = vmatprep.subr.bf16.mxu0 %v14579_v43 }
 0x3b6   :  { %v8422_v47 = vadd.f32 %v8421_v21, %v8420_v19  ;;  %v2736_v16 = vadd.f32 %v2735_v41, %v14551_v35  ;;  %9733 = vmatpush3.bf16.msra.mxu1 %v14579_v43  ;;  %9765 = vmatpush3.bf16.msra.mxu0 %v14579_v43  ;;  %v2931_v41 = vld [vmem:[#allocation7 + $0x28] sm:$0xff] }
 0x3b7   :  { %vm2791_vm8 = vcmp.ge.f32.partialorder %v2741_v55, 0.0  ;;  %v2807_v8 = vmul.f32 0.2, %v2741_v55 }
 0x3b8   :  { %vm2790_vm9 = vcmp.ge.f32.partialorder %v2736_v16, 0.0  ;;  %v2806_v44 = vmul.f32 0.2, %v2736_v16  ;;  %v2621_v39 = vadd.f32 %v8422_v47, %v14530_v53  ;;  %v2833_v47 = vld [vmem:[#allocation7 + $0x8] sm:$0xff] }
 0x3b9   :  { %v2823_v50 = vsel %vm2791_vm8, %v2741_v55, %v2807_v8  ;;  %v2834_v8 = vld [vmem:[#allocation7 + $0x10] sm:$0xff] }
 0x3ba   :  { %v2822_v51 = vsel %vm2790_vm9, %v2736_v16, %v2806_v44  ;;  %v2932_v16 = vld [vmem:[#allocation7 + $0x30] sm:$0xff]  ;;  %v2933_v44 = vld [vmem:[#allocation7 + $0x38] sm:$0xff] }
 0x3bb   :  { %v14587_v40 = vpack.c.bf16 %v2823_v50, %v2822_v51  ;;  %v3224_v50 = vld [vmem:[#allocation7 + $0x40] sm:$0xff]  ;;  %v3225_v51 = vld [vmem:[#allocation7 + $0x48] sm:$0xff] }
 0x3bc   :  { %v8423_v61 = vpop.f32.mrb[106].mxu1  ;;  %v8913_v28 = vpop.f32.mrb[24].mxu0 }
 0x3bd   :  { %v2751_v7 = vadd.f32 %v8913_v28, %v14559_v33  ;;  %v8424_v60 = vpop.f32.mrb[107].mxu1  ;;  %v2745_v35 = vpop.f32.mrb[25].mxu0  ;;  %9735 = vmatprep.subr.bf16.mxu1 %v14587_v40  ;;  %9767 = vmatprep.subr.bf16.mxu0 %v14587_v40  ;;  %v7995_v28 = vld [vmem:[%s15686_s4 + $0x48] sm:$0xff] }
 0x3be   :  { %v8425_v23 = vadd.f32 %v8424_v60, %v8423_v61  ;;  %v2746_v31 = vadd.f32 %v2745_v35, %v14555_v4  ;;  %9737 = vmatpush3.bf16.msra.mxu1 %v14587_v40  ;;  %9769 = vmatpush3.bf16.msra.mxu0 %v14587_v40  ;;  %v7994_v61 = vld [vmem:[%s15686_s4 + $0x40] sm:$0xff]  ;;  %v3226_v60 = vld [vmem:[#allocation7 + $0x50] sm:$0xff] }
 0x3bf   :  { %vm2793_vm10 = vcmp.ge.f32.partialorder %v2751_v7, 0.0  ;;  %v2809_v53 = vmul.f32 0.2, %v2751_v7  ;;  %v9786_v35 = vpack.c.bf16 %v7995_v28, %v7994_v61  ;;  %v8014_v61 = vld [vmem:[%s15686_s4 + $0xa0] sm:$0xff]  ;;  %v8015_v28 = vld [vmem:[%s15686_s4 + $0xa8] sm:$0xff] }
 0x3c0   :  { %vm2792_vm11 = vcmp.ge.f32.partialorder %v2746_v31, 0.0  ;;  %v2808_v32 = vmul.f32 0.2, %v2746_v31  ;;  %v2626_v58 = vadd.f32 %v8425_v23, %v14532_v63  ;;  %v7997_v23 = vld [vmem:[%s15686_s4 + $0x58] sm:$0xff] }
 0x3c1   :  { %v2825_v38 = vsel %vm2793_vm10, %v2751_v7, %v2809_v53  ;;  %v7996_v7 = vld [vmem:[%s15686_s4 + $0x50] sm:$0xff]  ;;  %v7998_v53 = vld [vmem:[%s15686_s4 + $0x60] sm:$0xff] }
 0x3c2   :  { %v2824_v5 = vsel %vm2792_vm11, %v2746_v31, %v2808_v32  ;;  %v9790_v31 = vpack.c.bf16 %v7997_v23, %v7996_v7  ;;  %v7999_v32 = vld [vmem:[%s15686_s4 + $0x68] sm:$0xff]  ;;  %v9858_v7 = vpack.c.bf16 %v8015_v28, %v8014_v61 }
 0x3c3   :  { %v14596_v59 = vpack.c.bf16 %v2825_v38, %v2824_v5  ;;  %v3624_v38 = vld [vmem:[#allocation7 + $0x80] sm:$0xff]  ;;  %v9794_v5 = vpack.c.bf16 %v7999_v32, %v7998_v53 }
 0x3c4   :  { %v8426_v33 = vpop.f32.mrb[108].mxu1  ;;  %v8916_v12 = vpop.f32.mrb[26].mxu0 }
 0x3c5   :  { %v2761_v2 = vadd.f32 %v8916_v12, %v2616_v27  ;;  %v8427_v14 = vpop.f32.mrb[109].mxu1  ;;  %v2755_v25 = vpop.f32.mrb[27].mxu0  ;;  %9739 = vmatprep.subr.bf16.mxu1 %v14596_v59  ;;  %9771 = vmatprep.subr.bf16.mxu0 %v14596_v59  ;;  %v8001_v12 = vld [vmem:[%s15686_s4 + $0x78] sm:$0xff] }
 0x3c6   :  { %v8428_v4 = vadd.f32 %v8427_v14, %v8426_v33  ;;  %v2756_v34 = vadd.f32 %v2755_v25, %v14569_v24  ;;  %9741 = vmatpush3.bf16.msra.mxu1 %v14596_v59  ;;  %9773 = vmatpush3.bf16.msra.mxu0 %v14596_v59  ;;  %v8000_v33 = vld [vmem:[%s15686_s4 + $0x70] sm:$0xff]  ;;  %v3625_v14 = vld [vmem:[#allocation7 + $0x88] sm:$0xff] }
 0x3c7   :  { %vm2795_vm12 = vcmp.ge.f32.partialorder %v2761_v2, 0.0  ;;  %v2811_v63 = vmul.f32 0.2, %v2761_v2  ;;  %v3626_v25 = vld [vmem:[#allocation7 + $0x90] sm:$0xff] }
 0x3c8   :  { %vm2794_vm13 = vcmp.ge.f32.partialorder %v2756_v34, 0.0  ;;  %v2810_v13 = vmul.f32 0.2, %v2756_v34  ;;  %v2631_v29 = vadd.f32 %v8428_v4, %v14534_v15  ;;  %v3627_v4 = vld [vmem:[#allocation7 + $0x98] sm:$0xff] }
 0x3c9   :  { %v2827_v30 = vsel %vm2795_vm12, %v2761_v2, %v2811_v63  ;;  %v9798_v2 = vpack.c.bf16 %v8001_v12, %v8000_v33  ;;  %v2921_v63 = vld [vmem:[%s15686_s4] sm:$0xff]  ;;  %v8023_v33 = vld [vmem:[%s15686_s4 + $0xc8] sm:$0xff] }
 0x3ca   :  { %v2826_v26 = vsel %vm2794_vm13, %v2756_v34, %v2810_v13  ;;  %v3824_v34 = vld [vmem:[#allocation7 + $0xa0] sm:$0xff]  ;;  %v2922_v13 = vld [vmem:[%s15686_s4 + $0x8] sm:$0xff] }
 0x3cb   :  { %v14604_v18 = vpack.c.bf16 %v2827_v30, %v2826_v26  ;;  %v3825_v30 = vld [vmem:[#allocation7 + $0xa8] sm:$0xff]  ;;  %v3826_v26 = vld [vmem:[#allocation7 + $0xb0] sm:$0xff] }
 0x3cc   :  { %v8429_v20 = vpop.f32.mrb[110].mxu1  ;;  %v8919_v54 = vpop.f32.mrb[28].mxu0 }
 0x3cd   :  { %v2771_v37 = vadd.f32 %v8919_v54, %v2626_v58  ;;  %v8430_v36 = vpop.f32.mrb[111].mxu1  ;;  %v2765_v62 = vpop.f32.mrb[29].mxu0  ;;  %9743 = vmatprep.subr.bf16.mxu1 %v14604_v18  ;;  %9775 = vmatprep.subr.bf16.mxu0 %v14604_v18  ;;  %v3227_v58 = vld [vmem:[#allocation7 + $0x58] sm:$0xff]  ;;  %v4024_v54 = vld [vmem:[#allocation7 + $0xc0] sm:$0xff] }
 0x3ce   :  { %v8431_v24 = vadd.f32 %v8430_v36, %v8429_v20  ;;  %v2766_v52 = vadd.f32 %v2765_v62, %v2621_v39  ;;  %9745 = vmatpush3.bf16.msra.mxu1 %v14604_v18  ;;  %9777 = vmatpush3.bf16.msra.mxu0 %v14604_v18  ;;  %v2835_v39 = vld [vmem:[#allocation7 + $0x18] sm:$0xff]  ;;  %v4026_v36 = vld [vmem:[#allocation7 + $0xd0] sm:$0xff] }
 0x3cf   :  { %vm2797_vm14 = vcmp.ge.f32.partialorder %v2771_v37, 0.0  ;;  %v2813_v15 = vmul.f32 0.2, %v2771_v37  ;;  %v3827_v20 = vld [vmem:[#allocation7 + $0xb8] sm:$0xff] }
 0x3d0   :  { %vm2796_vm15 = vcmp.ge.f32.partialorder %v2766_v52, 0.0  ;;  %v2812_v49 = vmul.f32 0.2, %v2766_v52  ;;  %v2636_v10 = vadd.f32 %v8431_v24, %v14536_v17  ;;  %v4027_v62 = vld [vmem:[#allocation7 + $0xd8] sm:$0xff]  ;;  %v2923_v24 = vld [vmem:[%s15686_s4 + $0x10] sm:$0xff] }
 0x3d1   :  { %v2829_v57 = vsel %vm2797_vm14, %v2771_v37, %v2813_v15  ;;  %v8922_v6 = vpop.f32.mrb[30].mxu0  ;;  %v4025_v37 = vld [vmem:[#allocation7 + $0xc8] sm:$0xff] }
 0x3d2   :  { %v2828_v48 = vsel %vm2796_vm15, %v2766_v52, %v2812_v49  ;;  %v2781_v56 = vadd.f32 %v8922_v6, %v2636_v10  ;;  %v2775_v27 = vpop.f32.mrb[31].mxu0  ;;  %v2924_v52 = vld [vmem:[%s15686_s4 + $0x18] sm:$0xff] }
 0x3d3   :  { %v14611_v9 = vpack.c.bf16 %v2829_v57, %v2828_v48  ;;  %v2776_v46 = vadd.f32 %v2775_v27, %v2631_v29  ;;  %v14696_v29 = vpack.c.bf16 %v2922_v13, %v2921_v63  ;;  %v9806_v57 = vpack.c.bf16 %v2924_v52, %v2923_v24  ;;  %v2925_v48 = vld [vmem:[%s15686_s4 + $0x20] sm:$0xff]  ;;  %v8035_v24 = vld [vmem:[%s15686_s4 + $0x108] sm:$0xff] }
 0x3d4   :  { %vm2799_vm0 = vcmp.ge.f32.partialorder %v2781_v56, 0.0  ;;  %v2815_v19 = vmul.f32 0.2, %v2781_v56 }
 0x3d5   :  { %vm2798_vm1 = vcmp.ge.f32.partialorder %v2776_v46, 0.0  ;;  %v2814_v42 = vmul.f32 0.2, %v2776_v46  ;;  %9747 = vmatprep.subr.bf16.mxu1 %v14611_v9  ;;  %9779 = vmatprep.subr.bf16.mxu0 %v14611_v9 }
 0x3d6   :  { %v2831_v55 = vsel %vm2799_vm0, %v2781_v56, %v2815_v19  ;;  %9749 = vmatpush3.bf16.msra.mxu1 %v14611_v9  ;;  %9781 = vmatpush3.bf16.msra.mxu0 %v14611_v9  ;;  %v2926_v56 = vld [vmem:[%s15686_s4 + $0x28] sm:$0xff] }
 0x3d7   :  { %v2830_v17 = vsel %vm2798_vm1, %v2776_v46, %v2814_v42  ;;  %v9810_v19 = vpack.c.bf16 %v2926_v56, %v2925_v48 }
 0x3d8   :  { %v14617_v21 = vpack.c.bf16 %v2831_v55, %v2830_v17  ;;  %v2927_v17 = vld [vmem:[%s15686_s4 + $0x30] sm:$0xff] }
 0x3da   :  { %9751 = vmatprep.subr.bf16.mxu1 %v14617_v21  ;;  %9783 = vmatprep.subr.bf16.mxu0 %v14617_v21 }
 0x3db   :  { %9753 = vmatpush3.bf16.msra.mxu1 %v14617_v21  ;;  %9785 = vmatpush3.bf16.msra.mxu0 %v14617_v21 }
 0x3dc   :  { %9819 = vmatprep.subr.bf16.mxu0 %v14561_v11  ;;  %9787 = vmatprep.subr.bf16.mxu1 %v9786_v35 }
 0x3de   :  { %8994 = vmatmul.mubr.f32.vlgmr.msra.gmra.mrb[32].mxu0 %v2931_v41  ;;  %8956 = vmatmul.mubr.f32.vlgmr.msra.gmra.mrb[112].mxu1 %v2833_v47  ;;  %v2928_v41 = vld [vmem:[%s15686_s4 + $0x38] sm:$0xff] }
 0x3df   :  { %9821 = vmatpush3.bf16.msra.mxu0 %v14561_v11  ;;  %8996 = vmatprep.mubr.f32.mxu0 %v2932_v16  ;;  %v9814_v47 = vpack.c.bf16 %v2928_v41, %v2927_v17  ;;  %v8010_v16 = vld [vmem:[%s15686_s4 + $0x80] sm:$0xff]  ;;  %v4426_v17 = vld [vmem:[#allocation7 + $0x110] sm:$0xff]  ;;  %v4427_v41 = vld [vmem:[#allocation7 + $0x118] sm:$0xff] }
 0x3e0   :  { %9823 = vmatprep.subr.bf16.mxu0 %v14571_v22  ;;  %8958 = vmatprep.mubr.f32.mxu1 %v2834_v8  ;;  %v8011_v8 = vld [vmem:[%s15686_s4 + $0x88] sm:$0xff] }
 0x3e1   :  { %9789 = vmatpush3.bf16.msra.mxu1 %v9786_v35  ;;  %v8017_v35 = vld [vmem:[%s15686_s4 + $0xb8] sm:$0xff] }
 0x3e2   :  { %8997 = vmatmul.mubr.f32.gmra.mrb[34].mxu0 %v2933_v44  ;;  %8959 = vmatmul.mubr.f32.gmra.mrb[114].mxu1 %v2835_v39  ;;  %v9850_v44 = vpack.c.bf16 %v8011_v8, %v8010_v16  ;;  %v8012_v39 = vld [vmem:[%s15686_s4 + $0x90] sm:$0xff]  ;;  %v8037_v16 = vld [vmem:[%s15686_s4 + $0x118] sm:$0xff] }
 0x3e3   :  { %9825 = vmatpush3.bf16.msra.mxu0 %v14571_v22  ;;  %9075 = vmatprep.mubr.f32.mxu0 %v3224_v50  ;;  %v8013_v50 = vld [vmem:[%s15686_s4 + $0x98] sm:$0xff] }
 0x3e4   :  { %9827 = vmatprep.subr.bf16.mxu0 %v14579_v43  ;;  %9791 = vmatprep.subr.bf16.mxu1 %v9790_v31 }
 0x3e5   :  { %9793 = vmatpush3.bf16.msra.mxu1 %v9790_v31 }
 0x3e6   :  { %9795 = vmatprep.subr.bf16.mxu1 %v9794_v5 }
 0x3e7   :  { %9829 = vmatpush3.bf16.msra.mxu0 %v14579_v43 }
 0x3e8   :  { %9831 = vmatprep.subr.bf16.mxu0 %v14587_v40 }
 0x3e9   :  { %9797 = vmatpush3.bf16.msra.mxu1 %v9794_v5  ;;  %v8022_v5 = vld [vmem:[%s15686_s4 + $0xc0] sm:$0xff] }
 0x3ea   :  { %9799 = vmatprep.subr.bf16.mxu1 %v9798_v2  ;;  %v9898_v12 = vpack.c.bf16 %v8023_v33, %v8022_v5  ;;  %v8050_v33 = vld [vmem:[%s15686_s4 + $0x160] sm:$0xff] }
 0x3eb   :  { %9833 = vmatpush3.bf16.msra.mxu0 %v14587_v40 }
 0x3ec   :  { %9835 = vmatprep.subr.bf16.mxu0 %v14596_v59 }
 0x3ed   :  { %9801 = vmatpush3.bf16.msra.mxu1 %v9798_v2  ;;  %v8024_v2 = vld [vmem:[%s15686_s4 + $0xd0] sm:$0xff] }
 0x3ee   :  { %9803 = vmatprep.subr.bf16.mxu1 %v14696_v29 }
 0x3ef   :  { %9837 = vmatpush3.bf16.msra.mxu0 %v14596_v59 }
 0x3f0   :  { %9839 = vmatprep.subr.bf16.mxu0 %v14604_v18 }
 0x3f3   :  { %9841 = vmatpush3.bf16.msra.mxu0 %v14604_v18 }
 0x3f4   :  { %9843 = vmatprep.subr.bf16.mxu0 %v14611_v9 }
 0x3f7   :  { %9845 = vmatpush3.bf16.msra.mxu0 %v14611_v9 }
 0x3f8   :  { %9847 = vmatprep.subr.bf16.mxu0 %v14617_v21 }
 0x3fb   :  { %9849 = vmatpush3.bf16.msra.mxu0 %v14617_v21 }
 0x3fc   :  { %9915 = vmatprep.subr.bf16.mxu0 %v14561_v11 }
 0x3fe   :  { %9076 = vmatmul.mubr.f32.vlgmr.msra.gmra.mrb[36].mxu0 %v3225_v51  ;;  %v9854_v51 = vpack.c.bf16 %v8013_v50, %v8012_v39  ;;  %v8038_v50 = vld [vmem:[%s15686_s4 + $0x120] sm:$0xff] }
 0x3ff   :  { %9917 = vmatpush3.bf16.msra.mxu0 %v14561_v11  ;;  %9078 = vmatprep.mubr.f32.mxu0 %v3226_v60  ;;  %v8016_v60 = vld [vmem:[%s15686_s4 + $0xb0] sm:$0xff] }
 0x400   :  { %9919 = vmatprep.subr.bf16.mxu0 %v14571_v22  ;;  %v9862_v23 = vpack.c.bf16 %v8017_v35, %v8016_v60  ;;  %v8040_v60 = vld [vmem:[%s15686_s4 + $0x130] sm:$0xff]  ;;  %v8041_v35 = vld [vmem:[%s15686_s4 + $0x138] sm:$0xff] }
 0x402   :  { %9079 = vmatmul.mubr.f32.gmra.mrb[38].mxu0 %v3227_v58 }
 0x403   :  { %9921 = vmatpush3.bf16.msra.mxu0 %v14571_v22  ;;  %9195 = vmatprep.mubr.f32.mxu0 %v3624_v38  ;;  %v3424_v38 = vld [vmem:[#allocation7 + $0x60] sm:$0xff] }
 0x404   :  { %9923 = vmatprep.subr.bf16.mxu0 %v14579_v43 }
 0x407   :  { %9925 = vmatpush3.bf16.msra.mxu0 %v14579_v43 }
 0x408   :  { %9927 = vmatprep.subr.bf16.mxu0 %v14587_v40 }
 0x40b   :  { %9929 = vmatpush3.bf16.msra.mxu0 %v14587_v40 }
 0x40c   :  { %9931 = vmatprep.subr.bf16.mxu0 %v14596_v59 }
 0x40f   :  { %9933 = vmatpush3.bf16.msra.mxu0 %v14596_v59 }
 0x410   :  { %9935 = vmatprep.subr.bf16.mxu0 %v14604_v18 }
 0x413   :  { %9937 = vmatpush3.bf16.msra.mxu0 %v14604_v18 }
 0x414   :  { %9939 = vmatprep.subr.bf16.mxu0 %v14611_v9 }
 0x417   :  { %9941 = vmatpush3.bf16.msra.mxu0 %v14611_v9 }
 0x418   :  { %9943 = vmatprep.subr.bf16.mxu0 %v14617_v21 }
 0x41b   :  { %9945 = vmatpush3.bf16.msra.mxu0 %v14617_v21 }
 0x41c   :  { %9963 = vmatprep.subr.bf16.mxu0 %v14561_v11 }
 0x41e   :  { %9196 = vmatmul.mubr.f32.vlgmr.msra.gmra.mrb[40].mxu0 %v3625_v14  ;;  %v8025_v14 = vld [vmem:[%s15686_s4 + $0xd8] sm:$0xff] }
 0x41f   :  { %9965 = vmatpush3.bf16.msra.mxu0 %v14561_v11  ;;  %9198 = vmatprep.mubr.f32.mxu0 %v3626_v25  ;;  %v3425_v25 = vld [vmem:[#allocation7 + $0x68] sm:$0xff]  ;;  %v9902_v13 = vpack.c.bf16 %v8025_v14, %v8024_v2  ;;  %v8052_v14 = vld [vmem:[%s15686_s4 + $0x170] sm:$0xff] }
 0x420   :  { %9967 = vmatprep.subr.bf16.mxu0 %v14571_v22 }
 0x422   :  { %9199 = vmatmul.mubr.f32.gmra.mrb[42].mxu0 %v3627_v4 }
 0x423   :  { %9969 = vmatpush3.bf16.msra.mxu0 %v14571_v22  ;;  %9255 = vmatprep.mubr.f32.mxu0 %v3824_v34  ;;  %v3426_v34 = vld [vmem:[#allocation7 + $0x70] sm:$0xff] }
 0x424   :  { %9971 = vmatprep.subr.bf16.mxu0 %v14579_v43 }
 0x427   :  { %9973 = vmatpush3.bf16.msra.mxu0 %v14579_v43 }
 0x428   :  { %9975 = vmatprep.subr.bf16.mxu0 %v14587_v40 }
 0x42b   :  { %9977 = vmatpush3.bf16.msra.mxu0 %v14587_v40 }
 0x42c   :  { %9979 = vmatprep.subr.bf16.mxu0 %v14596_v59 }
 0x42f   :  { %9981 = vmatpush3.bf16.msra.mxu0 %v14596_v59 }
 0x430   :  { %9983 = vmatprep.subr.bf16.mxu0 %v14604_v18 }
 0x433   :  { %9985 = vmatpush3.bf16.msra.mxu0 %v14604_v18 }
 0x434   :  { %9987 = vmatprep.subr.bf16.mxu0 %v14611_v9 }
 0x437   :  { %9989 = vmatpush3.bf16.msra.mxu0 %v14611_v9 }
 0x438   :  { %9991 = vmatprep.subr.bf16.mxu0 %v14617_v21 }
 0x43b   :  { %9993 = vmatpush3.bf16.msra.mxu0 %v14617_v21 }
 0x43c   :  { %10011 = vmatprep.subr.bf16.mxu0 %v14561_v11 }
 0x43e   :  { %9256 = vmatmul.mubr.f32.vlgmr.msra.gmra.mrb[44].mxu0 %v3825_v30  ;;  %v8027_v30 = vld [vmem:[%s15686_s4 + $0xe8] sm:$0xff] }
 0x43f   :  { %10013 = vmatpush3.bf16.msra.mxu0 %v14561_v11  ;;  %9258 = vmatprep.mubr.f32.mxu0 %v3826_v26  ;;  %v3427_v26 = vld [vmem:[#allocation7 + $0x78] sm:$0xff] }
 0x440   :  { %10015 = vmatprep.subr.bf16.mxu0 %v14571_v22 }
 0x442   :  { %9259 = vmatmul.mubr.f32.gmra.mrb[46].mxu0 %v3827_v20 }
 0x443   :  { %10017 = vmatpush3.bf16.msra.mxu0 %v14571_v22  ;;  %9315 = vmatprep.mubr.f32.mxu0 %v4024_v54  ;;  %v8028_v54 = vld [vmem:[%s15686_s4 + $0xf0] sm:$0xff] }
 0x444   :  { %10019 = vmatprep.subr.bf16.mxu0 %v14579_v43 }
 0x447   :  { %10021 = vmatpush3.bf16.msra.mxu0 %v14579_v43 }
 0x448   :  { %10023 = vmatprep.subr.bf16.mxu0 %v14587_v40 }
 0x44b   :  { %10025 = vmatpush3.bf16.msra.mxu0 %v14587_v40 }
 0x44c   :  { %10027 = vmatprep.subr.bf16.mxu0 %v14596_v59 }
 0x44f   :  { %10029 = vmatpush3.bf16.msra.mxu0 %v14596_v59 }
 0x450   :  { %10031 = vmatprep.subr.bf16.mxu0 %v14604_v18 }
 0x453   :  { %10033 = vmatpush3.bf16.msra.mxu0 %v14604_v18 }
 0x454   :  { %10035 = vmatprep.subr.bf16.mxu0 %v14611_v9 }
 0x457   :  { %10037 = vmatpush3.bf16.msra.mxu0 %v14611_v9 }
 0x458   :  { %10039 = vmatprep.subr.bf16.mxu0 %v14617_v21 }
 0x45b   :  { %10041 = vmatpush3.bf16.msra.mxu0 %v14617_v21 }
 0x45c   :  { %10107 = vmatprep.subr.bf16.mxu0 %v14561_v11 }
 0x45e   :  { %9316 = vmatmul.mubr.f32.vlgmr.msra.gmra.mrb[48].mxu0 %v4025_v37  ;;  %v8029_v37 = vld [vmem:[%s15686_s4 + $0xf8] sm:$0xff] }
 0x45f   :  { %10109 = vmatpush3.bf16.msra.mxu0 %v14561_v11  ;;  %9318 = vmatprep.mubr.f32.mxu0 %v4026_v36  ;;  %v9910_v36 = vpack.c.bf16 %v8029_v37, %v8028_v54  ;;  %v8063_v54 = vld [vmem:[%s15686_s4 + $0x1a8] sm:$0xff] }
 0x460   :  { %10111 = vmatprep.subr.bf16.mxu0 %v14571_v22 }
 0x462   :  { %9319 = vmatmul.mubr.f32.gmra.mrb[50].mxu0 %v4027_v62  ;;  %v8034_v62 = vld [vmem:[%s15686_s4 + $0x100] sm:$0xff] }
 0x463   :  { %10113 = vmatpush3.bf16.msra.mxu0 %v14571_v22  ;;  %v9946_v52 = vpack.c.bf16 %v8035_v24, %v8034_v62  ;;  %v8065_v62 = vld [vmem:[%s15686_s4 + $0x1b8] sm:$0xff] }
 0x464   :  { %10115 = vmatprep.subr.bf16.mxu0 %v14579_v43 }
 0x467   :  { %10117 = vmatpush3.bf16.msra.mxu0 %v14579_v43 }
 0x468   :  { %10119 = vmatprep.subr.bf16.mxu0 %v14587_v40 }
 0x46b   :  { %10121 = vmatpush3.bf16.msra.mxu0 %v14587_v40 }
 0x46c   :  { %10123 = vmatprep.subr.bf16.mxu0 %v14596_v59 }
 0x46f   :  { %10125 = vmatpush3.bf16.msra.mxu0 %v14596_v59 }
 0x470   :  { %10127 = vmatprep.subr.bf16.mxu0 %v14604_v18 }
 0x473   :  { %10129 = vmatpush3.bf16.msra.mxu0 %v14604_v18 }
 0x474   :  { %10131 = vmatprep.subr.bf16.mxu0 %v14611_v9 }
 0x477   :  { %10133 = vmatpush3.bf16.msra.mxu0 %v14611_v9 }
 0x478   :  { %10135 = vmatprep.subr.bf16.mxu0 %v14617_v21 }
 0x47b   :  { %10137 = vmatpush3.bf16.msra.mxu0 %v14617_v21 }
 0x4b1   :  { %v8995_v15 = vpop.f32.mrb[32].mxu0  ;;  %v8957_v49 = vpop.f32.mrb[112].mxu1 }
 0x4b2   :  { %v3000_v10 = vpop.f32.mrb[33].mxu0  ;;  %v2902_v6 = vpop.f32.mrb[113].mxu1 }
 0x4b3   :  { %9015 = vmatprep.mubr.msk.f32.mxu1 %vm3028_vm2, %v3000_v10 }
 0x4b4   :  { %9016 = vmatmul.mubr.msk.f32.vlgmr.msra.gmra.mrb[116].mxu1 %vm3028_vm2, %v8995_v15 }
 0x4b5   :  { %9805 = vmatpush3.bf16.msra.mxu1 %v14696_v29  ;;  %v8998_v27 = vpop.f32.mrb[34].mxu0  ;;  %v8960_v46 = vpop.f32.mrb[114].mxu1  ;;  %v8026_v29 = vld [vmem:[%s15686_s4 + $0xe0] sm:$0xff] }
 0x4b6   :  { %9807 = vmatprep.subr.bf16.mxu1 %v9806_v57  ;;  %v3010_v42 = vpop.f32.mrb[35].mxu0  ;;  %v2912_v55 = vpop.f32.mrb[115].mxu1  ;;  %v9906_v20 = vpack.c.bf16 %v8027_v30, %v8026_v29  ;;  %v8060_v29 = vld [vmem:[%s15686_s4 + $0x190] sm:$0xff]  ;;  %v8061_v30 = vld [vmem:[%s15686_s4 + $0x198] sm:$0xff] }
 0x4b7   :  { %9018 = vmatprep.mubr.msk.f32.mxu1 %vm3028_vm2, %v3010_v42  ;;  %v4424_v42 = vld [vmem:[#allocation7 + $0x100] sm:$0xff] }
 0x4b8   :  { %9019 = vmatmul.mubr.msk.f32.gmra.mrb[118].mxu1 %vm3028_vm2, %v8998_v27  ;;  %9435 = vmatprep.mubr.f32.mxu0 %v4424_v42 }
 0x4b9   :  { %9809 = vmatpush3.bf16.msra.mxu1 %v9806_v57  ;;  %9037 = vmatprep.mubr.msk.f32.mxu1 %vm3028_vm2, %v2902_v6 }
 0x4ba   :  { %9811 = vmatprep.subr.bf16.mxu1 %v9810_v19 }
 0x4bd   :  { %9813 = vmatpush3.bf16.msra.mxu1 %v9810_v19 }
 0x4be   :  { %9815 = vmatprep.subr.bf16.mxu1 %v9814_v47 }
 0x4c1   :  { %9817 = vmatpush3.bf16.msra.mxu1 %v9814_v47  ;;  %v8036_v47 = vld [vmem:[%s15686_s4 + $0x110] sm:$0xff] }
 0x4c2   :  { %9851 = vmatprep.subr.bf16.mxu1 %v9850_v44  ;;  %v9950_v39 = vpack.c.bf16 %v8037_v16, %v8036_v47  ;;  %v8084_v47 = vld [vmem:[%s15686_s4 + $0x210] sm:$0xff]  ;;  %v8085_v16 = vld [vmem:[%s15686_s4 + $0x218] sm:$0xff] }
 0x4c4   :  { %9038 = vmatmul.mubr.msk.f32.vlgmr.msra.gmra.mrb[116].mxu1 %vm3028_vm2, %v8957_v49 }
 0x4c5   :  { %9853 = vmatpush3.bf16.msra.mxu1 %v9850_v44  ;;  %9040 = vmatprep.mubr.msk.f32.mxu1 %vm3028_vm2, %v2912_v55  ;;  %v4425_v55 = vld [vmem:[#allocation7 + $0x108] sm:$0xff] }
 0x4c6   :  { %9855 = vmatprep.subr.bf16.mxu1 %v9854_v51  ;;  %9436 = vmatmul.mubr.f32.vlgmr.msra.gmra.mrb[52].mxu0 %v4425_v55 }
 0x4c7   :  { %9438 = vmatprep.mubr.f32.mxu0 %v4426_v17 }
 0x4c8   :  { %9041 = vmatmul.mubr.msk.f32.gmra.mrb[118].mxu1 %vm3028_vm2, %v8960_v46 }
 0x4c9   :  { %9857 = vmatpush3.bf16.msra.mxu1 %v9854_v51  ;;  %v8039_v51 = vld [vmem:[%s15686_s4 + $0x128] sm:$0xff] }
 0x4ca   :  { %9859 = vmatprep.subr.bf16.mxu1 %v9858_v7  ;;  %9439 = vmatmul.mubr.f32.gmra.mrb[54].mxu0 %v4427_v41 }
 0x4cd   :  { %9861 = vmatpush3.bf16.msra.mxu1 %v9858_v7  ;;  %v9954_v7 = vpack.c.bf16 %v8039_v51, %v8038_v50  ;;  %v8086_v50 = vld [vmem:[%s15686_s4 + $0x220] sm:$0xff]  ;;  %v8087_v51 = vld [vmem:[%s15686_s4 + $0x228] sm:$0xff] }
 0x4ce   :  { %9863 = vmatprep.subr.bf16.mxu1 %v9862_v23 }
 0x4d1   :  { %9865 = vmatpush3.bf16.msra.mxu1 %v9862_v23  ;;  %v9077_v31 = vpop.f32.mrb[36].mxu0  ;;  %v9958_v23 = vpack.c.bf16 %v8041_v35, %v8040_v60  ;;  %v8088_v60 = vld [vmem:[%s15686_s4 + $0x230] sm:$0xff]  ;;  %v8089_v35 = vld [vmem:[%s15686_s4 + $0x238] sm:$0xff] }
 0x4d2   :  { %9867 = vmatprep.subr.bf16.mxu1 %v14561_v11  ;;  %v3294_v53 = vpop.f32.mrb[37].mxu0 }
 0x4d3   :  { %9097 = vmatprep.mubr.msk.f32.mxu1 %vm3028_vm2, %v3294_v53  ;;  %v8047_v53 = vld [vmem:[%s15686_s4 + $0x148] sm:$0xff] }
 0x4d4   :  { %9098 = vmatmul.mubr.msk.f32.vlgmr.msra.gmra.mrb[116].mxu1 %vm3028_vm2, %v9077_v31  ;;  %v8046_v31 = vld [vmem:[%s15686_s4 + $0x140] sm:$0xff] }
 0x4d5   :  { %9869 = vmatpush3.bf16.msra.mxu1 %v14561_v11  ;;  %v9080_v32 = vpop.f32.mrb[38].mxu0 }
 0x4d6   :  { %9871 = vmatprep.subr.bf16.mxu1 %v14571_v22  ;;  %v3304_v58 = vpop.f32.mrb[39].mxu0 }
 0x4d7   :  { %9100 = vmatprep.mubr.msk.f32.mxu1 %vm3028_vm2, %v3304_v58  ;;  %v8048_v58 = vld [vmem:[%s15686_s4 + $0x150] sm:$0xff] }
 0x4d8   :  { %9101 = vmatmul.mubr.msk.f32.gmra.mrb[118].mxu1 %vm3028_vm2, %v9080_v32  ;;  %v9994_v32 = vpack.c.bf16 %v8047_v53, %v8046_v31 }
 0x4d9   :  { %9873 = vmatpush3.bf16.msra.mxu1 %v14571_v22  ;;  %9135 = vmatprep.mubr.f32.mxu1 %v3424_v38  ;;  %v8049_v38 = vld [vmem:[%s15686_s4 + $0x158] sm:$0xff] }
 0x4da   :  { %9875 = vmatprep.subr.bf16.mxu1 %v14579_v43  ;;  %v9998_v5 = vpack.c.bf16 %v8049_v38, %v8048_v58 }
 0x4dd   :  { %9877 = vmatpush3.bf16.msra.mxu1 %v14579_v43 }
 0x4de   :  { %9879 = vmatprep.subr.bf16.mxu1 %v14587_v40 }
 0x4e1   :  { %9881 = vmatpush3.bf16.msra.mxu1 %v14587_v40 }
 0x4e2   :  { %9883 = vmatprep.subr.bf16.mxu1 %v14596_v59 }
 0x4e5   :  { %9885 = vmatpush3.bf16.msra.mxu1 %v14596_v59 }
 0x4e6   :  { %9887 = vmatprep.subr.bf16.mxu1 %v14604_v18 }
 0x4e9   :  { %9889 = vmatpush3.bf16.msra.mxu1 %v14604_v18 }
 0x4ea   :  { %9891 = vmatprep.subr.bf16.mxu1 %v14611_v9 }
 0x4ed   :  { %9893 = vmatpush3.bf16.msra.mxu1 %v14611_v9 }
 0x4ee   :  { %9895 = vmatprep.subr.bf16.mxu1 %v14617_v21 }
 0x4f1   :  { %9897 = vmatpush3.bf16.msra.mxu1 %v14617_v21  ;;  %v14819_v4 = vpop.f32.mrb[40].mxu0 }
 0x4f2   :  { %9899 = vmatprep.subr.bf16.mxu1 %v9898_v12  ;;  %v3694_v63 = vpop.f32.mrb[41].mxu0 }
 0x4f4   :  { %9136 = vmatmul.mubr.f32.vlgmr.msra.gmra.mrb[120].mxu1 %v3425_v25  ;;  %v8053_v25 = vld [vmem:[%s15686_s4 + $0x178] sm:$0xff] }
 0x4f5   :  { %9138 = vmatprep.mubr.f32.mxu1 %v3426_v34  ;;  %9901 = vmatpush3.bf16.msra.mxu1 %v9898_v12  ;;  %v9200_v15 = vpop.f32.mrb[42].mxu0  ;;  %v8051_v12 = vld [vmem:[%s15686_s4 + $0x168] sm:$0xff]  ;;  %v8058_v34 = vld [vmem:[%s15686_s4 + $0x180] sm:$0xff] }
 0x4f6   :  { %9903 = vmatprep.subr.bf16.mxu1 %v9902_v13  ;;  %v3704_v49 = vpop.f32.mrb[43].mxu0  ;;  %v10002_v2 = vpack.c.bf16 %v8051_v12, %v8050_v33 }
 0x4f8   :  { %9139 = vmatmul.mubr.f32.gmra.mrb[122].mxu1 %v3427_v26  ;;  %v10046_v26 = vpack.c.bf16 %v8061_v30, %v8060_v29 }
 0x4f9   :  { %9905 = vmatpush3.bf16.msra.mxu1 %v9902_v13 }
 0x4fa   :  { %9907 = vmatprep.subr.bf16.mxu1 %v9906_v20 }
 0x4fd   :  { %9909 = vmatpush3.bf16.msra.mxu1 %v9906_v20  ;;  %v8062_v20 = vld [vmem:[%s15686_s4 + $0x1a0] sm:$0xff] }
 0x4fe   :  { %9911 = vmatprep.subr.bf16.mxu1 %v9910_v36  ;;  %v10050_v37 = vpack.c.bf16 %v8063_v54, %v8062_v20 }
 0x501   :  { %9913 = vmatpush3.bf16.msra.mxu1 %v9910_v36  ;;  %v8064_v36 = vld [vmem:[%s15686_s4 + $0x1b0] sm:$0xff] }
 0x502   :  { %9947 = vmatprep.subr.bf16.mxu1 %v9946_v52  ;;  %v10054_v24 = vpack.c.bf16 %v8065_v62, %v8064_v36 }
 0x511   :  { %v14839_v10 = vpop.f32.mrb[44].mxu0 }
 0x512   :  { %v3894_v57 = vpop.f32.mrb[45].mxu0 }
 0x515   :  { %v14841_v6 = vpop.f32.mrb[46].mxu0 }
 0x516   :  { %v14843_v48 = vpop.f32.mrb[47].mxu0 }
 0x531   :  { %v14845_v56 = vpop.f32.mrb[48].mxu0 }
 0x532   :  { %v14847_v27 = vpop.f32.mrb[49].mxu0 }
 0x535   :  { %v14849_v46 = vpop.f32.mrb[50].mxu0 }
 0x536   :  { %v14851_v19 = vpop.f32.mrb[51].mxu0 }
 0x599   :  { %v9437_v42 = vpop.f32.mrb[52].mxu0 }
 0x59a   :  { %v4494_v55 = vpop.f32.mrb[53].mxu0 }
 0x59d   :  { %v9440_v17 = vpop.f32.mrb[54].mxu0 }
 0x59e   :  { %v4504_v41 = vpop.f32.mrb[55].mxu0 }
 0x5c7   :  { %v9137_v8 = vpop.f32.mrb[120].mxu1 }
 0x5c8   :  { %v3494_v44 = vpop.f32.mrb[121].mxu1 }
 0x5c9   :  { %9157 = vmatprep.mubr.msk.f32.mxu1 %vm3028_vm2, %v3494_v44 }
 0x5ca   :  { %9158 = vmatmul.mubr.msk.f32.vlgmr.msra.gmra.mrb[116].mxu1 %vm3028_vm2, %v9137_v8 }
 0x5cb   :  { %9949 = vmatpush3.bf16.msra.mxu1 %v9946_v52  ;;  %v9140_v61 = vpop.f32.mrb[122].mxu1  ;;  %v4224_v52 = vld [vmem:[#allocation7 + $0xe0] sm:$0xff] }
 0x5cc   :  { %v3504_v28 = vpop.f32.mrb[123].mxu1  ;;  %9951 = vmatprep.subr.bf16.mxu1 %v9950_v39 }
 0x5cd   :  { %9160 = vmatprep.mubr.msk.f32.mxu1 %vm3028_vm2, %v3504_v28  ;;  %v10146_v28 = vpack.c.bf16 %v8087_v51, %v8086_v50 }
 0x5ce   :  { %9161 = vmatmul.mubr.msk.f32.gmra.mrb[118].mxu1 %vm3028_vm2, %v9140_v61 }
 0x5cf   :  { %9953 = vmatpush3.bf16.msra.mxu1 %v9950_v39  ;;  %9217 = vmatprep.mubr.msk.f32.mxu1 %vm3028_vm2, %v3694_v63  ;;  %v8059_v63 = vld [vmem:[%s15686_s4 + $0x188] sm:$0xff]  ;;  %v10142_v39 = vpack.c.bf16 %v8085_v16, %v8084_v47 }
 0x5d0   :  { %9955 = vmatprep.subr.bf16.mxu1 %v9954_v7  ;;  %v10042_v13 = vpack.c.bf16 %v8059_v63, %v8058_v34 }
 0x5d3   :  { %9957 = vmatpush3.bf16.msra.mxu1 %v9954_v7 }
 0x5d4   :  { %9959 = vmatprep.subr.bf16.mxu1 %v9958_v23 }
 0x5d7   :  { %9961 = vmatpush3.bf16.msra.mxu1 %v9958_v23  ;;  %v10150_v23 = vpack.c.bf16 %v8089_v35, %v8088_v60 }
 0x5d8   :  { %9995 = vmatprep.subr.bf16.mxu1 %v9994_v32 }
 0x5da   :  { %9218 = vmatmul.mubr.msk.f32.vlgmr.msra.gmra.mrb[116].mxu1 %vm3028_vm2, %v14819_v4  ;;  %v10006_v4 = vpack.c.bf16 %v8053_v25, %v8052_v14 }
 0x5db   :  { %9220 = vmatprep.mubr.msk.f32.mxu1 %vm3028_vm2, %v3704_v49  ;;  %9997 = vmatpush3.bf16.msra.mxu1 %v9994_v32 }
 0x5dc   :  { %9999 = vmatprep.subr.bf16.mxu1 %v9998_v5 }
 0x5de   :  { %9221 = vmatmul.mubr.msk.f32.gmra.mrb[118].mxu1 %vm3028_vm2, %v9200_v15  ;;  %v4226_v15 = vld [vmem:[#allocation7 + $0xf0] sm:$0xff] }
 0x5df   :  { %10001 = vmatpush3.bf16.msra.mxu1 %v9998_v5  ;;  %9277 = vmatprep.mubr.msk.f32.mxu1 %vm3028_vm2, %v3894_v57  ;;  %v4227_v57 = vld [vmem:[#allocation7 + $0xf8] sm:$0xff] }
 0x5e0   :  { %10003 = vmatprep.subr.bf16.mxu1 %v10002_v2 }
 0x5e3   :  { %10005 = vmatpush3.bf16.msra.mxu1 %v10002_v2 }
 0x5e4   :  { %10007 = vmatprep.subr.bf16.mxu1 %v10006_v4 }
 0x5e7   :  { %10009 = vmatpush3.bf16.msra.mxu1 %v10006_v4 }
 0x5e8   :  { %10043 = vmatprep.subr.bf16.mxu1 %v10042_v13 }
 0x5ea   :  { %9278 = vmatmul.mubr.msk.f32.vlgmr.msra.gmra.mrb[116].mxu1 %vm3028_vm2, %v14839_v10  ;;  %v8075_v10 = vld [vmem:[%s15686_s4 + $0x1e8] sm:$0xff] }
 0x5eb   :  { %10045 = vmatpush3.bf16.msra.mxu1 %v10042_v13  ;;  %9280 = vmatprep.mubr.msk.f32.mxu1 %vm3028_vm2, %v14843_v48  ;;  %v8077_v48 = vld [vmem:[%s15686_s4 + $0x1f8] sm:$0xff] }
 0x5ec   :  { %10047 = vmatprep.subr.bf16.mxu1 %v10046_v26 }
 0x5ee   :  { %9281 = vmatmul.mubr.msk.f32.gmra.mrb[118].mxu1 %vm3028_vm2, %v14841_v6 }
 0x5ef   :  { %10049 = vmatpush3.bf16.msra.mxu1 %v10046_v26  ;;  %9337 = vmatprep.mubr.msk.f32.mxu1 %vm3028_vm2, %v14847_v27  ;;  %v8082_v27 = vld [vmem:[%s15686_s4 + $0x200] sm:$0xff] }
 0x5f0   :  { %10051 = vmatprep.subr.bf16.mxu1 %v10050_v37 }
 0x5f3   :  { %10053 = vmatpush3.bf16.msra.mxu1 %v10050_v37 }
 0x5f4   :  { %10055 = vmatprep.subr.bf16.mxu1 %v10054_v24 }
 0x5f7   :  { %10057 = vmatpush3.bf16.msra.mxu1 %v10054_v24 }
 0x5f8   :  { %10059 = vmatprep.subr.bf16.mxu1 %v14561_v11 }
 0x5fa   :  { %9338 = vmatmul.mubr.msk.f32.vlgmr.msra.gmra.mrb[116].mxu1 %vm3028_vm2, %v14845_v56 }
 0x5fb   :  { %10061 = vmatpush3.bf16.msra.mxu1 %v14561_v11  ;;  %9340 = vmatprep.mubr.msk.f32.mxu1 %vm3028_vm2, %v14851_v19  ;;  %v8070_v11 = vld [vmem:[%s15686_s4 + $0x1c0] sm:$0xff] }
 0x5fc   :  { %10063 = vmatprep.subr.bf16.mxu1 %v14571_v22 }
 0x5fe   :  { %9341 = vmatmul.mubr.msk.f32.gmra.mrb[118].mxu1 %vm3028_vm2, %v14849_v46  ;;  %v8083_v46 = vld [vmem:[%s15686_s4 + $0x208] sm:$0xff] }
 0x5ff   :  { %10065 = vmatpush3.bf16.msra.mxu1 %v14571_v22  ;;  %9375 = vmatprep.mubr.f32.mxu1 %v4224_v52  ;;  %v8071_v22 = vld [vmem:[%s15686_s4 + $0x1c8] sm:$0xff]  ;;  %v10138_v19 = vpack.c.bf16 %v8083_v46, %v8082_v27 }
 0x600   :  { %10067 = vmatprep.subr.bf16.mxu1 %v14579_v43 }
 0x603   :  { %10069 = vmatpush3.bf16.msra.mxu1 %v14579_v43  ;;  %v10090_v43 = vpack.c.bf16 %v8071_v22, %v8070_v11 }
 0x604   :  { %10071 = vmatprep.subr.bf16.mxu1 %v14587_v40 }
 0x607   :  { %10073 = vmatpush3.bf16.msra.mxu1 %v14587_v40  ;;  %v8072_v40 = vld [vmem:[%s15686_s4 + $0x1d0] sm:$0xff] }
 0x608   :  { %10075 = vmatprep.subr.bf16.mxu1 %v14596_v59 }
 0x60b   :  { %10077 = vmatpush3.bf16.msra.mxu1 %v14596_v59  ;;  %v8073_v59 = vld [vmem:[%s15686_s4 + $0x1d8] sm:$0xff] }
 0x60c   :  { %10079 = vmatprep.subr.bf16.mxu1 %v14604_v18  ;;  %v10094_v49 = vpack.c.bf16 %v8073_v59, %v8072_v40 }
 0x60f   :  { %10081 = vmatpush3.bf16.msra.mxu1 %v14604_v18  ;;  %v4225_v18 = vld [vmem:[#allocation7 + $0xe8] sm:$0xff] }
 0x610   :  { %10083 = vmatprep.subr.bf16.mxu1 %v14611_v9 }
 0x613   :  { %10085 = vmatpush3.bf16.msra.mxu1 %v14611_v9  ;;  %v8074_v9 = vld [vmem:[%s15686_s4 + $0x1e0] sm:$0xff] }
 0x614   :  { %10087 = vmatprep.subr.bf16.mxu1 %v14617_v21  ;;  %v10098_v6 = vpack.c.bf16 %v8075_v10, %v8074_v9 }
 0x617   :  { %10089 = vmatpush3.bf16.msra.mxu1 %v14617_v21  ;;  %v8076_v21 = vld [vmem:[%s15686_s4 + $0x1f0] sm:$0xff] }
 0x618   :  { %10091 = vmatprep.subr.bf16.mxu1 %v10090_v43  ;;  %v10102_v56 = vpack.c.bf16 %v8077_v48, %v8076_v21 }
 0x61a   :  { %9376 = vmatmul.mubr.f32.vlgmr.msra.gmra.mrb[124].mxu1 %v4225_v18 }
 0x61b   :  { %9378 = vmatprep.mubr.f32.mxu1 %v4226_v15  ;;  %10093 = vmatpush3.bf16.msra.mxu1 %v10090_v43 }
 0x61c   :  { %10095 = vmatprep.subr.bf16.mxu1 %v10094_v49 }
 0x61e   :  { %9379 = vmatmul.mubr.f32.gmra.mrb[126].mxu1 %v4227_v57 }
 0x61f   :  { %10097 = vmatpush3.bf16.msra.mxu1 %v10094_v49 }
 0x620   :  { %10099 = vmatprep.subr.bf16.mxu1 %v10098_v6 }
 0x623   :  { %10101 = vmatpush3.bf16.msra.mxu1 %v10098_v6 }
 0x624   :  { %10103 = vmatprep.subr.bf16.mxu1 %v10102_v56 }
 0x627   :  { %10105 = vmatpush3.bf16.msra.mxu1 %v10102_v56 }
 0x628   :  { %10139 = vmatprep.subr.bf16.mxu1 %v10138_v19 }
 0x6ed   :  { %v9377_v8 = vpop.f32.mrb[124].mxu1 }
 0x6ee   :  { %v4294_v44 = vpop.f32.mrb[125].mxu1 }
 0x6ef   :  { %9397 = vmatprep.mubr.msk.f32.mxu1 %vm3028_vm2, %v4294_v44 }
 0x6f0   :  { %9398 = vmatmul.mubr.msk.f32.vlgmr.msra.gmra.mrb[116].mxu1 %vm3028_vm2, %v9377_v8 }
 0x6f1   :  { %10141 = vmatpush3.bf16.msra.mxu1 %v10138_v19  ;;  %v9380_v61 = vpop.f32.mrb[126].mxu1 }
 0x6f2   :  { %10143 = vmatprep.subr.bf16.mxu1 %v10142_v39  ;;  %v4304_v7 = vpop.f32.mrb[127].mxu1 }
 0x6f3   :  { %9400 = vmatprep.mubr.msk.f32.mxu1 %vm3028_vm2, %v4304_v7 }
 0x6f4   :  { %9401 = vmatmul.mubr.msk.f32.gmra.mrb[118].mxu1 %vm3028_vm2, %v9380_v61 }
 0x6f5   :  { %10145 = vmatpush3.bf16.msra.mxu1 %v10142_v39  ;;  %9457 = vmatprep.mubr.msk.f32.mxu1 %vm3028_vm2, %v4494_v55 }
 0x6f6   :  { %10147 = vmatprep.subr.bf16.mxu1 %v10146_v28 }
 0x6f9   :  { %10149 = vmatpush3.bf16.msra.mxu1 %v10146_v28 }
 0x6fa   :  { %10151 = vmatprep.subr.bf16.mxu1 %v10150_v23 }
 0x6fd   :  { %10153 = vmatpush3.bf16.msra.mxu1 %v10150_v23 }
 0x700   :  { %9458 = vmatmul.mubr.msk.f32.vlgmr.msra.gmra.mrb[116].mxu1 %vm3028_vm2, %v9437_v42 }
 0x701   :  { %9460 = vmatprep.mubr.msk.f32.mxu1 %vm3028_vm2, %v4504_v41 }
 0x704   :  { %9461 = vmatmul.mubr.msk.f32.gmra.mrb[118].mxu1 %vm3028_vm2, %v9440_v17 }
 0x705   :  { %11443 = shalt.err (!%p11440_p6)  }
 0x706   :  { %s11444_s26 = scalar_lea.vmem %s812_s18, 65536  ;;  %p11449_p8 = scmp.lt.s32.totalorder %s812_s18, %s812_s18 }
 0x707   :  { %p11445_p7 = scmp.ne.s32.totalorder %s812_s18, %s11444_s26  ;;  %p11450_p9 = scmp.lt.s32.totalorder %s11444_s26, %s11444_s26 }
 0x709   :  { %p11451_p10 = por %p11450_p9, %p11449_p8 }
 0x70b   :  { %p11452_p11 = pnand %p11451_p10, %p11445_p7 }
 0x70d   :  { %11455 = shalt.err (!%p11452_p11)  }
 0x70e   :  { %814 = dma.hbm_to_vmem [thread:$0]  %s15694_s12, 65536, %s812_s18, [#allocation4 + $0x1]  ;;  %v8094_v10 = vld [vmem:[#allocation9] ss:$0 sm:$0xff]  ;;  %v8095_v56 = vld [vmem:[#allocation10] ss:$0 sm:$0xff] }
 0x7d3   :  { %v9459_v31 = vpop.f32.mrb[116].mxu1 }
 0x7d4   :  { %v4600_v53 = vpop.f32.mrb[117].mxu1 }
 0x7d5   :  { %v4623_v32 = vadd.f32 %v9459_v31, %v4600_v53 }
 0x7d7   :  { %v9462_v58 = vpop.f32.mrb[118].mxu1 }
 0x7d8   :  { %v4610_v38 = vpop.f32.mrb[119].mxu1 }
 0x7d9   :  { %v4624_v5 = vadd.f32 %v4623_v32, %v4610_v38 }
 0x7db   :  { %v4625_v33 = vadd.f32 %v9462_v58, %v4624_v5 }
 0x7dd   :  { %v4626_v12 = vrot.slane %v4625_v33, 4 }
 0x7df   :  { %v4627_v2 = vadd.f32 %v4626_v12, %v4625_v33 }
 0x7e1   :  { %v4628_v14 = vrot.slane %v4627_v2, 2 }
 0x7e3   :  { %v4629_v25 = vadd.f32 %v4628_v14, %v4627_v2 }
 0x7e5   :  { %v4630_v4 = vrot.slane %v4629_v25, 1 }
 0x7e7   :  { %v4631_v34 = vadd.f32 %v4630_v4, %v4629_v25 }
 0x7e9   :  { %v4632_v63 = vmul.f32 0.03125, %v4631_v34 }
 0x7eb   :  { %v4633_v13 = vsub.f32 %v4600_v53, %v4632_v63  ;;  %v4634_v29 = vsub.f32 %v9459_v31, %v4632_v63  ;;  %v4635_v30 = vsub.f32 %v4610_v38, %v4632_v63  ;;  %v4636_v26 = vsub.f32 %v9462_v58, %v4632_v63 }
 0x7ed   :  { %v4637_v20 = vmul.f32 %v4633_v13, %v4633_v13  ;;  %v4638_v54 = vmul.f32 %v4634_v29, %v4634_v29  ;;  %v4639_v37 = vmul.f32 %v4635_v30, %v4635_v30  ;;  %v4640_v62 = vmul.f32 %v4636_v26, %v4636_v26 }
 0x7ef   :  { %v4641_v36 = vadd.f32 %v4638_v54, %v4637_v20 }
 0x7f1   :  { %v4642_v24 = vadd.f32 %v4641_v36, %v4639_v37 }
 0x7f3   :  { %v4643_v52 = vadd.f32 %v4642_v24, %v4640_v62 }
 0x7f5   :  { %v4644_v11 = vrot.slane %v4643_v52, 4 }
 0x7f7   :  { %v4645_v22 = vadd.f32 %v4644_v11, %v4643_v52 }
 0x7f9   :  { %v4646_v43 = vrot.slane %v4645_v22, 2 }
 0x7fb   :  { %v4647_v40 = vadd.f32 %v4646_v43, %v4645_v22 }
 0x7fd   :  { %v4648_v59 = vrot.slane %v4647_v40, 1 }
 0x7ff   :  { %v4649_v18 = vadd.f32 %v4648_v59, %v4647_v40 }
 0x801   :  { %v4650_v15 = vmul.f32 0.03125, %v4649_v18 }
 0x803   :  { %v4651_v49 = vadd.f32 1e-05, %v4650_v15 }
 0x805   :  { %11162 = vrsqrt.f32 %v4651_v49 }
 0x80f   :  { %v11163_v9 = vpop.eup %11162 }
 0x810   :  { %v4653_v57 = vmul.f32 %v11163_v9, %v4633_v13  ;;  %v4654_v6 = vmul.f32 %v11163_v9, %v4634_v29  ;;  %v4655_v21 = vmul.f32 %v11163_v9, %v4635_v30  ;;  %v4656_v48 = vmul.f32 %v11163_v9, %v4636_v26 }
 0x812   :  { %v4664_v27 = vmul.f32 %v8094_v10, %v4653_v57  ;;  %v4665_v46 = vmul.f32 %v8094_v10, %v4654_v6  ;;  %v4666_v19 = vmul.f32 %v8094_v10, %v4655_v21  ;;  %v4667_v42 = vmul.f32 %v8094_v10, %v4656_v48 }
 0x814   :  { %v4675_v55 = vadd.f32 %v8095_v56, %v4664_v27  ;;  %v4676_v17 = vadd.f32 %v8095_v56, %v4665_v46  ;;  %v4677_v41 = vadd.f32 %v8095_v56, %v4666_v19  ;;  %v4678_v47 = vadd.f32 %v8095_v56, %v4667_v42 }
 0x816   :  { %vm4679_vm3 = vcmp.ge.f32.partialorder %v4675_v55, 0.0  ;;  %vm4680_vm4 = vcmp.ge.f32.partialorder %v4676_v17, 0.0  ;;  %vm4681_vm5 = vcmp.ge.f32.partialorder %v4677_v41, 0.0  ;;  %vm4682_vm6 = vcmp.ge.f32.partialorder %v4678_v47, 0.0 }
 0x817   :  { %v4683_v16 = vmul.f32 0.2, %v4675_v55  ;;  %v4684_v8 = vmul.f32 0.2, %v4676_v17  ;;  %v4685_v44 = vmul.f32 0.2, %v4677_v41 }
 0x818   :  { %v4686_v39 = vmul.f32 0.2, %v4678_v47 }
 0x819   :  { %v4687_v50 = vsel %vm4679_vm3, %v4675_v55, %v4683_v16  ;;  %v4688_v51 = vsel %vm4680_vm4, %v4676_v17, %v4684_v8  ;;  %v4689_v61 = vsel %vm4681_vm5, %v4677_v41, %v4685_v44 }
 0x81a   :  { %v4690_v28 = vsel %vm4682_vm6, %v4678_v47, %v4686_v39 }
 0x81b   :  { %11468 = dma.done.wait [#allocation4], 36864 }
 0x81c   :  { %11469 = vsyncadd [#allocation4], 4294930432  ;;  %v15027_v7 = vpack.c.bf16 %v4688_v51, %v4687_v50  ;;  %v11489_v60 = vmov 0.0|0.0   ;;  %v15032_v35 = vpack.c.bf16 %v4690_v28, %v4689_v61  ;;  %vm11490_vm7 = vmmov 0   ;;  %v4983_v31 = vld [vmem:[#allocation12] sm:$0xff]  ;;  %v5209_v53 = vld [vmem:[#allocation12 + $0x18] sm:$0xff] }
 0x81d   :  { %10154 = vmatprep.subr.bf16.mxu0 %v11489_v60  ;;  %10172 = vmatprep.subr.bf16.mxu1 %v11489_v60  ;;  %v11491_v23 = vmov 0.0   ;;  %vm4984_vm8 = vcmask 261120   ;;  %v5059_v32 = vld [vmem:[#allocation12 + $0x8] sm:$0xff]  ;;  %v10208_v38 = vpack.c.bf16 %v11770_v3, %v11760_v1  ;;  %v5134_v5 = vld [vmem:[#allocation12 + $0x10] sm:$0xff]  ;;  %v5509_v33 = vld [vmem:[#allocation12 + $0x38] sm:$0xff] }
 0x81e   :  { %10156 = vmatpush3.bf16.msra.mxu0 %v15027_v7  ;;  %9471 = vmatprep.mubr.msk.f32.mxu0 %vm11490_vm7, %v11491_v23  ;;  %v5359_v58 = vld [vmem:[#allocation12 + $0x28] sm:$0xff]  ;;  %v15995_v12 = vld [vmem:[#allocation35_spill] sm:$0xff]  ;;  %v15999_v3 = vld [vmem:[#allocation38_spill] sm:$0xff] }
 0x81f   :  { %10157 = vmatprep.subr.bf16.mxu0 %v11489_v60  ;;  %10174 = vmatpush3.bf16.msra.mxu1 %v15027_v7  ;;  %v10210_v2 = vpack.c.bf16 %v15995_v12, %v11755_v0  ;;  %v15996_v14 = vld [vmem:[#allocation37_spill] sm:$0xff]  ;;  %v15997_v25 = vld [vmem:[#allocation39_spill] sm:$0xff]  ;;  %v15998_v1 = vld [vmem:[#allocation36_spill] sm:$0xff] }
 0x820   :  { %10175 = vmatprep.subr.bf16.mxu1 %v11489_v60  ;;  %9504 = vmatprep.mubr.msk.f32.mxu1 %vm11490_vm7, %v11491_v23  ;;  %v10212_v4 = vpack.c.bf16 %v15997_v25, %v15996_v14  ;;  %v10214_v34 = vpack.c.bf16 %v15999_v3, %v15998_v1  ;;  %v16000_v0 = vld [vmem:[#allocation41_spill] sm:$0xff]  ;;  %v16001_v63 = vld [vmem:[#allocation43_spill] sm:$0xff]  ;;  %v16002_v30 = vld [vmem:[#allocation40_spill] sm:$0xff] }
 0x821   :  { %v10216_v13 = vpack.c.bf16 %v16001_v63, %v16000_v0  ;;  %v5284_v29 = vld [vmem:[#allocation12 + $0x20] sm:$0xff]  ;;  %v16003_v26 = vld [vmem:[#allocation42_spill] sm:$0xff]  ;;  %v16004_v54 = vld [vmem:[#allocation45_spill] sm:$0xff] }
 0x822   :  { %10159 = vmatpush3.bf16.msra.mxu0 %v15032_v35  ;;  %v10218_v20 = vpack.c.bf16 %v16003_v26, %v16002_v30  ;;  %v16005_v37 = vld [vmem:[#allocation47_spill] sm:$0xff]  ;;  %v16006_v62 = vld [vmem:[#allocation44_spill] sm:$0xff]  ;;  %v16007_v24 = vld [vmem:[#allocation46_spill] sm:$0xff] }
 0x823   :  { %10160 = vmatprep.subr.bf16.mxu0 %v11489_v60  ;;  %10177 = vmatpush3.bf16.msra.mxu1 %v15032_v35  ;;  %v10220_v36 = vpack.c.bf16 %v16005_v37, %v16004_v54  ;;  %v10222_v52 = vpack.c.bf16 %v16007_v24, %v16006_v62  ;;  %v16008_v11 = vld [vmem:[#allocation49_spill] sm:$0xff]  ;;  %v16009_v22 = vld [vmem:[#allocation51_spill] sm:$0xff]  ;;  %v16010_v59 = vld [vmem:[#allocation48_spill] sm:$0xff] }
 0x824   :  { %10184 = vmatprep.subr.bf16.mxu1 %v11489_v60  ;;  %v10224_v43 = vpack.c.bf16 %v16009_v22, %v16008_v11  ;;  %v5434_v40 = vld [vmem:[#allocation12 + $0x30] sm:$0xff]  ;;  %v16013_v9 = vld [vmem:[#allocation55_spill] sm:$0xff]  ;;  %v16014_v57 = vld [vmem:[#allocation52_spill] sm:$0xff] }
 0x825   :  { %9472 = vmatmul.mubr.msk.f32.vlgmr.msra.gmra.mrb[56].mxu0 %vm4984_vm8, %v4983_v31  ;;  %v16011_v18 = vld [vmem:[#allocation50_spill] sm:$0xff]  ;;  %v16012_v49 = vld [vmem:[#allocation53_spill] sm:$0xff]  ;;  %v16017_v56 = vld [vmem:[#allocation59_spill] sm:$0xff] }
 0x826   :  { %10162 = vmatpush3.bf16.msra.mxu0 %v15027_v7  ;;  %9482 = vmatprep.mubr.msk.f32.mxu0 %vm11490_vm7, %v11491_v23  ;;  %v10226_v15 = vpack.c.bf16 %v16011_v18, %v16010_v59  ;;  %v10228_v10 = vpack.c.bf16 %v16013_v9, %v16012_v49  ;;  %v16015_v6 = vld [vmem:[#allocation54_spill] sm:$0xff]  ;;  %v16016_v48 = vld [vmem:[#allocation57_spill] sm:$0xff]  ;;  %v16018_v46 = vld [vmem:[#allocation56_spill] sm:$0xff] }
 0x827   :  { %10163 = vmatprep.subr.bf16.mxu0 %v11489_v60  ;;  %9505 = vmatmul.mubr.msk.f32.vlgmr.msra.gmra.mrb[128].mxu1 %vm4984_vm8, %v5209_v53  ;;  %v10230_v21 = vpack.c.bf16 %v16015_v6, %v16014_v57  ;;  %v10232_v27 = vpack.c.bf16 %v16017_v56, %v16016_v48  ;;  %v16019_v19 = vld [vmem:[#allocation58_spill] sm:$0xff]  ;;  %v16020_v55 = vld [vmem:[#allocation61_spill] sm:$0xff]  ;;  %v16021_v17 = vld [vmem:[#allocation63_spill] sm:$0xff] }
 0x828   :  { %10186 = vmatpush3.bf16.msra.mxu1 %v15027_v7  ;;  %9526 = vmatprep.mubr.msk.f32.mxu1 %vm11490_vm7, %v11491_v23  ;;  %v10234_v42 = vpack.c.bf16 %v16019_v19, %v16018_v46  ;;  %v10236_v41 = vpack.c.bf16 %v16021_v17, %v16020_v55  ;;  %v16022_v47 = vld [vmem:[#allocation60_spill] sm:$0xff]  ;;  %v16023_v16 = vld [vmem:[#allocation62_spill] sm:$0xff]  ;;  %v16024_v44 = vld [vmem:[#allocation65_spill] sm:$0xff] }
 0x829   :  { %10187 = vmatprep.subr.bf16.mxu1 %v11489_v60  ;;  %v10238_v8 = vpack.c.bf16 %v16023_v16, %v16022_v47  ;;  %v16025_v39 = vld [vmem:[#allocation67_spill] sm:$0xff]  ;;  %v16026_v51 = vld [vmem:[#allocation64_spill] sm:$0xff]  ;;  %v16027_v61 = vld [vmem:[#allocation66_spill] sm:$0xff] }
 0x82a   :  { %10165 = vmatpush3.bf16.msra.mxu0 %v15032_v35  ;;  %v10240_v50 = vpack.c.bf16 %v16025_v39, %v16024_v44  ;;  %v10242_v28 = vpack.c.bf16 %v16027_v61, %v16026_v51  ;;  %v16030_v31 = vld [vmem:[#allocation68_spill] sm:$0xff]  ;;  %v16031_v53 = vld [vmem:[#allocation70_spill] sm:$0xff]  ;;  %v16036_v14 = vld [vmem:[#allocation77_spill] sm:$0xff] }
 0x82b   :  { %10166 = vmatprep.subr.bf16.mxu0 %v11489_v60  ;;  %v16035_v12 = vld [vmem:[#allocation74_spill] sm:$0xff]  ;;  %v16037_v25 = vld [vmem:[#allocation79_spill] sm:$0xff]  ;;  %v16038_v1 = vld [vmem:[#allocation76_spill] sm:$0xff] }
 0x82c   :  { %10189 = vmatpush3.bf16.msra.mxu1 %v15032_v35  ;;  %v16039_v3 = vld [vmem:[#allocation78_spill] sm:$0xff]  ;;  %v16040_v0 = vld [vmem:[#allocation81_spill] sm:$0xff]  ;;  %v16041_v63 = vld [vmem:[#allocation83_spill] sm:$0xff] }
 0x82d   :  { %9483 = vmatmul.mubr.msk.f32.vlgmr.msra.gmra.mrb[58].mxu0 %vm4984_vm8, %v5059_v32  ;;  %10196 = vmatprep.subr.bf16.mxu1 %v11489_v60  ;;  %v10246_v32 = vpack.c.bf16 %v16031_v53, %v16030_v31  ;;  %v16043_v30 = vld [vmem:[#allocation82_spill] sm:$0xff]  ;;  %v16045_v54 = vld [vmem:[#allocation87_spill] sm:$0xff]  ;;  %v16052_v18 = vld [vmem:[#allocation93_spill] sm:$0xff] }
 0x82e   :  { %10168 = vmatpush3.bf16.msra.mxu0 %v15027_v7  ;;  %9493 = vmatprep.mubr.msk.f32.mxu0 %vm11490_vm7, %v11491_v23  ;;  %v16047_v62 = vld [vmem:[#allocation86_spill] sm:$0xff]  ;;  %v16049_v11 = vld [vmem:[#allocation91_spill] sm:$0xff]  ;;  %v16054_v9 = vld [vmem:[#allocation92_spill] sm:$0xff] }
 0x82f   :  { %10169 = vmatprep.subr.bf16.mxu0 %v11489_v60  ;;  %9527 = vmatmul.mubr.msk.f32.vlgmr.msra.gmra.mrb[130].mxu1 %vm4984_vm8, %v5359_v58  ;;  %v16032_v58 = vld [vmem:[#allocation73_spill] sm:$0xff]  ;;  %v5584_v56 = vld [vmem:[#allocation12 + $0x40] sm:$0xff]  ;;  %v16059_v17 = vld [vmem:[#allocation98_spill] sm:$0xff] }
 0x830   :  { %10198 = vmatpush3.bf16.msra.mxu1 %v15027_v7  ;;  %9548 = vmatprep.mubr.msk.f32.mxu1 %vm11490_vm7, %v11491_v23  ;;  %v16056_v6 = vld [vmem:[#allocation97_spill] sm:$0xff]  ;;  %v16058_v55 = vld [vmem:[#allocation96_spill] sm:$0xff]  ;;  %v16063_v61 = vld [vmem:[#allocation102_spill] sm:$0xff] }
 0x831   :  { %10199 = vmatprep.subr.bf16.mxu1 %v11489_v60  ;;  %v16060_v16 = vld [vmem:[#allocation101_spill] sm:$0xff]  ;;  %v16062_v51 = vld [vmem:[#allocation100_spill] sm:$0xff] }
 0x832   :  { %10171 = vmatpush3.bf16.msra.mxu0 %v15032_v35  ;;  %v16066_v53 = vld [vmem:[#allocation104_spill] sm:$0xff] }
 0x833   :  { %10178 = vmatprep.subr.bf16.mxu0 %v11489_v60 }
 0x834   :  { %10201 = vmatpush3.bf16.msra.mxu1 %v15032_v35 }
 0x835   :  { %9494 = vmatmul.mubr.msk.f32.vlgmr.msra.gmra.mrb[60].mxu0 %vm4984_vm8, %v5134_v5  ;;  %10209 = vmatprep.subr.bf16.mxu1 %v10208_v38  ;;  %v16033_v38 = vld [vmem:[#allocation75_spill] sm:$0xff] }
 0x836   :  { %10180 = vmatpush3.bf16.msra.mxu0 %v15027_v7  ;;  %9515 = vmatprep.mubr.msk.f32.mxu0 %vm11490_vm7, %v11491_v23  ;;  %v10248_v5 = vpack.c.bf16 %v16033_v38, %v16032_v58  ;;  %v16068_v38 = vld [vmem:[#allocation109_spill] sm:$0xff] }
 0x837   :  { %10181 = vmatprep.subr.bf16.mxu0 %v11489_v60  ;;  %9549 = vmatmul.mubr.msk.f32.vlgmr.msra.gmra.mrb[132].mxu1 %vm4984_vm8, %v5509_v33  ;;  %v16034_v33 = vld [vmem:[#allocation72_spill] sm:$0xff] }
 0x838   :  { %10211 = vmatpush1.bf16.msra.mxu1 %v10210_v2  ;;  %v10250_v2 = vpack.c.bf16 %v16035_v12, %v16034_v33 }
 0x839   :  { %10213 = vmatprep.subr.bf16.mxu1 %v10212_v4  ;;  %v10252_v4 = vpack.c.bf16 %v16037_v25, %v16036_v14  ;;  %v16070_v14 = vld [vmem:[#allocation108_spill] sm:$0xff]  ;;  %v16071_v25 = vld [vmem:[#allocation110_spill] sm:$0xff] }
 0x83a   :  { %10183 = vmatpush3.bf16.msra.mxu0 %v15032_v35 }
 0x83b   :  { %10190 = vmatprep.subr.bf16.mxu0 %v11489_v60 }
 0x83c   :  { %10215 = vmatpush1.bf16.msra.mxu1 %v10214_v34  ;;  %v10254_v34 = vpack.c.bf16 %v16039_v3, %v16038_v1  ;;  %v16072_v1 = vld [vmem:[#allocation113_spill] sm:$0xff]  ;;  %v16073_v3 = vld [vmem:[#allocation115_spill] sm:$0xff] }
 0x83d   :  { %9516 = vmatmul.mubr.msk.f32.vlgmr.msra.gmra.mrb[62].mxu0 %vm4984_vm8, %v5284_v29  ;;  %10217 = vmatprep.subr.bf16.mxu1 %v10216_v13  ;;  %v10256_v13 = vpack.c.bf16 %v16041_v63, %v16040_v0  ;;  %v16042_v29 = vld [vmem:[#allocation80_spill] sm:$0xff]  ;;  %v16075_v63 = vld [vmem:[#allocation114_spill] sm:$0xff] }
 0x83e   :  { %10192 = vmatpush3.bf16.msra.mxu0 %v15027_v7  ;;  %9537 = vmatprep.mubr.msk.f32.mxu0 %vm11490_vm7, %v11491_v23  ;;  %v10258_v26 = vpack.c.bf16 %v16043_v30, %v16042_v29  ;;  %v16074_v0 = vld [vmem:[#allocation112_spill] sm:$0xff]  ;;  %v16076_v29 = vld [vmem:[#allocation117_spill] sm:$0xff]  ;;  %v16077_v30 = vld [vmem:[#allocation119_spill] sm:$0xff] }
 0x83f   :  { %10193 = vmatprep.subr.bf16.mxu0 %v11489_v60 }
 0x840   :  { %10219 = vmatpush1.bf16.msra.mxu1 %v10218_v20  ;;  %v16044_v20 = vld [vmem:[#allocation85_spill] sm:$0xff] }
 0x841   :  { %10221 = vmatprep.subr.bf16.mxu1 %v10220_v36  ;;  %v10260_v37 = vpack.c.bf16 %v16045_v54, %v16044_v20  ;;  %v16046_v36 = vld [vmem:[#allocation84_spill] sm:$0xff] }
 0x842   :  { %10195 = vmatpush3.bf16.msra.mxu0 %v15032_v35  ;;  %v10262_v24 = vpack.c.bf16 %v16047_v62, %v16046_v36  ;;  %v16079_v36 = vld [vmem:[#allocation118_spill] sm:$0xff] }
 0x843   :  { %10202 = vmatprep.subr.bf16.mxu0 %v11489_v60 }
 0x844   :  { %10223 = vmatpush1.bf16.msra.mxu1 %v10222_v52  ;;  %v16048_v52 = vld [vmem:[#allocation89_spill] sm:$0xff] }
 0x845   :  { %10225 = vmatprep.subr.bf16.mxu1 %v10224_v43  ;;  %9538 = vmatmul.mubr.msk.f32.vlgmr.msra.gmra.mrb[64].mxu0 %vm4984_vm8, %v5434_v40  ;;  %v10264_v22 = vpack.c.bf16 %v16049_v11, %v16048_v52  ;;  %v16050_v43 = vld [vmem:[#allocation88_spill] sm:$0xff]  ;;  %v16051_v40 = vld [vmem:[#allocation90_spill] sm:$0xff]  ;;  %v16080_v52 = vld [vmem:[#allocation121_spill] sm:$0xff] }
 0x846   :  { %10204 = vmatpush3.bf16.msra.mxu0 %v15027_v7  ;;  %9559 = vmatprep.mubr.msk.f32.mxu0 %vm11490_vm7, %v11491_v23  ;;  %v16028_v7 = vld [vmem:[#allocation69_spill] sm:$0xff]  ;;  %v10266_v59 = vpack.c.bf16 %v16051_v40, %v16050_v43  ;;  %v16081_v11 = vld [vmem:[#allocation123_spill] sm:$0xff]  ;;  %v16082_v40 = vld [vmem:[#allocation120_spill] sm:$0xff] }
 0x847   :  { %10205 = vmatprep.subr.bf16.mxu0 %v11489_v60  ;;  %v16029_v60 = vld [vmem:[#allocation71_spill] sm:$0xff] }
 0x848   :  { %10227 = vmatpush1.bf16.msra.mxu1 %v10226_v15  ;;  %v16053_v15 = vld [vmem:[#allocation95_spill] sm:$0xff] }
 0x849   :  { %10229 = vmatprep.subr.bf16.mxu1 %v10228_v10  ;;  %v10268_v49 = vpack.c.bf16 %v16053_v15, %v16052_v18  ;;  %v16055_v10 = vld [vmem:[#allocation94_spill] sm:$0xff]  ;;  %v16084_v15 = vld [vmem:[#allocation125_spill] sm:$0xff] }
 0x84a   :  { %10207 = vmatpush3.bf16.msra.mxu0 %v15032_v35  ;;  %v10244_v35 = vpack.c.bf16 %v16029_v60, %v16028_v7  ;;  %v10270_v57 = vpack.c.bf16 %v16055_v10, %v16054_v9  ;;  %v16064_v60 = vld [vmem:[#allocation105_spill] sm:$0xff]  ;;  %v16086_v10 = vld [vmem:[#allocation124_spill] sm:$0xff] }
 0x84c   :  { %10231 = vmatpush1.bf16.msra.mxu1 %v10230_v21  ;;  %v16057_v21 = vld [vmem:[#allocation99_spill] sm:$0xff] }
 0x84d   :  { %10233 = vmatprep.subr.bf16.mxu1 %v10232_v27  ;;  %v10272_v48 = vpack.c.bf16 %v16057_v21, %v16056_v6  ;;  %9560 = vmatmul.mubr.msk.f32.vlgmr.msra.gmra.mrb[66].mxu0 %vm4984_vm8, %v5584_v56  ;;  %v16088_v21 = vld [vmem:[#allocation129_spill] sm:$0xff] }
 0x850   :  { %10235 = vmatpush1.bf16.msra.mxu1 %v10234_v42 }
 0x851   :  { %10237 = vmatprep.subr.bf16.mxu1 %v10236_v41  ;;  %v10274_v41 = vpack.c.bf16 %v16059_v17, %v16058_v55  ;;  %v16093_v55 = vld [vmem:[#allocation135_spill] sm:$0xff] }
 0x854   :  { %10239 = vmatpush1.bf16.msra.mxu1 %v10238_v8  ;;  %v16061_v8 = vld [vmem:[#allocation103_spill] sm:$0xff] }
 0x855   :  { %10241 = vmatprep.subr.bf16.mxu1 %v10240_v50  ;;  %v10276_v44 = vpack.c.bf16 %v16061_v8, %v16060_v16  ;;  %v16096_v8 = vld [vmem:[#allocation137_spill] sm:$0xff] }
 0x858   :  { %10243 = vmatpush1.bf16.msra.mxu1 %v10242_v28  ;;  %v10278_v28 = vpack.c.bf16 %v16063_v61, %v16062_v51  ;;  %v16098_v51 = vld [vmem:[#allocation136_spill] sm:$0xff]  ;;  %v16099_v61 = vld [vmem:[#allocation138_spill] sm:$0xff] }
 0x859   :  { %10245 = vmatprep.subr.bf16.mxu1 %v10244_v35  ;;  %v16065_v35 = vld [vmem:[#allocation107_spill] sm:$0xff] }
 0x85a   :  { %v10280_v31 = vpack.c.bf16 %v16065_v35, %v16064_v60  ;;  %v16101_v60 = vld [vmem:[#allocation143_spill] sm:$0xff] }
 0x85c   :  { %10247 = vmatpush1.bf16.msra.mxu1 %v10246_v32  ;;  %v16067_v32 = vld [vmem:[#allocation106_spill] sm:$0xff] }
 0x85d   :  { %10249 = vmatprep.subr.bf16.mxu1 %v10248_v5  ;;  %v10282_v58 = vpack.c.bf16 %v16067_v32, %v16066_v53  ;;  %v16069_v5 = vld [vmem:[#allocation111_spill] sm:$0xff]  ;;  %v16103_v53 = vld [vmem:[#allocation142_spill] sm:$0xff] }
 0x85e   :  { %v10284_v33 = vpack.c.bf16 %v16069_v5, %v16068_v38  ;;  %v16105_v38 = vld [vmem:[#allocation147_spill] sm:$0xff] }
 0x860   :  { %10251 = vmatpush1.bf16.msra.mxu1 %v10250_v2 }
 0x861   :  { %10253 = vmatprep.subr.bf16.mxu1 %v10252_v4  ;;  %v10286_v4 = vpack.c.bf16 %v16071_v25, %v16070_v14  ;;  %v16108_v25 = vld [vmem:[#allocation149_spill] sm:$0xff] }
 0x864   :  { %10255 = vmatpush1.bf16.msra.mxu1 %v10254_v34  ;;  %v10288_v34 = vpack.c.bf16 %v16073_v3, %v16072_v1  ;;  %v16110_v3 = vld [vmem:[#allocation148_spill] sm:$0xff] }
 0x865   :  { %10257 = vmatprep.subr.bf16.mxu1 %v10256_v13  ;;  %v10290_v13 = vpack.c.bf16 %v16075_v63, %v16074_v0  ;;  %v16112_v63 = vld [vmem:[#allocation153_spill] sm:$0xff] }
 0x868   :  { %10259 = vmatpush1.bf16.msra.mxu1 %v10258_v26  ;;  %v10292_v26 = vpack.c.bf16 %v16077_v30, %v16076_v29  ;;  %v16114_v30 = vld [vmem:[#allocation152_spill] sm:$0xff] }
 0x869   :  { %10261 = vmatprep.subr.bf16.mxu1 %v10260_v37  ;;  %v16078_v37 = vld [vmem:[#allocation116_spill] sm:$0xff] }
 0x86a   :  { %v10294_v62 = vpack.c.bf16 %v16079_v36, %v16078_v37  ;;  %v16116_v37 = vld [vmem:[#allocation157_spill] sm:$0xff]  ;;  %v16117_v36 = vld [vmem:[#allocation159_spill] sm:$0xff] }
 0x86c   :  { %10263 = vmatpush1.bf16.msra.mxu1 %v10262_v24 }
 0x86d   :  { %10265 = vmatprep.subr.bf16.mxu1 %v10264_v22  ;;  %v10296_v22 = vpack.c.bf16 %v16081_v11, %v16080_v52  ;;  %v16118_v52 = vld [vmem:[#allocation156_spill] sm:$0xff]  ;;  %v16119_v11 = vld [vmem:[#allocation158_spill] sm:$0xff] }
 0x870   :  { %10267 = vmatpush1.bf16.msra.mxu1 %v10266_v59  ;;  %v16083_v59 = vld [vmem:[#allocation122_spill] sm:$0xff] }
 0x871   :  { %10269 = vmatprep.subr.bf16.mxu1 %v10268_v49  ;;  %v10298_v18 = vpack.c.bf16 %v16083_v59, %v16082_v40  ;;  %v16085_v49 = vld [vmem:[#allocation127_spill] sm:$0xff] }
 0x872   :  { %v10300_v9 = vpack.c.bf16 %v16085_v49, %v16084_v15  ;;  %v16121_v40 = vld [vmem:[#allocation163_spill] sm:$0xff]  ;;  %v16123_v15 = vld [vmem:[#allocation162_spill] sm:$0xff] }
 0x874   :  { %10271 = vmatpush1.bf16.msra.mxu1 %v10270_v57  ;;  %v16087_v57 = vld [vmem:[#allocation126_spill] sm:$0xff] }
 0x875   :  { %10273 = vmatprep.subr.bf16.mxu1 %v10272_v48  ;;  %v10302_v6 = vpack.c.bf16 %v16087_v57, %v16086_v10  ;;  %v16089_v48 = vld [vmem:[#allocation131_spill] sm:$0xff]  ;;  %v16124_v10 = vld [vmem:[#allocation165_spill] sm:$0xff] }
 0x876   :  { %v10304_v56 = vpack.c.bf16 %v16089_v48, %v16088_v21  ;;  %v16125_v57 = vld [vmem:[#allocation167_spill] sm:$0xff]  ;;  %v16126_v48 = vld [vmem:[#allocation164_spill] sm:$0xff] }
 0x8f8   :  { %v5054_v27 = vpop.f32.mrb[56].mxu0 }
 0x8f9   :  { %v9473_v46 = vpop.f32.mrb[57].mxu0 }
 0x8fa   :  { %v5279_v19 = vpop.f32.mrb[128].mxu1  ;;  %v16091_v46 = vld [vmem:[#allocation130_spill] sm:$0xff] }
 0x8fb   :  { %v9506_v42 = vpop.f32.mrb[129].mxu1 }
 0x8fc   :  { %v16092_v42 = vld [vmem:[#allocation133_spill] sm:$0xff] }
 0x8fd   :  { %v10308_v17 = vpack.c.bf16 %v16093_v55, %v16092_v42  ;;  %v16130_v55 = vld [vmem:[#allocation168_spill] sm:$0xff] }
 0x900   :  { %v5129_v47 = vpop.f32.mrb[58].mxu0 }
 0x901   :  { %v9484_v39 = vpop.f32.mrb[59].mxu0  ;;  %5722 = vmatprep.mubr.f32.mxu1 %v5129_v47  ;;  %v16095_v47 = vld [vmem:[#allocation134_spill] sm:$0xff] }
 0x902   :  { %5723 = vmatmul.mubr.f32.vlgmr.msra.gmra.mrb[134].mxu1 %v5054_v27  ;;  %v15164_v50 = vpop.f32.mrb[130].mxu1  ;;  %v16090_v27 = vld [vmem:[#allocation128_spill] sm:$0xff] }
 0x903   :  { %10275 = vmatpush1.bf16.msra.mxu1 %v10274_v41  ;;  %5793 = vmatprep.mubr.f32.mxu1 %v5279_v19  ;;  %v9528_v7 = vpop.f32.mrb[131].mxu1  ;;  %v10306_v19 = vpack.c.bf16 %v16091_v46, %v16090_v27  ;;  %v16094_v41 = vld [vmem:[#allocation132_spill] sm:$0xff]  ;;  %v16128_v46 = vld [vmem:[#allocation169_spill] sm:$0xff] }
 0x904   :  { %10277 = vmatprep.subr.bf16.mxu1 %v10276_v44  ;;  %v10310_v16 = vpack.c.bf16 %v16095_v47, %v16094_v41  ;;  %v16097_v44 = vld [vmem:[#allocation139_spill] sm:$0xff]  ;;  %v16100_v7 = vld [vmem:[#allocation141_spill] sm:$0xff] }
 0x905   :  { %v10312_v39 = vpack.c.bf16 %v16097_v44, %v16096_v8  ;;  %v10316_v35 = vpack.c.bf16 %v16101_v60, %v16100_v7  ;;  %v16132_v47 = vld [vmem:[#allocation173_spill] sm:$0xff]  ;;  %v16135_v44 = vld [vmem:[#allocation174_spill] sm:$0xff] }
 0x906   :  { %v16139_v7 = vld [vmem:[#allocation178_spill] sm:$0xff] }
 0x907   :  { %10279 = vmatpush1.bf16.msra.mxu1 %v10278_v28  ;;  %v10314_v28 = vpack.c.bf16 %v16099_v61, %v16098_v51  ;;  %v16136_v51 = vld [vmem:[#allocation177_spill] sm:$0xff]  ;;  %v16137_v61 = vld [vmem:[#allocation179_spill] sm:$0xff] }
 0x908   :  { %10281 = vmatprep.subr.bf16.mxu1 %v10280_v31  ;;  %v15174_v12 = vpop.f32.mrb[60].mxu0  ;;  %v16102_v31 = vld [vmem:[#allocation140_spill] sm:$0xff] }
 0x909   :  { %v9495_v2 = vpop.f32.mrb[61].mxu0  ;;  %v10318_v32 = vpack.c.bf16 %v16103_v53, %v16102_v31  ;;  %v16141_v31 = vld [vmem:[#allocation183_spill] sm:$0xff] }
 0x90a   :  { %v15188_v24 = vpop.f32.mrb[132].mxu1  ;;  %v16107_v2 = vld [vmem:[#allocation146_spill] sm:$0xff] }
 0x90b   :  { %10283 = vmatpush1.bf16.msra.mxu1 %v10282_v58  ;;  %v9550_v43 = vpop.f32.mrb[133].mxu1  ;;  %v16104_v58 = vld [vmem:[#allocation145_spill] sm:$0xff] }
 0x90c   :  { %10285 = vmatprep.subr.bf16.mxu1 %v10284_v33  ;;  %v10320_v5 = vpack.c.bf16 %v16105_v38, %v16104_v58  ;;  %v16106_v33 = vld [vmem:[#allocation144_spill] sm:$0xff]  ;;  %v16120_v43 = vld [vmem:[#allocation161_spill] sm:$0xff]  ;;  %v16143_v58 = vld [vmem:[#allocation182_spill] sm:$0xff] }
 0x90d   :  { %v10322_v14 = vpack.c.bf16 %v16107_v2, %v16106_v33  ;;  %v10336_v59 = vpack.c.bf16 %v16121_v40, %v16120_v43  ;;  %v16145_v33 = vld [vmem:[#allocation187_spill] sm:$0xff]  ;;  %v16158_v40 = vld [vmem:[#allocation196_spill] sm:$0xff] }
 0x90f   :  { %10287 = vmatpush1.bf16.msra.mxu1 %v10286_v4  ;;  %v16109_v4 = vld [vmem:[#allocation151_spill] sm:$0xff] }
 0x910   :  { %10289 = vmatprep.subr.bf16.mxu1 %v10288_v34  ;;  %v15184_v20 = vpop.f32.mrb[62].mxu0  ;;  %v10324_v1 = vpack.c.bf16 %v16109_v4, %v16108_v25  ;;  %v16111_v34 = vld [vmem:[#allocation150_spill] sm:$0xff] }
 0x911   :  { %v9517_v54 = vpop.f32.mrb[63].mxu0  ;;  %v10326_v0 = vpack.c.bf16 %v16111_v34, %v16110_v3  ;;  %v16147_v25 = vld [vmem:[#allocation186_spill] sm:$0xff]  ;;  %v16149_v3 = vld [vmem:[#allocation191_spill] sm:$0xff] }
 0x913   :  { %10291 = vmatpush1.bf16.msra.mxu1 %v10290_v13  ;;  %v16113_v13 = vld [vmem:[#allocation155_spill] sm:$0xff] }
 0x914   :  { %10293 = vmatprep.subr.bf16.mxu1 %v10292_v26  ;;  %v10328_v29 = vpack.c.bf16 %v16113_v13, %v16112_v63  ;;  %v16115_v26 = vld [vmem:[#allocation154_spill] sm:$0xff] }
 0x915   :  { %v10330_v54 = vpack.c.bf16 %v16115_v26, %v16114_v30  ;;  %v16151_v63 = vld [vmem:[#allocation190_spill] sm:$0xff]  ;;  %v16153_v30 = vld [vmem:[#allocation195_spill] sm:$0xff] }
 0x917   :  { %10295 = vmatpush1.bf16.msra.mxu1 %v10294_v62  ;;  %v10332_v62 = vpack.c.bf16 %v16117_v36, %v16116_v37  ;;  %v16155_v37 = vld [vmem:[#allocation194_spill] sm:$0xff] }
 0x918   :  { %10297 = vmatprep.subr.bf16.mxu1 %v10296_v22  ;;  %v10334_v22 = vpack.c.bf16 %v16119_v11, %v16118_v52  ;;  %v16156_v52 = vld [vmem:[#allocation197_spill] sm:$0xff]  ;;  %v16157_v11 = vld [vmem:[#allocation199_spill] sm:$0xff] }
 0x91b   :  { %10299 = vmatpush1.bf16.msra.mxu1 %v10298_v18  ;;  %v16122_v18 = vld [vmem:[#allocation160_spill] sm:$0xff] }
 0x91c   :  { %10301 = vmatprep.subr.bf16.mxu1 %v10300_v9  ;;  %v10338_v49 = vpack.c.bf16 %v16123_v15, %v16122_v18  ;;  %v15234_v9 = vpop.f32.mrb[64].mxu0  ;;  %v16160_v15 = vld [vmem:[#allocation201_spill] sm:$0xff] }
 0x91d   :  { %v9539_v21 = vpop.f32.mrb[65].mxu0 }
 0x91f   :  { %10303 = vmatpush1.bf16.msra.mxu1 %v10302_v6  ;;  %v10340_v6 = vpack.c.bf16 %v16125_v57, %v16124_v10  ;;  %v16162_v57 = vld [vmem:[#allocation200_spill] sm:$0xff] }
 0x920   :  { %10305 = vmatprep.subr.bf16.mxu1 %v10304_v56  ;;  %v16127_v56 = vld [vmem:[#allocation166_spill] sm:$0xff] }
 0x921   :  { %v10342_v27 = vpack.c.bf16 %v16127_v56, %v16126_v48  ;;  %v16164_v48 = vld [vmem:[#allocation205_spill] sm:$0xff]  ;;  %v16165_v56 = vld [vmem:[#allocation207_spill] sm:$0xff] }
 0x923   :  { %10307 = vmatpush1.bf16.msra.mxu1 %v10306_v19  ;;  %v16129_v19 = vld [vmem:[#allocation171_spill] sm:$0xff] }
 0x924   :  { %10309 = vmatprep.subr.bf16.mxu1 %v10308_v17  ;;  %v10344_v42 = vpack.c.bf16 %v16129_v19, %v16128_v46  ;;  %v16131_v17 = vld [vmem:[#allocation170_spill] sm:$0xff]  ;;  %v16166_v46 = vld [vmem:[#allocation204_spill] sm:$0xff] }
 0x925   :  { %v10346_v41 = vpack.c.bf16 %v16131_v17, %v16130_v55  ;;  %v16167_v19 = vld [vmem:[#allocation206_spill] sm:$0xff]  ;;  %v16168_v55 = vld [vmem:[#allocation209_spill] sm:$0xff]  ;;  %v16169_v17 = vld [vmem:[#allocation211_spill] sm:$0xff] }
 0x927   :  { %10311 = vmatpush1.bf16.msra.mxu1 %v10310_v16  ;;  %v16133_v16 = vld [vmem:[#allocation175_spill] sm:$0xff] }
 0x928   :  { %10313 = vmatprep.subr.bf16.mxu1 %v10312_v39  ;;  %v10348_v8 = vpack.c.bf16 %v16133_v16, %v16132_v47  ;;  %v16170_v47 = vld [vmem:[#allocation208_spill] sm:$0xff]  ;;  %v16171_v16 = vld [vmem:[#allocation210_spill] sm:$0xff] }
 0x92b   :  { %10315 = vmatpush1.bf16.msra.mxu1 %v10314_v28  ;;  %v16138_v28 = vld [vmem:[#allocation176_spill] sm:$0xff] }
 0x92c   :  { %10317 = vmatprep.subr.bf16.mxu1 %v10316_v35  ;;  %v10354_v60 = vpack.c.bf16 %v16139_v7, %v16138_v28  ;;  %v16140_v35 = vld [vmem:[#allocation181_spill] sm:$0xff]  ;;  %v16177_v7 = vld [vmem:[#allocation219_spill] sm:$0xff] }
 0x92d   :  { %v10356_v53 = vpack.c.bf16 %v16141_v31, %v16140_v35  ;;  %v16176_v28 = vld [vmem:[#allocation217_spill] sm:$0xff]  ;;  %v16178_v35 = vld [vmem:[#allocation216_spill] sm:$0xff]  ;;  %v16179_v31 = vld [vmem:[#allocation218_spill] sm:$0xff] }
 0x92f   :  { %10319 = vmatpush1.bf16.msra.mxu1 %v10318_v32  ;;  %v16142_v32 = vld [vmem:[#allocation180_spill] sm:$0xff] }
 0x930   :  { %10321 = vmatprep.subr.bf16.mxu1 %v10320_v5  ;;  %v10358_v38 = vpack.c.bf16 %v16143_v58, %v16142_v32  ;;  %v16144_v5 = vld [vmem:[#allocation185_spill] sm:$0xff]  ;;  %v16181_v58 = vld [vmem:[#allocation223_spill] sm:$0xff] }
 0x931   :  { %v10360_v2 = vpack.c.bf16 %v16145_v33, %v16144_v5  ;;  %v16180_v32 = vld [vmem:[#allocation221_spill] sm:$0xff]  ;;  %v16182_v5 = vld [vmem:[#allocation220_spill] sm:$0xff]  ;;  %v16183_v33 = vld [vmem:[#allocation222_spill] sm:$0xff] }
 0x933   :  { %10323 = vmatpush1.bf16.msra.mxu1 %v10322_v14  ;;  %v16146_v14 = vld [vmem:[#allocation184_spill] sm:$0xff] }
 0x934   :  { %10325 = vmatprep.subr.bf16.mxu1 %v10324_v1  ;;  %v10362_v4 = vpack.c.bf16 %v16147_v25, %v16146_v14  ;;  %v16148_v1 = vld [vmem:[#allocation189_spill] sm:$0xff]  ;;  %v16185_v25 = vld [vmem:[#allocation227_spill] sm:$0xff] }
 0x935   :  { %v10364_v34 = vpack.c.bf16 %v16149_v3, %v16148_v1  ;;  %v16184_v14 = vld [vmem:[#allocation225_spill] sm:$0xff]  ;;  %v16186_v1 = vld [vmem:[#allocation224_spill] sm:$0xff]  ;;  %v16187_v3 = vld [vmem:[#allocation226_spill] sm:$0xff] }
 0x937   :  { %10327 = vmatpush1.bf16.msra.mxu1 %v10326_v0  ;;  %v16150_v0 = vld [vmem:[#allocation188_spill] sm:$0xff] }
 0x938   :  { %10329 = vmatprep.subr.bf16.mxu1 %v10328_v29  ;;  %v10366_v13 = vpack.c.bf16 %v16151_v63, %v16150_v0  ;;  %v16152_v29 = vld [vmem:[#allocation193_spill] sm:$0xff]  ;;  %v16189_v63 = vld [vmem:[#allocation231_spill] sm:$0xff] }
 0x939   :  { %v10368_v26 = vpack.c.bf16 %v16153_v30, %v16152_v29  ;;  %v16188_v0 = vld [vmem:[#allocation229_spill] sm:$0xff]  ;;  %v16190_v29 = vld [vmem:[#allocation228_spill] sm:$0xff]  ;;  %v16191_v30 = vld [vmem:[#allocation230_spill] sm:$0xff] }
 0x93b   :  { %10331 = vmatpush1.bf16.msra.mxu1 %v10330_v54  ;;  %v16154_v54 = vld [vmem:[#allocation192_spill] sm:$0xff] }
 0x93c   :  { %10333 = vmatprep.subr.bf16.mxu1 %v10332_v62  ;;  %v10370_v36 = vpack.c.bf16 %v16155_v37, %v16154_v54  ;;  %v15270_v62 = vpop.f32.mrb[66].mxu0  ;;  %v16192_v54 = vld [vmem:[#allocation233_spill] sm:$0xff]  ;;  %v16193_v37 = vld [vmem:[#allocation235_spill] sm:$0xff] }
 0x93d   :  { %v9561_v43 = vpop.f32.mrb[67].mxu0 }
 0x93e   :  { %v16196_v43 = vld [vmem:[#allocation237_spill] sm:$0xff] }
 0x93f   :  { %10335 = vmatpush1.bf16.msra.mxu1 %v10334_v22  ;;  %v10372_v22 = vpack.c.bf16 %v16157_v11, %v16156_v52  ;;  %v16194_v52 = vld [vmem:[#allocation232_spill] sm:$0xff]  ;;  %v16195_v11 = vld [vmem:[#allocation234_spill] sm:$0xff] }
 0x940   :  { %10337 = vmatprep.subr.bf16.mxu1 %v10336_v59  ;;  %v16159_v59 = vld [vmem:[#allocation198_spill] sm:$0xff] }
 0x941   :  { %v10374_v18 = vpack.c.bf16 %v16159_v59, %v16158_v40  ;;  %v16197_v40 = vld [vmem:[#allocation239_spill] sm:$0xff] }
 0x942   :  { %5794 = vmatmul.mubr.f32.vlgmr.msra.gmra.mrb[134].mxu1 %v15174_v12  ;;  %v16134_v12 = vld [vmem:[#allocation172_spill] sm:$0xff]  ;;  %v10412_v59 = vpack.c.bf16 %v16197_v40, %v16196_v43  ;;  %v16236_v43 = vld [vmem:[#allocation277_spill] sm:$0xff]  ;;  %v16237_v40 = vld [vmem:[#allocation279_spill] sm:$0xff] }
 0x943   :  { %10339 = vmatpush1.bf16.msra.mxu1 %v10338_v49  ;;  %5864 = vmatprep.mubr.f32.mxu1 %v15164_v50  ;;  %v10350_v39 = vpack.c.bf16 %v16135_v44, %v16134_v12  ;;  %v10352_v50 = vpack.c.bf16 %v16137_v61, %v16136_v51  ;;  %v16161_v49 = vld [vmem:[#allocation203_spill] sm:$0xff]  ;;  %v16172_v12 = vld [vmem:[#allocation213_spill] sm:$0xff]  ;;  %v16174_v51 = vld [vmem:[#allocation212_spill] sm:$0xff] }
 0x944   :  { %10341 = vmatprep.subr.bf16.mxu1 %v10340_v6  ;;  %v10376_v10 = vpack.c.bf16 %v16161_v49, %v16160_v15  ;;  %v16163_v6 = vld [vmem:[#allocation202_spill] sm:$0xff]  ;;  %v16173_v44 = vld [vmem:[#allocation215_spill] sm:$0xff]  ;;  %v16200_v49 = vld [vmem:[#allocation241_spill] sm:$0xff] }
 0x945   :  { %v10378_v21 = vpack.c.bf16 %v16163_v6, %v16162_v57  ;;  %v16175_v61 = vld [vmem:[#allocation214_spill] sm:$0xff]  ;;  %v16202_v57 = vld [vmem:[#allocation240_spill] sm:$0xff] }
 0x946   :  { %v16203_v6 = vld [vmem:[#allocation242_spill] sm:$0xff] }
 0x947   :  { %10343 = vmatpush1.bf16.msra.mxu1 %v10342_v27  ;;  %v10380_v27 = vpack.c.bf16 %v16165_v56, %v16164_v48  ;;  %v16204_v48 = vld [vmem:[#allocation245_spill] sm:$0xff]  ;;  %v16205_v56 = vld [vmem:[#allocation247_spill] sm:$0xff] }
 0x948   :  { %10345 = vmatprep.subr.bf16.mxu1 %v10344_v42  ;;  %v10382_v42 = vpack.c.bf16 %v16167_v19, %v16166_v46  ;;  %v16206_v46 = vld [vmem:[#allocation244_spill] sm:$0xff]  ;;  %v16207_v19 = vld [vmem:[#allocation246_spill] sm:$0xff] }
 0x94b   :  { %10347 = vmatpush1.bf16.msra.mxu1 %v10346_v41  ;;  %v10384_v41 = vpack.c.bf16 %v16169_v17, %v16168_v55  ;;  %v16208_v55 = vld [vmem:[#allocation249_spill] sm:$0xff]  ;;  %v16209_v17 = vld [vmem:[#allocation251_spill] sm:$0xff] }
 0x94c   :  { %10349 = vmatprep.subr.bf16.mxu1 %v10348_v8  ;;  %v10386_v8 = vpack.c.bf16 %v16171_v16, %v16170_v47  ;;  %v16210_v47 = vld [vmem:[#allocation248_spill] sm:$0xff]  ;;  %v16211_v16 = vld [vmem:[#allocation250_spill] sm:$0xff] }
 0x94f   :  { %10351 = vmatpush1.bf16.msra.mxu1 %v10350_v39  ;;  %v10388_v39 = vpack.c.bf16 %v16173_v44, %v16172_v12  ;;  %v16212_v12 = vld [vmem:[#allocation253_spill] sm:$0xff]  ;;  %v16213_v44 = vld [vmem:[#allocation255_spill] sm:$0xff] }
 0x950   :  { %10353 = vmatprep.subr.bf16.mxu1 %v10352_v50  ;;  %v10390_v50 = vpack.c.bf16 %v16175_v61, %v16174_v51  ;;  %v16214_v51 = vld [vmem:[#allocation252_spill] sm:$0xff]  ;;  %v16215_v61 = vld [vmem:[#allocation254_spill] sm:$0xff] }
 0x953   :  { %10355 = vmatpush1.bf16.msra.mxu1 %v10354_v60  ;;  %v10392_v60 = vpack.c.bf16 %v16177_v7, %v16176_v28  ;;  %v16216_v28 = vld [vmem:[#allocation257_spill] sm:$0xff]  ;;  %v16217_v7 = vld [vmem:[#allocation259_spill] sm:$0xff] }
 0x954   :  { %10357 = vmatprep.subr.bf16.mxu1 %v10356_v53  ;;  %v10394_v53 = vpack.c.bf16 %v16179_v31, %v16178_v35  ;;  %v16218_v35 = vld [vmem:[#allocation256_spill] sm:$0xff]  ;;  %v16219_v31 = vld [vmem:[#allocation258_spill] sm:$0xff] }
 0x957   :  { %10359 = vmatpush1.bf16.msra.mxu1 %v10358_v38  ;;  %v10396_v38 = vpack.c.bf16 %v16181_v58, %v16180_v32  ;;  %v16220_v32 = vld [vmem:[#allocation261_spill] sm:$0xff]  ;;  %v16221_v58 = vld [vmem:[#allocation263_spill] sm:$0xff] }
 0x958   :  { %10361 = vmatprep.subr.bf16.mxu1 %v10360_v2  ;;  %v10398_v2 = vpack.c.bf16 %v16183_v33, %v16182_v5  ;;  %v16222_v5 = vld [vmem:[#allocation260_spill] sm:$0xff]  ;;  %v16223_v33 = vld [vmem:[#allocation262_spill] sm:$0xff] }
 0x95b   :  { %10363 = vmatpush1.bf16.msra.mxu1 %v10362_v4  ;;  %v10400_v4 = vpack.c.bf16 %v16185_v25, %v16184_v14  ;;  %v16224_v14 = vld [vmem:[#allocation265_spill] sm:$0xff]  ;;  %v16225_v25 = vld [vmem:[#allocation267_spill] sm:$0xff] }
 0x95c   :  { %10365 = vmatprep.subr.bf16.mxu1 %v10364_v34  ;;  %v10402_v34 = vpack.c.bf16 %v16187_v3, %v16186_v1  ;;  %v16226_v1 = vld [vmem:[#allocation264_spill] sm:$0xff]  ;;  %v16227_v3 = vld [vmem:[#allocation266_spill] sm:$0xff] }
 0x95f   :  { %10367 = vmatpush1.bf16.msra.mxu1 %v10366_v13  ;;  %v10404_v13 = vpack.c.bf16 %v16189_v63, %v16188_v0  ;;  %v16228_v0 = vld [vmem:[#allocation269_spill] sm:$0xff]  ;;  %v16229_v63 = vld [vmem:[#allocation271_spill] sm:$0xff] }
 0x960   :  { %10369 = vmatprep.subr.bf16.mxu1 %v10368_v26  ;;  %v10406_v26 = vpack.c.bf16 %v16191_v30, %v16190_v29  ;;  %v16230_v29 = vld [vmem:[#allocation268_spill] sm:$0xff]  ;;  %v16231_v30 = vld [vmem:[#allocation270_spill] sm:$0xff] }
 0x963   :  { %10371 = vmatpush1.bf16.msra.mxu1 %v10370_v36  ;;  %v10408_v36 = vpack.c.bf16 %v16193_v37, %v16192_v54  ;;  %v16232_v54 = vld [vmem:[#allocation273_spill] sm:$0xff]  ;;  %v16233_v37 = vld [vmem:[#allocation275_spill] sm:$0xff] }
 0x964   :  { %10373 = vmatprep.subr.bf16.mxu1 %v10372_v22  ;;  %v10410_v22 = vpack.c.bf16 %v16195_v11, %v16194_v52  ;;  %v16234_v52 = vld [vmem:[#allocation272_spill] sm:$0xff]  ;;  %v16235_v11 = vld [vmem:[#allocation274_spill] sm:$0xff] }
 0x967   :  { %10375 = vmatpush1.bf16.msra.mxu1 %v10374_v18  ;;  %v16199_v18 = vld [vmem:[#allocation238_spill] sm:$0xff] }
 0x968   :  { %10377 = vmatprep.subr.bf16.mxu1 %v10376_v10  ;;  %v16201_v10 = vld [vmem:[#allocation243_spill] sm:$0xff] }
 0x96b   :  { %10379 = vmatpush1.bf16.msra.mxu1 %v10378_v21  ;;  %v10418_v21 = vpack.c.bf16 %v16203_v6, %v16202_v57  ;;  %v16242_v57 = vld [vmem:[#allocation280_spill] sm:$0xff]  ;;  %v16243_v6 = vld [vmem:[#allocation282_spill] sm:$0xff] }
 0x96c   :  { %10381 = vmatprep.subr.bf16.mxu1 %v10380_v27  ;;  %v10420_v27 = vpack.c.bf16 %v16205_v56, %v16204_v48  ;;  %v16244_v48 = vld [vmem:[#allocation285_spill] sm:$0xff]  ;;  %v16245_v56 = vld [vmem:[#allocation287_spill] sm:$0xff] }
 0x96f   :  { %10383 = vmatpush1.bf16.msra.mxu1 %v10382_v42  ;;  %v10422_v42 = vpack.c.bf16 %v16207_v19, %v16206_v46  ;;  %v16246_v46 = vld [vmem:[#allocation284_spill] sm:$0xff]  ;;  %v16247_v19 = vld [vmem:[#allocation286_spill] sm:$0xff] }
 0x970   :  { %10385 = vmatprep.subr.bf16.mxu1 %v10384_v41  ;;  %v10424_v41 = vpack.c.bf16 %v16209_v17, %v16208_v55  ;;  %v16248_v55 = vld [vmem:[#allocation289_spill] sm:$0xff]  ;;  %v16249_v17 = vld [vmem:[#allocation291_spill] sm:$0xff] }
 0x973   :  { %10387 = vmatpush1.bf16.msra.mxu1 %v10386_v8  ;;  %v10426_v8 = vpack.c.bf16 %v16211_v16, %v16210_v47  ;;  %v16250_v47 = vld [vmem:[#allocation288_spill] sm:$0xff]  ;;  %v16251_v16 = vld [vmem:[#allocation290_spill] sm:$0xff] }
 0x974   :  { %10389 = vmatprep.subr.bf16.mxu1 %v10388_v39  ;;  %v10428_v39 = vpack.c.bf16 %v16213_v44, %v16212_v12  ;;  %v16252_v12 = vld [vmem:[#allocation293_spill] sm:$0xff]  ;;  %v16253_v44 = vld [vmem:[#allocation295_spill] sm:$0xff] }
 0x977   :  { %10391 = vmatpush1.bf16.msra.mxu1 %v10390_v50  ;;  %v10430_v50 = vpack.c.bf16 %v16215_v61, %v16214_v51  ;;  %v16254_v51 = vld [vmem:[#allocation292_spill] sm:$0xff]  ;;  %v16255_v61 = vld [vmem:[#allocation294_spill] sm:$0xff] }
 0x978   :  { %10393 = vmatprep.subr.bf16.mxu1 %v10392_v60  ;;  %v10432_v60 = vpack.c.bf16 %v16217_v7, %v16216_v28  ;;  %v16256_v28 = vld [vmem:[#allocation297_spill] sm:$0xff]  ;;  %v16257_v7 = vld [vmem:[#allocation299_spill] sm:$0xff] }
 0x97b   :  { %10395 = vmatpush1.bf16.msra.mxu1 %v10394_v53  ;;  %v10434_v53 = vpack.c.bf16 %v16219_v31, %v16218_v35  ;;  %v16258_v35 = vld [vmem:[#allocation296_spill] sm:$0xff]  ;;  %v16259_v31 = vld [vmem:[#allocation298_spill] sm:$0xff] }
 0x97c   :  { %10397 = vmatprep.subr.bf16.mxu1 %v10396_v38  ;;  %v10436_v38 = vpack.c.bf16 %v16221_v58, %v16220_v32  ;;  %v16260_v32 = vld [vmem:[#allocation301_spill] sm:$0xff]  ;;  %v16261_v58 = vld [vmem:[#allocation303_spill] sm:$0xff] }
 0x97f   :  { %10399 = vmatpush1.bf16.msra.mxu1 %v10398_v2  ;;  %v10438_v2 = vpack.c.bf16 %v16223_v33, %v16222_v5  ;;  %v16263_v5 = vld [vmem:[#allocation302_spill] sm:$0xff] }
 0x980   :  { %10401 = vmatprep.subr.bf16.mxu1 %v10400_v4  ;;  %v10440_v4 = vpack.c.bf16 %v16225_v25, %v16224_v14  ;;  %v16265_v14 = vld [vmem:[#allocation307_spill] sm:$0xff] }
 0x982   :  { %5865 = vmatmul.mubr.f32.vlgmr.msra.gmra.mrb[134].mxu1 %v15184_v20  ;;  %v16198_v20 = vld [vmem:[#allocation236_spill] sm:$0xff] }
 0x983   :  { %10403 = vmatpush1.bf16.msra.mxu1 %v10402_v34  ;;  %5935 = vmatprep.mubr.f32.mxu1 %v15188_v24  ;;  %v10414_v15 = vpack.c.bf16 %v16199_v18, %v16198_v20  ;;  %v10416_v24 = vpack.c.bf16 %v16201_v10, %v16200_v49  ;;  %v10442_v34 = vpack.c.bf16 %v16227_v3, %v16226_v1  ;;  %v16238_v20 = vld [vmem:[#allocation276_spill] sm:$0xff]  ;;  %v16239_v18 = vld [vmem:[#allocation278_spill] sm:$0xff]  ;;  %v16240_v49 = vld [vmem:[#allocation281_spill] sm:$0xff] }
 0x984   :  { %10405 = vmatprep.subr.bf16.mxu1 %v10404_v13  ;;  %v10444_v13 = vpack.c.bf16 %v16229_v63, %v16228_v0  ;;  %v16241_v10 = vld [vmem:[#allocation283_spill] sm:$0xff]  ;;  %v16267_v1 = vld [vmem:[#allocation306_spill] sm:$0xff] }
 0x985   :  { %v16269_v0 = vld [vmem:[#allocation311_spill] sm:$0xff] }
 0x987   :  { %10407 = vmatpush1.bf16.msra.mxu1 %v10406_v26  ;;  %v10446_v26 = vpack.c.bf16 %v16231_v30, %v16230_v29  ;;  %v16271_v29 = vld [vmem:[#allocation310_spill] sm:$0xff] }
 0x988   :  { %10409 = vmatprep.subr.bf16.mxu1 %v10408_v36  ;;  %v10448_v36 = vpack.c.bf16 %v16233_v37, %v16232_v54  ;;  %v16273_v54 = vld [vmem:[#allocation315_spill] sm:$0xff] }
 0x98b   :  { %10411 = vmatpush1.bf16.msra.mxu1 %v10410_v22  ;;  %v10450_v22 = vpack.c.bf16 %v16235_v11, %v16234_v52  ;;  %v16275_v52 = vld [vmem:[#allocation314_spill] sm:$0xff] }
 0x98c   :  { %10413 = vmatprep.subr.bf16.mxu1 %v10412_v59  ;;  %v10452_v59 = vpack.c.bf16 %v16237_v40, %v16236_v43  ;;  %v16277_v43 = vld [vmem:[#allocation319_spill] sm:$0xff] }
 0x98f   :  { %10415 = vmatpush1.bf16.msra.mxu1 %v10414_v15  ;;  %v10454_v15 = vpack.c.bf16 %v16239_v18, %v16238_v20  ;;  %v16279_v20 = vld [vmem:[#allocation318_spill] sm:$0xff] }
 0x990   :  { %10417 = vmatprep.subr.bf16.mxu1 %v10416_v24  ;;  %v10456_v24 = vpack.c.bf16 %v16241_v10, %v16240_v49 }
 0x993   :  { %10419 = vmatpush1.bf16.msra.mxu1 %v10418_v21  ;;  %v10458_v21 = vpack.c.bf16 %v16243_v6, %v16242_v57 }
 0x994   :  { %10421 = vmatprep.subr.bf16.mxu1 %v10420_v27  ;;  %v10460_v27 = vpack.c.bf16 %v16245_v56, %v16244_v48 }
 0x997   :  { %10423 = vmatpush1.bf16.msra.mxu1 %v10422_v42  ;;  %v10462_v42 = vpack.c.bf16 %v16247_v19, %v16246_v46 }
 0x998   :  { %10425 = vmatprep.subr.bf16.mxu1 %v10424_v41  ;;  %v10464_v41 = vpack.c.bf16 %v16249_v17, %v16248_v55 }
 0x99b   :  { %10427 = vmatpush1.bf16.msra.mxu1 %v10426_v8  ;;  %v10466_v8 = vpack.c.bf16 %v16251_v16, %v16250_v47 }
 0x99c   :  { %10429 = vmatprep.subr.bf16.mxu1 %v10428_v39  ;;  %v10468_v39 = vpack.c.bf16 %v16253_v44, %v16252_v12 }
 0x99f   :  { %10431 = vmatpush1.bf16.msra.mxu1 %v10430_v50  ;;  %v10470_v50 = vpack.c.bf16 %v16255_v61, %v16254_v51 }
 0x9a0   :  { %10433 = vmatprep.subr.bf16.mxu1 %v10432_v60  ;;  %v10472_v60 = vpack.c.bf16 %v16257_v7, %v16256_v28 }
 0x9a3   :  { %10435 = vmatpush1.bf16.msra.mxu1 %v10434_v53  ;;  %v10474_v53 = vpack.c.bf16 %v16259_v31, %v16258_v35 }
 0x9a4   :  { %10437 = vmatprep.subr.bf16.mxu1 %v10436_v38  ;;  %v10476_v38 = vpack.c.bf16 %v16261_v58, %v16260_v32 }
 0x9a7   :  { %10439 = vmatpush1.bf16.msra.mxu1 %v10438_v2  ;;  %v16264_v2 = vld [vmem:[#allocation305_spill] sm:$0xff] }
 0x9a8   :  { %10441 = vmatprep.subr.bf16.mxu1 %v10440_v4  ;;  %v10480_v25 = vpack.c.bf16 %v16265_v14, %v16264_v2  ;;  %v16266_v4 = vld [vmem:[#allocation304_spill] sm:$0xff]  ;;  %v15405_v2 = vsub.s32 1, %v13592_v45 }
 0x9a9   :  { %v10482_v3 = vpack.c.bf16 %v16267_v1, %v16266_v4  ;;  %v6065_v14 = vld [vmem:[#allocation15] sm:$0x3] }
 0x9ab   :  { %10443 = vmatpush1.bf16.msra.mxu1 %v10442_v34  ;;  %v16268_v34 = vld [vmem:[#allocation309_spill] sm:$0xff] }
 0x9ac   :  { %10445 = vmatprep.subr.bf16.mxu1 %v10444_v13  ;;  %v10484_v63 = vpack.c.bf16 %v16269_v0, %v16268_v34  ;;  %v16270_v13 = vld [vmem:[#allocation308_spill] sm:$0xff] }
 0x9ad   :  { %v10486_v30 = vpack.c.bf16 %v16271_v29, %v16270_v13  ;;  %v6074_v13 = vrot.slane %v6065_v14, %v15405_v2 }
 0x9af   :  { %10447 = vmatpush1.bf16.msra.mxu1 %v10446_v26  ;;  %v16272_v26 = vld [vmem:[#allocation313_spill] sm:$0xff] }
 0x9b0   :  { %10449 = vmatprep.subr.bf16.mxu1 %v10448_v36  ;;  %v10488_v37 = vpack.c.bf16 %v16273_v54, %v16272_v26  ;;  %v16274_v36 = vld [vmem:[#allocation312_spill] sm:$0xff] }
 0x9b1   :  { %v10490_v11 = vpack.c.bf16 %v16275_v52, %v16274_v36 }
 0x9b3   :  { %10451 = vmatpush1.bf16.msra.mxu1 %v10450_v22  ;;  %v16276_v22 = vld [vmem:[#allocation317_spill] sm:$0xff] }
 0x9b4   :  { %10453 = vmatprep.subr.bf16.mxu1 %v10452_v59  ;;  %v10492_v40 = vpack.c.bf16 %v16277_v43, %v16276_v22  ;;  %v16278_v59 = vld [vmem:[#allocation316_spill] sm:$0xff] }
 0x9b5   :  { %v10494_v18 = vpack.c.bf16 %v16279_v20, %v16278_v59 }
 0x9b7   :  { %10455 = vmatpush1.bf16.msra.mxu1 %v10454_v15 }
 0x9b8   :  { %10457 = vmatprep.subr.bf16.mxu1 %v10456_v24 }
 0x9bb   :  { %10459 = vmatpush1.bf16.msra.mxu1 %v10458_v21 }
 0x9bc   :  { %10461 = vmatprep.subr.bf16.mxu1 %v10460_v27 }
 0x9bf   :  { %10463 = vmatpush1.bf16.msra.mxu1 %v10462_v42 }
 0x9c0   :  { %10465 = vmatprep.subr.bf16.mxu1 %v10464_v41 }
 0x9c2   :  { %5936 = vmatmul.mubr.f32.vlgmr.msra.gmra.mrb[134].mxu1 %v15234_v9  ;;  %v16262_v9 = vld [vmem:[#allocation300_spill] sm:$0xff] }
 0x9c3   :  { %10467 = vmatpush1.bf16.msra.mxu1 %v10466_v8  ;;  %6006 = vmatprep.mubr.f32.mxu1 %v11491_v23  ;;  %v10478_v33 = vpack.c.bf16 %v16263_v5, %v16262_v9  ;;  %v15402_v5 = vsub.s32 0, %v13592_v45 }
 0x9c4   :  { %10469 = vmatprep.subr.bf16.mxu1 %v10468_v39 }
 0x9c5   :  { %v6070_v0 = vrot.slane %v6065_v14, %v15402_v5 }
 0x9c7   :  { %10471 = vmatpush1.bf16.msra.mxu1 %v10470_v50 }
 0x9c8   :  { %10473 = vmatprep.subr.bf16.mxu1 %v10472_v60 }
 0x9cb   :  { %10475 = vmatpush1.bf16.msra.mxu1 %v10474_v53 }
 0x9cc   :  { %10477 = vmatprep.subr.bf16.mxu1 %v10476_v38 }
 0x9cf   :  { %10479 = vmatpush1.bf16.msra.mxu1 %v10478_v33  ;;  %v6051_v33 = vld [vmem:[#allocation13] sm:$0x3] }
 0x9d0   :  { %10481 = vmatprep.subr.bf16.mxu1 %v10480_v25  ;;  %v6056_v25 = vrot.slane %v6051_v33, %v15402_v5  ;;  %v6060_v1 = vrot.slane %v6051_v33, %v15405_v2 }
 0x9d3   :  { %10483 = vmatpush1.bf16.msra.mxu1 %v10482_v3 }
 0x9d4   :  { %10485 = vmatprep.subr.bf16.mxu1 %v10484_v63 }
 0x9d7   :  { %10487 = vmatpush1.bf16.msra.mxu1 %v10486_v30 }
 0x9d8   :  { %10489 = vmatprep.subr.bf16.mxu1 %v10488_v37 }
 0x9db   :  { %10491 = vmatpush1.bf16.msra.mxu1 %v10490_v11 }
 0x9dc   :  { %10493 = vmatprep.subr.bf16.mxu1 %v10492_v40 }
 0x9df   :  { %10495 = vmatpush1.bf16.msra.mxu1 %v10494_v18 }
 0x9e2   :  { %6007 = vmatmul.mubr.f32.vlgmr.msra.gmra.mrb[134].mxu1 %v15270_v62 }
 0xab5   :  { %v6008_v15 = vpop.f32.mrb[134].mxu1 }
 0xab6   :  { %v6013_v49 = vrot.slane %v6008_v15, 4  ;;  %v6010_v10 = vpop.f32.mrb[135].mxu1 }
 0xab7   :  { %v6019_v24 = vrot.slane %v6010_v10, 4 }
 0xab8   :  { %v6014_v57 = vadd.f32 %v6013_v49, %v6008_v15 }
 0xab9   :  { %v6020_v6 = vadd.f32 %v6019_v24, %v6010_v10 }
 0xaba   :  { %v6015_v21 = vrot.slane %v6014_v57, 2 }
 0xabb   :  { %v6021_v48 = vrot.slane %v6020_v6, 2 }
 0xabc   :  { %v6016_v56 = vadd.f32 %v6015_v21, %v6014_v57 }
 0xabd   :  { %v6022_v27 = vadd.f32 %v6021_v48, %v6020_v6 }
 0xabe   :  { %v6017_v46 = vrot.slane %v6016_v56, 1 }
 0xabf   :  { %v6023_v19 = vrot.slane %v6022_v27, 1 }
 0xac0   :  { %v6018_v42 = vadd.f32 %v6017_v46, %v6016_v56 }
 0xac1   :  { %v6024_v55 = vadd.f32 %v6023_v19, %v6022_v27 }
 0xac2   :  { %v6025_v17 = vmul.f32 0.125, %v6018_v42 }
 0xac3   :  { %v6026_v41 = vmul.f32 0.125, %v6024_v55 }
 0xac4   :  { %v6027_v47 = vsub.f32 %v6008_v15, %v6025_v17 }
 0xac5   :  { %v6028_v16 = vsub.f32 %v6010_v10, %v6026_v41 }
 0xac6   :  { %v6029_v8 = vmul.f32 %v6027_v47, %v6027_v47 }
 0xac7   :  { %v6030_v62 = vmul.f32 %v6028_v16, %v6028_v16 }
 0xac8   :  { %v6031_v12 = vrot.slane %v6029_v8, 4 }
 0xac9   :  { %v6037_v44 = vrot.slane %v6030_v62, 4 }
 0xaca   :  { %v6032_v39 = vadd.f32 %v6031_v12, %v6029_v8 }
 0xacb   :  { %v6038_v51 = vadd.f32 %v6037_v44, %v6030_v62 }
 0xacc   :  { %v6033_v61 = vrot.slane %v6032_v39, 2 }
 0xacd   :  { %v6039_v50 = vrot.slane %v6038_v51, 2 }
 0xace   :  { %v6034_v28 = vadd.f32 %v6033_v61, %v6032_v39 }
 0xacf   :  { %v6040_v7 = vadd.f32 %v6039_v50, %v6038_v51 }
 0xad0   :  { %v6035_v60 = vrot.slane %v6034_v28, 1 }
 0xad1   :  { %v6041_v35 = vrot.slane %v6040_v7, 1 }
 0xad2   :  { %v6036_v31 = vadd.f32 %v6035_v60, %v6034_v28 }
 0xad3   :  { %v6042_v53 = vadd.f32 %v6041_v35, %v6040_v7 }
 0xad4   :  { %v6043_v32 = vmul.f32 0.125, %v6036_v31 }
 0xad5   :  { %v6044_v58 = vmul.f32 0.125, %v6042_v53 }
 0xad6   :  { %v6045_v38 = vadd.f32 1e-05, %v6043_v32 }
 0xad7   :  { %v6046_v9 = vadd.f32 1e-05, %v6044_v58 }
 0xad8   :  { %11180 = vrsqrt.f32 %v6045_v38 }
 0xad9   :  { %11182 = vrsqrt.f32 %v6046_v9 }
 0xae2   :  { %v11181_v4 = vpop.eup %11180 }
 0xae3   :  { %v11183_v3 = vpop.eup %11182  ;;  %v6049_v34 = vmul.f32 %v11181_v4, %v6027_v47 }
 0xae4   :  { %v6050_v63 = vmul.f32 %v11183_v3, %v6028_v16 }
 0xae5   :  { %v6063_v29 = vmul.f32 %v6056_v25, %v6049_v34 }
 0xae6   :  { %v6064_v30 = vmul.f32 %v6060_v1, %v6050_v63 }
 0xae7   :  { %v6077_v26 = vadd.f32 %v6070_v0, %v6063_v29 }
 0xae8   :  { %v6078_v54 = vadd.f32 %v6074_v13, %v6064_v30 }
 0xae9   :  { %vm6079_vm9 = vcmp.ge.f32.partialorder %v6077_v26, 0.0  ;;  %v6081_v37 = vmul.f32 0.2, %v6077_v26 }
 0xaea   :  { %vm6080_vm10 = vcmp.ge.f32.partialorder %v6078_v54, 0.0  ;;  %v6082_v36 = vmul.f32 0.2, %v6078_v54 }
 0xaeb   :  { %v6083_v52 = vsel %vm6079_vm9, %v6077_v26, %v6081_v37 }
 0xaec   :  { %v6084_v11 = vsel %vm6080_vm10, %v6078_v54, %v6082_v36 }
 0xaed   :  { %11470 = dma.done.wait [#allocation4 + $0x1], 65536 }
 0xaee   :  { %11471 = vsyncadd [#allocation4 + $0x1], 4294901760  ;;  %6606 = vmatprep.subr.mxu0 %v6084_v11  ;;  %6670 = vmatprep.mubr.f32.mxu0 %v11491_v23  ;;  %vm6602_vm11 = vcmask 64512   ;;  %v6601_v22 = vld [vmem:[#allocation16] sm:$0x3]  ;;  %v6090_v40 = vld [vmem:[#allocation3 + $0x8] sm:$0xff] }
 0xaef   :  { %6607 = vmatpush1.msra.mxu0 %v6083_v52  ;;  %v6678_v43 = vld [vmem:[#allocation16 + $0x2] sm:$0x3]  ;;  %v6094_v59 = vld [vmem:[#allocation3 + $0x28] sm:$0xff]  ;;  %v6754_v20 = vld [vmem:[#allocation16 + $0x4] sm:$0x3]  ;;  %vm7473_vm12 = vcmask 1041408  }
 0xaf0   :  { %6682 = vmatprep.subr.mxu0 %v6084_v11  ;;  %8105 = vmatmul.mubr.msk.f32.vlgmr.msra.gmra.mrb[68].mxu0 %vm6602_vm11, %v6601_v22  ;;  %v10496_v18 = vpack.c.bf16 %v6094_v59, %v6090_v40  ;;  %v6089_v15 = vld [vmem:[#allocation3] sm:$0xff]  ;;  %v6098_v10 = vld [vmem:[#allocation3 + $0x48] sm:$0xff]  ;;  %v6830_v57 = vld [vmem:[#allocation16 + $0x6] sm:$0x3]  ;;  %vm7833_vm1 = vcmask 517120  }
 0xaf1   :  { %6683 = vmatpush1.msra.mxu0 %v6083_v52  ;;  %6746 = vmatprep.mubr.f32.mxu0 %v11491_v23  ;;  %v6093_v49 = vld [vmem:[#allocation3 + $0x20] sm:$0xff]  ;;  %v6102_v24 = vld [vmem:[#allocation3 + $0x68] sm:$0xff] }
 0xaf2   :  { %6758 = vmatprep.subr.mxu0 %v6084_v11  ;;  %v10498_v6 = vpack.c.bf16 %v6093_v49, %v6089_v15  ;;  %v10500_v21 = vpack.c.bf16 %v6102_v24, %v6098_v10  ;;  %v6097_v48 = vld [vmem:[#allocation3 + $0x40] sm:$0xff]  ;;  %v6106_v27 = vld [vmem:[#allocation3 + $0x88] sm:$0xff] }
 0xaf3   :  { %v6101_v56 = vld [vmem:[#allocation3 + $0x60] sm:$0xff]  ;;  %v6110_v46 = vld [vmem:[#allocation3 + $0xa8] sm:$0xff] }
 0xaf4   :  { %8106 = vmatmul.mubr.msk.f32.vlgmr.msra.gmra.mrb[70].mxu0 %vm6602_vm11, %v6678_v43  ;;  %v10502_v19 = vpack.c.bf16 %v6101_v56, %v6097_v48  ;;  %v10504_v42 = vpack.c.bf16 %v6110_v46, %v6106_v27  ;;  %v6105_v55 = vld [vmem:[#allocation3 + $0x80] sm:$0xff]  ;;  %v6114_v41 = vld [vmem:[#allocation3 + $0xc8] sm:$0xff] }
 0xaf5   :  { %6759 = vmatpush1.msra.mxu0 %v6083_v52  ;;  %6822 = vmatprep.mubr.f32.mxu0 %v11491_v23  ;;  %v6109_v17 = vld [vmem:[#allocation3 + $0xa0] sm:$0xff]  ;;  %v6118_v47 = vld [vmem:[#allocation3 + $0xe8] sm:$0xff] }
 0xaf6   :  { %6834 = vmatprep.subr.mxu0 %v6084_v11  ;;  %v10508_v16 = vpack.c.bf16 %v6118_v47, %v6114_v41  ;;  %v6113_v8 = vld [vmem:[#allocation3 + $0xc0] sm:$0xff]  ;;  %v6122_v12 = vld [vmem:[#allocation3 + $0x108] sm:$0xff] }
 0xaf7   :  { %v6117_v62 = vld [vmem:[#allocation3 + $0xe0] sm:$0xff]  ;;  %v6126_v44 = vld [vmem:[#allocation3 + $0x128] sm:$0xff] }
 0xaf8   :  { %8107 = vmatmul.mubr.msk.f32.vlgmr.msra.gmra.mrb[72].mxu0 %vm6602_vm11, %v6754_v20  ;;  %v10510_v39 = vpack.c.bf16 %v6117_v62, %v6113_v8  ;;  %v10512_v51 = vpack.c.bf16 %v6126_v44, %v6122_v12  ;;  %v6121_v61 = vld [vmem:[#allocation3 + $0x100] sm:$0xff]  ;;  %v6130_v28 = vld [vmem:[#allocation3 + $0x148] sm:$0xff] }
 0xaf9   :  { %6835 = vmatpush1.msra.mxu0 %v6083_v52  ;;  %6898 = vmatprep.mubr.f32.mxu0 %v11491_v23  ;;  %v10506_v23 = vpack.c.bf16 %v6109_v17, %v6105_v55  ;;  %v6125_v50 = vld [vmem:[#allocation3 + $0x120] sm:$0xff]  ;;  %v6134_v7 = vld [vmem:[#allocation3 + $0x168] sm:$0xff] }
 0xafa   :  { %10497 = vmatprep.subr.bf16.mxu0 %v10496_v18  ;;  %v10514_v60 = vpack.c.bf16 %v6125_v50, %v6121_v61  ;;  %v10516_v35 = vpack.c.bf16 %v6134_v7, %v6130_v28  ;;  %v6129_v31 = vld [vmem:[#allocation3 + $0x140] sm:$0xff]  ;;  %v6138_v32 = vld [vmem:[#allocation3 + $0x188] sm:$0xff] }
 0xafb   :  { %v6133_v53 = vld [vmem:[#allocation3 + $0x160] sm:$0xff]  ;;  %v6142_v58 = vld [vmem:[#allocation3 + $0x1a8] sm:$0xff] }
 0xafc   :  { %8108 = vmatmul.mubr.msk.f32.vlgmr.msra.gmra.mrb[74].mxu0 %vm6602_vm11, %v6830_v57  ;;  %v10518_v38 = vpack.c.bf16 %v6133_v53, %v6129_v31  ;;  %v10520_v9 = vpack.c.bf16 %v6142_v58, %v6138_v32  ;;  %v6137_v33 = vld [vmem:[#allocation3 + $0x180] sm:$0xff]  ;;  %v6146_v25 = vld [vmem:[#allocation3 + $0x1c8] sm:$0xff] }
 0xafd   :  { %10499 = vmatpush1.bf16.msra.mxu0 %v10498_v6  ;;  %v6141_v14 = vld [vmem:[#allocation3 + $0x1a0] sm:$0xff]  ;;  %v6150_v4 = vld [vmem:[#allocation3 + $0x1e8] sm:$0xff] }
 0xafe   :  { %10501 = vmatprep.subr.bf16.mxu0 %v10500_v21  ;;  %v10522_v1 = vpack.c.bf16 %v6141_v14, %v6137_v33  ;;  %v10524_v3 = vpack.c.bf16 %v6150_v4, %v6146_v25  ;;  %v6145_v34 = vld [vmem:[#allocation3 + $0x1c0] sm:$0xff]  ;;  %v6154_v63 = vld [vmem:[#allocation3 + $0x208] sm:$0xff] }
 0xaff   :  { %v6149_v0 = vld [vmem:[#allocation3 + $0x1e0] sm:$0xff]  ;;  %v6158_v13 = vld [vmem:[#allocation3 + $0x228] sm:$0xff] }
 0xb00   :  { %v10526_v29 = vpack.c.bf16 %v6149_v0, %v6145_v34  ;;  %v10528_v30 = vpack.c.bf16 %v6158_v13, %v6154_v63  ;;  %v6153_v26 = vld [vmem:[#allocation3 + $0x200] sm:$0xff]  ;;  %v6162_v37 = vld [vmem:[#allocation3 + $0x248] sm:$0xff] }
 0xb01   :  { %10503 = vmatpush1.bf16.msra.mxu0 %v10502_v19  ;;  %v6157_v54 = vld [vmem:[#allocation3 + $0x220] sm:$0xff]  ;;  %v6166_v36 = vld [vmem:[#allocation3 + $0x268] sm:$0xff] }
 0xb02   :  { %10505 = vmatprep.subr.bf16.mxu0 %v10504_v42  ;;  %v10530_v52 = vpack.c.bf16 %v6157_v54, %v6153_v26  ;;  %v10532_v11 = vpack.c.bf16 %v6166_v36, %v6162_v37  ;;  %v6161_v22 = vld [vmem:[#allocation3 + $0x240] sm:$0xff]  ;;  %v6170_v40 = vld [vmem:[#allocation3 + $0x288] sm:$0xff] }
 0xb03   :  { %v6165_v43 = vld [vmem:[#allocation3 + $0x260] sm:$0xff]  ;;  %v6174_v59 = vld [vmem:[#allocation3 + $0x2a8] sm:$0xff] }
 0xb04   :  { %v10534_v20 = vpack.c.bf16 %v6165_v43, %v6161_v22  ;;  %v10536_v18 = vpack.c.bf16 %v6174_v59, %v6170_v40  ;;  %v6169_v15 = vld [vmem:[#allocation3 + $0x280] sm:$0xff]  ;;  %v6178_v10 = vld [vmem:[#allocation3 + $0x2c8] sm:$0xff] }
 0xb05   :  { %10507 = vmatpush1.bf16.msra.mxu0 %v10506_v23  ;;  %v6173_v49 = vld [vmem:[#allocation3 + $0x2a0] sm:$0xff]  ;;  %v6182_v24 = vld [vmem:[#allocation3 + $0x2e8] sm:$0xff] }
 0xb06   :  { %10509 = vmatprep.subr.bf16.mxu0 %v10508_v16  ;;  %v10538_v57 = vpack.c.bf16 %v6173_v49, %v6169_v15  ;;  %v10540_v6 = vpack.c.bf16 %v6182_v24, %v6178_v10  ;;  %v6177_v21 = vld [vmem:[#allocation3 + $0x2c0] sm:$0xff]  ;;  %v6186_v56 = vld [vmem:[#allocation3 + $0x308] sm:$0xff] }
 0xb07   :  { %v6181_v48 = vld [vmem:[#allocation3 + $0x2e0] sm:$0xff]  ;;  %v6190_v27 = vld [vmem:[#allocation3 + $0x328] sm:$0xff] }
 0xb08   :  { %v10542_v46 = vpack.c.bf16 %v6181_v48, %v6177_v21  ;;  %v10544_v19 = vpack.c.bf16 %v6190_v27, %v6186_v56  ;;  %v6185_v42 = vld [vmem:[#allocation3 + $0x300] sm:$0xff]  ;;  %v6194_v17 = vld [vmem:[#allocation3 + $0x348] sm:$0xff] }
 0xb09   :  { %10511 = vmatpush1.bf16.msra.mxu0 %v10510_v39  ;;  %v6189_v55 = vld [vmem:[#allocation3 + $0x320] sm:$0xff]  ;;  %v6198_v41 = vld [vmem:[#allocation3 + $0x368] sm:$0xff] }
 0xb0a   :  { %10513 = vmatprep.subr.bf16.mxu0 %v10512_v51  ;;  %v10546_v47 = vpack.c.bf16 %v6189_v55, %v6185_v42  ;;  %v10548_v23 = vpack.c.bf16 %v6198_v41, %v6194_v17  ;;  %v6193_v16 = vld [vmem:[#allocation3 + $0x340] sm:$0xff]  ;;  %v6202_v62 = vld [vmem:[#allocation3 + $0x388] sm:$0xff] }
 0xb0b   :  { %v6197_v8 = vld [vmem:[#allocation3 + $0x360] sm:$0xff]  ;;  %v6206_v12 = vld [vmem:[#allocation3 + $0x3a8] sm:$0xff] }
 0xb0c   :  { %v10550_v44 = vpack.c.bf16 %v6197_v8, %v6193_v16  ;;  %v10552_v39 = vpack.c.bf16 %v6206_v12, %v6202_v62  ;;  %v6201_v51 = vld [vmem:[#allocation3 + $0x380] sm:$0xff]  ;;  %v6210_v50 = vld [vmem:[#allocation3 + $0x3c8] sm:$0xff] }
 0xb0d   :  { %10515 = vmatpush1.bf16.msra.mxu0 %v10514_v60  ;;  %v6205_v61 = vld [vmem:[#allocation3 + $0x3a0] sm:$0xff]  ;;  %v6214_v28 = vld [vmem:[#allocation3 + $0x3e8] sm:$0xff] }
 0xb0e   :  { %10517 = vmatprep.subr.bf16.mxu0 %v10516_v35  ;;  %v10554_v7 = vpack.c.bf16 %v6205_v61, %v6201_v51  ;;  %v10556_v60 = vpack.c.bf16 %v6214_v28, %v6210_v50  ;;  %v6209_v35 = vld [vmem:[#allocation3 + $0x3c0] sm:$0xff]  ;;  %v6218_v32 = vld [vmem:[#allocation3 + $0x408] sm:$0xff] }
 0xb0f   :  { %v6213_v31 = vld [vmem:[#allocation3 + $0x3e0] sm:$0xff]  ;;  %v6222_v58 = vld [vmem:[#allocation3 + $0x428] sm:$0xff] }
 0xb10   :  { %v10558_v53 = vpack.c.bf16 %v6213_v31, %v6209_v35  ;;  %v6221_v33 = vld [vmem:[#allocation3 + $0x420] sm:$0xff]  ;;  %v6226_v14 = vld [vmem:[#allocation3 + $0x448] sm:$0xff] }
 0xb11   :  { %10519 = vmatpush1.bf16.msra.mxu0 %v10518_v38  ;;  %v10560_v38 = vpack.c.bf16 %v6222_v58, %v6218_v32  ;;  %v6230_v25 = vld [vmem:[#allocation3 + $0x468] sm:$0xff]  ;;  %v6225_v0 = vld [vmem:[#allocation3 + $0x440] sm:$0xff] }
 0xb12   :  { %10521 = vmatprep.subr.bf16.mxu0 %v10520_v9  ;;  %v6217_v9 = vld [vmem:[#allocation3 + $0x400] sm:$0xff]  ;;  %v10564_v34 = vpack.c.bf16 %v6230_v25, %v6226_v14  ;;  %v6234_v13 = vld [vmem:[#allocation3 + $0x488] sm:$0xff] }
 0xb13   :  { %v6229_v63 = vld [vmem:[#allocation3 + $0x460] sm:$0xff]  ;;  %v6246_v22 = vld [vmem:[#allocation3 + $0x4e8] sm:$0xff] }
 0xb14   :  { %v6233_v37 = vld [vmem:[#allocation3 + $0x480] sm:$0xff]  ;;  %v6250_v49 = vld [vmem:[#allocation3 + $0x508] sm:$0xff] }
 0xb15   :  { %10523 = vmatpush1.bf16.msra.mxu0 %v10522_v1  ;;  %v10562_v1 = vpack.c.bf16 %v6221_v33, %v6217_v9  ;;  %v6237_v36 = vld [vmem:[#allocation3 + $0x4a0] sm:$0xff]  ;;  %v6254_v10 = vld [vmem:[#allocation3 + $0x528] sm:$0xff] }
 0xb16   :  { %10525 = vmatprep.subr.bf16.mxu0 %v10524_v3  ;;  %v10570_v43 = vpack.c.bf16 %v6237_v36, %v6233_v37  ;;  %v6253_v21 = vld [vmem:[#allocation3 + $0x520] sm:$0xff]  ;;  %v6258_v48 = vld [vmem:[#allocation3 + $0x548] sm:$0xff] }
 0xb17   :  { %v6262_v56 = vld [vmem:[#allocation3 + $0x568] sm:$0xff]  ;;  %v6261_v42 = vld [vmem:[#allocation3 + $0x560] sm:$0xff] }
 0xb18   :  { %v6266_v55 = vld [vmem:[#allocation3 + $0x588] sm:$0xff]  ;;  %v6265_v16 = vld [vmem:[#allocation3 + $0x580] sm:$0xff] }
 0xb19   :  { %10527 = vmatpush1.bf16.msra.mxu0 %v10526_v29  ;;  %v6238_v29 = vld [vmem:[#allocation3 + $0x4a8] sm:$0xff]  ;;  %v6269_v8 = vld [vmem:[#allocation3 + $0x5a0] sm:$0xff] }
 0xb1a   :  { %10529 = vmatprep.subr.bf16.mxu0 %v10528_v30  ;;  %v10566_v30 = vpack.c.bf16 %v6229_v63, %v6225_v0  ;;  %v10568_v54 = vpack.c.bf16 %v6238_v29, %v6234_v13  ;;  %v6270_v17 = vld [vmem:[#allocation3 + $0x5a8] sm:$0xff]  ;;  %v6273_v61 = vld [vmem:[#allocation3 + $0x5c0] sm:$0xff] }
 0xb1b   :  { %v6274_v12 = vld [vmem:[#allocation3 + $0x5c8] sm:$0xff]  ;;  %v6277_v50 = vld [vmem:[#allocation3 + $0x5e0] sm:$0xff] }
 0xb1c   :  { %v6282_v28 = vld [vmem:[#allocation3 + $0x608] sm:$0xff]  ;;  %v6281_v31 = vld [vmem:[#allocation3 + $0x600] sm:$0xff] }
 0xb1d   :  { %10531 = vmatpush1.bf16.msra.mxu0 %v10530_v52  ;;  %v6290_v32 = vld [vmem:[#allocation3 + $0x648] sm:$0xff]  ;;  %v6289_v33 = vld [vmem:[#allocation3 + $0x640] sm:$0xff] }
 0xb1e   :  { %10533 = vmatprep.subr.bf16.mxu0 %v10532_v11  ;;  %v6242_v11 = vld [vmem:[#allocation3 + $0x4c8] sm:$0xff]  ;;  %v6293_v14 = vld [vmem:[#allocation3 + $0x660] sm:$0xff] }
 0xb1f   :  { %v10572_v59 = vpack.c.bf16 %v6246_v22, %v6242_v11  ;;  %v6294_v58 = vld [vmem:[#allocation3 + $0x668] sm:$0xff]  ;;  %v6297_v63 = vld [vmem:[#allocation3 + $0x680] sm:$0xff] }
 0xb20   :  { %v10596_v9 = vpack.c.bf16 %v6294_v58, %v6290_v32  ;;  %v6298_v25 = vld [vmem:[#allocation3 + $0x688] sm:$0xff]  ;;  %v6301_v13 = vld [vmem:[#allocation3 + $0x6a0] sm:$0xff] }
 0xb21   :  { %10535 = vmatpush1.bf16.msra.mxu0 %v10534_v20  ;;  %v6241_v20 = vld [vmem:[#allocation3 + $0x4c0] sm:$0xff]  ;;  %v6306_v29 = vld [vmem:[#allocation3 + $0x6c8] sm:$0xff] }
 0xb22   :  { %10537 = vmatprep.subr.bf16.mxu0 %v10536_v18  ;;  %v6245_v18 = vld [vmem:[#allocation3 + $0x4e0] sm:$0xff]  ;;  %v6314_v22 = vld [vmem:[#allocation3 + $0x708] sm:$0xff] }
 0xb23   :  { %v10574_v24 = vpack.c.bf16 %v6245_v18, %v6241_v20  ;;  %v6305_v36 = vld [vmem:[#allocation3 + $0x6c0] sm:$0xff]  ;;  %v6362_v58 = vld [vmem:[#allocation3 + $0x888] sm:$0xff] }
 0xb24   :  { %v6309_v11 = vld [vmem:[#allocation3 + $0x6e0] sm:$0xff] }
 0xb25   :  { %10539 = vmatpush1.bf16.msra.mxu0 %v10538_v57  ;;  %v10576_v57 = vpack.c.bf16 %v6254_v10, %v6250_v49  ;;  %v6313_v18 = vld [vmem:[#allocation3 + $0x700] sm:$0xff]  ;;  %v6322_v10 = vld [vmem:[#allocation3 + $0x748] sm:$0xff] }
 0xb26   :  { %10541 = vmatprep.subr.bf16.mxu0 %v10540_v6  ;;  %v6249_v6 = vld [vmem:[#allocation3 + $0x500] sm:$0xff] }
 0xb27   :  { %v10578_v27 = vpack.c.bf16 %v6253_v21, %v6249_v6  ;;  %v6317_v49 = vld [vmem:[#allocation3 + $0x720] sm:$0xff] }
 0xb28   :  { %v6321_v21 = vld [vmem:[#allocation3 + $0x740] sm:$0xff] }
 0xb29   :  { %10543 = vmatpush1.bf16.msra.mxu0 %v10542_v46  ;;  %v10580_v46 = vpack.c.bf16 %v6262_v56, %v6258_v48  ;;  %v6325_v48 = vld [vmem:[#allocation3 + $0x760] sm:$0xff]  ;;  %v6330_v56 = vld [vmem:[#allocation3 + $0x788] sm:$0xff] }
 0xb2a   :  { %10545 = vmatprep.subr.bf16.mxu0 %v10544_v19  ;;  %v6257_v19 = vld [vmem:[#allocation3 + $0x540] sm:$0xff] }
 0xb2b   :  { %v10582_v41 = vpack.c.bf16 %v6261_v42, %v6257_v19  ;;  %v6329_v42 = vld [vmem:[#allocation3 + $0x780] sm:$0xff] }
 0xb2c   :  { %v6357_v32 = vld [vmem:[#allocation3 + $0x860] sm:$0xff] }
 0xb2d   :  { %10547 = vmatpush1.bf16.msra.mxu0 %v10546_v47 }
 0xb2e   :  { %10549 = vmatprep.subr.bf16.mxu0 %v10548_v23  ;;  %v10584_v23 = vpack.c.bf16 %v6270_v17, %v6266_v55  ;;  %v6333_v55 = vld [vmem:[#allocation3 + $0x7a0] sm:$0xff]  ;;  %v6338_v17 = vld [vmem:[#allocation3 + $0x7c8] sm:$0xff] }
 0xb31   :  { %10551 = vmatpush1.bf16.msra.mxu0 %v10550_v44  ;;  %v6278_v44 = vld [vmem:[#allocation3 + $0x5e8] sm:$0xff] }
 0xb32   :  { %10553 = vmatprep.subr.bf16.mxu0 %v10552_v39  ;;  %v10586_v39 = vpack.c.bf16 %v6269_v8, %v6265_v16  ;;  %v10588_v51 = vpack.c.bf16 %v6278_v44, %v6274_v12  ;;  %v6337_v8 = vld [vmem:[#allocation3 + $0x7c0] sm:$0xff]  ;;  %v6346_v44 = vld [vmem:[#allocation3 + $0x808] sm:$0xff] }
 0xb33   :  { %v6341_v12 = vld [vmem:[#allocation3 + $0x7e0] sm:$0xff] }
 0xb35   :  { %10555 = vmatpush1.bf16.msra.mxu0 %v10554_v7  ;;  %v6286_v7 = vld [vmem:[#allocation3 + $0x628] sm:$0xff] }
 0xb36   :  { %10557 = vmatprep.subr.bf16.mxu0 %v10556_v60  ;;  %v10590_v60 = vpack.c.bf16 %v6277_v50, %v6273_v61  ;;  %v10592_v35 = vpack.c.bf16 %v6286_v7, %v6282_v28  ;;  %v6345_v50 = vld [vmem:[#allocation3 + $0x800] sm:$0xff]  ;;  %v6354_v7 = vld [vmem:[#allocation3 + $0x848] sm:$0xff] }
 0xb37   :  { %v6349_v28 = vld [vmem:[#allocation3 + $0x820] sm:$0xff] }
 0xb39   :  { %10559 = vmatpush1.bf16.msra.mxu0 %v10558_v53  ;;  %v6285_v53 = vld [vmem:[#allocation3 + $0x620] sm:$0xff] }
 0xb3a   :  { %10561 = vmatprep.subr.bf16.mxu0 %v10560_v38  ;;  %v10594_v38 = vpack.c.bf16 %v6285_v53, %v6281_v31  ;;  %v6353_v53 = vld [vmem:[#allocation3 + $0x840] sm:$0xff] }
 0xbc3   :  { %v15419_v4 = vpop.f32.mrb[68].mxu0 }
 0xbc4   :  { %v15421_v3 = vpop.f32.mrb[69].mxu0 }
 0xbc5   :  { %6969 = vmatprep.mubr.f32.mxu0 %v15421_v3 }
 0xbc6   :  { %6970 = vmatmul.mubr.f32.vlgmr.msra.gmra.mrb[76].mxu0 %v15419_v4 }
 0xbc7   :  { %10563 = vmatpush1.bf16.msra.mxu0 %v10562_v1  ;;  %v15425_v26 = vpop.f32.mrb[70].mxu0  ;;  %v6302_v1 = vld [vmem:[#allocation3 + $0x6a8] sm:$0xff] }
 0xbc8   :  { %10565 = vmatprep.subr.bf16.mxu0 %v10564_v34  ;;  %v15427_v52 = vpop.f32.mrb[71].mxu0  ;;  %v10598_v34 = vpack.c.bf16 %v6293_v14, %v6289_v33  ;;  %v10600_v0 = vpack.c.bf16 %v6302_v1, %v6298_v25  ;;  %v6361_v14 = vld [vmem:[#allocation3 + $0x880] sm:$0xff]  ;;  %v6370_v1 = vld [vmem:[#allocation3 + $0x8c8] sm:$0xff] }
 0xbc9   :  { %7040 = vmatprep.mubr.f32.mxu0 %v15427_v52  ;;  %v6365_v25 = vld [vmem:[#allocation3 + $0x8a0] sm:$0xff] }
 0xbcb   :  { %10567 = vmatpush1.bf16.msra.mxu0 %v10566_v30  ;;  %v15430_v40 = vpop.f32.mrb[72].mxu0  ;;  %v6310_v30 = vld [vmem:[#allocation3 + $0x6e8] sm:$0xff] }
 0xbcc   :  { %10569 = vmatprep.subr.bf16.mxu0 %v10568_v54  ;;  %v15432_v15 = vpop.f32.mrb[73].mxu0  ;;  %v10602_v54 = vpack.c.bf16 %v6301_v13, %v6297_v63  ;;  %v10604_v37 = vpack.c.bf16 %v6310_v30, %v6306_v29  ;;  %v6369_v13 = vld [vmem:[#allocation3 + $0x8c0] sm:$0xff]  ;;  %v6378_v30 = vld [vmem:[#allocation3 + $0x908] sm:$0xff] }
 0xbcd   :  { %v6373_v29 = vld [vmem:[#allocation3 + $0x8e0] sm:$0xff] }
 0xbcf   :  { %10571 = vmatpush1.bf16.msra.mxu0 %v10570_v43  ;;  %v15434_v47 = vpop.f32.mrb[74].mxu0  ;;  %v6318_v43 = vld [vmem:[#allocation3 + $0x728] sm:$0xff] }
 0xbd0   :  { %10573 = vmatprep.subr.bf16.mxu0 %v10572_v59  ;;  %v15436_v62 = vpop.f32.mrb[75].mxu0  ;;  %v10606_v59 = vpack.c.bf16 %v6309_v11, %v6305_v36  ;;  %v10608_v20 = vpack.c.bf16 %v6318_v43, %v6314_v22  ;;  %v6377_v11 = vld [vmem:[#allocation3 + $0x900] sm:$0xff]  ;;  %v6386_v43 = vld [vmem:[#allocation3 + $0x948] sm:$0xff] }
 0xbd1   :  { %v6381_v22 = vld [vmem:[#allocation3 + $0x920] sm:$0xff] }
 0xbd3   :  { %10575 = vmatpush1.bf16.msra.mxu0 %v10574_v24  ;;  %v6326_v24 = vld [vmem:[#allocation3 + $0x768] sm:$0xff] }
 0xbd4   :  { %10577 = vmatprep.subr.bf16.mxu0 %v10576_v57  ;;  %v10610_v57 = vpack.c.bf16 %v6317_v49, %v6313_v18  ;;  %v10612_v6 = vpack.c.bf16 %v6326_v24, %v6322_v10  ;;  %v6385_v49 = vld [vmem:[#allocation3 + $0x940] sm:$0xff]  ;;  %v6394_v24 = vld [vmem:[#allocation3 + $0x988] sm:$0xff] }
 0xbd5   :  { %v6389_v10 = vld [vmem:[#allocation3 + $0x960] sm:$0xff] }
 0xbd7   :  { %10579 = vmatpush1.bf16.msra.mxu0 %v10578_v27  ;;  %v6334_v27 = vld [vmem:[#allocation3 + $0x7a8] sm:$0xff] }
 0xbd8   :  { %10581 = vmatprep.subr.bf16.mxu0 %v10580_v46  ;;  %v10614_v46 = vpack.c.bf16 %v6325_v48, %v6321_v21  ;;  %v10616_v19 = vpack.c.bf16 %v6334_v27, %v6330_v56  ;;  %v6393_v48 = vld [vmem:[#allocation3 + $0x980] sm:$0xff]  ;;  %v6402_v27 = vld [vmem:[#allocation3 + $0x9c8] sm:$0xff] }
 0xbd9   :  { %v6397_v56 = vld [vmem:[#allocation3 + $0x9a0] sm:$0xff] }
 0xbdb   :  { %10583 = vmatpush1.bf16.msra.mxu0 %v10582_v41  ;;  %v6342_v41 = vld [vmem:[#allocation3 + $0x7e8] sm:$0xff] }
 0xbdc   :  { %10585 = vmatprep.subr.bf16.mxu0 %v10584_v23  ;;  %v10618_v23 = vpack.c.bf16 %v6333_v55, %v6329_v42  ;;  %v10620_v16 = vpack.c.bf16 %v6342_v41, %v6338_v17  ;;  %v6401_v55 = vld [vmem:[#allocation3 + $0x9c0] sm:$0xff]  ;;  %v6410_v41 = vld [vmem:[#allocation3 + $0xa08] sm:$0xff] }
 0xbdd   :  { %v6405_v17 = vld [vmem:[#allocation3 + $0x9e0] sm:$0xff] }
 0xbdf   :  { %10587 = vmatpush1.bf16.msra.mxu0 %v10586_v39  ;;  %v6350_v39 = vld [vmem:[#allocation3 + $0x828] sm:$0xff] }
 0xbe0   :  { %10589 = vmatprep.subr.bf16.mxu0 %v10588_v51  ;;  %v10622_v51 = vpack.c.bf16 %v6341_v12, %v6337_v8  ;;  %v10624_v61 = vpack.c.bf16 %v6350_v39, %v6346_v44  ;;  %v6409_v12 = vld [vmem:[#allocation3 + $0xa00] sm:$0xff]  ;;  %v6418_v39 = vld [vmem:[#allocation3 + $0xa48] sm:$0xff] }
 0xbe1   :  { %v6413_v44 = vld [vmem:[#allocation3 + $0xa20] sm:$0xff] }
 0xbe3   :  { %10591 = vmatpush1.bf16.msra.mxu0 %v10590_v60  ;;  %v6358_v60 = vld [vmem:[#allocation3 + $0x868] sm:$0xff] }
 0xbe4   :  { %10593 = vmatprep.subr.bf16.mxu0 %v10592_v35  ;;  %v10626_v35 = vpack.c.bf16 %v6349_v28, %v6345_v50  ;;  %v10628_v31 = vpack.c.bf16 %v6358_v60, %v6354_v7  ;;  %v6417_v28 = vld [vmem:[#allocation3 + $0xa40] sm:$0xff]  ;;  %v6426_v60 = vld [vmem:[#allocation3 + $0xa88] sm:$0xff] }
 0xbe5   :  { %v6421_v7 = vld [vmem:[#allocation3 + $0xa60] sm:$0xff] }
 0xbe7   :  { %10595 = vmatpush1.bf16.msra.mxu0 %v10594_v38  ;;  %v6366_v38 = vld [vmem:[#allocation3 + $0x8a8] sm:$0xff] }
 0xbe8   :  { %10597 = vmatprep.subr.bf16.mxu0 %v10596_v9  ;;  %v10630_v9 = vpack.c.bf16 %v6357_v32, %v6353_v53  ;;  %v10632_v33 = vpack.c.bf16 %v6366_v38, %v6362_v58  ;;  %v6425_v32 = vld [vmem:[#allocation3 + $0xa80] sm:$0xff]  ;;  %v6434_v38 = vld [vmem:[#allocation3 + $0xac8] sm:$0xff] }
 0xbe9   :  { %v6429_v58 = vld [vmem:[#allocation3 + $0xaa0] sm:$0xff] }
 0xbeb   :  { %10599 = vmatpush1.bf16.msra.mxu0 %v10598_v34  ;;  %v6374_v34 = vld [vmem:[#allocation3 + $0x8e8] sm:$0xff] }
 0xbec   :  { %10601 = vmatprep.subr.bf16.mxu0 %v10600_v0  ;;  %v10634_v0 = vpack.c.bf16 %v6365_v25, %v6361_v14  ;;  %v10636_v63 = vpack.c.bf16 %v6374_v34, %v6370_v1  ;;  %v6433_v25 = vld [vmem:[#allocation3 + $0xac0] sm:$0xff]  ;;  %v6442_v34 = vld [vmem:[#allocation3 + $0xb08] sm:$0xff] }
 0xbed   :  { %v6437_v1 = vld [vmem:[#allocation3 + $0xae0] sm:$0xff] }
 0xbef   :  { %10603 = vmatpush1.bf16.msra.mxu0 %v10602_v54  ;;  %v6382_v54 = vld [vmem:[#allocation3 + $0x928] sm:$0xff] }
 0xbf0   :  { %10605 = vmatprep.subr.bf16.mxu0 %v10604_v37  ;;  %v10638_v37 = vpack.c.bf16 %v6373_v29, %v6369_v13  ;;  %v10640_v36 = vpack.c.bf16 %v6382_v54, %v6378_v30  ;;  %v6441_v29 = vld [vmem:[#allocation3 + $0xb00] sm:$0xff]  ;;  %v6450_v54 = vld [vmem:[#allocation3 + $0xb48] sm:$0xff] }
 0xbf1   :  { %v6445_v30 = vld [vmem:[#allocation3 + $0xb20] sm:$0xff] }
 0xbf3   :  { %10607 = vmatpush1.bf16.msra.mxu0 %v10606_v59  ;;  %v6390_v59 = vld [vmem:[#allocation3 + $0x968] sm:$0xff] }
 0xbf4   :  { %10609 = vmatprep.subr.bf16.mxu0 %v10608_v20  ;;  %v10642_v20 = vpack.c.bf16 %v6381_v22, %v6377_v11  ;;  %v10644_v18 = vpack.c.bf16 %v6390_v59, %v6386_v43  ;;  %v6449_v22 = vld [vmem:[#allocation3 + $0xb40] sm:$0xff]  ;;  %v6458_v59 = vld [vmem:[#allocation3 + $0xb88] sm:$0xff] }
 0xbf5   :  { %v6453_v43 = vld [vmem:[#allocation3 + $0xb60] sm:$0xff] }
 0xbf7   :  { %10611 = vmatpush1.bf16.msra.mxu0 %v10610_v57  ;;  %v6398_v57 = vld [vmem:[#allocation3 + $0x9a8] sm:$0xff] }
 0xbf8   :  { %10613 = vmatprep.subr.bf16.mxu0 %v10612_v6  ;;  %v10646_v6 = vpack.c.bf16 %v6389_v10, %v6385_v49  ;;  %v10648_v21 = vpack.c.bf16 %v6398_v57, %v6394_v24  ;;  %v6457_v10 = vld [vmem:[#allocation3 + $0xb80] sm:$0xff]  ;;  %v6466_v57 = vld [vmem:[#allocation3 + $0xbc8] sm:$0xff] }
 0xbf9   :  { %v6461_v24 = vld [vmem:[#allocation3 + $0xba0] sm:$0xff] }
 0xbfb   :  { %10615 = vmatpush1.bf16.msra.mxu0 %v10614_v46  ;;  %v6406_v46 = vld [vmem:[#allocation3 + $0x9e8] sm:$0xff] }
 0xbfc   :  { %10617 = vmatprep.subr.bf16.mxu0 %v10616_v19  ;;  %v10650_v19 = vpack.c.bf16 %v6397_v56, %v6393_v48  ;;  %v10652_v42 = vpack.c.bf16 %v6406_v46, %v6402_v27  ;;  %v6465_v56 = vld [vmem:[#allocation3 + $0xbc0] sm:$0xff]  ;;  %v6474_v46 = vld [vmem:[#allocation3 + $0xc08] sm:$0xff] }
 0xbfd   :  { %v6469_v27 = vld [vmem:[#allocation3 + $0xbe0] sm:$0xff] }
 0xbff   :  { %10619 = vmatpush1.bf16.msra.mxu0 %v10618_v23  ;;  %v6414_v23 = vld [vmem:[#allocation3 + $0xa28] sm:$0xff] }
 0xc00   :  { %10621 = vmatprep.subr.bf16.mxu0 %v10620_v16  ;;  %v10654_v16 = vpack.c.bf16 %v6405_v17, %v6401_v55  ;;  %v10656_v8 = vpack.c.bf16 %v6414_v23, %v6410_v41  ;;  %v6473_v17 = vld [vmem:[#allocation3 + $0xc00] sm:$0xff]  ;;  %v6482_v23 = vld [vmem:[#allocation3 + $0xc48] sm:$0xff] }
 0xc01   :  { %v6477_v41 = vld [vmem:[#allocation3 + $0xc20] sm:$0xff] }
 0xc03   :  { %10623 = vmatpush1.bf16.msra.mxu0 %v10622_v51  ;;  %v6422_v51 = vld [vmem:[#allocation3 + $0xa68] sm:$0xff] }
 0xc04   :  { %10625 = vmatprep.subr.bf16.mxu0 %v10624_v61  ;;  %v10658_v61 = vpack.c.bf16 %v6413_v44, %v6409_v12  ;;  %v10660_v50 = vpack.c.bf16 %v6422_v51, %v6418_v39  ;;  %v6481_v44 = vld [vmem:[#allocation3 + $0xc40] sm:$0xff]  ;;  %v6490_v51 = vld [vmem:[#allocation3 + $0xc88] sm:$0xff] }
 0xc05   :  { %v6485_v39 = vld [vmem:[#allocation3 + $0xc60] sm:$0xff] }
 0xc06   :  { %7041 = vmatmul.mubr.f32.vlgmr.msra.gmra.mrb[76].mxu0 %v15425_v26 }
 0xc07   :  { %10627 = vmatpush1.bf16.msra.mxu0 %v10626_v35  ;;  %7111 = vmatprep.mubr.f32.mxu0 %v15432_v15  ;;  %v6430_v35 = vld [vmem:[#allocation3 + $0xaa8] sm:$0xff] }
 0xc08   :  { %10629 = vmatprep.subr.bf16.mxu0 %v10628_v31  ;;  %v10662_v31 = vpack.c.bf16 %v6421_v7, %v6417_v28  ;;  %v10664_v53 = vpack.c.bf16 %v6430_v35, %v6426_v60  ;;  %v6489_v7 = vld [vmem:[#allocation3 + $0xc80] sm:$0xff]  ;;  %v6498_v35 = vld [vmem:[#allocation3 + $0xcc8] sm:$0xff] }
 0xc09   :  { %v6493_v60 = vld [vmem:[#allocation3 + $0xca0] sm:$0xff] }
 0xc0b   :  { %10631 = vmatpush1.bf16.msra.mxu0 %v10630_v9  ;;  %v6438_v9 = vld [vmem:[#allocation3 + $0xae8] sm:$0xff] }
 0xc0c   :  { %10633 = vmatprep.subr.bf16.mxu0 %v10632_v33  ;;  %v10666_v33 = vpack.c.bf16 %v6429_v58, %v6425_v32  ;;  %v10668_v14 = vpack.c.bf16 %v6438_v9, %v6434_v38  ;;  %v6497_v58 = vld [vmem:[#allocation3 + $0xcc0] sm:$0xff]  ;;  %v6506_v9 = vld [vmem:[#allocation3 + $0xd08] sm:$0xff] }
 0xc0d   :  { %v6501_v38 = vld [vmem:[#allocation3 + $0xce0] sm:$0xff] }
 0xc0f   :  { %10635 = vmatpush1.bf16.msra.mxu0 %v10634_v0  ;;  %v6446_v0 = vld [vmem:[#allocation3 + $0xb28] sm:$0xff] }
 0xc10   :  { %10637 = vmatprep.subr.bf16.mxu0 %v10636_v63  ;;  %v10670_v63 = vpack.c.bf16 %v6437_v1, %v6433_v25  ;;  %v10672_v13 = vpack.c.bf16 %v6446_v0, %v6442_v34  ;;  %v6505_v1 = vld [vmem:[#allocation3 + $0xd00] sm:$0xff]  ;;  %v6514_v0 = vld [vmem:[#allocation3 + $0xd48] sm:$0xff] }
 0xc11   :  { %v6509_v34 = vld [vmem:[#allocation3 + $0xd20] sm:$0xff] }
 0xc13   :  { %10639 = vmatpush1.bf16.msra.mxu0 %v10638_v37  ;;  %v6454_v37 = vld [vmem:[#allocation3 + $0xb68] sm:$0xff] }
 0xc14   :  { %10641 = vmatprep.subr.bf16.mxu0 %v10640_v36  ;;  %v10674_v36 = vpack.c.bf16 %v6445_v30, %v6441_v29  ;;  %v10676_v11 = vpack.c.bf16 %v6454_v37, %v6450_v54  ;;  %v6513_v30 = vld [vmem:[#allocation3 + $0xd40] sm:$0xff]  ;;  %v6522_v37 = vld [vmem:[#allocation3 + $0xd88] sm:$0xff] }
 0xc15   :  { %v6517_v54 = vld [vmem:[#allocation3 + $0xd60] sm:$0xff] }
 0xc17   :  { %10643 = vmatpush1.bf16.msra.mxu0 %v10642_v20  ;;  %v6462_v20 = vld [vmem:[#allocation3 + $0xba8] sm:$0xff] }
 0xc18   :  { %10645 = vmatprep.subr.bf16.mxu0 %v10644_v18  ;;  %v10678_v18 = vpack.c.bf16 %v6453_v43, %v6449_v22  ;;  %v10680_v49 = vpack.c.bf16 %v6462_v20, %v6458_v59  ;;  %v6521_v43 = vld [vmem:[#allocation3 + $0xd80] sm:$0xff]  ;;  %v6530_v20 = vld [vmem:[#allocation3 + $0xdc8] sm:$0xff] }
 0xc19   :  { %v6525_v59 = vld [vmem:[#allocation3 + $0xda0] sm:$0xff] }
 0xc1b   :  { %10647 = vmatpush1.bf16.msra.mxu0 %v10646_v6  ;;  %v6470_v6 = vld [vmem:[#allocation3 + $0xbe8] sm:$0xff] }
 0xc1c   :  { %10649 = vmatprep.subr.bf16.mxu0 %v10648_v21  ;;  %v10682_v21 = vpack.c.bf16 %v6461_v24, %v6457_v10  ;;  %v10684_v48 = vpack.c.bf16 %v6470_v6, %v6466_v57  ;;  %v6529_v24 = vld [vmem:[#allocation3 + $0xdc0] sm:$0xff]  ;;  %v6538_v6 = vld [vmem:[#allocation3 + $0xe08] sm:$0xff] }
 0xc1d   :  { %v6533_v57 = vld [vmem:[#allocation3 + $0xde0] sm:$0xff] }
 0xc1f   :  { %10651 = vmatpush1.bf16.msra.mxu0 %v10650_v19  ;;  %v6478_v19 = vld [vmem:[#allocation3 + $0xc28] sm:$0xff] }
 0xc20   :  { %10653 = vmatprep.subr.bf16.mxu0 %v10652_v42  ;;  %v10686_v42 = vpack.c.bf16 %v6469_v27, %v6465_v56  ;;  %v10688_v55 = vpack.c.bf16 %v6478_v19, %v6474_v46  ;;  %v6537_v27 = vld [vmem:[#allocation3 + $0xe00] sm:$0xff]  ;;  %v6546_v19 = vld [vmem:[#allocation3 + $0xe48] sm:$0xff] }
 0xc21   :  { %v6541_v46 = vld [vmem:[#allocation3 + $0xe20] sm:$0xff] }
 0xc23   :  { %10655 = vmatpush1.bf16.msra.mxu0 %v10654_v16  ;;  %v6486_v16 = vld [vmem:[#allocation3 + $0xc68] sm:$0xff] }
 0xc24   :  { %10657 = vmatprep.subr.bf16.mxu0 %v10656_v8  ;;  %v10690_v8 = vpack.c.bf16 %v6477_v41, %v6473_v17  ;;  %v10692_v12 = vpack.c.bf16 %v6486_v16, %v6482_v23  ;;  %v6545_v41 = vld [vmem:[#allocation3 + $0xe40] sm:$0xff]  ;;  %v6554_v16 = vld [vmem:[#allocation3 + $0xe88] sm:$0xff] }
 0xc25   :  { %v6549_v23 = vld [vmem:[#allocation3 + $0xe60] sm:$0xff] }
 0xc27   :  { %10659 = vmatpush1.bf16.msra.mxu0 %v10658_v61  ;;  %v6494_v61 = vld [vmem:[#allocation3 + $0xca8] sm:$0xff] }
 0xc28   :  { %10661 = vmatprep.subr.bf16.mxu0 %v10660_v50  ;;  %v10694_v50 = vpack.c.bf16 %v6485_v39, %v6481_v44  ;;  %v10696_v28 = vpack.c.bf16 %v6494_v61, %v6490_v51  ;;  %v6553_v39 = vld [vmem:[#allocation3 + $0xe80] sm:$0xff]  ;;  %v6562_v61 = vld [vmem:[#allocation3 + $0xec8] sm:$0xff] }
 0xc29   :  { %v6557_v51 = vld [vmem:[#allocation3 + $0xea0] sm:$0xff] }
 0xc2b   :  { %10663 = vmatpush1.bf16.msra.mxu0 %v10662_v31  ;;  %v6502_v31 = vld [vmem:[#allocation3 + $0xce8] sm:$0xff] }
 0xc2c   :  { %10665 = vmatprep.subr.bf16.mxu0 %v10664_v53  ;;  %v10698_v53 = vpack.c.bf16 %v6493_v60, %v6489_v7  ;;  %v10700_v32 = vpack.c.bf16 %v6502_v31, %v6498_v35  ;;  %v6561_v60 = vld [vmem:[#allocation3 + $0xec0] sm:$0xff]  ;;  %v6570_v31 = vld [vmem:[#allocation3 + $0xf08] sm:$0xff] }
 0xc2d   :  { %v6565_v35 = vld [vmem:[#allocation3 + $0xee0] sm:$0xff] }
 0xc2f   :  { %10667 = vmatpush1.bf16.msra.mxu0 %v10666_v33  ;;  %v6510_v33 = vld [vmem:[#allocation3 + $0xd28] sm:$0xff] }
 0xc30   :  { %10669 = vmatprep.subr.bf16.mxu0 %v10668_v14  ;;  %v10702_v14 = vpack.c.bf16 %v6501_v38, %v6497_v58  ;;  %v10704_v25 = vpack.c.bf16 %v6510_v33, %v6506_v9  ;;  %v6569_v38 = vld [vmem:[#allocation3 + $0xf00] sm:$0xff]  ;;  %v6578_v33 = vld [vmem:[#allocation3 + $0xf48] sm:$0xff] }
 0xc31   :  { %v6573_v9 = vld [vmem:[#allocation3 + $0xf20] sm:$0xff] }
 0xc33   :  { %10671 = vmatpush1.bf16.msra.mxu0 %v10670_v63  ;;  %v6518_v63 = vld [vmem:[#allocation3 + $0xd68] sm:$0xff] }
 0xc34   :  { %10673 = vmatprep.subr.bf16.mxu0 %v10672_v13  ;;  %v10706_v13 = vpack.c.bf16 %v6509_v34, %v6505_v1  ;;  %v10708_v29 = vpack.c.bf16 %v6518_v63, %v6514_v0  ;;  %v6577_v34 = vld [vmem:[#allocation3 + $0xf40] sm:$0xff]  ;;  %v6586_v63 = vld [vmem:[#allocation3 + $0xf88] sm:$0xff] }
 0xc35   :  { %v6581_v0 = vld [vmem:[#allocation3 + $0xf60] sm:$0xff] }
 0xc37   :  { %10675 = vmatpush1.bf16.msra.mxu0 %v10674_v36  ;;  %v6526_v36 = vld [vmem:[#allocation3 + $0xda8] sm:$0xff] }
 0xc38   :  { %10677 = vmatprep.subr.bf16.mxu0 %v10676_v11  ;;  %v10710_v11 = vpack.c.bf16 %v6517_v54, %v6513_v30  ;;  %v10712_v22 = vpack.c.bf16 %v6526_v36, %v6522_v37  ;;  %v6585_v54 = vld [vmem:[#allocation3 + $0xf80] sm:$0xff]  ;;  %v6594_v36 = vld [vmem:[#allocation3 + $0xfc8] sm:$0xff] }
 0xc39   :  { %v6589_v37 = vld [vmem:[#allocation3 + $0xfa0] sm:$0xff] }
 0xc3b   :  { %10679 = vmatpush1.bf16.msra.mxu0 %v10678_v18  ;;  %v6534_v18 = vld [vmem:[#allocation3 + $0xde8] sm:$0xff] }
 0xc3c   :  { %10681 = vmatprep.subr.bf16.mxu0 %v10680_v49  ;;  %v10714_v49 = vpack.c.bf16 %v6525_v59, %v6521_v43  ;;  %v10716_v10 = vpack.c.bf16 %v6534_v18, %v6530_v20  ;;  %v6593_v59 = vld [vmem:[#allocation3 + $0xfc0] sm:$0xff]  ;;  %v6092_v18 = vld [vmem:[#allocation3 + $0x18] sm:$0xff] }
 0xc3d   :  { %v6597_v20 = vld [vmem:[#allocation3 + $0xfe0] sm:$0xff] }
 0xc3f   :  { %10683 = vmatpush1.bf16.msra.mxu0 %v10682_v21  ;;  %v6542_v21 = vld [vmem:[#allocation3 + $0xe28] sm:$0xff] }
 0xc40   :  { %10685 = vmatprep.subr.bf16.mxu0 %v10684_v48  ;;  %v10718_v48 = vpack.c.bf16 %v6533_v57, %v6529_v24  ;;  %v10720_v56 = vpack.c.bf16 %v6542_v21, %v6538_v6  ;;  %v6091_v57 = vld [vmem:[#allocation3 + $0x10] sm:$0xff]  ;;  %v6100_v21 = vld [vmem:[#allocation3 + $0x58] sm:$0xff] }
 0xc41   :  { %v6095_v6 = vld [vmem:[#allocation3 + $0x30] sm:$0xff] }
 0xc43   :  { %10687 = vmatpush1.bf16.msra.mxu0 %v10686_v42  ;;  %v6550_v42 = vld [vmem:[#allocation3 + $0xe68] sm:$0xff] }
 0xc44   :  { %10689 = vmatprep.subr.bf16.mxu0 %v10688_v55  ;;  %v10722_v55 = vpack.c.bf16 %v6541_v46, %v6537_v27  ;;  %v10724_v17 = vpack.c.bf16 %v6550_v42, %v6546_v19  ;;  %v6099_v46 = vld [vmem:[#allocation3 + $0x50] sm:$0xff]  ;;  %v6108_v42 = vld [vmem:[#allocation3 + $0x98] sm:$0xff] }
 0xc45   :  { %v6103_v19 = vld [vmem:[#allocation3 + $0x70] sm:$0xff] }
 0xc46   :  { %7112 = vmatmul.mubr.f32.vlgmr.msra.gmra.mrb[76].mxu0 %v15430_v40 }
 0xc47   :  { %10691 = vmatpush1.bf16.msra.mxu0 %v10690_v8  ;;  %7182 = vmatprep.mubr.f32.mxu0 %v15436_v62  ;;  %v6558_v8 = vld [vmem:[#allocation3 + $0xea8] sm:$0xff] }
 0xc48   :  { %10693 = vmatprep.subr.bf16.mxu0 %v10692_v12  ;;  %v10726_v12 = vpack.c.bf16 %v6549_v23, %v6545_v41  ;;  %v10728_v44 = vpack.c.bf16 %v6558_v8, %v6554_v16  ;;  %v6107_v23 = vld [vmem:[#allocation3 + $0x90] sm:$0xff]  ;;  %v6116_v8 = vld [vmem:[#allocation3 + $0xd8] sm:$0xff] }
 0xc49   :  { %v6111_v16 = vld [vmem:[#allocation3 + $0xb0] sm:$0xff] }
 0xc4b   :  { %10695 = vmatpush1.bf16.msra.mxu0 %v10694_v50  ;;  %v6566_v50 = vld [vmem:[#allocation3 + $0xee8] sm:$0xff] }
 0xc4c   :  { %10697 = vmatprep.subr.bf16.mxu0 %v10696_v28  ;;  %v10730_v28 = vpack.c.bf16 %v6557_v51, %v6553_v39  ;;  %v10732_v7 = vpack.c.bf16 %v6566_v50, %v6562_v61  ;;  %v6115_v51 = vld [vmem:[#allocation3 + $0xd0] sm:$0xff]  ;;  %v6124_v50 = vld [vmem:[#allocation3 + $0x118] sm:$0xff] }
 0xc4d   :  { %v6119_v61 = vld [vmem:[#allocation3 + $0xf0] sm:$0xff] }
 0xc4f   :  { %10699 = vmatpush1.bf16.msra.mxu0 %v10698_v53  ;;  %v6574_v53 = vld [vmem:[#allocation3 + $0xf28] sm:$0xff] }
 0xc50   :  { %10701 = vmatprep.subr.bf16.mxu0 %v10700_v32  ;;  %v10734_v32 = vpack.c.bf16 %v6565_v35, %v6561_v60  ;;  %v10736_v58 = vpack.c.bf16 %v6574_v53, %v6570_v31  ;;  %v6127_v35 = vld [vmem:[#allocation3 + $0x130] sm:$0xff]  ;;  %v6132_v31 = vld [vmem:[#allocation3 + $0x158] sm:$0xff] }
 0xc51   :  { %v6136_v53 = vld [vmem:[#allocation3 + $0x178] sm:$0xff] }
 0xc53   :  { %10703 = vmatpush1.bf16.msra.mxu0 %v10702_v14  ;;  %v6582_v14 = vld [vmem:[#allocation3 + $0xf68] sm:$0xff] }
 0xc54   :  { %10705 = vmatprep.subr.bf16.mxu0 %v10704_v25  ;;  %v10738_v25 = vpack.c.bf16 %v6573_v9, %v6569_v38  ;;  %v10740_v1 = vpack.c.bf16 %v6582_v14, %v6578_v33  ;;  %v6131_v38 = vld [vmem:[#allocation3 + $0x150] sm:$0xff]  ;;  %v6140_v33 = vld [vmem:[#allocation3 + $0x198] sm:$0xff] }
 0xc55   :  { %v6135_v9 = vld [vmem:[#allocation3 + $0x170] sm:$0xff]  ;;  %v6144_v14 = vld [vmem:[#allocation3 + $0x1b8] sm:$0xff] }
 0xc57   :  { %10707 = vmatpush1.bf16.msra.mxu0 %v10706_v13  ;;  %v6590_v13 = vld [vmem:[#allocation3 + $0xfa8] sm:$0xff] }
 0xc58   :  { %10709 = vmatprep.subr.bf16.mxu0 %v10708_v29  ;;  %v10742_v29 = vpack.c.bf16 %v6581_v0, %v6577_v34  ;;  %v10744_v30 = vpack.c.bf16 %v6590_v13, %v6586_v63  ;;  %v6139_v34 = vld [vmem:[#allocation3 + $0x190] sm:$0xff]  ;;  %v6148_v63 = vld [vmem:[#allocation3 + $0x1d8] sm:$0xff] }
 0xc59   :  { %v6143_v0 = vld [vmem:[#allocation3 + $0x1b0] sm:$0xff]  ;;  %v6152_v13 = vld [vmem:[#allocation3 + $0x1f8] sm:$0xff] }
 0xc5b   :  { %10711 = vmatpush1.bf16.msra.mxu0 %v10710_v11  ;;  %v6598_v11 = vld [vmem:[#allocation3 + $0xfe8] sm:$0xff] }
 0xc5c   :  { %10713 = vmatprep.subr.bf16.mxu0 %v10712_v22  ;;  %v10746_v22 = vpack.c.bf16 %v6589_v37, %v6585_v54  ;;  %v10748_v43 = vpack.c.bf16 %v6598_v11, %v6594_v36  ;;  %v6147_v54 = vld [vmem:[#allocation3 + $0x1d0] sm:$0xff]  ;;  %v6156_v36 = vld [vmem:[#allocation3 + $0x218] sm:$0xff] }
 0xc5d   :  { %v6151_v37 = vld [vmem:[#allocation3 + $0x1f0] sm:$0xff]  ;;  %v6160_v11 = vld [vmem:[#allocation3 + $0x238] sm:$0xff] }
 0xc5f   :  { %10715 = vmatpush1.bf16.msra.mxu0 %v10714_v49  ;;  %v6096_v49 = vld [vmem:[#allocation3 + $0x38] sm:$0xff] }
 0xc60   :  { %10717 = vmatprep.subr.bf16.mxu0 %v10716_v10  ;;  %v10750_v10 = vpack.c.bf16 %v6597_v20, %v6593_v59  ;;  %v10752_v24 = vpack.c.bf16 %v6096_v49, %v6092_v18  ;;  %v6155_v59 = vld [vmem:[#allocation3 + $0x210] sm:$0xff]  ;;  %v6164_v18 = vld [vmem:[#allocation3 + $0x258] sm:$0xff] }
 0xc61   :  { %v6159_v20 = vld [vmem:[#allocation3 + $0x230] sm:$0xff]  ;;  %v6168_v49 = vld [vmem:[#allocation3 + $0x278] sm:$0xff] }
 0xc63   :  { %10719 = vmatpush1.bf16.msra.mxu0 %v10718_v48  ;;  %v6104_v48 = vld [vmem:[#allocation3 + $0x78] sm:$0xff] }
 0xc64   :  { %10721 = vmatprep.subr.bf16.mxu0 %v10720_v56  ;;  %v10754_v56 = vpack.c.bf16 %v6095_v6, %v6091_v57  ;;  %v10756_v27 = vpack.c.bf16 %v6104_v48, %v6100_v21  ;;  %v6163_v57 = vld [vmem:[#allocation3 + $0x250] sm:$0xff]  ;;  %v6172_v21 = vld [vmem:[#allocation3 + $0x298] sm:$0xff] }
 0xc65   :  { %v6167_v6 = vld [vmem:[#allocation3 + $0x270] sm:$0xff]  ;;  %v6176_v48 = vld [vmem:[#allocation3 + $0x2b8] sm:$0xff] }
 0xc67   :  { %10723 = vmatpush1.bf16.msra.mxu0 %v10722_v55  ;;  %v6112_v55 = vld [vmem:[#allocation3 + $0xb8] sm:$0xff] }
 0xc68   :  { %10725 = vmatprep.subr.bf16.mxu0 %v10724_v17  ;;  %v10758_v17 = vpack.c.bf16 %v6103_v19, %v6099_v46  ;;  %v10760_v41 = vpack.c.bf16 %v6112_v55, %v6108_v42  ;;  %v6171_v46 = vld [vmem:[#allocation3 + $0x290] sm:$0xff]  ;;  %v6180_v42 = vld [vmem:[#allocation3 + $0x2d8] sm:$0xff] }
 0xc69   :  { %v6175_v19 = vld [vmem:[#allocation3 + $0x2b0] sm:$0xff]  ;;  %v6184_v55 = vld [vmem:[#allocation3 + $0x2f8] sm:$0xff] }
 0xc6b   :  { %10727 = vmatpush1.bf16.msra.mxu0 %v10726_v12  ;;  %v6120_v12 = vld [vmem:[#allocation3 + $0xf8] sm:$0xff] }
 0xc6c   :  { %10729 = vmatprep.subr.bf16.mxu0 %v10728_v44  ;;  %v10762_v44 = vpack.c.bf16 %v6111_v16, %v6107_v23  ;;  %v10764_v39 = vpack.c.bf16 %v6120_v12, %v6116_v8  ;;  %v6179_v23 = vld [vmem:[#allocation3 + $0x2d0] sm:$0xff]  ;;  %v6188_v8 = vld [vmem:[#allocation3 + $0x318] sm:$0xff] }
 0xc6d   :  { %v6183_v16 = vld [vmem:[#allocation3 + $0x2f0] sm:$0xff]  ;;  %v6192_v12 = vld [vmem:[#allocation3 + $0x338] sm:$0xff] }
 0xc6f   :  { %10731 = vmatpush1.bf16.msra.mxu0 %v10730_v28  ;;  %v6128_v28 = vld [vmem:[#allocation3 + $0x138] sm:$0xff] }
 0xc70   :  { %10733 = vmatprep.subr.bf16.mxu0 %v10732_v7  ;;  %v10766_v7 = vpack.c.bf16 %v6119_v61, %v6115_v51  ;;  %v10768_v60 = vpack.c.bf16 %v6128_v28, %v6124_v50  ;;  %v6187_v51 = vld [vmem:[#allocation3 + $0x310] sm:$0xff]  ;;  %v6196_v50 = vld [vmem:[#allocation3 + $0x358] sm:$0xff] }
 0xc71   :  { %v6191_v61 = vld [vmem:[#allocation3 + $0x330] sm:$0xff]  ;;  %v6200_v28 = vld [vmem:[#allocation3 + $0x378] sm:$0xff] }
 0xc73   :  { %10735 = vmatpush1.bf16.msra.mxu0 %v10734_v32 }
 0xc74   :  { %10737 = vmatprep.subr.bf16.mxu0 %v10736_v58  ;;  %v10772_v58 = vpack.c.bf16 %v6136_v53, %v6132_v31  ;;  %v6204_v31 = vld [vmem:[#allocation3 + $0x398] sm:$0xff] }
 0xc75   :  { %v6208_v53 = vld [vmem:[#allocation3 + $0x3b8] sm:$0xff] }
 0xc77   :  { %10739 = vmatpush1.bf16.msra.mxu0 %v10738_v25  ;;  %v10774_v25 = vpack.c.bf16 %v6135_v9, %v6131_v38  ;;  %v6203_v38 = vld [vmem:[#allocation3 + $0x390] sm:$0xff] }
 0xc78   :  { %10741 = vmatprep.subr.bf16.mxu0 %v10740_v1  ;;  %v10776_v1 = vpack.c.bf16 %v6144_v14, %v6140_v33  ;;  %v6207_v9 = vld [vmem:[#allocation3 + $0x3b0] sm:$0xff]  ;;  %v6212_v33 = vld [vmem:[#allocation3 + $0x3d8] sm:$0xff] }
 0xc79   :  { %v6216_v14 = vld [vmem:[#allocation3 + $0x3f8] sm:$0xff] }
 0xc7b   :  { %10743 = vmatpush1.bf16.msra.mxu0 %v10742_v29  ;;  %v10778_v29 = vpack.c.bf16 %v6143_v0, %v6139_v34  ;;  %v6211_v34 = vld [vmem:[#allocation3 + $0x3d0] sm:$0xff] }
 0xc7c   :  { %10745 = vmatprep.subr.bf16.mxu0 %v10744_v30  ;;  %v10780_v30 = vpack.c.bf16 %v6152_v13, %v6148_v63  ;;  %v6215_v0 = vld [vmem:[#allocation3 + $0x3f0] sm:$0xff]  ;;  %v6220_v63 = vld [vmem:[#allocation3 + $0x418] sm:$0xff] }
 0xc7d   :  { %v6224_v13 = vld [vmem:[#allocation3 + $0x438] sm:$0xff] }
 0xc7f   :  { %10747 = vmatpush1.bf16.msra.mxu0 %v10746_v22  ;;  %v10782_v22 = vpack.c.bf16 %v6151_v37, %v6147_v54  ;;  %v6219_v54 = vld [vmem:[#allocation3 + $0x410] sm:$0xff] }
 0xc80   :  { %10749 = vmatprep.subr.bf16.mxu0 %v10748_v43  ;;  %v10784_v43 = vpack.c.bf16 %v6160_v11, %v6156_v36  ;;  %v6223_v37 = vld [vmem:[#allocation3 + $0x430] sm:$0xff]  ;;  %v6228_v36 = vld [vmem:[#allocation3 + $0x458] sm:$0xff] }
 0xc81   :  { %v6232_v11 = vld [vmem:[#allocation3 + $0x478] sm:$0xff] }
 0xc83   :  { %10751 = vmatpush1.bf16.msra.mxu0 %v10750_v10  ;;  %v10786_v10 = vpack.c.bf16 %v6159_v20, %v6155_v59  ;;  %v6227_v59 = vld [vmem:[#allocation3 + $0x450] sm:$0xff] }
 0xc84   :  { %10753 = vmatprep.subr.bf16.mxu0 %v10752_v24  ;;  %v10788_v24 = vpack.c.bf16 %v6168_v49, %v6164_v18  ;;  %v6231_v20 = vld [vmem:[#allocation3 + $0x470] sm:$0xff]  ;;  %v6236_v18 = vld [vmem:[#allocation3 + $0x498] sm:$0xff] }
 0xc85   :  { %v6240_v49 = vld [vmem:[#allocation3 + $0x4b8] sm:$0xff] }
 0xc86   :  { %7183 = vmatmul.mubr.f32.vlgmr.msra.gmra.mrb[76].mxu0 %v15434_v47 }
 0xc87   :  { %10755 = vmatpush1.bf16.msra.mxu0 %v10754_v56  ;;  %7253 = vmatprep.mubr.f32.mxu0 %v15421_v3  ;;  %v6123_v3 = vld [vmem:[#allocation3 + $0x110] sm:$0xff]  ;;  %v10790_v56 = vpack.c.bf16 %v6167_v6, %v6163_v57 }
 0xc88   :  { %10757 = vmatprep.subr.bf16.mxu0 %v10756_v27  ;;  %v10770_v32 = vpack.c.bf16 %v6127_v35, %v6123_v3  ;;  %v10792_v27 = vpack.c.bf16 %v6176_v48, %v6172_v21  ;;  %v6195_v3 = vld [vmem:[#allocation3 + $0x350] sm:$0xff]  ;;  %v6244_v21 = vld [vmem:[#allocation3 + $0x4d8] sm:$0xff] }
 0xc89   :  { %v6199_v35 = vld [vmem:[#allocation3 + $0x370] sm:$0xff]  ;;  %v6248_v48 = vld [vmem:[#allocation3 + $0x4f8] sm:$0xff] }
 0xc8a   :  { %v6235_v57 = vld [vmem:[#allocation3 + $0x490] sm:$0xff] }
 0xc8b   :  { %10759 = vmatpush1.bf16.msra.mxu0 %v10758_v17  ;;  %v10794_v17 = vpack.c.bf16 %v6175_v19, %v6171_v46  ;;  %v6239_v6 = vld [vmem:[#allocation3 + $0x4b0] sm:$0xff] }
 0xc8c   :  { %10761 = vmatprep.subr.bf16.mxu0 %v10760_v41  ;;  %v10796_v41 = vpack.c.bf16 %v6184_v55, %v6180_v42  ;;  %v6243_v46 = vld [vmem:[#allocation3 + $0x4d0] sm:$0xff]  ;;  %v6252_v42 = vld [vmem:[#allocation3 + $0x518] sm:$0xff] }
 0xc8d   :  { %v6247_v19 = vld [vmem:[#allocation3 + $0x4f0] sm:$0xff]  ;;  %v6256_v55 = vld [vmem:[#allocation3 + $0x538] sm:$0xff] }
 0xc8f   :  { %10763 = vmatpush1.bf16.msra.mxu0 %v10762_v44  ;;  %v10798_v44 = vpack.c.bf16 %v6183_v16, %v6179_v23  ;;  %v6260_v23 = vld [vmem:[#allocation3 + $0x558] sm:$0xff] }
 0xc90   :  { %10765 = vmatprep.subr.bf16.mxu0 %v10764_v39  ;;  %v10800_v39 = vpack.c.bf16 %v6192_v12, %v6188_v8  ;;  %v6264_v16 = vld [vmem:[#allocation3 + $0x578] sm:$0xff] }
 0xc91   :  { %v10836_v12 = vpack.c.bf16 %v6264_v16, %v6260_v23 }
 0xc93   :  { %10767 = vmatpush1.bf16.msra.mxu0 %v10766_v7  ;;  %v10802_v7 = vpack.c.bf16 %v6191_v61, %v6187_v51  ;;  %v6268_v51 = vld [vmem:[#allocation3 + $0x598] sm:$0xff] }
 0xc94   :  { %10769 = vmatprep.subr.bf16.mxu0 %v10768_v60  ;;  %v10804_v60 = vpack.c.bf16 %v6200_v28, %v6196_v50  ;;  %v6272_v61 = vld [vmem:[#allocation3 + $0x5b8] sm:$0xff] }
 0xc95   :  { %v10840_v28 = vpack.c.bf16 %v6272_v61, %v6268_v51  ;;  %v7640_v51 = vld [vmem:[%s15697_s15 + $0x90] sm:$0xff]  ;;  %v7641_v61 = vld [vmem:[%s15697_s15 + $0x98] sm:$0xff] }
 0xc97   :  { %10771 = vmatpush1.bf16.msra.mxu0 %v10770_v32  ;;  %v10806_v32 = vpack.c.bf16 %v6199_v35, %v6195_v3  ;;  %v6276_v3 = vld [vmem:[#allocation3 + $0x5d8] sm:$0xff] }
 0xc98   :  { %10773 = vmatprep.subr.bf16.mxu0 %v10772_v58  ;;  %v10808_v58 = vpack.c.bf16 %v6208_v53, %v6204_v31  ;;  %v6280_v35 = vld [vmem:[#allocation3 + $0x5f8] sm:$0xff] }
 0xc99   :  { %v10844_v53 = vpack.c.bf16 %v6280_v35, %v6276_v3 }
 0xc9b   :  { %10775 = vmatpush1.bf16.msra.mxu0 %v10774_v25  ;;  %v10810_v25 = vpack.c.bf16 %v6207_v9, %v6203_v38  ;;  %v6284_v38 = vld [vmem:[#allocation3 + $0x618] sm:$0xff] }
 0xc9c   :  { %10777 = vmatprep.subr.bf16.mxu0 %v10776_v1  ;;  %v10812_v1 = vpack.c.bf16 %v6216_v14, %v6212_v33  ;;  %v6288_v9 = vld [vmem:[#allocation3 + $0x638] sm:$0xff] }
 0xc9d   :  { %v10848_v14 = vpack.c.bf16 %v6288_v9, %v6284_v38  ;;  %v7642_v38 = vld [vmem:[%s15697_s15 + $0xa0] sm:$0xff]  ;;  %v7643_v9 = vld [vmem:[%s15697_s15 + $0xa8] sm:$0xff] }
 0xc9f   :  { %10779 = vmatpush1.bf16.msra.mxu0 %v10778_v29  ;;  %v10814_v29 = vpack.c.bf16 %v6215_v0, %v6211_v34  ;;  %v6292_v34 = vld [vmem:[#allocation3 + $0x658] sm:$0xff] }
 0xca0   :  { %10781 = vmatprep.subr.bf16.mxu0 %v10780_v30  ;;  %v10816_v30 = vpack.c.bf16 %v6224_v13, %v6220_v63  ;;  %v6296_v0 = vld [vmem:[#allocation3 + $0x678] sm:$0xff] }
 0xca1   :  { %v10852_v13 = vpack.c.bf16 %v6296_v0, %v6292_v34 }
 0xca3   :  { %10783 = vmatpush1.bf16.msra.mxu0 %v10782_v22  ;;  %v10818_v22 = vpack.c.bf16 %v6223_v37, %v6219_v54  ;;  %v6300_v54 = vld [vmem:[#allocation3 + $0x698] sm:$0xff] }
 0xca4   :  { %10785 = vmatprep.subr.bf16.mxu0 %v10784_v43  ;;  %v10820_v43 = vpack.c.bf16 %v6232_v11, %v6228_v36  ;;  %v6304_v37 = vld [vmem:[#allocation3 + $0x6b8] sm:$0xff] }
 0xca5   :  { %v10856_v11 = vpack.c.bf16 %v6304_v37, %v6300_v54  ;;  %v7644_v54 = vld [vmem:[%s15697_s15 + $0xb0] sm:$0xff]  ;;  %v7645_v37 = vld [vmem:[%s15697_s15 + $0xb8] sm:$0xff] }
 0xca7   :  { %10787 = vmatpush1.bf16.msra.mxu0 %v10786_v10  ;;  %v10822_v10 = vpack.c.bf16 %v6231_v20, %v6227_v59  ;;  %v6308_v59 = vld [vmem:[#allocation3 + $0x6d8] sm:$0xff] }
 0xca8   :  { %10789 = vmatprep.subr.bf16.mxu0 %v10788_v24  ;;  %v10824_v24 = vpack.c.bf16 %v6240_v49, %v6236_v18  ;;  %v6312_v20 = vld [vmem:[#allocation3 + $0x6f8] sm:$0xff] }
 0xca9   :  { %v10860_v49 = vpack.c.bf16 %v6312_v20, %v6308_v59 }
 0xcab   :  { %10791 = vmatpush1.bf16.msra.mxu0 %v10790_v56  ;;  %v10826_v56 = vpack.c.bf16 %v6239_v6, %v6235_v57  ;;  %v6316_v57 = vld [vmem:[#allocation3 + $0x718] sm:$0xff] }
 0xcac   :  { %10793 = vmatprep.subr.bf16.mxu0 %v10792_v27  ;;  %v10828_v27 = vpack.c.bf16 %v6248_v48, %v6244_v21  ;;  %v6320_v6 = vld [vmem:[#allocation3 + $0x738] sm:$0xff] }
 0xcad   :  { %v10864_v48 = vpack.c.bf16 %v6320_v6, %v6316_v57  ;;  %v7646_v57 = vld [vmem:[%s15697_s15 + $0xc0] sm:$0xff]  ;;  %v7647_v6 = vld [vmem:[%s15697_s15 + $0xc8] sm:$0xff] }
 0xcaf   :  { %10795 = vmatpush1.bf16.msra.mxu0 %v10794_v17  ;;  %v10832_v17 = vpack.c.bf16 %v6256_v55, %v6252_v42  ;;  %v7638_v42 = vld [vmem:[%s15697_s15 + $0x80] sm:$0xff]  ;;  %v7639_v55 = vld [vmem:[%s15697_s15 + $0x88] sm:$0xff] }
 0xcb0   :  { %10797 = vmatprep.subr.bf16.mxu0 %v10796_v41  ;;  %v6255_v41 = vld [vmem:[#allocation3 + $0x530] sm:$0xff] }
 0xcb3   :  { %10799 = vmatpush1.bf16.msra.mxu0 %v10798_v44  ;;  %v6259_v44 = vld [vmem:[#allocation3 + $0x550] sm:$0xff] }
 0xcb4   :  { %10801 = vmatprep.subr.bf16.mxu0 %v10800_v39  ;;  %v6263_v39 = vld [vmem:[#allocation3 + $0x570] sm:$0xff] }
 0xcb5   :  { %v10838_v50 = vpack.c.bf16 %v6263_v39, %v6259_v44  ;;  %v6332_v44 = vld [vmem:[#allocation3 + $0x798] sm:$0xff] }
 0xcb6   :  { %v6336_v39 = vld [vmem:[#allocation3 + $0x7b8] sm:$0xff] }
 0xcb7   :  { %10803 = vmatpush1.bf16.msra.mxu0 %v10802_v7  ;;  %v6267_v7 = vld [vmem:[#allocation3 + $0x590] sm:$0xff]  ;;  %v10872_v35 = vpack.c.bf16 %v6336_v39, %v6332_v44 }
 0xcb8   :  { %10805 = vmatprep.subr.bf16.mxu0 %v10804_v60  ;;  %v6271_v60 = vld [vmem:[#allocation3 + $0x5b0] sm:$0xff] }
 0xcb9   :  { %v10842_v31 = vpack.c.bf16 %v6271_v60, %v6267_v7  ;;  %v7625_v7 = vld [vmem:[%s15697_s15 + $0x18] sm:$0xff] }
 0xcbb   :  { %10807 = vmatpush1.bf16.msra.mxu0 %v10806_v32  ;;  %v6275_v32 = vld [vmem:[#allocation3 + $0x5d0] sm:$0xff] }
 0xcbc   :  { %10809 = vmatprep.subr.bf16.mxu0 %v10808_v58  ;;  %v6279_v58 = vld [vmem:[#allocation3 + $0x5f0] sm:$0xff] }
 0xcbd   :  { %v10846_v33 = vpack.c.bf16 %v6279_v58, %v6275_v32  ;;  %v6340_v32 = vld [vmem:[#allocation3 + $0x7d8] sm:$0xff] }
 0xcbe   :  { %v6344_v58 = vld [vmem:[#allocation3 + $0x7f8] sm:$0xff] }
 0xcbf   :  { %10811 = vmatpush1.bf16.msra.mxu0 %v10810_v25  ;;  %v6283_v25 = vld [vmem:[#allocation3 + $0x610] sm:$0xff]  ;;  %v10876_v0 = vpack.c.bf16 %v6344_v58, %v6340_v32 }
 0xcc0   :  { %10813 = vmatprep.subr.bf16.mxu0 %v10812_v1  ;;  %v6287_v1 = vld [vmem:[#allocation3 + $0x630] sm:$0xff] }
 0xcc1   :  { %v10850_v63 = vpack.c.bf16 %v6287_v1, %v6283_v25  ;;  %v7627_v25 = vld [vmem:[%s15697_s15 + $0x28] sm:$0xff] }
 0xcc3   :  { %10815 = vmatpush1.bf16.msra.mxu0 %v10814_v29  ;;  %v6291_v29 = vld [vmem:[#allocation3 + $0x650] sm:$0xff] }
 0xcc4   :  { %10817 = vmatprep.subr.bf16.mxu0 %v10816_v30  ;;  %v6295_v30 = vld [vmem:[#allocation3 + $0x670] sm:$0xff] }
 0xcc5   :  { %v10854_v36 = vpack.c.bf16 %v6295_v30, %v6291_v29  ;;  %v6348_v29 = vld [vmem:[#allocation3 + $0x818] sm:$0xff] }
 0xcc6   :  { %7254 = vmatmul.mubr.f32.vlgmr.msra.gmra.mrb[78].mxu0 %v15419_v4  ;;  %v10830_v4 = vpack.c.bf16 %v6247_v19, %v6243_v46  ;;  %v6324_v46 = vld [vmem:[#allocation3 + $0x758] sm:$0xff] }
 0xcc7   :  { %10819 = vmatpush1.bf16.msra.mxu0 %v10818_v22  ;;  %7324 = vmatprep.mubr.f32.mxu0 %v15427_v52  ;;  %v6251_v52 = vld [vmem:[#allocation3 + $0x510] sm:$0xff]  ;;  %v6328_v19 = vld [vmem:[#allocation3 + $0x778] sm:$0xff] }
 0xcc8   :  { %10821 = vmatprep.subr.bf16.mxu0 %v10820_v43  ;;  %v10834_v8 = vpack.c.bf16 %v6255_v41, %v6251_v52  ;;  %v6299_v22 = vld [vmem:[#allocation3 + $0x690] sm:$0xff]  ;;  %v7623_v52 = vld [vmem:[%s15697_s15 + $0x8] sm:$0xff]  ;;  %v10868_v16 = vpack.c.bf16 %v6328_v19, %v6324_v46  ;;  %v6352_v30 = vld [vmem:[#allocation3 + $0x838] sm:$0xff] }
 0xcc9   :  { %v6303_v43 = vld [vmem:[#allocation3 + $0x6b0] sm:$0xff]  ;;  %v10880_v20 = vpack.c.bf16 %v6352_v30, %v6348_v29 }
 0xcca   :  { %v10858_v18 = vpack.c.bf16 %v6303_v43, %v6299_v22  ;;  %v7629_v22 = vld [vmem:[%s15697_s15 + $0x38] sm:$0xff]  ;;  %v6379_v29 = vld [vmem:[#allocation3 + $0x910] sm:$0xff] }
 0xccb   :  { %10823 = vmatpush1.bf16.msra.mxu0 %v10822_v10  ;;  %v6307_v10 = vld [vmem:[#allocation3 + $0x6d0] sm:$0xff] }
 0xccc   :  { %10825 = vmatprep.subr.bf16.mxu0 %v10824_v24  ;;  %v6311_v24 = vld [vmem:[#allocation3 + $0x6f0] sm:$0xff] }
 0xccd   :  { %v10862_v21 = vpack.c.bf16 %v6311_v24, %v6307_v10  ;;  %v6356_v10 = vld [vmem:[#allocation3 + $0x858] sm:$0xff]  ;;  %v6383_v30 = vld [vmem:[#allocation3 + $0x930] sm:$0xff] }
 0xcce   :  { %v6360_v24 = vld [vmem:[#allocation3 + $0x878] sm:$0xff] }
 0xccf   :  { %10827 = vmatpush1.bf16.msra.mxu0 %v10826_v56  ;;  %v6315_v56 = vld [vmem:[#allocation3 + $0x710] sm:$0xff]  ;;  %v10884_v19 = vpack.c.bf16 %v6360_v24, %v6356_v10 }
 0xcd0   :  { %10829 = vmatprep.subr.bf16.mxu0 %v10828_v27  ;;  %v6319_v27 = vld [vmem:[#allocation3 + $0x730] sm:$0xff] }
 0xcd1   :  { %v10866_v41 = vpack.c.bf16 %v6319_v27, %v6315_v56  ;;  %v7631_v56 = vld [vmem:[%s15697_s15 + $0x48] sm:$0xff]  ;;  %v6395_v10 = vld [vmem:[#allocation3 + $0x990] sm:$0xff] }
 0xcd2   :  { %v6399_v24 = vld [vmem:[#allocation3 + $0x9b0] sm:$0xff] }
 0xcd3   :  { %10831 = vmatpush1.bf16.msra.mxu0 %v10830_v4  ;;  %v11008_v4 = vpack.c.bf16 %v7639_v55, %v7638_v42  ;;  %v6355_v42 = vld [vmem:[#allocation3 + $0x850] sm:$0xff] }
 0xcd4   :  { %10833 = vmatprep.subr.bf16.mxu0 %v10832_v17  ;;  %v7622_v17 = vld [vmem:[%s15697_s15] sm:$0xff]  ;;  %v6359_v55 = vld [vmem:[#allocation3 + $0x870] sm:$0xff] }
 0xcd5   :  { %v11010_v23 = vpack.c.bf16 %v7623_v52, %v7622_v17  ;;  %11009 = vmatprep.subr.bf16.mxu1 %v11008_v4  ;;  %v6364_v4 = vld [vmem:[#allocation3 + $0x898] sm:$0xff]  ;;  %v7648_v52 = vld [vmem:[%s15697_s15 + $0xd0] sm:$0xff] }
 0xcd6   :  { %v6368_v17 = vld [vmem:[#allocation3 + $0x8b8] sm:$0xff] }
 0xcd7   :  { %10835 = vmatpush1.bf16.msra.mxu0 %v10834_v8  ;;  %v6323_v8 = vld [vmem:[#allocation3 + $0x750] sm:$0xff]  ;;  %11011 = vmatpush3.bf16.msra.mxu1 %v11010_v23  ;;  %v10888_v39 = vpack.c.bf16 %v6368_v17, %v6364_v4 }
 0xcd8   :  { %10837 = vmatprep.subr.bf16.mxu0 %v10836_v12  ;;  %v6327_v12 = vld [vmem:[#allocation3 + $0x770] sm:$0xff] }
 0xcd9   :  { %v10870_v60 = vpack.c.bf16 %v6327_v12, %v6323_v8  ;;  %v7633_v8 = vld [vmem:[%s15697_s15 + $0x58] sm:$0xff]  ;;  %v10886_v12 = vpack.c.bf16 %v6359_v55, %v6355_v42  ;;  %v6411_v4 = vld [vmem:[#allocation3 + $0xa10] sm:$0xff] }
 0xcda   :  { %v6415_v17 = vld [vmem:[#allocation3 + $0xa30] sm:$0xff] }
 0xcdb   :  { %10839 = vmatpush1.bf16.msra.mxu0 %v10838_v50  ;;  %v11012_v50 = vpack.c.bf16 %v7641_v61, %v7640_v51  ;;  %v6363_v51 = vld [vmem:[#allocation3 + $0x890] sm:$0xff] }
 0xcdc   :  { %10841 = vmatprep.subr.bf16.mxu0 %v10840_v28  ;;  %v7624_v28 = vld [vmem:[%s15697_s15 + $0x10] sm:$0xff] }
 0xcdd   :  { %v11014_v3 = vpack.c.bf16 %v7625_v7, %v7624_v28  ;;  %11013 = vmatprep.subr.bf16.mxu1 %v11012_v50  ;;  %v6367_v61 = vld [vmem:[#allocation3 + $0x8b0] sm:$0xff]  ;;  %v6372_v50 = vld [vmem:[#allocation3 + $0x8d8] sm:$0xff]  ;;  %v7650_v28 = vld [vmem:[%s15697_s15 + $0xe0] sm:$0xff] }
 0xcde   :  { %v7651_v7 = vld [vmem:[%s15697_s15 + $0xe8] sm:$0xff] }
 0xcdf   :  { %10843 = vmatpush1.bf16.msra.mxu0 %v10842_v31  ;;  %v6331_v31 = vld [vmem:[#allocation3 + $0x790] sm:$0xff]  ;;  %11015 = vmatpush3.bf16.msra.mxu1 %v11014_v3  ;;  %v7635_v3 = vld [vmem:[%s15697_s15 + $0x68] sm:$0xff] }
 0xce0   :  { %10845 = vmatprep.subr.bf16.mxu0 %v10844_v53  ;;  %v6335_v53 = vld [vmem:[#allocation3 + $0x7b0] sm:$0xff] }
 0xce1   :  { %v10874_v1 = vpack.c.bf16 %v6335_v53, %v6331_v31  ;;  %v6371_v31 = vld [vmem:[#allocation3 + $0x8d0] sm:$0xff] }
 0xce2   :  { %v6375_v53 = vld [vmem:[#allocation3 + $0x8f0] sm:$0xff] }
 0xce3   :  { %10847 = vmatpush1.bf16.msra.mxu0 %v10846_v33  ;;  %v11016_v33 = vpack.c.bf16 %v7643_v9, %v7642_v38  ;;  %v7652_v38 = vld [vmem:[%s15697_s15 + $0xf0] sm:$0xff]  ;;  %v7653_v9 = vld [vmem:[%s15697_s15 + $0xf8] sm:$0xff] }
 0xce4   :  { %10849 = vmatprep.subr.bf16.mxu0 %v10848_v14  ;;  %v7626_v14 = vld [vmem:[%s15697_s15 + $0x20] sm:$0xff] }
 0xce5   :  { %v11018_v34 = vpack.c.bf16 %v7627_v25, %v7626_v14  ;;  %11017 = vmatprep.subr.bf16.mxu1 %v11016_v33  ;;  %v7636_v33 = vld [vmem:[%s15697_s15 + $0x70] sm:$0xff]  ;;  %v6380_v14 = vld [vmem:[#allocation3 + $0x918] sm:$0xff] }
 0xce6   :  { %v6384_v25 = vld [vmem:[#allocation3 + $0x938] sm:$0xff] }
 0xce7   :  { %10851 = vmatpush1.bf16.msra.mxu0 %v10850_v63  ;;  %v6339_v63 = vld [vmem:[#allocation3 + $0x7d0] sm:$0xff]  ;;  %11019 = vmatpush3.bf16.msra.mxu1 %v11018_v34  ;;  %v7637_v34 = vld [vmem:[%s15697_s15 + $0x78] sm:$0xff] }
 0xce8   :  { %10853 = vmatprep.subr.bf16.mxu0 %v10852_v13  ;;  %v6343_v13 = vld [vmem:[#allocation3 + $0x7f0] sm:$0xff] }
 0xce9   :  { %v10878_v43 = vpack.c.bf16 %v6343_v13, %v6339_v63  ;;  %v10894_v63 = vpack.c.bf16 %v6375_v53, %v6371_v31  ;;  %v10896_v13 = vpack.c.bf16 %v6384_v25, %v6380_v14  ;;  %v6444_v31 = vld [vmem:[#allocation3 + $0xb18] sm:$0xff] }
 0xcea   :  { %v6448_v53 = vld [vmem:[#allocation3 + $0xb38] sm:$0xff] }
 0xceb   :  { %10855 = vmatpush1.bf16.msra.mxu0 %v10854_v36  ;;  %v11020_v36 = vpack.c.bf16 %v7645_v37, %v7644_v54  ;;  %v6388_v54 = vld [vmem:[#allocation3 + $0x958] sm:$0xff] }
 0xcec   :  { %10857 = vmatprep.subr.bf16.mxu0 %v10856_v11  ;;  %v7628_v11 = vld [vmem:[%s15697_s15 + $0x30] sm:$0xff]  ;;  %v6392_v37 = vld [vmem:[#allocation3 + $0x978] sm:$0xff] }
 0xced   :  { %v11022_v59 = vpack.c.bf16 %v7629_v22, %v7628_v11  ;;  %11021 = vmatprep.subr.bf16.mxu1 %v11020_v36  ;;  %v10898_v36 = vpack.c.bf16 %v6383_v30, %v6379_v29  ;;  %v10900_v11 = vpack.c.bf16 %v6392_v37, %v6388_v54  ;;  %v6387_v22 = vld [vmem:[#allocation3 + $0x950] sm:$0xff]  ;;  %v6456_v14 = vld [vmem:[#allocation3 + $0xb78] sm:$0xff] }
 0xcee   :  { %v6459_v54 = vld [vmem:[#allocation3 + $0xb90] sm:$0xff] }
 0xcef   :  { %10859 = vmatpush1.bf16.msra.mxu0 %v10858_v18  ;;  %v6347_v18 = vld [vmem:[#allocation3 + $0x810] sm:$0xff]  ;;  %11023 = vmatpush3.bf16.msra.mxu1 %v11022_v59  ;;  %v6396_v59 = vld [vmem:[#allocation3 + $0x998] sm:$0xff] }
 0xcf0   :  { %10861 = vmatprep.subr.bf16.mxu0 %v10860_v49  ;;  %v6351_v49 = vld [vmem:[#allocation3 + $0x830] sm:$0xff] }
 0xcf1   :  { %v10882_v27 = vpack.c.bf16 %v6351_v49, %v6347_v18  ;;  %v6463_v37 = vld [vmem:[#allocation3 + $0xbb0] sm:$0xff] }
 0xcf3   :  { %10863 = vmatpush1.bf16.msra.mxu0 %v10862_v21  ;;  %v11024_v21 = vpack.c.bf16 %v7647_v6, %v7646_v57  ;;  %v6404_v57 = vld [vmem:[#allocation3 + $0x9d8] sm:$0xff] }
 0xcf4   :  { %10865 = vmatprep.subr.bf16.mxu0 %v10864_v48  ;;  %v7630_v48 = vld [vmem:[%s15697_s15 + $0x40] sm:$0xff]  ;;  %v6408_v6 = vld [vmem:[#allocation3 + $0x9f8] sm:$0xff] }
 0xcf5   :  { %v11026_v46 = vpack.c.bf16 %v7631_v56, %v7630_v48  ;;  %11025 = vmatprep.subr.bf16.mxu1 %v11024_v21  ;;  %v10906_v21 = vpack.c.bf16 %v6399_v24, %v6395_v10  ;;  %v10908_v48 = vpack.c.bf16 %v6408_v6, %v6404_v57  ;;  %v6403_v56 = vld [vmem:[#allocation3 + $0x9d0] sm:$0xff] }
 0xcf6   :  { %v6475_v57 = vld [vmem:[#allocation3 + $0xc10] sm:$0xff] }
 0xcf7   :  { %10867 = vmatpush1.bf16.msra.mxu0 %v10866_v41  ;;  %11027 = vmatpush3.bf16.msra.mxu1 %v11026_v46  ;;  %v7649_v41 = vld [vmem:[%s15697_s15 + $0xd8] sm:$0xff]  ;;  %v6479_v6 = vld [vmem:[#allocation3 + $0xc30] sm:$0xff] }
 0xcf8   :  { %10869 = vmatprep.subr.bf16.mxu0 %v10868_v16  ;;  %v11028_v23 = vpack.c.bf16 %v7649_v41, %v7648_v52  ;;  %v7632_v16 = vld [vmem:[%s15697_s15 + $0x50] sm:$0xff]  ;;  %v6412_v46 = vld [vmem:[#allocation3 + $0xa18] sm:$0xff] }
 0xcf9   :  { %v11030_v44 = vpack.c.bf16 %v7633_v8, %v7632_v16  ;;  %v6420_v52 = vld [vmem:[#allocation3 + $0xa58] sm:$0xff]  ;;  %v6419_v8 = vld [vmem:[#allocation3 + $0xa50] sm:$0xff] }
 0xcfa   :  { %11029 = vmatprep.subr.bf16.mxu1 %v11028_v23  ;;  %v6424_v41 = vld [vmem:[#allocation3 + $0xa78] sm:$0xff]  ;;  %v10914_v23 = vpack.c.bf16 %v6415_v17, %v6411_v4 }
 0xcfb   :  { %10871 = vmatpush1.bf16.msra.mxu0 %v10870_v60  ;;  %11031 = vmatpush3.bf16.msra.mxu1 %v11030_v44  ;;  %v11032_v60 = vpack.c.bf16 %v7651_v7, %v7650_v28  ;;  %v10916_v16 = vpack.c.bf16 %v6424_v41, %v6420_v52  ;;  %v6428_v44 = vld [vmem:[#allocation3 + $0xa98] sm:$0xff]  ;;  %v6491_v52 = vld [vmem:[#allocation3 + $0xc90] sm:$0xff] }
 0xcfc   :  { %10873 = vmatprep.subr.bf16.mxu0 %v10872_v35  ;;  %v10890_v35 = vpack.c.bf16 %v6367_v61, %v6363_v51  ;;  %v6436_v28 = vld [vmem:[#allocation3 + $0xad8] sm:$0xff]  ;;  %v6495_v41 = vld [vmem:[#allocation3 + $0xcb0] sm:$0xff] }
 0xcfd   :  { %11033 = vmatprep.subr.bf16.mxu1 %v11032_v60  ;;  %v6440_v7 = vld [vmem:[#allocation3 + $0xaf8] sm:$0xff] }
 0xcff   :  { %10875 = vmatpush1.bf16.msra.mxu0 %v10874_v1  ;;  %v11036_v1 = vpack.c.bf16 %v7653_v9, %v7652_v38  ;;  %v6443_v38 = vld [vmem:[#allocation3 + $0xb10] sm:$0xff] }
 0xd00   :  { %10877 = vmatprep.subr.bf16.mxu0 %v10876_v0  ;;  %v11038_v0 = vpack.c.bf16 %v7637_v34, %v7636_v33  ;;  %v6447_v9 = vld [vmem:[#allocation3 + $0xb30] sm:$0xff]  ;;  %v6452_v33 = vld [vmem:[#allocation3 + $0xb58] sm:$0xff] }
 0xd01   :  { %v10930_v25 = vpack.c.bf16 %v6447_v9, %v6443_v38  ;;  %v6451_v34 = vld [vmem:[#allocation3 + $0xb50] sm:$0xff] }
 0xd02   :  { %v6523_v38 = vld [vmem:[#allocation3 + $0xd90] sm:$0xff] }
 0xd03   :  { %10879 = vmatpush1.bf16.msra.mxu0 %v10878_v43  ;;  %v6391_v43 = vld [vmem:[#allocation3 + $0x970] sm:$0xff] }
 0xd04   :  { %10881 = vmatprep.subr.bf16.mxu0 %v10880_v20  ;;  %v6400_v20 = vld [vmem:[#allocation3 + $0x9b8] sm:$0xff]  ;;  %v10902_v18 = vpack.c.bf16 %v6391_v43, %v6387_v22  ;;  %v10938_v22 = vpack.c.bf16 %v6463_v37, %v6459_v54  ;;  %v6527_v9 = vld [vmem:[#allocation3 + $0xdb0] sm:$0xff] }
 0xd05   :  { %v10904_v49 = vpack.c.bf16 %v6400_v20, %v6396_v59  ;;  %v6467_v59 = vld [vmem:[#allocation3 + $0xbd0] sm:$0xff] }
 0xd06   :  { %7325 = vmatmul.mubr.f32.vlgmr.msra.gmra.mrb[78].mxu0 %v15425_v26  ;;  %v6376_v26 = vld [vmem:[#allocation3 + $0x8f8] sm:$0xff]  ;;  %v6471_v20 = vld [vmem:[#allocation3 + $0xbf0] sm:$0xff] }
 0xd07   :  { %10883 = vmatpush1.bf16.msra.mxu0 %v10882_v27  ;;  %7395 = vmatprep.mubr.f32.mxu0 %v15432_v15  ;;  %v7634_v15 = vld [vmem:[%s15697_s15 + $0x60] sm:$0xff]  ;;  %v10892_v58 = vpack.c.bf16 %v6376_v26, %v6372_v50  ;;  %v6407_v27 = vld [vmem:[#allocation3 + $0x9f0] sm:$0xff]  ;;  %v10942_v10 = vpack.c.bf16 %v6471_v20, %v6467_v59 }
 0xd08   :  { %10885 = vmatprep.subr.bf16.mxu0 %v10884_v19  ;;  %v11034_v32 = vpack.c.bf16 %v7635_v3, %v7634_v15  ;;  %v6416_v19 = vld [vmem:[#allocation3 + $0xa38] sm:$0xff]  ;;  %v10910_v42 = vpack.c.bf16 %v6407_v27, %v6403_v56  ;;  %v6427_v50 = vld [vmem:[#allocation3 + $0xa90] sm:$0xff]  ;;  %v10924_v15 = vpack.c.bf16 %v6440_v7, %v6436_v28  ;;  %v10946_v56 = vpack.c.bf16 %v6479_v6, %v6475_v57 }
 0xd09   :  { %v10912_v55 = vpack.c.bf16 %v6416_v19, %v6412_v46  ;;  %v6431_v26 = vld [vmem:[#allocation3 + $0xab0] sm:$0xff]  ;;  %v6516_v28 = vld [vmem:[#allocation3 + $0xd58] sm:$0xff] }
 0xd0a   :  { %11035 = vmatpush3.bf16.msra.mxu1 %v11034_v32  ;;  %v10922_v60 = vpack.c.bf16 %v6431_v26, %v6427_v50  ;;  %v6435_v3 = vld [vmem:[#allocation3 + $0xad0] sm:$0xff]  ;;  %v6520_v7 = vld [vmem:[#allocation3 + $0xd78] sm:$0xff] }
 0xd0b   :  { %10887 = vmatpush1.bf16.msra.mxu0 %v10886_v12  ;;  %11037 = vmatprep.subr.bf16.mxu1 %v11036_v1  ;;  %v6423_v12 = vld [vmem:[#allocation3 + $0xa70] sm:$0xff]  ;;  %v10932_v1 = vpack.c.bf16 %v6456_v14, %v6452_v33  ;;  %v6532_v14 = vld [vmem:[#allocation3 + $0xdd8] sm:$0xff] }
 0xd0c   :  { %10889 = vmatprep.subr.bf16.mxu0 %v10888_v39  ;;  %v6432_v39 = vld [vmem:[#allocation3 + $0xab8] sm:$0xff]  ;;  %v10918_v51 = vpack.c.bf16 %v6423_v12, %v6419_v8  ;;  %v6483_v46 = vld [vmem:[#allocation3 + $0xc50] sm:$0xff]  ;;  %v10954_v8 = vpack.c.bf16 %v6495_v41, %v6491_v52 }
 0xd0d   :  { %v10920_v61 = vpack.c.bf16 %v6432_v39, %v6428_v44  ;;  %v6487_v19 = vld [vmem:[#allocation3 + $0xc70] sm:$0xff]  ;;  %v6548_v6 = vld [vmem:[#allocation3 + $0xe58] sm:$0xff] }
 0xd0e   :  { %11039 = vmatpush3.bf16.msra.mxu1 %v11038_v0  ;;  %v6455_v0 = vld [vmem:[#allocation3 + $0xb70] sm:$0xff]  ;;  %v10950_v4 = vpack.c.bf16 %v6487_v19, %v6483_v46  ;;  %v6560_v52 = vld [vmem:[#allocation3 + $0xeb8] sm:$0xff] }
 0xd0f   :  { %10891 = vmatpush1.bf16.msra.mxu0 %v10890_v35  ;;  %v6439_v35 = vld [vmem:[#allocation3 + $0xaf0] sm:$0xff]  ;;  %v10934_v29 = vpack.c.bf16 %v6455_v0, %v6451_v34 }
 0xd10   :  { %10893 = vmatprep.subr.bf16.mxu0 %v10892_v58  ;;  %v10926_v32 = vpack.c.bf16 %v6439_v35, %v6435_v3  ;;  %v10928_v58 = vpack.c.bf16 %v6448_v53, %v6444_v31  ;;  %v6499_v44 = vld [vmem:[#allocation3 + $0xcd0] sm:$0xff]  ;;  %v6524_v31 = vld [vmem:[#allocation3 + $0xd98] sm:$0xff] }
 0xd11   :  { %v6503_v39 = vld [vmem:[#allocation3 + $0xcf0] sm:$0xff]  ;;  %v6528_v53 = vld [vmem:[#allocation3 + $0xdb8] sm:$0xff] }
 0xd12   :  { %v6511_v26 = vld [vmem:[#allocation3 + $0xd30] sm:$0xff] }
 0xd13   :  { %10895 = vmatpush1.bf16.msra.mxu0 %v10894_v63  ;;  %v6460_v63 = vld [vmem:[#allocation3 + $0xb98] sm:$0xff]  ;;  %v6515_v3 = vld [vmem:[#allocation3 + $0xd50] sm:$0xff] }
 0xd14   :  { %10897 = vmatprep.subr.bf16.mxu0 %v10896_v13  ;;  %v6464_v13 = vld [vmem:[#allocation3 + $0xbb8] sm:$0xff]  ;;  %v6519_v35 = vld [vmem:[#allocation3 + $0xd70] sm:$0xff] }
 0xd15   :  { %v10936_v30 = vpack.c.bf16 %v6464_v13, %v6460_v63  ;;  %v10970_v13 = vpack.c.bf16 %v6527_v9, %v6523_v38  ;;  %v6531_v54 = vld [vmem:[#allocation3 + $0xdd0] sm:$0xff] }
 0xd16   :  { %v6535_v37 = vld [vmem:[#allocation3 + $0xdf0] sm:$0xff] }
 0xd17   :  { %10899 = vmatpush1.bf16.msra.mxu0 %v10898_v36  ;;  %v6468_v36 = vld [vmem:[#allocation3 + $0xbd8] sm:$0xff]  ;;  %v10974_v20 = vpack.c.bf16 %v6535_v37, %v6531_v54  ;;  %v6579_v37 = vld [vmem:[#allocation3 + $0xf50] sm:$0xff] }
 0xd18   :  { %10901 = vmatprep.subr.bf16.mxu0 %v10900_v11  ;;  %v6472_v11 = vld [vmem:[#allocation3 + $0xbf8] sm:$0xff] }
 0xd19   :  { %v10940_v43 = vpack.c.bf16 %v6472_v11, %v6468_v36  ;;  %v6540_v11 = vld [vmem:[#allocation3 + $0xe18] sm:$0xff] }
 0xd1b   :  { %10903 = vmatpush1.bf16.msra.mxu0 %v10902_v18  ;;  %v6476_v18 = vld [vmem:[#allocation3 + $0xc18] sm:$0xff] }
 0xd1c   :  { %10905 = vmatprep.subr.bf16.mxu0 %v10904_v49  ;;  %v6480_v49 = vld [vmem:[#allocation3 + $0xc38] sm:$0xff] }
 0xd1d   :  { %v10944_v24 = vpack.c.bf16 %v6480_v49, %v6476_v18 }
 0xd1f   :  { %10907 = vmatpush1.bf16.msra.mxu0 %v10906_v21  ;;  %v6484_v21 = vld [vmem:[#allocation3 + $0xc58] sm:$0xff] }
 0xd20   :  { %10909 = vmatprep.subr.bf16.mxu0 %v10908_v48  ;;  %v6488_v48 = vld [vmem:[#allocation3 + $0xc78] sm:$0xff] }
 0xd21   :  { %v10948_v27 = vpack.c.bf16 %v6488_v48, %v6484_v21  ;;  %v6552_v21 = vld [vmem:[#allocation3 + $0xe78] sm:$0xff] }
 0xd22   :  { %v10980_v19 = vpack.c.bf16 %v6552_v21, %v6548_v6  ;;  %v6596_v21 = vld [vmem:[#allocation3 + $0xfd8] sm:$0xff] }
 0xd23   :  { %10911 = vmatpush1.bf16.msra.mxu0 %v10910_v42  ;;  %v6492_v42 = vld [vmem:[#allocation3 + $0xc98] sm:$0xff] }
 0xd24   :  { %10913 = vmatprep.subr.bf16.mxu0 %v10912_v55  ;;  %v6496_v55 = vld [vmem:[#allocation3 + $0xcb8] sm:$0xff] }
 0xd25   :  { %v10952_v17 = vpack.c.bf16 %v6496_v55, %v6492_v42  ;;  %v6547_v42 = vld [vmem:[#allocation3 + $0xe50] sm:$0xff] }
 0xd26   :  { %v6551_v55 = vld [vmem:[#allocation3 + $0xe70] sm:$0xff] }
 0xd27   :  { %10915 = vmatpush1.bf16.msra.mxu0 %v10914_v23  ;;  %v6500_v23 = vld [vmem:[#allocation3 + $0xcd8] sm:$0xff] }
 0xd28   :  { %10917 = vmatprep.subr.bf16.mxu0 %v10916_v16  ;;  %v6504_v16 = vld [vmem:[#allocation3 + $0xcf8] sm:$0xff] }
 0xd29   :  { %v10956_v12 = vpack.c.bf16 %v6504_v16, %v6500_v23  ;;  %v10982_v16 = vpack.c.bf16 %v6551_v55, %v6547_v42  ;;  %v6595_v55 = vld [vmem:[#allocation3 + $0xfd0] sm:$0xff] }
 0xd2b   :  { %10919 = vmatpush1.bf16.msra.mxu0 %v10918_v51  ;;  %v6508_v51 = vld [vmem:[#allocation3 + $0xd18] sm:$0xff] }
 0xd2c   :  { %10921 = vmatprep.subr.bf16.mxu0 %v10920_v61  ;;  %v6512_v61 = vld [vmem:[#allocation3 + $0xd38] sm:$0xff] }
 0xd2d   :  { %v10960_v50 = vpack.c.bf16 %v6512_v61, %v6508_v51  ;;  %v6564_v61 = vld [vmem:[#allocation3 + $0xed8] sm:$0xff] }
 0xd2f   :  { %10923 = vmatpush1.bf16.msra.mxu0 %v10922_v60 }
 0xd30   :  { %10925 = vmatprep.subr.bf16.mxu0 %v10924_v15  ;;  %v10964_v15 = vpack.c.bf16 %v6520_v7, %v6516_v28 }
 0xd33   :  { %10927 = vmatpush1.bf16.msra.mxu0 %v10926_v32  ;;  %v10966_v32 = vpack.c.bf16 %v6519_v35, %v6515_v3  ;;  %v6572_v35 = vld [vmem:[#allocation3 + $0xf18] sm:$0xff] }
 0xd34   :  { %10929 = vmatprep.subr.bf16.mxu0 %v10928_v58  ;;  %v10968_v58 = vpack.c.bf16 %v6528_v53, %v6524_v31  ;;  %v6576_v31 = vld [vmem:[#allocation3 + $0xf38] sm:$0xff] }
 0xd37   :  { %10931 = vmatpush1.bf16.msra.mxu0 %v10930_v25  ;;  %v6536_v25 = vld [vmem:[#allocation3 + $0xdf8] sm:$0xff] }
 0xd38   :  { %10933 = vmatprep.subr.bf16.mxu0 %v10932_v1 }
 0xd3b   :  { %10935 = vmatpush1.bf16.msra.mxu0 %v10934_v29 }
 0xd3c   :  { %10937 = vmatprep.subr.bf16.mxu0 %v10936_v30  ;;  %v10972_v30 = vpack.c.bf16 %v6536_v25, %v6532_v14  ;;  %v6571_v14 = vld [vmem:[#allocation3 + $0xf10] sm:$0xff] }
 0xd3d   :  { %v6575_v25 = vld [vmem:[#allocation3 + $0xf30] sm:$0xff] }
 0xd3f   :  { %10939 = vmatpush1.bf16.msra.mxu0 %v10938_v22  ;;  %v6544_v22 = vld [vmem:[#allocation3 + $0xe38] sm:$0xff] }
 0xd40   :  { %10941 = vmatprep.subr.bf16.mxu0 %v10940_v43  ;;  %v10976_v49 = vpack.c.bf16 %v6544_v22, %v6540_v11  ;;  %v6588_v22 = vld [vmem:[#allocation3 + $0xf98] sm:$0xff] }
 0xd43   :  { %10943 = vmatpush1.bf16.msra.mxu0 %v10942_v10  ;;  %v6539_v10 = vld [vmem:[#allocation3 + $0xe10] sm:$0xff] }
 0xd44   :  { %10945 = vmatprep.subr.bf16.mxu0 %v10944_v24  ;;  %v6543_v24 = vld [vmem:[#allocation3 + $0xe30] sm:$0xff] }
 0xd46   :  { %7396 = vmatmul.mubr.f32.vlgmr.msra.gmra.mrb[78].mxu0 %v15430_v40  ;;  %v10958_v40 = vpack.c.bf16 %v6503_v39, %v6499_v44  ;;  %v6555_v44 = vld [vmem:[#allocation3 + $0xe90] sm:$0xff] }
 0xd47   :  { %10947 = vmatpush1.bf16.msra.mxu0 %v10946_v56  ;;  %7466 = vmatprep.mubr.f32.mxu0 %v15436_v62  ;;  %v6507_v62 = vld [vmem:[#allocation3 + $0xd10] sm:$0xff] }
 0xd48   :  { %10949 = vmatprep.subr.bf16.mxu0 %v10948_v27  ;;  %v10962_v60 = vpack.c.bf16 %v6511_v26, %v6507_v62  ;;  %v10978_v27 = vpack.c.bf16 %v6543_v24, %v6539_v10  ;;  %v6559_v39 = vld [vmem:[#allocation3 + $0xeb0] sm:$0xff] }
 0xd49   :  { %v10986_v26 = vpack.c.bf16 %v6559_v39, %v6555_v44  ;;  %v6587_v24 = vld [vmem:[#allocation3 + $0xf90] sm:$0xff] }
 0xd4b   :  { %10951 = vmatpush1.bf16.msra.mxu0 %v10950_v4 }
 0xd4c   :  { %10953 = vmatprep.subr.bf16.mxu0 %v10952_v17  ;;  %v6556_v17 = vld [vmem:[#allocation3 + $0xe98] sm:$0xff] }
 0xd4f   :  { %10955 = vmatpush1.bf16.msra.mxu0 %v10954_v8 }
 0xd50   :  { %10957 = vmatprep.subr.bf16.mxu0 %v10956_v12  ;;  %v10984_v12 = vpack.c.bf16 %v6560_v52, %v6556_v17 }
 0xd53   :  { %10959 = vmatpush1.bf16.msra.mxu0 %v10958_v40  ;;  %v6568_v40 = vld [vmem:[#allocation3 + $0xef8] sm:$0xff] }
 0xd54   :  { %10961 = vmatprep.subr.bf16.mxu0 %v10960_v50  ;;  %v10988_v7 = vpack.c.bf16 %v6568_v40, %v6564_v61 }
 0xd57   :  { %10963 = vmatpush1.bf16.msra.mxu0 %v10962_v60  ;;  %v6563_v60 = vld [vmem:[#allocation3 + $0xed0] sm:$0xff] }
 0xd58   :  { %10965 = vmatprep.subr.bf16.mxu0 %v10964_v15  ;;  %v6567_v15 = vld [vmem:[#allocation3 + $0xef0] sm:$0xff] }
 0xd59   :  { %v7184_v33 = vpop.f32.mrb[76].mxu0  ;;  %v10990_v38 = vpack.c.bf16 %v6567_v15, %v6563_v60 }
 0xd5a   :  { %v7474_v1 = vsel %vm7473_vm12, %v7184_v33, 0.0  ;;  %v7186_v34 = vpop.f32.mrb[77].mxu0 }
 0xd5b   :  { %v7475_v0 = vrot.slane %v7474_v1, 4  ;;  %v7481_v63 = vsel %vm7473_vm12, %v7186_v34, 0.0  ;;  %10967 = vmatpush1.bf16.msra.mxu0 %v10966_v32 }
 0xd5c   :  { %v7482_v29 = vrot.slane %v7481_v63, 4  ;;  %10969 = vmatprep.subr.bf16.mxu0 %v10968_v58 }
 0xd5d   :  { %v7476_v36 = vadd.f32 %v7475_v0, %v7474_v1  ;;  %v6584_v0 = vld [vmem:[#allocation3 + $0xf78] sm:$0xff] }
 0xd5e   :  { %v7483_v43 = vadd.f32 %v7482_v29, %v7481_v63  ;;  %v10994_v29 = vpack.c.bf16 %v6575_v25, %v6571_v14  ;;  %v7674_v25 = vld [vmem:[%s15697_s15 + $0x1a0] sm:$0xff] }
 0xd5f   :  { %v7477_v59 = vrot.slane %v7476_v36, 2  ;;  %10971 = vmatpush1.bf16.msra.mxu0 %v10970_v13 }
 0xd60   :  { %v7484_v18 = vrot.slane %v7483_v43, 2  ;;  %10973 = vmatprep.subr.bf16.mxu0 %v10972_v30 }
 0xd61   :  { %v7478_v57 = vadd.f32 %v7477_v59, %v7476_v36  ;;  %v6583_v36 = vld [vmem:[#allocation3 + $0xf70] sm:$0xff] }
 0xd62   :  { %v7485_v48 = vadd.f32 %v7484_v18, %v7483_v43  ;;  %v6592_v43 = vld [vmem:[#allocation3 + $0xfb8] sm:$0xff]  ;;  %v10998_v18 = vpack.c.bf16 %v6583_v36, %v6579_v37  ;;  %v7660_v37 = vld [vmem:[%s15697_s15 + $0x130] sm:$0xff] }
 0xd63   :  { %v7479_v56 = vrot.slane %v7478_v57, 1  ;;  %10975 = vmatpush1.bf16.msra.mxu0 %v10974_v20  ;;  %v11000_v10 = vpack.c.bf16 %v6592_v43, %v6588_v22  ;;  %v7661_v36 = vld [vmem:[%s15697_s15 + $0x138] sm:$0xff]  ;;  %v7678_v22 = vld [vmem:[%s15697_s15 + $0x1c0] sm:$0xff]  ;;  %v7679_v43 = vld [vmem:[%s15697_s15 + $0x1c8] sm:$0xff] }
 0xd64   :  { %v7486_v46 = vrot.slane %v7485_v48, 1  ;;  %10977 = vmatprep.subr.bf16.mxu0 %v10976_v49 }
 0xd65   :  { %v7480_v4 = vadd.f32 %v7479_v56, %v7478_v57  ;;  %v6591_v57 = vld [vmem:[#allocation3 + $0xfb0] sm:$0xff] }
 0xd66   :  { %v7487_v41 = vadd.f32 %v7486_v46, %v7485_v48  ;;  %v6600_v48 = vld [vmem:[#allocation3 + $0xff8] sm:$0xff]  ;;  %v11002_v46 = vpack.c.bf16 %v6591_v57, %v6587_v24 }
 0xd67   :  { %v7502_v23 = vmul.f32 0.5, %v7480_v4  ;;  %10979 = vmatpush1.bf16.msra.mxu0 %v10978_v27  ;;  %v11004_v42 = vpack.c.bf16 %v6600_v48, %v6596_v21  ;;  %v6599_v4 = vld [vmem:[#allocation3 + $0xff0] sm:$0xff]  ;;  %v7681_v24 = vld [vmem:[%s15697_s15 + $0x1d8] sm:$0xff] }
 0xd68   :  { %v7503_v8 = vmul.f32 0.5, %v7487_v41  ;;  %10981 = vmatprep.subr.bf16.mxu0 %v10980_v19  ;;  %v11006_v52 = vpack.c.bf16 %v6599_v4, %v6595_v55  ;;  %v15558_v41 = vld [vmem:[#allocation18] sm:$0xf]  ;;  %v7684_v4 = vld [vmem:[%s15697_s15 + $0x1f0] sm:$0xff] }
 0xd69   :  { %v15548_v51 = vsub.f32 %v7184_v33, %v7502_v23  ;;  %v10992_v33 = vpack.c.bf16 %v6576_v31, %v6572_v35  ;;  %v15561_v23 = vld [vmem:[#allocation19] sm:$0xf]  ;;  %v7655_v31 = vld [vmem:[%s15697_s15 + $0x108] sm:$0xff] }
 0xd6a   :  { %v15550_v50 = vsub.f32 %v7186_v34, %v7503_v8  ;;  %v6580_v34 = vld [vmem:[#allocation3 + $0xf58] sm:$0xff]  ;;  %v7589_v61 = vrot.slane %v15561_v23, %v15402_v5 }
 0xd6b   :  { %v7510_v62 = vmul.f32 %v15548_v51, %v15548_v51  ;;  %10983 = vmatpush1.bf16.msra.mxu0 %v10982_v16  ;;  %v10996_v54 = vpack.c.bf16 %v6584_v0, %v6580_v34  ;;  %v7563_v16 = vrot.slane %v15558_v41, %v15402_v5  ;;  %v7670_v5 = vld [vmem:[%s15697_s15 + $0x180] sm:$0xff]  ;;  %v7665_v21 = vld [vmem:[%s15697_s15 + $0x158] sm:$0xff] }
 0xd6c   :  { %v7511_v28 = vmul.f32 %v15550_v50, %v15550_v50  ;;  %10985 = vmatprep.subr.bf16.mxu0 %v10984_v12  ;;  %v7567_v12 = vrot.slane %v15558_v41, %v15405_v2  ;;  %v7658_v0 = vld [vmem:[%s15697_s15 + $0x120] sm:$0xff] }
 0xd6d   :  { %v7514_v3 = vsel %vm7473_vm12, %v7510_v62, 0.0 }
 0xd6e   :  { %v7515_v53 = vrot.slane %v7514_v3, 4  ;;  %v7521_v32 = vsel %vm7473_vm12, %v7511_v28, 0.0 }
 0xd6f   :  { %v7522_v58 = vrot.slane %v7521_v32, 4  ;;  %10987 = vmatpush1.bf16.msra.mxu0 %v10986_v26 }
 0xd70   :  { %v7516_v9 = vadd.f32 %v7515_v53, %v7514_v3  ;;  %10989 = vmatprep.subr.bf16.mxu0 %v10988_v7 }
 0xd71   :  { %v7523_v1 = vadd.f32 %v7522_v58, %v7521_v32  ;;  %v7672_v32 = vld [vmem:[%s15697_s15 + $0x190] sm:$0xff]  ;;  %v7673_v58 = vld [vmem:[%s15697_s15 + $0x198] sm:$0xff] }
 0xd72   :  { %v7517_v63 = vrot.slane %v7516_v9, 2 }
 0xd73   :  { %v7524_v13 = vrot.slane %v7523_v1, 2  ;;  %10991 = vmatpush1.bf16.msra.mxu0 %v10990_v38  ;;  %v11044_v38 = vpack.c.bf16 %v7673_v58, %v7672_v32 }
 0xd74   :  { %v7518_v30 = vadd.f32 %v7517_v63, %v7516_v9  ;;  %10993 = vmatprep.subr.bf16.mxu0 %v10992_v33  ;;  %v7656_v9 = vld [vmem:[%s15697_s15 + $0x110] sm:$0xff]  ;;  %v7657_v33 = vld [vmem:[%s15697_s15 + $0x118] sm:$0xff]  ;;  %v7659_v63 = vld [vmem:[%s15697_s15 + $0x128] sm:$0xff] }
 0xd75   :  { %v7525_v11 = vadd.f32 %v7524_v13, %v7523_v1  ;;  %v11046_v14 = vpack.c.bf16 %v7657_v33, %v7656_v9  ;;  %v7675_v1 = vld [vmem:[%s15697_s15 + $0x1a8] sm:$0xff]  ;;  %v11050_v13 = vpack.c.bf16 %v7659_v63, %v7658_v0 }
 0xd76   :  { %v7519_v59 = vrot.slane %v7518_v30, 1  ;;  %v11048_v34 = vpack.c.bf16 %v7675_v1, %v7674_v25 }
 0xd77   :  { %v7526_v20 = vrot.slane %v7525_v11, 1  ;;  %10995 = vmatpush1.bf16.msra.mxu0 %v10994_v29  ;;  %v7676_v29 = vld [vmem:[%s15697_s15 + $0x1b0] sm:$0xff] }
 0xd78   :  { %v7520_v49 = vadd.f32 %v7519_v59, %v7518_v30  ;;  %10997 = vmatprep.subr.bf16.mxu0 %v10996_v54  ;;  %v7677_v30 = vld [vmem:[%s15697_s15 + $0x1b8] sm:$0xff]  ;;  %v11056_v59 = vpack.c.bf16 %v7679_v43, %v7678_v22 }
 0xd79   :  { %v7527_v6 = vadd.f32 %v7526_v20, %v7525_v11  ;;  %v11052_v54 = vpack.c.bf16 %v7677_v30, %v7676_v29  ;;  %v11054_v11 = vpack.c.bf16 %v7661_v36, %v7660_v37  ;;  %v7662_v20 = vld [vmem:[%s15697_s15 + $0x140] sm:$0xff] }
 0xd7a   :  { %v7542_v56 = vmul.f32 0.5, %v7520_v49 }
 0xd7b   :  { %v7543_v27 = vmul.f32 0.5, %v7527_v6  ;;  %10999 = vmatpush1.bf16.msra.mxu0 %v10998_v18  ;;  %v7663_v18 = vld [vmem:[%s15697_s15 + $0x148] sm:$0xff]  ;;  %v7664_v6 = vld [vmem:[%s15697_s15 + $0x150] sm:$0xff] }
 0xd7c   :  { %v7546_v19 = vadd.f32 1e-05, %v7542_v56  ;;  %11001 = vmatprep.subr.bf16.mxu0 %v11000_v10  ;;  %v11058_v49 = vpack.c.bf16 %v7663_v18, %v7662_v20  ;;  %v7680_v10 = vld [vmem:[%s15697_s15 + $0x1d0] sm:$0xff]  ;;  %v11062_v48 = vpack.c.bf16 %v7665_v21, %v7664_v6  ;;  %v7682_v56 = vld [vmem:[%s15697_s15 + $0x1e0] sm:$0xff] }
 0xd7d   :  { %v7547_v17 = vadd.f32 1e-05, %v7543_v27  ;;  %v11060_v57 = vpack.c.bf16 %v7681_v24, %v7680_v10  ;;  %v7683_v27 = vld [vmem:[%s15697_s15 + $0x1e8] sm:$0xff]  ;;  %v7570_v10 = vsub.s32 2, %v13592_v45  ;;  %v7574_v24 = vsub.s32 3, %v13592_v45 }
 0xd7e   :  { %11184 = vrsqrt.f32 %v7546_v19  ;;  %v7666_v19 = vld [vmem:[%s15697_s15 + $0x160] sm:$0xff] }
 0xd7f   :  { %11186 = vrsqrt.f32 %v7547_v17  ;;  %11003 = vmatpush1.bf16.msra.mxu0 %v11002_v46  ;;  %v11064_v46 = vpack.c.bf16 %v7683_v27, %v7682_v56  ;;  %v7685_v17 = vld [vmem:[%s15697_s15 + $0x1f8] sm:$0xff]  ;;  %v7575_v21 = vrot.slane %v15558_v41, %v7574_v24  ;;  %v7597_v27 = vrot.slane %v15561_v23, %v7570_v10 }
 0xd80   :  { %11005 = vmatprep.subr.bf16.mxu0 %v11004_v42  ;;  %v7667_v42 = vld [vmem:[%s15697_s15 + $0x168] sm:$0xff] }
 0xd81   :  { %v11066_v55 = vpack.c.bf16 %v7667_v42, %v7666_v19  ;;  %v7601_v19 = vrot.slane %v15561_v23, %v7574_v24 }
 0xd83   :  { %11007 = vmatpush1.bf16.msra.mxu0 %v11006_v52  ;;  %v7668_v52 = vld [vmem:[%s15697_s15 + $0x170] sm:$0xff] }
 0xd86   :  { %7467 = vmatmul.mubr.f32.vlgmr.msra.gmra.mrb[78].mxu0 %v15434_v47  ;;  %v7593_v47 = vrot.slane %v15561_v23, %v15405_v2  ;;  %v7671_v2 = vld [vmem:[%s15697_s15 + $0x188] sm:$0xff] }
 0xd88   :  { %v11185_v8 = vpop.eup %11184 }
 0xd89   :  { %v11187_v44 = vpop.eup %11186  ;;  %v7554_v39 = vmul.f32 %v11185_v8, %v15548_v51  ;;  %v11040_v51 = vpack.c.bf16 %v7671_v2, %v7670_v5  ;;  %v7669_v8 = vld [vmem:[%s15697_s15 + $0x178] sm:$0xff] }
 0xd8a   :  { %v7555_v40 = vmul.f32 %v11187_v44, %v15550_v50  ;;  %v7654_v50 = vld [vmem:[%s15697_s15 + $0x100] sm:$0xff] }
 0xd8b   :  { %v7580_v62 = vmul.f32 %v7563_v16, %v7554_v39  ;;  %v11042_v53 = vpack.c.bf16 %v7655_v31, %v7654_v50  ;;  %11041 = vmatprep.subr.bf16.mxu1 %v11040_v51  ;;  %v11068_v16 = vpack.c.bf16 %v7685_v17, %v7684_v4 }
 0xd8c   :  { %v7581_v26 = vmul.f32 %v7567_v12, %v7555_v40  ;;  %v11070_v12 = vpack.c.bf16 %v7669_v8, %v7668_v52 }
 0xd8d   :  { %v7606_v28 = vadd.f32 %v7589_v61, %v7580_v62 }
 0xd8e   :  { %v7607_v7 = vadd.f32 %v7593_v47, %v7581_v26 }
 0xd8f   :  { %v7614_v60 = vmul.f32 0.2, %v7606_v28  ;;  %vm7610_vm14 = vcmp.ge.f32.partialorder %v7606_v28, 0.0 }
 0xd90   :  { %vm7611_vm13 = vcmp.ge.f32.partialorder %v7607_v7, 0.0  ;;  %v7615_v15 = vmul.f32 0.2, %v7607_v7 }
 0xd91   :  { %v7618_v35 = vsel %vm7610_vm14, %v7606_v28, %v7614_v60 }
 0xd92   :  { %v7619_v3 = vsel %vm7611_vm13, %v7607_v7, %v7615_v15 }
 0xd93   :  { %7757 = vmatprep.mubr.f32.mxu1 %v7619_v3 }
 0xd94   :  { %7758 = vmatmul.mubr.f32.vlgmr.msra.gmra.mrb[136].mxu1 %v7618_v35 }
 0xd95   :  { %11043 = vmatpush3.bf16.msra.mxu1 %v11042_v53 }
 0xd96   :  { %11045 = vmatprep.subr.bf16.mxu1 %v11044_v38 }
 0xd99   :  { %11047 = vmatpush3.bf16.msra.mxu1 %v11046_v14 }
 0xd9a   :  { %11049 = vmatprep.subr.bf16.mxu1 %v11048_v34 }
 0xd9d   :  { %11051 = vmatpush3.bf16.msra.mxu1 %v11050_v13 }
 0xd9e   :  { %11053 = vmatprep.subr.bf16.mxu1 %v11052_v54 }
 0xda1   :  { %11055 = vmatpush3.bf16.msra.mxu1 %v11054_v11 }
 0xda2   :  { %11057 = vmatprep.subr.bf16.mxu1 %v11056_v59 }
 0xda5   :  { %11059 = vmatpush3.bf16.msra.mxu1 %v11058_v49 }
 0xda6   :  { %11061 = vmatprep.subr.bf16.mxu1 %v11060_v57  ;;  %v7571_v57 = vrot.slane %v15558_v41, %v7570_v10  ;;  %v8109_v41 = vld [vmem:[#allocation21] ss:$0 sm:$0xff] }
 0xda9   :  { %11063 = vmatpush3.bf16.msra.mxu1 %v11062_v48 }
 0xdaa   :  { %11065 = vmatprep.subr.bf16.mxu1 %v11064_v46 }
 0xdad   :  { %11067 = vmatpush3.bf16.msra.mxu1 %v11066_v55 }
 0xdae   :  { %11069 = vmatprep.subr.bf16.mxu1 %v11068_v16 }
 0xdb1   :  { %11071 = vmatpush3.bf16.msra.mxu1 %v11070_v12 }
 0xe59   :  { %v7468_v44 = vpop.f32.mrb[78].mxu0 }
 0xe5a   :  { %v7488_v39 = vsel %vm7473_vm12, %v7468_v44, 0.0  ;;  %v7470_v61 = vpop.f32.mrb[79].mxu0 }
 0xe5b   :  { %v7489_v40 = vrot.slane %v7488_v39, 4  ;;  %v7495_v47 = vsel %vm7473_vm12, %v7470_v61, 0.0 }
 0xe5c   :  { %v7496_v62 = vrot.slane %v7495_v47, 4 }
 0xe5d   :  { %v7490_v26 = vadd.f32 %v7489_v40, %v7488_v39 }
 0xe5e   :  { %v7497_v28 = vadd.f32 %v7496_v62, %v7495_v47 }
 0xe5f   :  { %v7491_v7 = vrot.slane %v7490_v26, 2 }
 0xe60   :  { %v7498_v60 = vrot.slane %v7497_v28, 2 }
 0xe61   :  { %v7492_v15 = vadd.f32 %v7491_v7, %v7490_v26 }
 0xe62   :  { %v7499_v3 = vadd.f32 %v7498_v60, %v7497_v28 }
 0xe63   :  { %v7493_v35 = vrot.slane %v7492_v15, 1 }
 0xe64   :  { %v7500_v5 = vrot.slane %v7499_v3, 1 }
 0xe65   :  { %v7494_v2 = vadd.f32 %v7493_v35, %v7492_v15 }
 0xe66   :  { %v7501_v51 = vadd.f32 %v7500_v5, %v7499_v3 }
 0xe67   :  { %v7504_v50 = vmul.f32 0.5, %v7494_v2  ;;  %v8829_v31 = vpop.f32.mrb[136].mxu1 }
 0xe68   :  { %v7505_v53 = vmul.f32 0.5, %v7501_v51  ;;  %v8830_v32 = vpop.f32.mrb[137].mxu1 }
 0xe69   :  { %v7508_v58 = vsub.f32 %v7468_v44, %v7504_v50  ;;  %v8831_v38 = vadd.f32 %v8830_v32, %v8829_v31 }
 0xe6a   :  { %v7509_v9 = vsub.f32 %v7470_v61, %v7505_v53 }
 0xe6b   :  { %v7512_v33 = vmul.f32 %v7508_v58, %v7508_v58  ;;  %v7760_v39 = vadd.f32 %v8831_v38, %v8109_v41 }
 0xe6c   :  { %v7513_v14 = vmul.f32 %v7509_v9, %v7509_v9 }
 0xe6d   :  { %v7528_v25 = vsel %vm7473_vm12, %v7512_v33, 0.0 }
 0xe6e   :  { %v7529_v1 = vrot.slane %v7528_v25, 4  ;;  %v7535_v34 = vsel %vm7473_vm12, %v7513_v14, 0.0 }
 0xe6f   :  { %v7536_v0 = vrot.slane %v7535_v34, 4 }
 0xe70   :  { %v7530_v63 = vadd.f32 %v7529_v1, %v7528_v25 }
 0xe71   :  { %v7537_v13 = vadd.f32 %v7536_v0, %v7535_v34 }
 0xe72   :  { %v7531_v29 = vrot.slane %v7530_v63, 2 }
 0xe73   :  { %v7538_v30 = vrot.slane %v7537_v13, 2 }
 0xe74   :  { %v7532_v54 = vadd.f32 %v7531_v29, %v7530_v63 }
 0xe75   :  { %v7539_v37 = vadd.f32 %v7538_v30, %v7537_v13 }
 0xe76   :  { %v7533_v36 = vrot.slane %v7532_v54, 1 }
 0xe77   :  { %v7540_v11 = vrot.slane %v7539_v37, 1 }
 0xe78   :  { %v7534_v22 = vadd.f32 %v7533_v36, %v7532_v54 }
 0xe79   :  { %v7541_v43 = vadd.f32 %v7540_v11, %v7539_v37 }
 0xe7a   :  { %v7544_v59 = vmul.f32 0.5, %v7534_v22 }
 0xe7b   :  { %v7545_v20 = vmul.f32 0.5, %v7541_v43 }
 0xe7c   :  { %v7548_v18 = vadd.f32 1e-05, %v7544_v59 }
 0xe7d   :  { %v7549_v49 = vadd.f32 1e-05, %v7545_v20 }
 0xe7e   :  { %11188 = vrsqrt.f32 %v7548_v18 }
 0xe7f   :  { %11190 = vrsqrt.f32 %v7549_v49 }
 0xe88   :  { %v11189_v6 = vpop.eup %11188 }
 0xe89   :  { %v11191_v48 = vpop.eup %11190  ;;  %v7556_v56 = vmul.f32 %v11189_v6, %v7508_v58 }
 0xe8a   :  { %v7557_v46 = vmul.f32 %v11191_v48, %v7509_v9 }
 0xe8b   :  { %v7582_v42 = vmul.f32 %v7571_v57, %v7556_v56 }
 0xe8c   :  { %v7583_v55 = vmul.f32 %v7575_v21, %v7557_v46 }
 0xe8d   :  { %v7608_v4 = vadd.f32 %v7597_v27, %v7582_v42 }
 0xe8e   :  { %v7609_v17 = vadd.f32 %v7601_v19, %v7583_v55 }
 0xe8f   :  { %v7616_v52 = vmul.f32 0.2, %v7608_v4  ;;  %vm7612_vm0 = vcmp.ge.f32.partialorder %v7608_v4, 0.0 }
 0xe90   :  { %vm7613_vm15 = vcmp.ge.f32.partialorder %v7609_v17, 0.0  ;;  %v7617_v16 = vmul.f32 0.2, %v7609_v17 }
 0xe91   :  { %v7620_v8 = vsel %vm7612_vm0, %v7608_v4, %v7616_v52 }
 0xe92   :  { %v7621_v45 = vsel %vm7613_vm15, %v7609_v17, %v7617_v16 }
 0xe93   :  { %7827 = vmatprep.mubr.f32.mxu1 %v7621_v45 }
 0xe94   :  { %7828 = vmatmul.mubr.f32.vlgmr.msra.gmra.mrb[138].mxu1 %v7620_v8 }
 0xf67   :  { %v8864_v12 = vpop.f32.mrb[138].mxu1 }
 0xf68   :  { %v8865_v44 = vpop.f32.mrb[139].mxu1 }
 0xf69   :  { %v8866_v61 = vadd.f32 %v8865_v44, %v8864_v12 }
 0xf6b   :  { %v7830_v40 = vadd.f32 %v8866_v61, %v7760_v39 }
 0xf6d   :  { %7834 = vst.msk [vmem:[%s15699_s17] sm:$0x3] %vm7833_vm1, %v7830_v40 }
 0xf6e   :  { %7839 = vsyncpa [#allocation6], 1 }
 0xf6f   :  { %7840 = vsyncpa [#allocation8], 1 }
 0xf70   :  { %7841 = vsyncpa [#allocation11], 1 }
 0xf71   :  { %7842 = vsyncpa [#allocation14], 1 }
 0xf72   :  { %7843 = vsyncpa [#allocation17], 1 }
 0xf73   :  { %7844 = vsyncpa [#allocation20], 1 }
 0xf74   :  { %7845 = vsyncmov [#allocation4] }
 0xf77   :  { %s7846_s28 = vpop.sfrf %7845 }
 0xf78   :  { %p8110_p12 = scmp.ne.s32.totalorder %s7846_s28, 0 }
 0xf7a   :  { %7850 = shalt.err (%p8110_p12)  }
 0xf7b   :  { %7852 = vsyncmov [#allocation4 + $0x1] }
 0xf7e   :  { %s7853_s9 = vpop.sfrf %7852 }
 0xf7f   :  { %p8111_p13 = scmp.ne.s32.totalorder %s7853_s9, 0 }
 0xf81   :  { %7857 = shalt.err (%p8111_p13)  }

</bundles_post_ra>
